<compile_context>
chip_gen: v6e
topology: v6e:2x2x1
jax: 0.10.0
libtpu: 0.0.40
codegen_flags: <defaults>
</compile_context>

<pallas_src>
import math
from functools import partial

import jax
import jax.numpy as jnp
from jax import lax
from jax.experimental import pallas as pl
from jax.experimental.pallas import tpu as pltpu


# ---------------------------------------------------------------------------
# helpers
# ---------------------------------------------------------------------------
def _layer_norm(x, g, b, eps=1e-5):
    """fp32 LayerNorm over the last dim (matches the fp16-safe LayerNorm)."""
    x = x.astype(jnp.float32)
    mu = jnp.mean(x, axis=-1, keepdims=True)
    xc = x - mu
    var = jnp.mean(xc * xc, axis=-1, keepdims=True)
    inv = lax.rsqrt(var + eps)
    return xc * inv * g + b


# ---------------------------------------------------------------------------
# fused kernel: one batch block per grid step
# ---------------------------------------------------------------------------
def _block_kernel(n_head,
                  q_ref, k_ref, v_ref, vec_ref, bfc_ref,
                  wq, wk, wv, wc, wfc, wpr,
                  qout_ref, attnw_ref):
    Nb, Lq, E = q_ref.shape
    Lk = k_ref.shape[1]
    H = n_head
    dh = E // H
    Mq = Nb * Lq
    Mk = Nb * Lk
    scale = 1.0 / math.sqrt(dh)                     # trace-time scalar

    # packed (9, E) slab of LN params / biases.
    vec = vec_ref[...]
    ln1_g, ln1_b = vec[0:1, :], vec[1:2, :]
    ln2_g, ln2_b = vec[2:3, :], vec[3:4, :]
    bq, bk, bv = vec[4:5, :], vec[5:6, :], vec[6:7, :]
    bc, bpr = vec[7:8, :], vec[8:9, :]
    bfc = bfc_ref[...]

    # flatten batch block into the matmul M-rows.
    q2 = q_ref[...].reshape(Mq, E)
    k2 = k_ref[...].reshape(Mk, E)
    v2 = v_ref[...].reshape(Mk, E)

    # ln_1 on q, k, v (fp32), then bf16 for the MXU weight matmuls.
    qn = _layer_norm(q2, ln1_g, ln1_b).astype(jnp.bfloat16)
    kn = _layer_norm(k2, ln1_g, ln1_b).astype(jnp.bfloat16)
    vn = _layer_norm(v2, ln1_g, ln1_b).astype(jnp.bfloat16)

    # separate q/k/v projections (weights pre-transposed to (E, E), bf16).
    Q = (jnp.dot(qn, wq[...], preferred_element_type=jnp.float32) + bq) * scale
    K = jnp.dot(kn, wk[...], preferred_element_type=jnp.float32) + bk
    V = jnp.dot(vn, wv[...], preferred_element_type=jnp.float32) + bv

    # --- head-batched attention ------------------------------------------
    # Heads are contiguous 128-lane slices of E; stack them onto a leading
    # batch axis (index = h * Nb + b) so both attention matmuls are single
    # batched contractions and the softmax runs once.
    def split_heads(x, L):
        x3 = x.reshape(Nb, L, E)
        return jnp.concatenate(
            [x3[:, :, h * dh:(h + 1) * dh] for h in range(H)], axis=0)

    Qh = split_heads(Q, Lq)                         # (H*Nb, Lq, dh)
    Kh = split_heads(K, Lk)                         # (H*Nb, Lk, dh)
    Vh = split_heads(V, Lk)                         # (H*Nb, Lk, dh)

    s = jnp.einsum('bqd,bkd->bqk', Qh, Kh,
                   preferred_element_type=jnp.float32)        # (H*Nb, Lq, Lk)
    m = jnp.max(s, axis=-1, keepdims=True)
    e = jnp.exp(s - m)
    p = e * pl.reciprocal(jnp.sum(e, axis=-1, keepdims=True), approx=True)
    ctx_h = jnp.einsum('bqk,bkd->bqd', p, Vh,
                       preferred_element_type=jnp.float32)    # (H*Nb, Lq, dh)

    # merge heads back onto the lane axis (128-lane aligned slices).
    ctx = jnp.concatenate(
        [ctx_h[h * Nb:(h + 1) * Nb] for h in range(H)], axis=-1)  # (Nb, Lq, E)
    ctx = ctx.reshape(Mq, E)

    # head-averaged attention weights (average_attn_weights=True semantics).
    # NOTE: last dim Lk < 128 -> masked store; negligible at these sizes.
    p_sum = p[0:Nb]
    for h in range(1, H):
        p_sum = p_sum + p[h * Nb:(h + 1) * Nb]
    attnw_ref[...] = p_sum * (1.0 / H)

    # output projection + first residual (residual uses the un-normalized q).
    attn_out = jnp.dot(ctx.astype(jnp.bfloat16), wc[...],
                       preferred_element_type=jnp.float32) + bc
    x = q2.astype(jnp.float32) + attn_out

    # MLP branch: ln_2 -> Linear -> QuickGELU -> Linear, second residual.
    xn = _layer_norm(x, ln2_g, ln2_b).astype(jnp.bfloat16)
    h1 = jnp.dot(xn, wfc[...], preferred_element_type=jnp.float32) + bfc
    h1 = h1 * pl.reciprocal(1.0 + jnp.exp(-1.702 * h1), approx=True)  # QuickGELU
    mlp = jnp.dot(h1.astype(jnp.bfloat16), wpr[...],
                  preferred_element_type=jnp.float32) + bpr

    qout_ref[...] = (x + mlp).reshape(Nb, Lq, E)


# ---------------------------------------------------------------------------
# wrapper = CrossResidualAttentionBlock.forward
# ---------------------------------------------------------------------------
def cross_residual_attention_block(params, q, k, v, *, batch_block=None):
    """q: (Lq, N, E), k/v: (Lk, N, E) -> (q_out (Lq, N, E), attn_w (N, Lq, Lk))."""
    Lq, N, E = q.shape
    Lk = k.shape[0]
    H = params["n_head"]
    assert E % H == 0

    # ---- batch block size: flatten toward tall MXU matmuls, but keep >=2
    #      parallel grid steps when N > 1 so v7x's two TensorCores both work.
    if batch_block is None:
        rows_target = 256
        nb = max(1, min(N, rows_target // max(Lq, 1)))
        if N > 1:
            nb = min(nb, max(1, N // 2))
        while N % nb:                 # even division -> no garbage partial rows
            nb -= 1
    else:
        nb = batch_block
        assert N % nb == 0
    grid_n = N // nb

    # batch-major, feature-last layout for lane-dense tiles.
    qb = jnp.transpose(q, (1, 0, 2)).astype(jnp.float32)
    kb = jnp.transpose(k, (1, 0, 2)).astype(jnp.float32)
    vb = jnp.transpose(v, (1, 0, 2)).astype(jnp.float32)

    def wt(w):             # torch (out, in) -> (in, out) bf16 so kernel does x @ W.T
        return jnp.transpose(w).astype(jnp.bfloat16)

    # pack all (E,)-wide LN params / biases into one slab -> fewer DMA buffers.
    vec512 = jnp.stack([params["ln1_g"], params["ln1_b"],
                        params["ln2_g"], params["ln2_b"],
                        params["bq"], params["bk"], params["bv"],
                        params["bc"], params["b_proj"]]).astype(jnp.float32)
    bfc = params["b_fc"].reshape(1, -1).astype(jnp.float32)

    ops = (qb, kb, vb, vec512, bfc,
           wt(params["wq"]), wt(params["wk"]), wt(params["wv"]),
           wt(params["wc"]), wt(params["w_fc"]), wt(params["w_proj"]))

    def batch_spec(L):
        return pl.BlockSpec((nb, L, E), lambda i: (i, 0, 0))

    def const_spec(shape):
        return pl.BlockSpec(shape, lambda i, nd=len(shape): (0,) * nd)

    in_specs = [batch_spec(Lq), batch_spec(Lk), batch_spec(Lk)]
    in_specs += [const_spec(o.shape) for o in ops[3:]]

    q_out, attn_w = pl.pallas_call(
        partial(_block_kernel, H),
        grid=(grid_n,),
        in_specs=in_specs,
        out_specs=[pl.BlockSpec((nb, Lq, E), lambda i: (i, 0, 0)),
                   pl.BlockSpec((nb, Lq, Lk), lambda i: (i, 0, 0))],
        out_shape=[jax.ShapeDtypeStruct((N, Lq, E), jnp.float32),
                   jax.ShapeDtypeStruct((N, Lq, Lk), jnp.float32)],
        compiler_params=pltpu.CompilerParams(
            dimension_semantics=("parallel",),
            # ~6.3 MiB of bf16 weights double-buffered + activations: the v5e
            # 16 MiB scoped-VMEM default is too tight, so raise it explicitly.
            vmem_limit_bytes=32 * 1024 * 1024),
    )(*ops)

    return jnp.transpose(q_out, (1, 0, 2)), attn_w


# ---------------------------------------------------------------------------
# pure-JAX reference (mirrors F.multi_head_attention_forward semantics)
# ---------------------------------------------------------------------------
def _reference_forward(params, q, k, v):
    E = q.shape[-1]
    H = params["n_head"]
    dh = E // H
    Lq, N, _ = q.shape
    Lk = k.shape[0]

    def ln(x, g, b):
        mu = jnp.mean(x, -1, keepdims=True)
        var = jnp.mean((x - mu) ** 2, -1, keepdims=True)
        return (x - mu) / jnp.sqrt(var + 1e-5) * g + b

    qn = ln(q, params["ln1_g"], params["ln1_b"])
    kn = ln(k, params["ln1_g"], params["ln1_b"])
    vn = ln(v, params["ln1_g"], params["ln1_b"])
    Q = qn @ params["wq"].T + params["bq"]
    K = kn @ params["wk"].T + params["bk"]
    V = vn @ params["wv"].T + params["bv"]

    def split(x, L):
        return x.reshape(L, N, H, dh).transpose(1, 2, 0, 3)   # (N, H, L, dh)

    Qh, Kh, Vh = split(Q, Lq), split(K, Lk), split(V, Lk)
    s = jnp.einsum("nhqd,nhkd->nhqk", Qh / math.sqrt(dh), Kh)
    p = jax.nn.softmax(s, axis=-1)
    ctx = jnp.einsum("nhqk,nhkd->nhqd", p, Vh)
    ctx = ctx.transpose(2, 0, 1, 3).reshape(Lq, N, E)
    attn_out = ctx @ params["wc"].T + params["bc"]
    x = q + attn_out
    xn = ln(x, params["ln2_g"], params["ln2_b"])
    h1 = xn @ params["w_fc"].T + params["b_fc"]
    h1 = h1 * jax.nn.sigmoid(1.702 * h1)
    mlp = h1 @ params["w_proj"].T + params["b_proj"]
    return x + mlp, jnp.mean(p, axis=1)


# ---------------------------------------------------------------------------
if __name__ == "__main__":
    D_MODEL, N_HEAD = 512, 4          # head_dim = 128 (lane aligned)
    LQ, LK, BATCH = 8, 16, 2

    key = jax.random.PRNGKey(0)
    keys = jax.random.split(key, 16)

    def nrm(kk, shape, s=0.02):
        return jax.random.normal(kk, shape, jnp.float32) * s

    params = {
        "n_head": N_HEAD,
        "ln1_g": jnp.ones((D_MODEL,), jnp.float32),
        "ln1_b": jnp.zeros((D_MODEL,), jnp.float32),
        "ln2_g": jnp.ones((D_MODEL,), jnp.float32),
        "ln2_b": jnp.zeros((D_MODEL,), jnp.float32),
        "wq": nrm(keys[0], (D_MODEL, D_MODEL)), "bq": nrm(keys[1], (D_MODEL,)),
        "wk": nrm(keys[2], (D_MODEL, D_MODEL)), "bk": nrm(keys[3], (D_MODEL,)),
        "wv": nrm(keys[4], (D_MODEL, D_MODEL)), "bv": nrm(keys[5], (D_MODEL,)),
        "wc": nrm(keys[6], (D_MODEL, D_MODEL)), "bc": nrm(keys[7], (D_MODEL,)),
        "w_fc": nrm(keys[8], (4 * D_MODEL, D_MODEL)),
        "b_fc": nrm(keys[9], (4 * D_MODEL,)),
        "w_proj": nrm(keys[10], (D_MODEL, 4 * D_MODEL)),
        "b_proj": nrm(keys[11], (D_MODEL,)),
    }

    q = jax.random.normal(keys[12], (LQ, BATCH, D_MODEL), jnp.float32)
    k = jax.random.normal(keys[13], (LK, BATCH, D_MODEL), jnp.float32)
    v = jax.random.normal(keys[14], (LK, BATCH, D_MODEL), jnp.float32)

    q_out, attn_w = cross_residual_attention_block(params, q, k, v)
    q_out, attn_w = jax.block_until_ready((q_out, attn_w))

    assert q_out.shape == (LQ, BATCH, D_MODEL), q_out.shape
    assert attn_w.shape == (BATCH, LQ, LK), attn_w.shape
    assert bool(jnp.all(jnp.isfinite(q_out)))
    assert bool(jnp.all(jnp.isfinite(attn_w)))
    # softmax rows must sum to ~1 (approx reciprocal -> loose tolerance)
    assert bool(jnp.all(jnp.abs(jnp.sum(attn_w, axis=-1) - 1.0) < 1e-2))

    # compare with pure-JAX reference (bf16 weight stream -> loose tolerance)
    q_ref, w_ref = _reference_forward(params, q, k, v)
    assert float(jnp.max(jnp.abs(q_out - q_ref))) < 5e-2
    assert float(jnp.max(jnp.abs(attn_w - w_ref))) < 2e-2

    print("KERNEL_OK")
</pallas_src>

<mosaic_0001>
module attributes {stable_mosaic.version = 11 : i64} {
  func.func @_block_kernel(%arg0: i32, %arg1: memref<1x8x512xf32, #tpu.memory_space<vmem>>, %arg2: memref<1x16x512xf32, #tpu.memory_space<vmem>>, %arg3: memref<1x16x512xf32, #tpu.memory_space<vmem>>, %arg4: memref<9x512xf32, #tpu.memory_space<vmem>>, %arg5: memref<1x2048xf32, #tpu.memory_space<vmem>>, %arg6: memref<512x512xbf16, #tpu.memory_space<vmem>>, %arg7: memref<512x512xbf16, #tpu.memory_space<vmem>>, %arg8: memref<512x512xbf16, #tpu.memory_space<vmem>>, %arg9: memref<512x512xbf16, #tpu.memory_space<vmem>>, %arg10: memref<512x2048xbf16, #tpu.memory_space<vmem>>, %arg11: memref<2048x512xbf16, #tpu.memory_space<vmem>>, %arg12: memref<1x8x512xf32, #tpu.memory_space<vmem>>, %arg13: memref<1x8x16xf32, #tpu.memory_space<vmem>>) attributes {dimension_semantics = [#tpu.dimension_semantics<parallel>], iteration_bounds = array<i64: 2>, scalar_prefetch = 0 : i64, scratch_operands = 0 : i64, tpu.core_type = #tpu.core_type<tc>, window_params = [{transform_indices = @transform_0, window_bounds = array<i64: 1, 8, 512>}, {transform_indices = @transform_1, window_bounds = array<i64: 1, 16, 512>}, {transform_indices = @transform_2, window_bounds = array<i64: 1, 16, 512>}, {pipeline_mode = #tpu.pipeline_mode<synchronous>, transform_indices = @transform_3, window_bounds = array<i64: 9, 512>}, {pipeline_mode = #tpu.pipeline_mode<synchronous>, transform_indices = @transform_4, window_bounds = array<i64: 1, 2048>}, {pipeline_mode = #tpu.pipeline_mode<synchronous>, transform_indices = @transform_5, window_bounds = array<i64: 512, 512>}, {pipeline_mode = #tpu.pipeline_mode<synchronous>, transform_indices = @transform_6, window_bounds = array<i64: 512, 512>}, {pipeline_mode = #tpu.pipeline_mode<synchronous>, transform_indices = @transform_7, window_bounds = array<i64: 512, 512>}, {pipeline_mode = #tpu.pipeline_mode<synchronous>, transform_indices = @transform_8, window_bounds = array<i64: 512, 512>}, {pipeline_mode = #tpu.pipeline_mode<synchronous>, transform_indices = @transform_9, window_bounds = array<i64: 512, 2048>}, {pipeline_mode = #tpu.pipeline_mode<synchronous>, transform_indices = @transform_10, window_bounds = array<i64: 2048, 512>}, {transform_indices = @transform_11, window_bounds = array<i64: 1, 8, 512>}, {transform_indices = @transform_12, window_bounds = array<i64: 1, 8, 16>}]} {
    %c0 = arith.constant 0 : index
    %c0_0 = arith.constant 0 : index
    %0 = vector.load %arg4[%c0, %c0_0] : memref<9x512xf32, #tpu.memory_space<vmem>>, vector<9x512xf32>
    %1 = vector.extract_strided_slice %0 {offsets = [0, 0], sizes = [1, 512], strides = [1, 1]} : vector<9x512xf32> to vector<1x512xf32>
    %2 = vector.extract_strided_slice %0 {offsets = [1, 0], sizes = [1, 512], strides = [1, 1]} : vector<9x512xf32> to vector<1x512xf32>
    %3 = vector.extract_strided_slice %0 {offsets = [2, 0], sizes = [1, 512], strides = [1, 1]} : vector<9x512xf32> to vector<1x512xf32>
    %4 = vector.extract_strided_slice %0 {offsets = [3, 0], sizes = [1, 512], strides = [1, 1]} : vector<9x512xf32> to vector<1x512xf32>
    %5 = vector.extract_strided_slice %0 {offsets = [4, 0], sizes = [1, 512], strides = [1, 1]} : vector<9x512xf32> to vector<1x512xf32>
    %6 = vector.extract_strided_slice %0 {offsets = [5, 0], sizes = [1, 512], strides = [1, 1]} : vector<9x512xf32> to vector<1x512xf32>
    %7 = vector.extract_strided_slice %0 {offsets = [6, 0], sizes = [1, 512], strides = [1, 1]} : vector<9x512xf32> to vector<1x512xf32>
    %8 = vector.extract_strided_slice %0 {offsets = [7, 0], sizes = [1, 512], strides = [1, 1]} : vector<9x512xf32> to vector<1x512xf32>
    %9 = vector.extract_strided_slice %0 {offsets = [8, 0], sizes = [1, 512], strides = [1, 1]} : vector<9x512xf32> to vector<1x512xf32>
    %c0_1 = arith.constant 0 : index
    %c0_2 = arith.constant 0 : index
    %10 = vector.load %arg5[%c0_1, %c0_2] : memref<1x2048xf32, #tpu.memory_space<vmem>>, vector<1x2048xf32>
    %c0_3 = arith.constant 0 : index
    %c0_4 = arith.constant 0 : index
    %c0_5 = arith.constant 0 : index
    %11 = vector.load %arg1[%c0_3, %c0_4, %c0_5] : memref<1x8x512xf32, #tpu.memory_space<vmem>>, vector<1x8x512xf32>
    %12 = vector.shape_cast %11 : vector<1x8x512xf32> to vector<8x512xf32>
    %c0_6 = arith.constant 0 : index
    %c0_7 = arith.constant 0 : index
    %c0_8 = arith.constant 0 : index
    %13 = vector.load %arg2[%c0_6, %c0_7, %c0_8] : memref<1x16x512xf32, #tpu.memory_space<vmem>>, vector<1x16x512xf32>
    %14 = vector.shape_cast %13 : vector<1x16x512xf32> to vector<16x512xf32>
    %c0_9 = arith.constant 0 : index
    %c0_10 = arith.constant 0 : index
    %c0_11 = arith.constant 0 : index
    %15 = vector.load %arg3[%c0_9, %c0_10, %c0_11] : memref<1x16x512xf32, #tpu.memory_space<vmem>>, vector<1x16x512xf32>
    %16 = vector.shape_cast %15 : vector<1x16x512xf32> to vector<16x512xf32>
    %cst = arith.constant dense<0.000000e+00> : vector<8xf32>
    %17 = vector.multi_reduction <add>, %12, %cst [1] : vector<8x512xf32> to vector<8xf32>
    %18 = vector.shape_cast %17 : vector<8xf32> to vector<8x1xf32>
    %cst_12 = arith.constant 5.120000e+02 : f32
    %19 = vector.broadcast %cst_12 : f32 to vector<8x1xf32>
    %20 = arith.divf %18, %19 : vector<8x1xf32>
    %21 = vector.broadcast %20 : vector<8x1xf32> to vector<8x512xf32>
    %22 = arith.subf %12, %21 : vector<8x512xf32>
    %23 = arith.mulf %22, %22 : vector<8x512xf32>
    %cst_13 = arith.constant dense<0.000000e+00> : vector<8xf32>
    %24 = vector.multi_reduction <add>, %23, %cst_13 [1] : vector<8x512xf32> to vector<8xf32>
    %25 = vector.shape_cast %24 : vector<8xf32> to vector<8x1xf32>
    %cst_14 = arith.constant 5.120000e+02 : f32
    %26 = vector.broadcast %cst_14 : f32 to vector<8x1xf32>
    %27 = arith.divf %25, %26 : vector<8x1xf32>
    %cst_15 = arith.constant 9.99999974E-6 : f32
    %28 = vector.broadcast %cst_15 : f32 to vector<8x1xf32>
    %29 = arith.addf %27, %28 : vector<8x1xf32>
    %30 = math.rsqrt %29 : vector<8x1xf32>
    %31 = vector.broadcast %30 : vector<8x1xf32> to vector<8x512xf32>
    %32 = arith.mulf %22, %31 : vector<8x512xf32>
    %33 = vector.broadcast %1 : vector<1x512xf32> to vector<8x512xf32>
    %34 = arith.mulf %32, %33 : vector<8x512xf32>
    %35 = vector.broadcast %2 : vector<1x512xf32> to vector<8x512xf32>
    %36 = arith.addf %34, %35 : vector<8x512xf32>
    %37 = arith.truncf %36 : vector<8x512xf32> to vector<8x512xbf16>
    %cst_16 = arith.constant dense<0.000000e+00> : vector<16xf32>
    %38 = vector.multi_reduction <add>, %14, %cst_16 [1] : vector<16x512xf32> to vector<16xf32>
    %39 = vector.shape_cast %38 : vector<16xf32> to vector<16x1xf32>
    %cst_17 = arith.constant 5.120000e+02 : f32
    %40 = vector.broadcast %cst_17 : f32 to vector<16x1xf32>
    %41 = arith.divf %39, %40 : vector<16x1xf32>
    %42 = vector.broadcast %41 : vector<16x1xf32> to vector<16x512xf32>
    %43 = arith.subf %14, %42 : vector<16x512xf32>
    %44 = arith.mulf %43, %43 : vector<16x512xf32>
    %cst_18 = arith.constant dense<0.000000e+00> : vector<16xf32>
    %45 = vector.multi_reduction <add>, %44, %cst_18 [1] : vector<16x512xf32> to vector<16xf32>
    %46 = vector.shape_cast %45 : vector<16xf32> to vector<16x1xf32>
    %cst_19 = arith.constant 5.120000e+02 : f32
    %47 = vector.broadcast %cst_19 : f32 to vector<16x1xf32>
    %48 = arith.divf %46, %47 : vector<16x1xf32>
    %cst_20 = arith.constant 9.99999974E-6 : f32
    %49 = vector.broadcast %cst_20 : f32 to vector<16x1xf32>
    %50 = arith.addf %48, %49 : vector<16x1xf32>
    %51 = math.rsqrt %50 : vector<16x1xf32>
    %52 = vector.broadcast %51 : vector<16x1xf32> to vector<16x512xf32>
    %53 = arith.mulf %43, %52 : vector<16x512xf32>
    %54 = vector.broadcast %1 : vector<1x512xf32> to vector<16x512xf32>
    %55 = arith.mulf %53, %54 : vector<16x512xf32>
    %56 = vector.broadcast %2 : vector<1x512xf32> to vector<16x512xf32>
    %57 = arith.addf %55, %56 : vector<16x512xf32>
    %58 = arith.truncf %57 : vector<16x512xf32> to vector<16x512xbf16>
    %cst_21 = arith.constant dense<0.000000e+00> : vector<16xf32>
    %59 = vector.multi_reduction <add>, %16, %cst_21 [1] : vector<16x512xf32> to vector<16xf32>
    %60 = vector.shape_cast %59 : vector<16xf32> to vector<16x1xf32>
    %cst_22 = arith.constant 5.120000e+02 : f32
    %61 = vector.broadcast %cst_22 : f32 to vector<16x1xf32>
    %62 = arith.divf %60, %61 : vector<16x1xf32>
    %63 = vector.broadcast %62 : vector<16x1xf32> to vector<16x512xf32>
    %64 = arith.subf %16, %63 : vector<16x512xf32>
    %65 = arith.mulf %64, %64 : vector<16x512xf32>
    %cst_23 = arith.constant dense<0.000000e+00> : vector<16xf32>
    %66 = vector.multi_reduction <add>, %65, %cst_23 [1] : vector<16x512xf32> to vector<16xf32>
    %67 = vector.shape_cast %66 : vector<16xf32> to vector<16x1xf32>
    %cst_24 = arith.constant 5.120000e+02 : f32
    %68 = vector.broadcast %cst_24 : f32 to vector<16x1xf32>
    %69 = arith.divf %67, %68 : vector<16x1xf32>
    %cst_25 = arith.constant 9.99999974E-6 : f32
    %70 = vector.broadcast %cst_25 : f32 to vector<16x1xf32>
    %71 = arith.addf %69, %70 : vector<16x1xf32>
    %72 = math.rsqrt %71 : vector<16x1xf32>
    %73 = vector.broadcast %72 : vector<16x1xf32> to vector<16x512xf32>
    %74 = arith.mulf %64, %73 : vector<16x512xf32>
    %75 = vector.broadcast %1 : vector<1x512xf32> to vector<16x512xf32>
    %76 = arith.mulf %74, %75 : vector<16x512xf32>
    %77 = vector.broadcast %2 : vector<1x512xf32> to vector<16x512xf32>
    %78 = arith.addf %76, %77 : vector<16x512xf32>
    %79 = arith.truncf %78 : vector<16x512xf32> to vector<16x512xbf16>
    %c0_26 = arith.constant 0 : index
    %c0_27 = arith.constant 0 : index
    %80 = vector.load %arg6[%c0_26, %c0_27] : memref<512x512xbf16, #tpu.memory_space<vmem>>, vector<512x512xbf16>
    %cst_28 = arith.constant dense<0.000000e+00> : vector<8x512xf32>
    %81 = tpu.matmul %37, %80, %cst_28 {dimension_numbers = #tpu.dot_dimension_numbers<[1], [0], [0], [1], [0, 0, 1, 1], [], []>} : vector<8x512xbf16>, vector<512x512xbf16>, vector<8x512xf32> -> vector<8x512xf32>
    %82 = vector.broadcast %5 : vector<1x512xf32> to vector<8x512xf32>
    %83 = arith.addf %81, %82 : vector<8x512xf32>
    %cst_29 = arith.constant 0.0883883461 : f32
    %84 = vector.broadcast %cst_29 : f32 to vector<8x512xf32>
    %85 = arith.mulf %83, %84 : vector<8x512xf32>
    %c0_30 = arith.constant 0 : index
    %c0_31 = arith.constant 0 : index
    %86 = vector.load %arg7[%c0_30, %c0_31] : memref<512x512xbf16, #tpu.memory_space<vmem>>, vector<512x512xbf16>
    %cst_32 = arith.constant dense<0.000000e+00> : vector<16x512xf32>
    %87 = tpu.matmul %58, %86, %cst_32 {dimension_numbers = #tpu.dot_dimension_numbers<[1], [0], [0], [1], [0, 0, 1, 1], [], []>} : vector<16x512xbf16>, vector<512x512xbf16>, vector<16x512xf32> -> vector<16x512xf32>
    %88 = vector.broadcast %6 : vector<1x512xf32> to vector<16x512xf32>
    %89 = arith.addf %87, %88 : vector<16x512xf32>
    %c0_33 = arith.constant 0 : index
    %c0_34 = arith.constant 0 : index
    %90 = vector.load %arg8[%c0_33, %c0_34] : memref<512x512xbf16, #tpu.memory_space<vmem>>, vector<512x512xbf16>
    %cst_35 = arith.constant dense<0.000000e+00> : vector<16x512xf32>
    %91 = tpu.matmul %79, %90, %cst_35 {dimension_numbers = #tpu.dot_dimension_numbers<[1], [0], [0], [1], [0, 0, 1, 1], [], []>} : vector<16x512xbf16>, vector<512x512xbf16>, vector<16x512xf32> -> vector<16x512xf32>
    %92 = vector.broadcast %7 : vector<1x512xf32> to vector<16x512xf32>
    %93 = arith.addf %91, %92 : vector<16x512xf32>
    %94 = vector.shape_cast %85 : vector<8x512xf32> to vector<1x8x512xf32>
    %95 = vector.extract_strided_slice %94 {offsets = [0, 0, 0], sizes = [1, 8, 128], strides = [1, 1, 1]} : vector<1x8x512xf32> to vector<1x8x128xf32>
    %96 = vector.extract_strided_slice %94 {offsets = [0, 0, 128], sizes = [1, 8, 128], strides = [1, 1, 1]} : vector<1x8x512xf32> to vector<1x8x128xf32>
    %97 = vector.extract_strided_slice %94 {offsets = [0, 0, 256], sizes = [1, 8, 128], strides = [1, 1, 1]} : vector<1x8x512xf32> to vector<1x8x128xf32>
    %98 = vector.extract_strided_slice %94 {offsets = [0, 0, 384], sizes = [1, 8, 128], strides = [1, 1, 1]} : vector<1x8x512xf32> to vector<1x8x128xf32>
    %99 = tpu.concatenate %95, %96, %97, %98 in 0 : vector<1x8x128xf32>, vector<1x8x128xf32>, vector<1x8x128xf32>, vector<1x8x128xf32> -> vector<4x8x128xf32>
    %100 = vector.shape_cast %89 : vector<16x512xf32> to vector<1x16x512xf32>
    %101 = vector.extract_strided_slice %100 {offsets = [0, 0, 0], sizes = [1, 16, 128], strides = [1, 1, 1]} : vector<1x16x512xf32> to vector<1x16x128xf32>
    %102 = vector.extract_strided_slice %100 {offsets = [0, 0, 128], sizes = [1, 16, 128], strides = [1, 1, 1]} : vector<1x16x512xf32> to vector<1x16x128xf32>
    %103 = vector.extract_strided_slice %100 {offsets = [0, 0, 256], sizes = [1, 16, 128], strides = [1, 1, 1]} : vector<1x16x512xf32> to vector<1x16x128xf32>
    %104 = vector.extract_strided_slice %100 {offsets = [0, 0, 384], sizes = [1, 16, 128], strides = [1, 1, 1]} : vector<1x16x512xf32> to vector<1x16x128xf32>
    %105 = tpu.concatenate %101, %102, %103, %104 in 0 : vector<1x16x128xf32>, vector<1x16x128xf32>, vector<1x16x128xf32>, vector<1x16x128xf32> -> vector<4x16x128xf32>
    %106 = vector.shape_cast %93 : vector<16x512xf32> to vector<1x16x512xf32>
    %107 = vector.extract_strided_slice %106 {offsets = [0, 0, 0], sizes = [1, 16, 128], strides = [1, 1, 1]} : vector<1x16x512xf32> to vector<1x16x128xf32>
    %108 = vector.extract_strided_slice %106 {offsets = [0, 0, 128], sizes = [1, 16, 128], strides = [1, 1, 1]} : vector<1x16x512xf32> to vector<1x16x128xf32>
    %109 = vector.extract_strided_slice %106 {offsets = [0, 0, 256], sizes = [1, 16, 128], strides = [1, 1, 1]} : vector<1x16x512xf32> to vector<1x16x128xf32>
    %110 = vector.extract_strided_slice %106 {offsets = [0, 0, 384], sizes = [1, 16, 128], strides = [1, 1, 1]} : vector<1x16x512xf32> to vector<1x16x128xf32>
    %111 = tpu.concatenate %107, %108, %109, %110 in 0 : vector<1x16x128xf32>, vector<1x16x128xf32>, vector<1x16x128xf32>, vector<1x16x128xf32> -> vector<4x16x128xf32>
    "tpu.trace_start"() <{level = 10 : i32, message = "bqd,bkd->bqk"}> : () -> ()
    %cst_36 = arith.constant dense<0.000000e+00> : vector<4x8x16xf32>
    %112 = tpu.matmul %99, %105, %cst_36 {dimension_numbers = #tpu.dot_dimension_numbers<[2], [2], [1], [1], [0, 0, 0, 1, 1, 1], [0], [0]>} : vector<4x8x128xf32>, vector<4x16x128xf32>, vector<4x8x16xf32> -> vector<4x8x16xf32>
    "tpu.trace_stop"() : () -> ()
    %cst_37 = arith.constant dense<0xFF800000> : vector<4x8xf32>
    %113 = vector.multi_reduction <maximumf>, %112, %cst_37 [2] : vector<4x8x16xf32> to vector<4x8xf32>
    %114 = vector.shape_cast %113 : vector<4x8xf32> to vector<4x8x1xf32>
    %115 = vector.broadcast %114 : vector<4x8x1xf32> to vector<4x8x16xf32>
    %116 = arith.subf %112, %115 : vector<4x8x16xf32>
    %117 = math.exp %116 : vector<4x8x16xf32>
    %cst_38 = arith.constant dense<0.000000e+00> : vector<4x8xf32>
    %118 = vector.multi_reduction <add>, %117, %cst_38 [2] : vector<4x8x16xf32> to vector<4x8xf32>
    %119 = vector.shape_cast %118 : vector<4x8xf32> to vector<4x8x1xf32>
    %120 = tpu.reciprocal %119 {approx = true} : vector<4x8x1xf32> -> vector<4x8x1xf32>
    %121 = vector.broadcast %120 : vector<4x8x1xf32> to vector<4x8x16xf32>
    %122 = arith.mulf %117, %121 : vector<4x8x16xf32>
    "tpu.trace_start"() <{level = 10 : i32, message = "bqk,bkd->bqd"}> : () -> ()
    %cst_39 = arith.constant dense<0.000000e+00> : vector<4x8x128xf32>
    %123 = tpu.matmul %122, %111, %cst_39 {dimension_numbers = #tpu.dot_dimension_numbers<[2], [1], [1], [2], [0, 0, 0, 1, 1, 2], [0], [0]>} : vector<4x8x16xf32>, vector<4x16x128xf32>, vector<4x8x128xf32> -> vector<4x8x128xf32>
    "tpu.trace_stop"() : () -> ()
    %124 = vector.extract_strided_slice %123 {offsets = [0, 0, 0], sizes = [1, 8, 128], strides = [1, 1, 1]} : vector<4x8x128xf32> to vector<1x8x128xf32>
    %125 = vector.extract_strided_slice %123 {offsets = [1, 0, 0], sizes = [1, 8, 128], strides = [1, 1, 1]} : vector<4x8x128xf32> to vector<1x8x128xf32>
    %126 = vector.extract_strided_slice %123 {offsets = [2, 0, 0], sizes = [1, 8, 128], strides = [1, 1, 1]} : vector<4x8x128xf32> to vector<1x8x128xf32>
    %127 = vector.extract_strided_slice %123 {offsets = [3, 0, 0], sizes = [1, 8, 128], strides = [1, 1, 1]} : vector<4x8x128xf32> to vector<1x8x128xf32>
    %128 = tpu.concatenate %124, %125, %126, %127 in 2 : vector<1x8x128xf32>, vector<1x8x128xf32>, vector<1x8x128xf32>, vector<1x8x128xf32> -> vector<1x8x512xf32>
    %129 = vector.shape_cast %128 : vector<1x8x512xf32> to vector<8x512xf32>
    %130 = vector.extract_strided_slice %122 {offsets = [0, 0, 0], sizes = [1, 8, 16], strides = [1, 1, 1]} : vector<4x8x16xf32> to vector<1x8x16xf32>
    %131 = vector.extract_strided_slice %122 {offsets = [1, 0, 0], sizes = [1, 8, 16], strides = [1, 1, 1]} : vector<4x8x16xf32> to vector<1x8x16xf32>
    %132 = arith.addf %130, %131 : vector<1x8x16xf32>
    %133 = vector.extract_strided_slice %122 {offsets = [2, 0, 0], sizes = [1, 8, 16], strides = [1, 1, 1]} : vector<4x8x16xf32> to vector<1x8x16xf32>
    %134 = arith.addf %132, %133 : vector<1x8x16xf32>
    %135 = vector.extract_strided_slice %122 {offsets = [3, 0, 0], sizes = [1, 8, 16], strides = [1, 1, 1]} : vector<4x8x16xf32> to vector<1x8x16xf32>
    %136 = arith.addf %134, %135 : vector<1x8x16xf32>
    %cst_40 = arith.constant 2.500000e-01 : f32
    %137 = vector.broadcast %cst_40 : f32 to vector<1x8x16xf32>
    %138 = arith.mulf %136, %137 : vector<1x8x16xf32>
    %c0_41 = arith.constant 0 : index
    %c0_42 = arith.constant 0 : index
    %c0_43 = arith.constant 0 : index
    %139 = vector.load %arg13[%c0_41, %c0_42, %c0_43] : memref<1x8x16xf32, #tpu.memory_space<vmem>>, vector<1x8x16xf32>
    tpu.vector_store %arg13[%c0_41, %c0_42, %c0_43], %138 {strides = array<i32>} : memref<1x8x16xf32, #tpu.memory_space<vmem>>, vector<1x8x16xf32>,
    %140 = arith.truncf %129 : vector<8x512xf32> to vector<8x512xbf16>
    %c0_44 = arith.constant 0 : index
    %c0_45 = arith.constant 0 : index
    %141 = vector.load %arg9[%c0_44, %c0_45] : memref<512x512xbf16, #tpu.memory_space<vmem>>, vector<512x512xbf16>
    %cst_46 = arith.constant dense<0.000000e+00> : vector<8x512xf32>
    %142 = tpu.matmul %140, %141, %cst_46 {dimension_numbers = #tpu.dot_dimension_numbers<[1], [0], [0], [1], [0, 0, 1, 1], [], []>} : vector<8x512xbf16>, vector<512x512xbf16>, vector<8x512xf32> -> vector<8x512xf32>
    %143 = vector.broadcast %8 : vector<1x512xf32> to vector<8x512xf32>
    %144 = arith.addf %142, %143 : vector<8x512xf32>
    %145 = arith.addf %12, %144 : vector<8x512xf32>
    %cst_47 = arith.constant dense<0.000000e+00> : vector<8xf32>
    %146 = vector.multi_reduction <add>, %145, %cst_47 [1] : vector<8x512xf32> to vector<8xf32>
    %147 = vector.shape_cast %146 : vector<8xf32> to vector<8x1xf32>
    %cst_48 = arith.constant 5.120000e+02 : f32
    %148 = vector.broadcast %cst_48 : f32 to vector<8x1xf32>
    %149 = arith.divf %147, %148 : vector<8x1xf32>
    %150 = vector.broadcast %149 : vector<8x1xf32> to vector<8x512xf32>
    %151 = arith.subf %145, %150 : vector<8x512xf32>
    %152 = arith.mulf %151, %151 : vector<8x512xf32>
    %cst_49 = arith.constant dense<0.000000e+00> : vector<8xf32>
    %153 = vector.multi_reduction <add>, %152, %cst_49 [1] : vector<8x512xf32> to vector<8xf32>
    %154 = vector.shape_cast %153 : vector<8xf32> to vector<8x1xf32>
    %cst_50 = arith.constant 5.120000e+02 : f32
    %155 = vector.broadcast %cst_50 : f32 to vector<8x1xf32>
    %156 = arith.divf %154, %155 : vector<8x1xf32>
    %cst_51 = arith.constant 9.99999974E-6 : f32
    %157 = vector.broadcast %cst_51 : f32 to vector<8x1xf32>
    %158 = arith.addf %156, %157 : vector<8x1xf32>
    %159 = math.rsqrt %158 : vector<8x1xf32>
    %160 = vector.broadcast %159 : vector<8x1xf32> to vector<8x512xf32>
    %161 = arith.mulf %151, %160 : vector<8x512xf32>
    %162 = vector.broadcast %3 : vector<1x512xf32> to vector<8x512xf32>
    %163 = arith.mulf %161, %162 : vector<8x512xf32>
    %164 = vector.broadcast %4 : vector<1x512xf32> to vector<8x512xf32>
    %165 = arith.addf %163, %164 : vector<8x512xf32>
    %166 = arith.truncf %165 : vector<8x512xf32> to vector<8x512xbf16>
    %c0_52 = arith.constant 0 : index
    %c0_53 = arith.constant 0 : index
    %167 = vector.load %arg10[%c0_52, %c0_53] : memref<512x2048xbf16, #tpu.memory_space<vmem>>, vector<512x2048xbf16>
    %cst_54 = arith.constant dense<0.000000e+00> : vector<8x2048xf32>
    %168 = tpu.matmul %166, %167, %cst_54 {dimension_numbers = #tpu.dot_dimension_numbers<[1], [0], [0], [1], [0, 0, 1, 1], [], []>} : vector<8x512xbf16>, vector<512x2048xbf16>, vector<8x2048xf32> -> vector<8x2048xf32>
    %169 = vector.broadcast %10 : vector<1x2048xf32> to vector<8x2048xf32>
    %170 = arith.addf %168, %169 : vector<8x2048xf32>
    %cst_55 = arith.constant -1.702000e+00 : f32
    %171 = vector.broadcast %cst_55 : f32 to vector<8x2048xf32>
    %172 = arith.mulf %171, %170 : vector<8x2048xf32>
    %173 = math.exp %172 : vector<8x2048xf32>
    %cst_56 = arith.constant 1.000000e+00 : f32
    %174 = vector.broadcast %cst_56 : f32 to vector<8x2048xf32>
    %175 = arith.addf %174, %173 : vector<8x2048xf32>
    %176 = tpu.reciprocal %175 {approx = true} : vector<8x2048xf32> -> vector<8x2048xf32>
    %177 = arith.mulf %170, %176 : vector<8x2048xf32>
    %178 = arith.truncf %177 : vector<8x2048xf32> to vector<8x2048xbf16>
    %c0_57 = arith.constant 0 : index
    %c0_58 = arith.constant 0 : index
    %179 = vector.load %arg11[%c0_57, %c0_58] : memref<2048x512xbf16, #tpu.memory_space<vmem>>, vector<2048x512xbf16>
    %cst_59 = arith.constant dense<0.000000e+00> : vector<8x512xf32>
    %180 = tpu.matmul %178, %179, %cst_59 {dimension_numbers = #tpu.dot_dimension_numbers<[1], [0], [0], [1], [0, 0, 1, 1], [], []>} : vector<8x2048xbf16>, vector<2048x512xbf16>, vector<8x512xf32> -> vector<8x512xf32>
    %181 = vector.broadcast %9 : vector<1x512xf32> to vector<8x512xf32>
    %182 = arith.addf %180, %181 : vector<8x512xf32>
    %183 = arith.addf %145, %182 : vector<8x512xf32>
    %184 = vector.shape_cast %183 : vector<8x512xf32> to vector<1x8x512xf32>
    %c0_60 = arith.constant 0 : index
    %c0_61 = arith.constant 0 : index
    %c0_62 = arith.constant 0 : index
    %185 = vector.load %arg12[%c0_60, %c0_61, %c0_62] : memref<1x8x512xf32, #tpu.memory_space<vmem>>, vector<1x8x512xf32>
    tpu.vector_store %arg12[%c0_60, %c0_61, %c0_62], %184 {strides = array<i32>} : memref<1x8x512xf32, #tpu.memory_space<vmem>>, vector<1x8x512xf32>,
    return
  }
  func.func @transform_0(%arg0: i32) -> (i32, i32, i32) {
    %c0_i32 = arith.constant 0 : i32
    %c0_i32_0 = arith.constant 0 : i32
    %c0_i32_1 = arith.constant 0 : i32
    return %arg0, %c0_i32, %c0_i32_0 : i32, i32, i32
  }
  func.func @transform_1(%arg0: i32) -> (i32, i32, i32) {
    %c0_i32 = arith.constant 0 : i32
    %c0_i32_0 = arith.constant 0 : i32
    %c0_i32_1 = arith.constant 0 : i32
    return %arg0, %c0_i32, %c0_i32_0 : i32, i32, i32
  }
  func.func @transform_2(%arg0: i32) -> (i32, i32, i32) {
    %c0_i32 = arith.constant 0 : i32
    %c0_i32_0 = arith.constant 0 : i32
    %c0_i32_1 = arith.constant 0 : i32
    return %arg0, %c0_i32, %c0_i32_0 : i32, i32, i32
  }
  func.func @transform_3(%arg0: i32) -> (i32, i32) {
    %c0_i32 = arith.constant 0 : i32
    %c0_i32_0 = arith.constant 0 : i32
    %c0_i32_1 = arith.constant 0 : i32
    return %c0_i32, %c0_i32_0 : i32, i32
  }
  func.func @transform_4(%arg0: i32) -> (i32, i32) {
    %c0_i32 = arith.constant 0 : i32
    %c0_i32_0 = arith.constant 0 : i32
    %c0_i32_1 = arith.constant 0 : i32
    return %c0_i32, %c0_i32_0 : i32, i32
  }
  func.func @transform_5(%arg0: i32) -> (i32, i32) {
    %c0_i32 = arith.constant 0 : i32
    %c0_i32_0 = arith.constant 0 : i32
    %c0_i32_1 = arith.constant 0 : i32
    return %c0_i32, %c0_i32_0 : i32, i32
  }
  func.func @transform_6(%arg0: i32) -> (i32, i32) {
    %c0_i32 = arith.constant 0 : i32
    %c0_i32_0 = arith.constant 0 : i32
    %c0_i32_1 = arith.constant 0 : i32
    return %c0_i32, %c0_i32_0 : i32, i32
  }
  func.func @transform_7(%arg0: i32) -> (i32, i32) {
    %c0_i32 = arith.constant 0 : i32
    %c0_i32_0 = arith.constant 0 : i32
    %c0_i32_1 = arith.constant 0 : i32
    return %c0_i32, %c0_i32_0 : i32, i32
  }
  func.func @transform_8(%arg0: i32) -> (i32, i32) {
    %c0_i32 = arith.constant 0 : i32
    %c0_i32_0 = arith.constant 0 : i32
    %c0_i32_1 = arith.constant 0 : i32
    return %c0_i32, %c0_i32_0 : i32, i32
  }
  func.func @transform_9(%arg0: i32) -> (i32, i32) {
    %c0_i32 = arith.constant 0 : i32
    %c0_i32_0 = arith.constant 0 : i32
    %c0_i32_1 = arith.constant 0 : i32
    return %c0_i32, %c0_i32_0 : i32, i32
  }
  func.func @transform_10(%arg0: i32) -> (i32, i32) {
    %c0_i32 = arith.constant 0 : i32
    %c0_i32_0 = arith.constant 0 : i32
    %c0_i32_1 = arith.constant 0 : i32
    return %c0_i32, %c0_i32_0 : i32, i32
  }
  func.func @transform_11(%arg0: i32) -> (i32, i32, i32) {
    %c0_i32 = arith.constant 0 : i32
    %c0_i32_0 = arith.constant 0 : i32
    %c0_i32_1 = arith.constant 0 : i32
    return %arg0, %c0_i32, %c0_i32_0 : i32, i32, i32
  }
  func.func @transform_12(%arg0: i32) -> (i32, i32, i32) {
    %c0_i32 = arith.constant 0 : i32
    %c0_i32_0 = arith.constant 0 : i32
    %c0_i32_1 = arith.constant 0 : i32
    return %arg0, %c0_i32, %c0_i32_0 : i32, i32, i32
  }
}

</mosaic_0001>

<bundles_post_ra>
// kernel: tpu_custom_call.1
= control target key start
LH: loop header
LB: loop body
LE: loop exit
PB: predicated region body
PF: predicated region fallthrough
CT: control target
= control target key end

     0   :  { %s18398_s0 = inlined_call_operand.hbm [shape: f32[2,8,512], index: 0, kind: input, shape index: {}]   ;;  %s18399_s1 = inlined_call_operand.hbm [shape: f32[2,16,512], index: 1, kind: input, shape index: {}]   ;;  %s18400_s2 = inlined_call_operand.hbm [shape: f32[2,16,512], index: 2, kind: input, shape index: {}]   ;;  %s18401_s3 = inlined_call_operand.hbm [shape: f32[9,512], index: 3, kind: input, shape index: {}]   ;;  %s18402_s4 = inlined_call_operand.hbm [shape: f32[1,2048], index: 4, kind: input, shape index: {}]   ;;  %s18403_s5 = inlined_call_operand.hbm [shape: bf16[512,512], index: 5, kind: input, shape index: {}]   ;;  %s18404_s6 = inlined_call_operand.hbm [shape: bf16[512,512], index: 6, kind: input, shape index: {}]   ;;  %s18405_s7 = inlined_call_operand.hbm [shape: bf16[512,512], index: 7, kind: input, shape index: {}]   ;;  %s18406_s8 = inlined_call_operand.hbm [shape: bf16[512,512], index: 8, kind: input, shape index: {}]   ;;  %s18407_s9 = inlined_call_operand.hbm [shape: bf16[512,2048], index: 9, kind: input, shape index: {}]   ;;  %s18408_s10 = inlined_call_operand.hbm [shape: bf16[2048,512], index: 10, kind: input, shape index: {}]   ;;  %s18409_s11 = inlined_call_operand.hbm [shape: f32[2,8,512], index: 11, kind: output, shape index: {0}]   ;;  %s18410_s12 = inlined_call_operand.hbm [shape: f32[2,8,16], index: 12, kind: output, shape index: {1}]  }
   0x1   :  { %18438 = sst [smem:[#allocation37_spill]] %s18399_s1 }
   0x2   :  { %18439 = sst [smem:[#allocation38_spill]] %s18401_s3 }
   0x3   :  { %18440 = sst [smem:[#allocation39_spill]] %s18402_s4 }
   0x4   :  { %18441 = sst [smem:[#allocation40_spill]] %s18403_s5 }
   0x5   :  { %18442 = sst [smem:[#allocation41_spill]] %s18404_s6 }
   0x6   :  { %18443 = sst [smem:[#allocation42_spill]] %s18405_s7 }
   0x7   :  { %18444 = sst [smem:[#allocation43_spill]] %s18407_s9 }
   0x8   :  { %18445 = sst [smem:[#allocation44_spill]] %s18409_s11 }
   0x9   :  { %18446 = sst [smem:[#allocation45_spill]] %s18410_s12 }
   0xa   :  { %18 = vsyncpa [#allocation3], 0 }
   0xb   :  { %20 = vsyncpa [#allocation3 + $0x1], 0 }
   0xc   :  { %21 = vsyncpa [#allocation6], 0 }
   0xd   :  { %23 = vsyncpa [#allocation6 + $0x1], 0 }
   0xe   :  { %24 = vsyncpa [#allocation9], 0 }
   0xf   :  { %25 = vsyncpa [#allocation12], 0 }
  0x10   :  { %26 = vsyncpa [#allocation15], 0 }
  0x11   :  { %27 = vsyncpa [#allocation18], 0 }
  0x12   :  { %28 = vsyncpa [#allocation4], 0 }
  0x13   :  { %30 = vsyncpa [#allocation4 + $0x1], 0 }
  0x14   :  { %31 = vsyncpa [#allocation22], 0 }
  0x15   :  { %33 = vsyncpa [#allocation22 + $0x1], 0  ;;  %s17272_s21 = smov 0   ;;  %s17274_s22 = smov 0  }
  0x16   :  { %s17276_s23 = smov 0   ;;  %s17278_s24 = smov 0  }
  0x17 LB: > { %18447 = sst [smem:[#allocation31_spill]] %s17172_s21  ;;  %s17186_s25 = smov [#allocation8]   ;;  %s17184_s24 = sphi %s17278_s24, %s18495_s24   ;;  %s17180_s23 = sphi %s17276_s23, %s18497_s23   ;;  %s17176_s22 = sphi %s17274_s22, %s18499_s22   ;;  %s17172_s21 = sphi %s17272_s21, %s18498_s21  }
  0x18   : > { %18448 = sst [smem:[#allocation32_spill]] %s17180_s23  ;;  %s354_s26 = sshll.u32 %s17186_s25, 4  ;;  %s355_s26 = int_to_ptr.vmem [resolvable:$true] %s354_s26 }
  0x19   : > { %s17293_s27 = sadd.s32 4294967295, %s17184_s24   ;;  %p13318_p0 = scmp.ge.s32.totalorder %s17184_s24, 1 }
  0x1a   : > { %p18426_p1 = scmp.eq.s32.totalorder %s17293_s27, 0  ;;  %p342_p2 = scmp.lt.s32.totalorder %s17184_s24, 3 }
  0x1b   : > { %s17187_s29 = smov [#allocation11]   ;;  %s17188_s14 = smov [#allocation14]  }
  0x1c   : > { %p17298_p3 = pnand %p13318_p0, %p342_p2  ;;  %s378_s30 = sshll.u32 %s17187_s29, 4  ;;  %s17311_s30 = int_to_ptr.vmem [resolvable:$true] %s378_s30 }
  0x1d   : > { %s17313_s15 = sshll.u32 %s17188_s14, 4  ;;  %s16789_s17 = scalar_lea.vmem %s355_s26, 1024  ;;  %s405_s15 = int_to_ptr.vmem [resolvable:$true] %s17313_s15 }
  0x1e   : > { %s18449_s28 = scalar_select %p17298_p3, 1, 0 }
  0x1f   : > { %p15028_p5 = pneg %p17298_p3  ;;  %p16790_p8 = scmp.ne.s32.totalorder %s355_s26, %s16789_s17 }
  0x20   : > { %p16797_p11 = scmp.lt.s32.totalorder %s355_s26, %s355_s26  ;;  %p16798_p12 = scmp.lt.s32.totalorder %s16789_s17, %s16789_s17 }
  0x21   : > { %p17307_p6 = pnand %p15028_p5, %p18426_p1 }
  0x22   : > { %p16799_p13 = por %p16798_p12, %p16797_p11 }
  0x23   : > { %s18450_s13 = scalar_select %p17307_p6, 1, 0 }
  0x24   : > { %p17317_p7 = pneg %p17307_p6 }
  0x26   : > { %s18451_s16 = scalar_select %p17317_p7, 1, 0 }
  0x27   : > { %p16792_p9 = pnand %p16790_p8, %p17317_p7 }
  0x29   : > { %p16793_p10 = pneg %p16792_p9 }
  0x2b   : > { %p16800_p0 = pnand %p16799_p13, %p16793_p10 }
  0x2d   : > { %16803 = shalt.err (!%p16800_p0)
}
  0x2e   : > { %s18411_s18 = smov 512   ;;  %s18417_s19 = smov 32  }
  0x2f   : > { %s18452_s3 = sld [smem:[#allocation38_spill]]  ;;  %s16815_s29 = scalar_lea.vmem %s17311_s30, 16384 }
  0x30   : > { %p16816_p2 = scmp.ne.s32.totalorder %s17311_s30, %s16815_s29  ;;  %p16823_p9 = scmp.lt.s32.totalorder %s17311_s30, %s17311_s30 }
  0x31   : > { %p16824_p10 = scmp.lt.s32.totalorder %s16815_s29, %s16815_s29 }
  0x32   : > { %p16818_p5 = pnand %p16816_p2, %p17317_p7 }
  0x33   : > { %p16825_p11 = por %p16824_p10, %p16823_p9 }
  0x34   : > { %p16819_p8 = pneg %p16818_p5 }
  0x35   : > { %15031 = dma.hbm_to_vmem [thread:$0]  (!%p17307_p6), %s18452_s3, 1024, %s355_s26, [#allocation9], %s18411_s18, %s18411_s18, %s18417_s19  }
  0x36   : > { %p16826_p12 = pnand %p16825_p11, %p16819_p8 }
  0x38   : > { %16829 = shalt.err (!%p16826_p12)
}
  0x39   : > { %s18413_s14 = smov 256   ;;  %s18415_s17 = smov 16  }
  0x3a   : > { %s18453_s5 = sld [smem:[#allocation40_spill]]  ;;  %s16841_s25 = scalar_lea.vmem %s405_s15, 16384 }
  0x3b   : > { %p16842_p13 = scmp.ne.s32.totalorder %s405_s15, %s16841_s25  ;;  %p16849_p5 = scmp.lt.s32.totalorder %s405_s15, %s405_s15 }
  0x3c   : > { %p16850_p8 = scmp.lt.s32.totalorder %s16841_s25, %s16841_s25 }
  0x3d   : > { %p16844_p0 = pnand %p16842_p13, %p17317_p7 }
  0x3e   : > { %p16851_p9 = por %p16850_p8, %p16849_p5 }
  0x3f   : > { %p16845_p2 = pneg %p16844_p0 }
  0x40   : > { %15037 = dma.hbm_to_vmem [thread:$0]  (!%p17307_p6), %s18453_s5, 16384, %s17311_s30, [#allocation12], %s18413_s14, %s18413_s14, %s18415_s17  }
  0x41   : > { %p16852_p10 = pnand %p16851_p9, %p16845_p2 }
  0x43   : > { %16855 = shalt.err (!%p16852_p10)
}
  0x44   : > { %s18454_s7 = sld [smem:[#allocation42_spill]]  ;;  %s17193_s30 = smov [#allocation17]  }
  0x45   : > { %s430_s26 = sshll.u32 %s17193_s30, 4  ;;  %s431_s26 = int_to_ptr.vmem [resolvable:$true] %s430_s26 }
  0x46   : > { %s16867_s20 = scalar_lea.vmem %s431_s26, 65536  ;;  %p16875_p0 = scmp.lt.s32.totalorder %s431_s26, %s431_s26 }
  0x47   : > { %p16868_p11 = scmp.ne.s32.totalorder %s431_s26, %s16867_s20  ;;  %p16876_p2 = scmp.lt.s32.totalorder %s16867_s20, %s16867_s20 }
  0x49   : > { %p16870_p12 = pnand %p16868_p11, %p17317_p7  ;;  %p16877_p5 = por %p16876_p2, %p16875_p0 }
  0x4a   : > { %15043 = dma.hbm_to_vmem [thread:$0]  (!%p17307_p6), %s18454_s7, 16384, %s405_s15, [#allocation15], %s18413_s14, %s18413_s14, %s18415_s17  }
  0x4b   : > { %p16871_p13 = pneg %p16870_p12 }
  0x4d   : > { %p16878_p8 = pnand %p16877_p5, %p16871_p13 }
  0x4f   : > { %16881 = shalt.err (!%p16878_p8)
}
  0x50   : > { %s17194_s25 = smov 1024   ;;  %s17195_s15 = smov 64  }
  0x51   : > { %s18455_s9 = sld [smem:[#allocation43_spill]]  ;;  %s13317_s30 = sadd.s32 4294967294, %s17184_s24  }
  0x52   : > { %s17366_s20 = sadd.s32 1, %s17184_s24   ;;  %s46_s17 = sadd.s32 1, %s17180_s23 }
  0x53   : > { %18456 = sst [smem:[#allocation33_spill]] %s17366_s20  ;;  %s43_s14 = ssub.s32 %s17184_s24, %s17366_s20 }
  0x54   : > { %p44_p9 = scmp.eq.s32.totalorder %s43_s14, 0  ;;  %p53_p10 = scmp.ne.s32.totalorder %s17180_s23, %s17176_s22 }
  0x55   : > { %p54_p11 = scmp.eq.s32.totalorder %s17184_s24, 0  ;;  %p59_p12 = scmp.ne.s32.totalorder %s17176_s22, %s17172_s21 }
  0x56   : > { %s17377_s19 = scalar_select %p44_p9, %s17180_s23, %s46_s17  }
  0x57   : > { %15049 = dma.hbm_to_vmem [thread:$0]  (!%p17307_p6), %s18455_s9, 65536, %s431_s26, [#allocation18], %s17194_s25, %s17194_s25, %s17195_s15  }
  0x58   : > { %18457 = sst [smem:[#allocation34_spill]] %s17377_s19  ;;  %p55_p13 = por %p54_p11, %p53_p10 }
  0x59   : > { %p17381_p0 = por %p18426_p1, %p59_p12  ;;  %p303_p2 = scmp.eq.s32.totalorder %s17293_s27, 1 }
  0x5a   : > { %p309_p5 = scmp.eq.s32.totalorder %s13317_s30, 1  ;;  %p15078_p8 = scmp.lt.s32.totalorder %s17184_s24, 2 }
  0x5b   : > { %s18458_s18 = scalar_select %p17381_p0, 1, 0 }
  0x5c   : > { %s17388_s26 = sand.u32 1, %s17180_s23   ;;  %p17390_p4 = por %p303_p2, %p53_p10 }
  0x5d   : > { %p17394_p3 = por %p309_p5, %p59_p12  ;;  %p17398_p9 = pnand %p15078_p8, %p55_p13 }
  0x5e   : > { %s18459_s14 = scalar_select %p17390_p4, 1, 0 }
  0x5f   : > { %s18461_s17 = scalar_select %p17394_p3, 1, 0 }
  0x60   : > { %18460 = sst [smem:[#allocation35_spill]] %s18459_s14  ;;  %s476_s15 = sand.u32 1, %s17184_s24  }
  0x61   : > { %18462 = sst [smem:[#allocation36_spill]] %s18461_s17  ;;  %s18424_s29 = sshll.u32 %s17388_s26, 6 }
  0x62   : > { %s18425_s30 = sshll.u32 %s17184_s24, 10  ;;  %s480_s3 = scalar_lea.vmem [#allocation5], %s18424_s29 }
  0x63   : > { %s487_s5 = sshll.u32 %s480_s3, 4  ;;  %s18464_s1 = sld [smem:[#allocation37_spill]]  ;;  %s17414_s5 = int_to_ptr.vmem [resolvable:$true] %s487_s5 }
  0x64   : > { %s17416_s23 = scalar_lea.sflag [#allocation6], %s476_s15  ;;  %p17422_p11 = pneg %p17398_p9 }
  0x69   : > { %s17412_s19 = scalar_lea.hbm %s18464_s1, %s18425_s30  ;;  %s16887_s9 = scalar_lea.hbm %s18464_s1, 2048 }
  0x6a   : > { %s16882_s20 = scalar_lea.hbm %s17412_s19, 1024  ;;  %p16888_p2 = scmp.lt.s32.totalorder %s17412_s19, %s18464_s1 }
  0x6b   : > { %p16883_p10 = scmp.ne.s32.totalorder %s17412_s19, %s16882_s20  ;;  %p16889_p5 = scmp.lt.s32.totalorder %s16887_s9, %s16882_s20 }
  0x6d   : > { %p16885_p12 = pnand %p17422_p11, %p16883_p10  ;;  %p16890_p8 = por %p16889_p5, %p16888_p2 }
  0x6f   : > { %p16886_p13 = pneg %p16885_p12 }
  0x71   : > { %p16891_p1 = pnand %p16890_p8, %p16886_p13 }
  0x73   : > { %16894 = shalt.err (!%p16891_p1)
}
  0x74   : > { %s16895_s15 = scalar_lea.vmem %s17414_s5, 1024  ;;  %s17196_s21 = smov [#allocation5]  }
  0x75   : > { %p16896_p3 = scmp.ne.s32.totalorder %s17414_s5, %s16895_s15  ;;  %s16900_s3 = sshll.u32 %s17196_s21, 4  ;;  %s16901_s3 = int_to_ptr.vmem [resolvable:$false] %s16900_s3 }
  0x76   : > { %s16902_s7 = scalar_lea.vmem %s16901_s3, 2048  ;;  %p16903_p4 = scmp.lt.s32.totalorder %s17414_s5, %s16901_s3 }
  0x77   : > { %p16898_p10 = pnand %p16896_p3, %p17422_p11  ;;  %p16904_p0 = scmp.lt.s32.totalorder %s16902_s7, %s16895_s15 }
  0x79   : > { %p16899_p12 = pneg %p16898_p10  ;;  %p16905_p6 = por %p16904_p0, %p16903_p4 }
  0x7b   : > { %p16906_p7 = pnand %p16905_p6, %p16899_p12 }
  0x7d   : > { %16909 = shalt.err (!%p16906_p7)
}
  0x7e   : > { %s18466_s20 = smov 32   ;;  %s18467_s29 = smov 512  }
  0x7f   : > { %15059 = dma.hbm_to_vmem [thread:$0]  (!%p17398_p9), %s17412_s19, 1024, %s17414_s5, %s17416_s23, %s18467_s29, %s18467_s29, %s18466_s20  }
  0x80   : > { %s18468_s21 = sshll.u32 %s17184_s24, 10  ;;  %s18469_s3 = sshll.u32 %s17388_s26, 6 }
  0x81   : > { %s17453_s15 = scalar_lea.hbm %s18400_s2, %s18468_s21  ;;  %s501_s7 = scalar_lea.vmem [#allocation7], %s18469_s3 }
  0x82   : > { %s508_s1 = sshll.u32 %s501_s7, 4  ;;  %s17197_s11 = smov [#allocation10]   ;;  %s17457_s1 = int_to_ptr.vmem [resolvable:$true] %s508_s1 }
  0x83   : > { %s368_s12 = sshll.u32 %s17197_s11, 4  ;;  %p18470_p3 = scmp.ne.s32.totalorder %s18451_s16, 0  ;;  %s369_s12 = int_to_ptr.vmem [resolvable:$true] %s368_s12 }
  0x84   : > { %s16921_s14 = scalar_lea.vmem %s369_s12, 256  ;;  %p16929_p7 = scmp.lt.s32.totalorder %s369_s12, %s369_s12 }
  0x85   : > { %p16922_p1 = scmp.ne.s32.totalorder %s369_s12, %s16921_s14  ;;  %p16930_p0 = scmp.lt.s32.totalorder %s16921_s14, %s16921_s14 }
  0x87   : > { %p16924_p4 = pnand %p16922_p1, %p18470_p3  ;;  %p16931_p13 = por %p16930_p0, %p16929_p7 }
  0x89   : > { %p16925_p6 = pneg %p16924_p4 }
  0x8b   : > { %p16932_p2 = pnand %p16931_p13, %p16925_p6 }
  0x8d   : > { %16935 = shalt.err (!%p16932_p2)
}
  0x8e   : > { %p18471_p5 = scmp.ne.s32.totalorder %s18450_s13, 0  ;;  %s18472_s4 = sld [smem:[#allocation39_spill]] }
  0x8f   : > { %s17198_s21 = smov [#allocation13]   ;;  %s17199_s30 = smov [#allocation16]  }
  0x90   : > { %s391_s11 = sshll.u32 %s17198_s21, 4  ;;  %s417_s9 = sshll.u32 %s17199_s30, 4  ;;  %s392_s11 = int_to_ptr.vmem [resolvable:$true] %s391_s11  ;;  %s418_s9 = int_to_ptr.vmem [resolvable:$true] %s417_s9 }
  0x91   : > { %s16947_s3 = scalar_lea.vmem %s392_s11, 16384  ;;  %p16955_p1 = scmp.lt.s32.totalorder %s392_s11, %s392_s11 }
  0x92   : > { %p16948_p8 = scmp.ne.s32.totalorder %s392_s11, %s16947_s3  ;;  %p16956_p4 = scmp.lt.s32.totalorder %s16947_s3, %s16947_s3 }
  0x94   : > { %15034 = dma.hbm_to_vmem [thread:$0]  (!%p18471_p5), %s18472_s4, 256, %s369_s12, [#allocation9]  }
  0x95   : > { %p16950_p10 = pnand %p16948_p8, %p18470_p3  ;;  %p16957_p6 = por %p16956_p4, %p16955_p1 }
  0x97   : > { %p16951_p12 = pneg %p16950_p10 }
  0x99   : > { %p16958_p7 = pnand %p16957_p6, %p16951_p12 }
  0x9b   : > { %16961 = shalt.err (!%p16958_p7)
}
  0x9c   : > { %s18473_s14 = smov 16   ;;  %s18474_s7 = smov 256  }
  0x9d   : > { %s18475_s6 = sld [smem:[#allocation41_spill]]  ;;  %s16973_s19 = scalar_lea.vmem %s418_s9, 16384 }
  0x9e   : > { %p16974_p0 = scmp.ne.s32.totalorder %s418_s9, %s16973_s19  ;;  %p16981_p8 = scmp.lt.s32.totalorder %s418_s9, %s418_s9 }
  0x9f   : > { %p16982_p10 = scmp.lt.s32.totalorder %s16973_s19, %s16973_s19 }
  0xa0   : > { %p16976_p13 = pnand %p16974_p0, %p18470_p3 }
  0xa1   : > { %p16983_p12 = por %p16982_p10, %p16981_p8 }
  0xa2   : > { %p16977_p2 = pneg %p16976_p13 }
  0xa3   : > { %15040 = dma.hbm_to_vmem [thread:$0]  (!%p18471_p5), %s18475_s6, 16384, %s392_s11, [#allocation12], %s18474_s7, %s18474_s7, %s18473_s14  }
  0xa4   : > { %p16984_p1 = pnand %p16983_p12, %p16977_p2 }
  0xa6   : > { %16987 = shalt.err (!%p16984_p1)
}
  0xa7   : > { %15046 = dma.hbm_to_vmem [thread:$0]  (!%p18471_p5), %s18406_s8, 16384, %s418_s9, [#allocation15], %s18474_s7, %s18474_s7, %s18473_s14  }
  0xa8   : > { %s17200_s11 = smov [#allocation19]   ;;  %s13328_s12 = sshll.u32 %s17388_s26, 5 }
  0xa9   : > { %s443_s3 = sshll.u32 %s17200_s11, 4  ;;  %s444_s3 = int_to_ptr.vmem [resolvable:$true] %s443_s3 }
  0xaa   : > { %s16999_s5 = scalar_lea.vmem %s444_s3, 65536  ;;  %p17007_p0 = scmp.lt.s32.totalorder %s444_s3, %s444_s3 }
  0xab   : > { %p17000_p4 = scmp.ne.s32.totalorder %s444_s3, %s16999_s5  ;;  %p17008_p13 = scmp.lt.s32.totalorder %s16999_s5, %s16999_s5 }
  0xad   : > { %p17002_p6 = pnand %p17000_p4, %p18470_p3  ;;  %p17009_p2 = por %p17008_p13, %p17007_p0 }
  0xaf   : > { %p17003_p7 = pneg %p17002_p6 }
  0xb1   : > { %p17010_p8 = pnand %p17009_p2, %p17003_p7 }
  0xb3   : > { %17013 = shalt.err (!%p17010_p8)
}
  0xb4   : > { %15052 = dma.hbm_to_vmem [thread:$0]  (!%p18471_p5), %s18408_s10, 65536, %s444_s3, [#allocation18], %s18474_s7, %s18474_s7, %s18473_s14  }
  0xb5   : > { %s14902_s16 = sshll.u32 %s17184_s24, 9  ;;  %s461_s13 = scalar_lea.vmem [#allocation2], %s13328_s12 }
  0xb6   : > { %s17501_s11 = scalar_lea.hbm %s18398_s0, %s14902_s16  ;;  %s469_s5 = sshll.u32 %s461_s13, 4  ;;  %s470_s5 = int_to_ptr.vmem [resolvable:$true] %s469_s5 }
  0xb7   : > { %s458_s4 = scalar_lea.sflag [#allocation3], %s17388_s26  ;;  %s17014_s6 = scalar_lea.hbm %s17501_s11, 512 }
  0xb8   : > { %p17015_p3 = scmp.ne.s32.totalorder %s17501_s11, %s17014_s6  ;;  %s17019_s7 = scalar_lea.hbm %s18398_s0, 1024 }
  0xb9   : > { %p17020_p5 = scmp.lt.s32.totalorder %s17501_s11, %s18398_s0  ;;  %p17021_p1 = scmp.lt.s32.totalorder %s17019_s7, %s17014_s6 }
  0xba   : > { %p17017_p10 = pnand %p17015_p3, %p17422_p11 }
  0xbb   : > { %p17022_p4 = por %p17021_p1, %p17020_p5 }
  0xbc   : > { %p17018_p12 = pneg %p17017_p10 }
  0xbe   : > { %p17023_p6 = pnand %p17022_p4, %p17018_p12 }
  0xc0   : > { %17026 = shalt.err (!%p17023_p6)
}
  0xc1   : > { %s17027_s12 = scalar_lea.vmem %s470_s5, 512  ;;  %s17201_s26 = smov [#allocation2]  }
  0xc2   : > { %p17028_p7 = scmp.ne.s32.totalorder %s470_s5, %s17027_s12  ;;  %s17032_s16 = sshll.u32 %s17201_s26, 4  ;;  %s17033_s16 = int_to_ptr.vmem [resolvable:$false] %s17032_s16 }
  0xc3   : > { %s17034_s21 = scalar_lea.vmem %s17033_s16, 1024  ;;  %p17035_p2 = scmp.lt.s32.totalorder %s470_s5, %s17033_s16 }
  0xc4   : > { %p17030_p0 = pnand %p17028_p7, %p17422_p11  ;;  %p17036_p8 = scmp.lt.s32.totalorder %s17034_s21, %s17027_s12 }
  0xc6   : > { %p17031_p13 = pneg %p17030_p0  ;;  %p17037_p3 = por %p17036_p8, %p17035_p2 }
  0xc8   : > { %p17038_p10 = pnand %p17037_p3, %p17031_p13 }
  0xca   : > { %17041 = shalt.err (!%p17038_p10)
}
  0xcb   : > { %15056 = dma.hbm_to_vmem [thread:$0]  (!%p17398_p9), %s17501_s11, 512, %s470_s5, %s458_s4  }
  0xcc   : > { %s17042_s6 = scalar_lea.hbm %s17453_s15, 1024  ;;  %s17047_s9 = scalar_lea.hbm %s18400_s2, 2048 }
  0xcd   : > { %p17043_p12 = scmp.ne.s32.totalorder %s17453_s15, %s17042_s6  ;;  %p17048_p4 = scmp.lt.s32.totalorder %s17453_s15, %s18400_s2 }
  0xce   : > { %p17049_p6 = scmp.lt.s32.totalorder %s17047_s9, %s17042_s6 }
  0xcf   : > { %p17045_p5 = pnand %p17043_p12, %p17422_p11 }
  0xd0   : > { %p17050_p7 = por %p17049_p6, %p17048_p4 }
  0xd1   : > { %p17046_p1 = pneg %p17045_p5 }
  0xd3   : > { %p17051_p0 = pnand %p17050_p7, %p17046_p1 }
  0xd5   : > { %17054 = shalt.err (!%p17051_p0)
}
  0xd6   : > { %s17055_s4 = scalar_lea.vmem %s17457_s1, 1024  ;;  %s17202_s11 = smov [#allocation7]  }
  0xd7   : > { %p17056_p13 = scmp.ne.s32.totalorder %s17457_s1, %s17055_s4  ;;  %s17060_s5 = sshll.u32 %s17202_s11, 4  ;;  %s17061_s5 = int_to_ptr.vmem [resolvable:$false] %s17060_s5 }
  0xd8   : > { %s17062_s3 = scalar_lea.vmem %s17061_s5, 2048  ;;  %p17063_p3 = scmp.lt.s32.totalorder %s17457_s1, %s17061_s5 }
  0xd9   : > { %p17058_p2 = pnand %p17056_p13, %p17422_p11  ;;  %p17064_p10 = scmp.lt.s32.totalorder %s17062_s3, %s17055_s4 }
  0xdb   : > { %p17059_p8 = pneg %p17058_p2  ;;  %p17065_p12 = por %p17064_p10, %p17063_p3 }
  0xdd   : > { %p17066_p5 = pnand %p17065_p12, %p17059_p8 }
  0xdf   : > { %17069 = shalt.err (!%p17066_p5)
}
  0xe0   : > { %15062 = dma.hbm_to_vmem [thread:$0]  (!%p17398_p9), %s17453_s15, 1024, %s17457_s1, %s17416_s23, %s18467_s29, %s18467_s29, %s18466_s20  }
  0xe1   : > { %p18476_p11 = scmp.ne.s32.totalorder %s18449_s28, 0 }
  0xe2   : > { %s17547_s17 = sand.u32 (!%p18476_p11), 1, %s17176_s22   ;;  %p18477_p1 = scmp.ne.s32.totalorder (!%p18476_p11), %s18458_s18, 0 }
  0xe3   : > { %520 = sbr.rel (%p18476_p11) target bundleno = 3430 (0xd66), region = 64  ;;  %s13338_s19 = sshll.u32 (!%p18476_p11), %s17547_s17, 5 }
  0xe4   : > { %s523_s12 = scalar_lea.sflag (!%p18476_p11), [#allocation3], %s17547_s17  ;;  %s17553_s25 = scalar_lea.vmem (!%p18476_p11), [#allocation2], %s13338_s19 }
  0xe8   : > { %17139 = dma.done.wait (%p18477_p1), %s523_s12, 512  }
  0xe9   : > { %17141 = vsyncadd (%p18477_p1), %s523_s12, 4294966784  ;;  %s531_s1 = sand.u32 1, %s17293_s27   ;;  %s13339_s23 = sshll.u32 %s17547_s17, 6 }
  0xea   : > { %s532_s28 = scalar_lea.sflag [#allocation6], %s531_s1  ;;  %s535_s20 = scalar_lea.vmem [#allocation5], %s13339_s23 }
  0xeb   : > { %17143 = dma.done.wait (%p18477_p1), %s532_s28, 2048  }
  0xec   : > { %17145 = vsyncadd (%p18477_p1), %s532_s28, 4294965248  ;;  %s17565_s29 = scalar_lea.vmem [#allocation7], %s13339_s23  ;;  %p18478_p9 = scmp.eq.s32.totalorder %s17293_s27, 0 }
  0xee   : > { %17147 = dma.done.wait (%p18478_p9), [#allocation9], 1280   ;;  %p18479_p4 = pmov %p18478_p9 }
  0xf0   : > { %17149 = vsyncadd (%p18479_p4), [#allocation9], 4294966016  ;;  %p18480_p6 = pmov %p18479_p4 }
  0xf1   : > { %p18481_p7 = pmov %p18479_p4 }
  0xf2   : > { %17151 = dma.done.wait (%p18480_p6), [#allocation12], 32768  }
  0xf3   : > { %17153 = vsyncadd (%p18481_p7), [#allocation12], 4294934528  ;;  %p18482_p0 = pmov %p18479_p4 }
  0xf5   : > { %17155 = dma.done.wait (%p18482_p0), [#allocation15], 32768   ;;  %p18483_p13 = pmov %p18482_p0 }
  0xf6   : > { %p18484_p2 = pmov %p18482_p0 }
  0xf7   : > { %17157 = vsyncadd (%p18483_p13), [#allocation15], 4294934528 }
  0xf8   : > { %17159 = dma.done.wait (%p18484_p2), [#allocation18], 131072   ;;  %p18485_p8 = pmov %p18482_p0 }
  0xf9   : > { %v17583_v0 = vld [vmem:[%s535_s20] sm:$0xff]  ;;  %v17585_v1 = vld [vmem:[%s535_s20 + $0x8] sm:$0xff]  ;;  %v17587_v2 = vld [vmem:[%s535_s20 + $0x10] sm:$0xff]  ;;  %vm17204_vm0 = vmmov 0   ;;  %vm4021_vm1 = vcmask 130048   ;;  %s13350_s18 = sshll.u32 %s17547_s17, 3 }
  0xfa   : > { %17161 = vsyncadd (%p18485_p8), [#allocation18], 4294836224  ;;  %v17589_v3 = vld [vmem:[%s535_s20 + $0x18] sm:$0xff]  ;;  %v733_v4 = vadd.f32 %v17585_v1, %v17583_v0  ;;  %v17594_v5 = vld [vmem:[%s17553_s25] sm:$0xff]  ;;  %s18015_s15 = scalar_lea.vmem [#allocation21], %s13350_s18  ;;  %s18333_s26 = scalar_lea.vmem [#allocation20], %s13338_s19 }
  0xfb   : > { %v17597_v6 = vld [vmem:[%s17553_s25 + $0x8] sm:$0xff]  ;;  %v17600_v7 = vld [vmem:[%s17553_s25 + $0x10] sm:$0xff]  ;;  %v17603_v8 = vld [vmem:[%s17553_s25 + $0x18] sm:$0xff]  ;;  %s18486_s16 = sld [smem:[#allocation35_spill]]  ;;  %s14899_s21 = sshll.u32 %s17293_s27, 7 }
  0xfc   : > { %v662_v9 = vadd.f32 %v17597_v6, %v17594_v5  ;;  %v17607_v10 = vld [vmem:[%s535_s20 + $0x20] sm:$0xff]  ;;  %v734_v11 = vadd.f32 %v733_v4, %v17587_v2  ;;  %v17610_v12 = vld [vmem:[%s535_s20 + $0x28] sm:$0xff]  ;;  %v17612_v13 = vld [vmem:[%s535_s20 + $0x30] sm:$0xff]  ;;  %s13096_s6 = sshll.u32 %s18015_s15, 4  ;;  %s18487_s9 = sld [smem:[#allocation45_spill]]  ;;  %s13097_s6 = int_to_ptr.vmem [resolvable:$true] %s13096_s6 }
  0xfd   : > { %v17614_v14 = vld [vmem:[%s535_s20 + $0x38] sm:$0xff]  ;;  %v738_v16 = vadd.f32 %v17610_v12, %v17607_v10  ;;  %v15136_v21 = vld [vmem:[#allocation11 + $0xe4] ss:$16 sps:$4 sm:$0xff]   ;;  %v15140_v23 = vld [vmem:[#allocation11 + $0xe0] ss:$16 sps:$4 sm:$0xff]   ;;  %s13069_s7 = scalar_lea.sflag [#allocation22], %s17547_s17 }
  0xfe   : > { %v663_v15 = vadd.f32 %v662_v9, %v17600_v7  ;;  %v735_v17 = vadd.f32 %v734_v11, %v17589_v3  ;;  %v15138_v22 = vld [vmem:[#allocation11 + $0x2e4] ss:$16 sps:$4 sm:$0xff]   ;;  %v15141_v24 = vld [vmem:[#allocation11 + $0x2e0] ss:$16 sps:$4 sm:$0xff]   ;;  %1661 = vmatprep.subr.bf16.mxu0 %v15136_v21  ;;  %s17070_s4 = scalar_lea.vmem %s13097_s6, 128  ;;  %s17205_s11 = smov [#allocation21]  }
  0xff   : > { %v739_v19 = vadd.f32 %v738_v16, %v17612_v13  ;;  %v15142_v25 = vld [vmem:[#allocation11 + $0xc4] ss:$16 sps:$4 sm:$0xff]   ;;  %1702 = vmatprep.subr.bf16.mxu1 %v15138_v22  ;;  %1662 = vmatpush1.bf16.msra.mxu0 %v15140_v23  ;;  %v15146_v27 = vld [vmem:[#allocation11 + $0xc0] ss:$16 sps:$4 sm:$0xff]   ;;  %p17071_p3 = scmp.ne.s32.totalorder %s13097_s6, %s17070_s4  ;;  %s17074_s5 = sshll.u32 %s17205_s11, 4  ;;  %s17075_s5 = int_to_ptr.vmem [resolvable:$false] %s17074_s5 }
 0x100   : > { %v664_v18 = vadd.f32 %v663_v15, %v17603_v8  ;;  %736 = vadd.xlane.f32.xlu1 %v735_v17  ;;  %v15144_v26 = vld [vmem:[#allocation11 + $0x2c4] ss:$16 sps:$4 sm:$0xff]   ;;  %1703 = vmatpush1.bf16.msra.mxu1 %v15141_v24  ;;  %v15147_v28 = vld [vmem:[#allocation11 + $0x2c0] ss:$16 sps:$4 sm:$0xff]   ;;  %v17636_v17 = vld [vmem:[%s17565_s29 + $0x28] sm:$0xff]  ;;  %s17076_s3 = scalar_lea.vmem %s17075_s5, 256  ;;  %p17077_p11 = scmp.lt.s32.totalorder %s13097_s6, %s17075_s5 }
 0x101   : > { %v740_v20 = vadd.f32 %v739_v19, %v17614_v14  ;;  %1663 = vmatprep.subr.bf16.mxu0 %v15142_v25  ;;  %1704 = vmatprep.subr.bf16.mxu1 %v15144_v26  ;;  %v15148_v29 = vld [vmem:[#allocation11 + $0xa4] ss:$16 sps:$4 sm:$0xff]   ;;  %v15152_v31 = vld [vmem:[#allocation11 + $0xa0] ss:$16 sps:$4 sm:$0xff]   ;;  %p18488_p10 = scmp.ne.s32.totalorder %s18486_s16, 0  ;;  %p17078_p1 = scmp.lt.s32.totalorder %s17076_s3, %s17070_s4 }
 0x102   : > { %665 = vadd.xlane.f32.xlu0 %v664_v18  ;;  %v15150_v30 = vld [vmem:[#allocation11 + $0x2a4] ss:$16 sps:$4 sm:$0xff]   ;;  %v15153_v32 = vld [vmem:[#allocation11 + $0x2a0] ss:$16 sps:$4 sm:$0xff]   ;;  %s13094_s14 = scalar_lea.hbm %s18487_s9, %s14899_s21 }
 0x103   : > { %1664 = vmatpush1.bf16.msra.mxu0 %v15146_v27  ;;  %v15154_v33 = vld [vmem:[#allocation11 + $0x84] ss:$16 sps:$4 sm:$0xff]   ;;  %v15158_v35 = vld [vmem:[#allocation11 + $0x80] ss:$16 sps:$4 sm:$0xff]   ;;  %p17072_p12 = pnand %p17071_p3, %p18488_p10  ;;  %p17079_p9 = por %p17078_p1, %p17077_p11 }
 0x104   : > { %741 = vadd.xlane.f32.xlu1 %v740_v20  ;;  %1705 = vmatpush1.bf16.msra.mxu1 %v15147_v28  ;;  %v15156_v34 = vld [vmem:[#allocation11 + $0x284] ss:$16 sps:$4 sm:$0xff]   ;;  %v15159_v36 = vld [vmem:[#allocation11 + $0x280] ss:$16 sps:$4 sm:$0xff]  }
 0x105   : > { %1665 = vmatprep.subr.bf16.mxu0 %v15148_v29  ;;  %1706 = vmatprep.subr.bf16.mxu1 %v15150_v30  ;;  %v15160_v37 = vld [vmem:[#allocation11 + $0x64] ss:$16 sps:$4 sm:$0xff]   ;;  %v15164_v39 = vld [vmem:[#allocation11 + $0x60] ss:$16 sps:$4 sm:$0xff]   ;;  %p17073_p5 = pneg %p17072_p12 }
 0x106   : > { %v15162_v38 = vld [vmem:[#allocation11 + $0x264] ss:$16 sps:$4 sm:$0xff]   ;;  %v15165_v40 = vld [vmem:[#allocation11 + $0x260] ss:$16 sps:$4 sm:$0xff]  }
 0x107   : > { %1666 = vmatpush1.bf16.msra.mxu0 %v15152_v31  ;;  %v15166_v41 = vld [vmem:[#allocation11 + $0x44] ss:$16 sps:$4 sm:$0xff]   ;;  %v15170_v43 = vld [vmem:[#allocation11 + $0x40] ss:$16 sps:$4 sm:$0xff]   ;;  %p17080_p4 = pnand %p17079_p9, %p17073_p5 }
 0x108   : > { %1707 = vmatpush1.bf16.msra.mxu1 %v15153_v32  ;;  %1667 = vmatprep.subr.bf16.mxu0 %v15154_v33  ;;  %v15168_v42 = vld [vmem:[#allocation11 + $0x244] ss:$16 sps:$4 sm:$0xff]   ;;  %v15171_v44 = vld [vmem:[#allocation11 + $0x240] ss:$16 sps:$4 sm:$0xff]  }
 0x109   : > { %1708 = vmatprep.subr.bf16.mxu1 %v15156_v34  ;;  %v15172_v45 = vld [vmem:[#allocation11 + $0x24] ss:$16 sps:$4 sm:$0xff]   ;;  %v15176_v47 = vld [vmem:[#allocation11 + $0x20] ss:$16 sps:$4 sm:$0xff]  }
 0x10a   : > { %v15174_v46 = vld [vmem:[#allocation11 + $0x224] ss:$16 sps:$4 sm:$0xff]   ;;  %v15177_v48 = vld [vmem:[#allocation11 + $0x220] ss:$16 sps:$4 sm:$0xff]  }
 0x10b   : > { %1668 = vmatpush1.bf16.msra.mxu0 %v15158_v35  ;;  %v15178_v49 = vld [vmem:[#allocation11 + $0x4] ss:$16 sps:$4 sm:$0xff]   ;;  %v15182_v51 = vld [vmem:[#allocation11] ss:$16 sps:$4 sm:$0xff]  }
 0x10c   : > { %1709 = vmatpush1.bf16.msra.mxu1 %v15159_v36  ;;  %1669 = vmatprep.subr.bf16.mxu0 %v15160_v37  ;;  %v15180_v50 = vld [vmem:[#allocation11 + $0x204] ss:$16 sps:$4 sm:$0xff]   ;;  %v15183_v52 = vld [vmem:[#allocation11 + $0x200] ss:$16 sps:$4 sm:$0xff]  }
 0x10d   : > { %1710 = vmatprep.subr.bf16.mxu1 %v15162_v38  ;;  %v15184_v53 = vld [vmem:[#allocation11 + $0x1e4] ss:$16 sps:$4 sm:$0xff]   ;;  %v15188_v55 = vld [vmem:[#allocation11 + $0x1e0] ss:$16 sps:$4 sm:$0xff]  }
 0x10e   : > { %v15186_v54 = vld [vmem:[#allocation11 + $0x3e4] ss:$16 sps:$4 sm:$0xff]   ;;  %v15189_v56 = vld [vmem:[#allocation11 + $0x3e0] ss:$16 sps:$4 sm:$0xff]  }
 0x10f   : > { %1670 = vmatpush1.bf16.msra.mxu0 %v15164_v39  ;;  %v15190_v57 = vld [vmem:[#allocation11 + $0x1c4] ss:$16 sps:$4 sm:$0xff]   ;;  %v15194_v59 = vld [vmem:[#allocation11 + $0x1c0] ss:$16 sps:$4 sm:$0xff]  }
 0x110   : > { %1711 = vmatpush1.bf16.msra.mxu1 %v15165_v40  ;;  %1671 = vmatprep.subr.bf16.mxu0 %v15166_v41  ;;  %v15192_v58 = vld [vmem:[#allocation11 + $0x3c4] ss:$16 sps:$4 sm:$0xff]   ;;  %v15195_v60 = vld [vmem:[#allocation11 + $0x3c0] ss:$16 sps:$4 sm:$0xff]   ;;  %v17706_v41 = vld [vmem:[%s17565_s29 + $0x38] sm:$0xff] }
 0x111   : > { %1712 = vmatprep.subr.bf16.mxu1 %v15168_v42  ;;  %v17633_v16 = vld [vmem:[%s17565_s29 + $0x20] sm:$0xff]  ;;  %v17684_v31 = vld [vmem:[%s17565_s29 + $0x30] sm:$0xff] }
 0x112   : > { %v17648_v21 = vld [vmem:[%s17565_s29] sm:$0xff]  ;;  %v17695_v32 = vld [vmem:[%s17565_s29 + $0x10] sm:$0xff] }
 0x113   : > { %1672 = vmatpush1.bf16.msra.mxu0 %v15170_v43 }
 0x114   : > { %1713 = vmatpush1.bf16.msra.mxu1 %v15171_v44  ;;  %1673 = vmatprep.subr.bf16.mxu0 %v15172_v45  ;;  %v17710_v44 = vld [vmem:[%s17565_s29 + $0x18] sm:$0xff] }
 0x115   : > { %1714 = vmatprep.subr.bf16.mxu1 %v15174_v46 }
 0x117   : > { %1674 = vmatpush1.bf16.msra.mxu0 %v15176_v47 }
 0x118   : > { %1715 = vmatpush1.bf16.msra.mxu1 %v15177_v48  ;;  %1675 = vmatprep.subr.bf16.mxu0 %v15178_v49 }
 0x119   : > { %1716 = vmatprep.subr.bf16.mxu1 %v15180_v50  ;;  %v15196_v50 = vld [vmem:[#allocation11 + $0x1a4] ss:$16 sps:$4 sm:$0xff]  }
 0x11b   : > { %1676 = vmatpush1.bf16.msra.mxu0 %v15182_v51  ;;  %v15198_v51 = vld [vmem:[#allocation11 + $0x3a4] ss:$16 sps:$4 sm:$0xff]  }
 0x11c   : > { %1717 = vmatpush1.bf16.msra.mxu1 %v15183_v52  ;;  %1677 = vmatprep.subr.bf16.mxu0 %v15184_v53  ;;  %v15200_v52 = vld [vmem:[#allocation11 + $0x1a0] ss:$16 sps:$4 sm:$0xff]  }
 0x11d   : > { %1718 = vmatprep.subr.bf16.mxu1 %v15186_v54  ;;  %v15201_v53 = vld [vmem:[#allocation11 + $0x3a0] ss:$16 sps:$4 sm:$0xff]   ;;  %v15202_v54 = vld [vmem:[#allocation11 + $0x184] ss:$16 sps:$4 sm:$0xff]  }
 0x11f   : > { %1678 = vmatpush2.bf16.msra.mxu0 %v15188_v55  ;;  %v15204_v55 = vld [vmem:[#allocation11 + $0x384] ss:$16 sps:$4 sm:$0xff]  }
 0x120   : > { %1719 = vmatpush2.bf16.msra.mxu1 %v15189_v56  ;;  %1679 = vmatprep.subr.bf16.mxu0 %v15190_v57  ;;  %v15206_v56 = vld [vmem:[#allocation11 + $0x180] ss:$16 sps:$4 sm:$0xff]  }
 0x121   : > { %1720 = vmatprep.subr.bf16.mxu1 %v15192_v58  ;;  %v15207_v57 = vld [vmem:[#allocation11 + $0x380] ss:$16 sps:$4 sm:$0xff]   ;;  %v15208_v58 = vld [vmem:[#allocation11 + $0x164] ss:$16 sps:$4 sm:$0xff]  }
 0x123   : > { %1680 = vmatpush2.bf16.msra.mxu0 %v15194_v59  ;;  %v15210_v59 = vld [vmem:[#allocation11 + $0x364] ss:$16 sps:$4 sm:$0xff]  }
 0x124   : > { %1721 = vmatpush2.bf16.msra.mxu1 %v15195_v60  ;;  %1681 = vmatprep.subr.bf16.mxu0 %v15196_v50  ;;  %v15212_v60 = vld [vmem:[#allocation11 + $0x160] ss:$16 sps:$4 sm:$0xff]  }
 0x125   : > { %1722 = vmatprep.subr.bf16.mxu1 %v15198_v51 }
 0x127   : > { %1682 = vmatpush2.bf16.msra.mxu0 %v15200_v52 }
 0x128   : > { %1723 = vmatpush2.bf16.msra.mxu1 %v15201_v53  ;;  %1683 = vmatprep.subr.bf16.mxu0 %v15202_v54 }
 0x129   : > { %1724 = vmatprep.subr.bf16.mxu1 %v15204_v55 }
 0x12b   : > { %1684 = vmatpush2.bf16.msra.mxu0 %v15206_v56 }
 0x12c   : > { %1725 = vmatpush2.bf16.msra.mxu1 %v15207_v57  ;;  %1685 = vmatprep.subr.bf16.mxu0 %v15208_v58  ;;  %v635_v58 = vld [vmem:[#allocation8 + $0x18] sm:$0xff] }
 0x12d   : > { %1726 = vmatprep.subr.bf16.mxu1 %v15210_v59  ;;  %v632_v59 = vld [vmem:[#allocation8] sm:$0xff] }
 0x12f   : > { %1686 = vmatpush2.bf16.msra.mxu0 %v15212_v60  ;;  %v634_v60 = vld [vmem:[#allocation8 + $0x10] sm:$0xff] }
 0x189   : > { %v737_v61 = vpop.xlane.xlu1 %736 }
 0x18a   : > { %v743_v62 = vmul.f32 0.001953125, %v737_v61  ;;  %v15213_v61 = vld [vmem:[#allocation11 + $0x360] ss:$16 sps:$4 sm:$0xff]  }
 0x18b   : > { %v666_v63 = vpop.xlane.xlu0 %665  ;;  %1727 = vmatpush2.bf16.msra.mxu1 %v15213_v61 }
 0x18c   : > { %v668_v4 = vmul.f32 0.001953125, %v666_v63  ;;  %v17624_v9 = vsub.f32 %v17583_v0, %v743_v62  ;;  %v17627_v11 = vsub.f32 %v17585_v1, %v743_v62  ;;  %v17630_v15 = vsub.f32 %v17587_v2, %v743_v62  ;;  %v17651_v1 = vld [vmem:[%s17565_s29 + $0x8] sm:$0xff]  ;;  %v15216_v63 = vld [vmem:[#allocation11 + $0x344] ss:$16 sps:$4 sm:$0xff]  }
 0x18d   : > { %v742_v20 = vpop.xlane.xlu1 %741  ;;  %v17654_v22 = vsub.f32 %v17589_v3, %v743_v62  ;;  %v805_v33 = vadd.f32 %v17651_v1, %v17648_v21  ;;  %v15214_v62 = vld [vmem:[#allocation11 + $0x144] ss:$16 sps:$4 sm:$0xff]   ;;  %1728 = vmatprep.subr.bf16.mxu1 %v15216_v63 }
 0x18e   : > { %v17639_v18 = vsub.f32 %v17594_v5, %v668_v4  ;;  %v17642_v19 = vsub.f32 %v17597_v6, %v668_v4  ;;  %v17645_v0 = vsub.f32 %v17600_v7, %v668_v4  ;;  %v744_v2 = vmul.f32 0.001953125, %v742_v20  ;;  %v15219_v20 = vld [vmem:[#allocation11 + $0x340] ss:$16 sps:$4 sm:$0xff]   ;;  %1687 = vmatprep.subr.bf16.mxu0 %v15214_v62 }
 0x18f   : > { %v753_v5 = vmul.f32 %v17624_v9, %v17624_v9  ;;  %v754_v6 = vmul.f32 %v17627_v11, %v17627_v11  ;;  %v17661_v23 = vsub.f32 %v17603_v8, %v668_v4  ;;  %v755_v3 = vmul.f32 %v17630_v15, %v17630_v15  ;;  %v15218_v4 = vld [vmem:[#allocation11 + $0x140] ss:$16 sps:$4 sm:$0xff]   ;;  %1729 = vmatpush2.bf16.msra.mxu1 %v15219_v20 }
 0x190   : > { %v673_v7 = vmul.f32 %v17639_v18, %v17639_v18  ;;  %v674_v24 = vmul.f32 %v17642_v19, %v17642_v19  ;;  %v17670_v25 = vsub.f32 %v17607_v10, %v744_v2  ;;  %v17673_v26 = vsub.f32 %v17610_v12, %v744_v2  ;;  %1688 = vmatpush2.bf16.msra.mxu0 %v15218_v4 }
 0x191   : > { %v17676_v27 = vsub.f32 %v17612_v13, %v744_v2  ;;  %v17679_v8 = vsub.f32 %v17614_v14, %v744_v2  ;;  %v675_v28 = vmul.f32 %v17645_v0, %v17645_v0  ;;  %v761_v30 = vadd.f32 %v754_v6, %v753_v5  ;;  %v15220_v2 = vld [vmem:[#allocation11 + $0x124] ss:$16 sps:$4 sm:$0xff]   ;;  %v15224_v6 = vld [vmem:[#allocation11 + $0x120] ss:$16 sps:$4 sm:$0xff]  }
 0x192   : > { %v677_v29 = vadd.f32 %v674_v24, %v673_v7  ;;  %v810_v10 = vadd.f32 %v17636_v17, %v17633_v16  ;;  %v757_v12 = vmul.f32 %v17670_v25, %v17670_v25  ;;  %v758_v13 = vmul.f32 %v17673_v26, %v17673_v26  ;;  %v15222_v5 = vld [vmem:[#allocation11 + $0x324] ss:$16 sps:$4 sm:$0xff]   ;;  %v15225_v7 = vld [vmem:[#allocation11 + $0x320] ss:$16 sps:$4 sm:$0xff]   ;;  %1689 = vmatprep.subr.bf16.mxu0 %v15220_v2 }
 0x193   : > { %v759_v14 = vmul.f32 %v17676_v27, %v17676_v27  ;;  %v676_v34 = vmul.f32 %v17661_v23, %v17661_v23  ;;  %v756_v36 = vmul.f32 %v17654_v22, %v17654_v22  ;;  %v762_v37 = vadd.f32 %v761_v30, %v755_v3  ;;  %1730 = vmatprep.subr.bf16.mxu1 %v15222_v5  ;;  %v15226_v24 = vld [vmem:[#allocation11 + $0x104] ss:$16 sps:$4 sm:$0xff]   ;;  %v15234_v30 = vld [vmem:[#allocation11 + $0xec] ss:$16 sps:$4 sm:$0xff]  }
 0x194   : > { %v678_v35 = vadd.f32 %v677_v29, %v675_v28  ;;  %v760_v38 = vmul.f32 %v17679_v8, %v17679_v8  ;;  %v766_v39 = vadd.f32 %v758_v13, %v757_v12  ;;  %v811_v43 = vadd.f32 %v810_v10, %v17684_v31  ;;  %1690 = vmatpush2.bf16.msra.mxu0 %v15224_v6  ;;  %v15228_v3 = vld [vmem:[#allocation11 + $0x304] ss:$16 sps:$4 sm:$0xff]   ;;  %v15230_v28 = vld [vmem:[#allocation11 + $0x100] ss:$16 sps:$4 sm:$0xff]   ;;  %v15237_v10 = vld [vmem:[#allocation11 + $0x2ec] ss:$16 sps:$4 sm:$0xff]  }
 0x195   : > { %v763_v45 = vadd.f32 %v762_v37, %v756_v36  ;;  %v806_v46 = vadd.f32 %v805_v33, %v17695_v32  ;;  %1731 = vmatpush2.bf16.msra.mxu1 %v15225_v7  ;;  %v15231_v29 = vld [vmem:[#allocation11 + $0x300] ss:$16 sps:$4 sm:$0xff]   ;;  %1691 = vmatprep.subr.bf16.mxu0 %v15226_v24  ;;  %v689_v36 = vlaneseq }
 0x196   : > { %v679_v40 = vadd.f32 %v678_v35, %v676_v34  ;;  %v767_v42 = vadd.f32 %v766_v39, %v759_v14  ;;  %v812_v48 = vadd.f32 %v811_v43, %v17706_v41  ;;  %1732 = vmatprep.subr.bf16.mxu1 %v15228_v3 }
 0x197   : > { %v807_v49 = vadd.f32 %v806_v46, %v17710_v44 }
 0x198   : > { %680 = vadd.xlane.f32.xlu0 %v679_v40  ;;  %v768_v47 = vadd.f32 %v767_v42, %v760_v38  ;;  %1692 = vmatpush2.bf16.msra.mxu0 %v15230_v28 }
 0x199   : > { %1733 = vmatpush2.bf16.msra.mxu1 %v15231_v29  ;;  %1743 = vmatprep.subr.bf16.mxu0 %v15234_v30 }
 0x19a   : > { %769 = vadd.xlane.f32.xlu1 %v768_v47  ;;  %1784 = vmatprep.subr.bf16.mxu1 %v15237_v10 }
 0x19c   : > { %764 = vadd.xlane.f32.xlu0 %v763_v45  ;;  %v17715_v45 = vshrl.u32 %v689_v36, 7 }
 0x19e   : > { %813 = vadd.xlane.f32.xlu1 %v812_v48  ;;  %v17748_v54 = vsub.s32 0, %v17715_v45  ;;  %v17759_v57 = vsub.s32 1, %v17715_v45 }
 0x1a0   : > { %808 = vadd.xlane.f32.xlu0 %v807_v49  ;;  %v17767_v2 = vrot.slane %v635_v58, %v17748_v54  ;;  %v17770_v5 = vrot.slane %v632_v59, %v17748_v54  ;;  %v17773_v6 = vrot.slane %v634_v60, %v17748_v54  ;;  %v17779_v28 = vrot.slane %v635_v58, %v17759_v57  ;;  %v15241_v58 = vld [vmem:[#allocation11 + $0x2c8] ss:$16 sps:$4 sm:$0xff]  }
 0x1a1   : > { %v17782_v29 = vrot.slane %v632_v59, %v17759_v57  ;;  %v15246_v59 = vld [vmem:[#allocation11 + $0xac] ss:$16 sps:$4 sm:$0xff]  }
 0x221   : > { %v681_v12 = vpop.xlane.xlu0 %680 }
 0x222   : > { %v682_v13 = vmul.f32 0.001953125, %v681_v12 }
 0x223   : > { %v770_v33 = vpop.xlane.xlu1 %769 }
 0x224   : > { %v683_v14 = vadd.f32 1e-05, %v682_v13  ;;  %v772_v34 = vmul.f32 0.001953125, %v770_v33  ;;  %v17789_v33 = vrot.slane %v634_v60, %v17759_v57 }
 0x225   : > { %v765_v35 = vpop.xlane.xlu0 %764 }
 0x226   : > { %16672 = vrsqrt.f32 %v683_v14  ;;  %v771_v37 = vmul.f32 0.001953125, %v765_v35  ;;  %v774_v38 = vadd.f32 1e-05, %v772_v34 }
 0x227   : > { %v814_v40 = vpop.xlane.xlu1 %813 }
 0x228   : > { %v773_v39 = vadd.f32 1e-05, %v771_v37  ;;  %16674 = vrsqrt.f32 %v774_v38  ;;  %v816_v42 = vmul.f32 0.001953125, %v814_v40  ;;  %v15232_v38 = vld [vmem:[#allocation11 + $0xe8] ss:$16 sps:$4 sm:$0xff]  }
 0x229   : > { %v809_v43 = vpop.xlane.xlu0 %808 }
 0x22a   : > { %16676 = vrsqrt.f32 %v773_v39  ;;  %v815_v46 = vmul.f32 0.001953125, %v809_v43  ;;  %v17718_v47 = vsub.f32 %v17633_v16, %v816_v42  ;;  %v17721_v48 = vsub.f32 %v17636_v17, %v816_v42  ;;  %v633_v17 = vld [vmem:[#allocation8 + $0x8] sm:$0xff] }
 0x22b   : > { %v17724_v49 = vsub.f32 %v17684_v31, %v816_v42  ;;  %v17727_v50 = vsub.f32 %v17706_v41, %v816_v42  ;;  %v17764_v4 = vrot.slane %v633_v17, %v17748_v54  ;;  %v17776_v3 = vrot.slane %v633_v17, %v17759_v57  ;;  %v15235_v39 = vld [vmem:[#allocation11 + $0x2e8] ss:$16 sps:$4 sm:$0xff]  }
 0x22c   : > { %v17730_v51 = vsub.f32 %v17648_v21, %v815_v46  ;;  %v17733_v52 = vsub.f32 %v17651_v1, %v815_v46  ;;  %v17736_v53 = vsub.f32 %v17695_v32, %v815_v46  ;;  %v17739_v16 = vsub.f32 %v17710_v44, %v815_v46 }
 0x22d   : > { %v829_v31 = vmul.f32 %v17718_v47, %v17718_v47  ;;  %v830_v41 = vmul.f32 %v17721_v48, %v17721_v48  ;;  %v831_v21 = vmul.f32 %v17724_v49, %v17724_v49  ;;  %v832_v55 = vmul.f32 %v17727_v50, %v17727_v50 }
 0x22e   : > { %v825_v1 = vmul.f32 %v17730_v51, %v17730_v51  ;;  %v826_v32 = vmul.f32 %v17733_v52, %v17733_v52  ;;  %v827_v44 = vmul.f32 %v17736_v53, %v17736_v53  ;;  %v828_v61 = vmul.f32 %v17739_v16, %v17739_v16 }
 0x22f   : > { %v838_v56 = vadd.f32 %v830_v41, %v829_v31  ;;  %v15240_v41 = vld [vmem:[#allocation11 + $0xcc] ss:$16 sps:$4 sm:$0xff]  }
 0x230   : > { %v833_v62 = vadd.f32 %v826_v32, %v825_v1 }
 0x231   : > { %v839_v63 = vadd.f32 %v838_v56, %v831_v21  ;;  %v15243_v21 = vld [vmem:[#allocation11 + $0x2cc] ss:$16 sps:$4 sm:$0xff]   ;;  %v15238_v56 = vld [vmem:[#allocation11 + $0xc8] ss:$16 sps:$4 sm:$0xff]  }
 0x232   : > { %v834_v20 = vadd.f32 %v833_v62, %v827_v44 }
 0x233   : > { %v16673_v7 = vpop.eup %16672  ;;  %v840_v24 = vadd.f32 %v839_v63, %v832_v55 }
 0x234   : > { %v835_v30 = vadd.f32 %v834_v20, %v828_v61  ;;  %v686_v10 = vmul.f32 %v16673_v7, %v17642_v19  ;;  %v688_v12 = vmul.f32 %v16673_v7, %v17661_v23  ;;  %v685_v13 = vmul.f32 %v16673_v7, %v17639_v18  ;;  %v15249_v61 = vld [vmem:[#allocation11 + $0x2ac] ss:$16 sps:$4 sm:$0xff]  }
 0x235   : > { %841 = vadd.xlane.f32.xlu1 %v840_v24  ;;  %v687_v14 = vmul.f32 %v16673_v7, %v17645_v0  ;;  %v17791_v34 = vpop.eup %16674 }
 0x236   : > { %836 = vadd.xlane.f32.xlu0 %v835_v30  ;;  %v706_v35 = vmul.f32 %v17764_v4, %v686_v10  ;;  %v708_v36 = vmul.f32 %v17767_v2, %v688_v12  ;;  %v705_v37 = vmul.f32 %v17770_v5, %v685_v13  ;;  %v781_v42 = vmul.f32 %v17791_v34, %v17670_v25  ;;  %v15252_v10 = vld [vmem:[#allocation11 + $0x8c] ss:$16 sps:$4 sm:$0xff]  }
 0x237   : > { %v17796_v19 = vpop.eup %16676  ;;  %v707_v23 = vmul.f32 %v17773_v6, %v687_v14  ;;  %v783_v55 = vmul.f32 %v17791_v34, %v17676_v27  ;;  %v15247_v27 = vld [vmem:[#allocation11 + $0x2a8] ss:$16 sps:$4 sm:$0xff]   ;;  %v15255_v12 = vld [vmem:[#allocation11 + $0x28c] ss:$16 sps:$4 sm:$0xff]  }
 0x238   : > { %v726_v18 = vadd.f32 %v17776_v3, %v706_v35  ;;  %v728_v0 = vadd.f32 %v17779_v28, %v708_v36  ;;  %v725_v40 = vadd.f32 %v17782_v29, %v705_v37  ;;  %v777_v32 = vmul.f32 %v17796_v19, %v17624_v9  ;;  %v15250_v14 = vld [vmem:[#allocation11 + $0x88] ss:$16 sps:$4 sm:$0xff]   ;;  %v15258_v36 = vld [vmem:[#allocation11 + $0x6c] ss:$16 sps:$4 sm:$0xff]  }
 0x239   : > { %v727_v43 = vadd.f32 %v17789_v33, %v707_v23  ;;  %v789_v44 = vmul.f32 %v781_v42, %v17770_v5  ;;  %v779_v25 = vmul.f32 %v17796_v19, %v17630_v15  ;;  %v791_v63 = vmul.f32 %v783_v55, %v17773_v6  ;;  %v15244_v15 = vld [vmem:[#allocation11 + $0xa8] ss:$16 sps:$4 sm:$0xff]   ;;  %v15261_v37 = vld [vmem:[#allocation11 + $0x26c] ss:$16 sps:$4 sm:$0xff]  }
 0x23a   : > { %v730_v46 = vpack.c.bf16 %v726_v18, %v726_v18  ;;  %v732_v17 = vpack.c.bf16 %v728_v0, %v728_v0  ;;  %v17805_v31 = vpack.c.bf16 %v725_v40, %v725_v40  ;;  %v785_v60 = vmul.f32 %v777_v32, %v17770_v5  ;;  %v15253_v35 = vld [vmem:[#allocation11 + $0x288] ss:$16 sps:$4 sm:$0xff]   ;;  %v15264_v0 = vld [vmem:[#allocation11 + $0x4c] ss:$16 sps:$4 sm:$0xff]  }
 0x23b   : > { %v17807_v1 = vpack.c.bf16 %v727_v43, %v727_v43  ;;  %v797_v9 = vadd.f32 %v789_v44, %v17782_v29  ;;  %v787_v62 = vmul.f32 %v779_v25, %v17773_v6  ;;  %v799_v24 = vadd.f32 %v791_v63, %v17789_v33  ;;  %v15256_v23 = vld [vmem:[#allocation11 + $0x68] ss:$16 sps:$4 sm:$0xff]   ;;  %v15270_v42 = vld [vmem:[#allocation11 + $0x2c] ss:$16 sps:$4 sm:$0xff]  }
 0x23c   : > { %1693 = vmatprep.mubr.bf16.mxu0 %v730_v46  ;;  %1734 = vmatprep.mubr.bf16.mxu1 %v732_v17  ;;  %v793_v20 = vadd.f32 %v785_v60, %v17782_v29  ;;  %v15259_v18 = vld [vmem:[#allocation11 + $0x268] ss:$16 sps:$4 sm:$0xff]   ;;  %v15273_v43 = vld [vmem:[#allocation11 + $0x22c] ss:$16 sps:$4 sm:$0xff]  }
 0x23d   : > { %1694 = vmatmul.mubr.bf16.vlgmr.msra.gmra.mxu0 %v17805_v31  ;;  %1735 = vmatmul.mubr.bf16.vlgmr.msra.gmra.mxu1 %v17807_v1  ;;  %v795_v7 = vadd.f32 %v787_v62, %v17789_v33  ;;  %v15265_v40 = vld [vmem:[#allocation11 + $0x248] ss:$16 sps:$4 sm:$0xff]   ;;  %v15282_v25 = vld [vmem:[#allocation11 + $0x1ec] ss:$16 sps:$4 sm:$0xff]  }
 0x23e   : > { %1744 = vmatpush1.bf16.msra.mxu0 %v15232_v38  ;;  %1785 = vmatpush1.bf16.msra.mxu1 %v15235_v39  ;;  %v17825_v30 = vpack.c.bf16 %v797_v9, %v793_v20  ;;  %v15267_v38 = vld [vmem:[#allocation11 + $0x24c] ss:$16 sps:$4 sm:$0xff]   ;;  %v15262_v39 = vld [vmem:[#allocation11 + $0x48] ss:$16 sps:$4 sm:$0xff]  }
 0x23f   : > { %1775 = vmatprep.mubr.bf16.mxu0 %v730_v46  ;;  %1816 = vmatprep.mubr.bf16.mxu1 %v732_v17  ;;  %v17827_v13 = vpack.c.bf16 %v799_v24, %v795_v7  ;;  %v15268_v46 = vld [vmem:[#allocation11 + $0x28] ss:$16 sps:$4 sm:$0xff]   ;;  %v15285_v55 = vld [vmem:[#allocation11 + $0x3ec] ss:$16 sps:$4 sm:$0xff]  }
 0x240   : > { %1745 = vmatprep.subr.bf16.mxu0 %v15240_v41  ;;  %1786 = vmatprep.subr.bf16.mxu1 %v15243_v21  ;;  %v15271_v17 = vld [vmem:[#allocation11 + $0x228] ss:$16 sps:$4 sm:$0xff]   ;;  %v15276_v41 = vld [vmem:[#allocation11 + $0xc] ss:$16 sps:$4 sm:$0xff]  }
 0x241   : > { %v15279_v21 = vld [vmem:[#allocation11 + $0x20c] ss:$16 sps:$4 sm:$0xff]   ;;  %v15274_v32 = vld [vmem:[#allocation11 + $0x8] ss:$16 sps:$4 sm:$0xff]  }
 0x242   : > { %1746 = vmatpush1.bf16.msra.mxu0 %v15238_v56  ;;  %1787 = vmatpush1.bf16.msra.mxu1 %v15241_v58  ;;  %v15277_v44 = vld [vmem:[#allocation11 + $0x208] ss:$16 sps:$4 sm:$0xff]   ;;  %v15291_v60 = vld [vmem:[#allocation11 + $0x3cc] ss:$16 sps:$4 sm:$0xff]  }
 0x243   : > { %1747 = vmatprep.subr.bf16.mxu0 %v15246_v59  ;;  %1788 = vmatprep.subr.bf16.mxu1 %v15249_v61  ;;  %v15280_v56 = vld [vmem:[#allocation11 + $0x1e8] ss:$16 sps:$4 sm:$0xff]   ;;  %v15288_v59 = vld [vmem:[#allocation11 + $0x1cc] ss:$16 sps:$4 sm:$0xff]  }
 0x244   : > { %v15283_v58 = vld [vmem:[#allocation11 + $0x3e8] ss:$16 sps:$4 sm:$0xff]   ;;  %v15294_v62 = vld [vmem:[#allocation11 + $0x1ac] ss:$16 sps:$4 sm:$0xff]  }
 0x245   : > { %v15286_v9 = vld [vmem:[#allocation11 + $0x1c8] ss:$16 sps:$4 sm:$0xff]   ;;  %v15297_v63 = vld [vmem:[#allocation11 + $0x3ac] ss:$16 sps:$4 sm:$0xff]  }
 0x246   : > { %1748 = vmatpush1.bf16.msra.mxu0 %v15244_v15  ;;  %1789 = vmatpush1.bf16.msra.mxu1 %v15247_v27  ;;  %v15289_v61 = vld [vmem:[#allocation11 + $0x3c8] ss:$16 sps:$4 sm:$0xff]   ;;  %v15300_v20 = vld [vmem:[#allocation11 + $0x18c] ss:$16 sps:$4 sm:$0xff]  }
 0x247   : > { %1749 = vmatprep.subr.bf16.mxu0 %v15252_v10  ;;  %1790 = vmatprep.subr.bf16.mxu1 %v15255_v12  ;;  %v15292_v15 = vld [vmem:[#allocation11 + $0x1a8] ss:$16 sps:$4 sm:$0xff]   ;;  %v15303_v7 = vld [vmem:[#allocation11 + $0x38c] ss:$16 sps:$4 sm:$0xff]  }
 0x248   : > { %v15295_v27 = vld [vmem:[#allocation11 + $0x3a8] ss:$16 sps:$4 sm:$0xff]   ;;  %v15306_v12 = vld [vmem:[#allocation11 + $0x16c] ss:$16 sps:$4 sm:$0xff]  }
 0x249   : > { %v15298_v24 = vld [vmem:[#allocation11 + $0x188] ss:$16 sps:$4 sm:$0xff]  }
 0x24a   : > { %1750 = vmatpush1.bf16.msra.mxu0 %v15250_v14  ;;  %1791 = vmatpush1.bf16.msra.mxu1 %v15253_v35  ;;  %v15301_v10 = vld [vmem:[#allocation11 + $0x388] ss:$16 sps:$4 sm:$0xff]   ;;  %v15309_v14 = vld [vmem:[#allocation11 + $0x36c] ss:$16 sps:$4 sm:$0xff]  }
 0x24b   : > { %1751 = vmatprep.subr.bf16.mxu0 %v15258_v36  ;;  %1792 = vmatprep.subr.bf16.mxu1 %v15261_v37  ;;  %v15304_v35 = vld [vmem:[#allocation11 + $0x168] ss:$16 sps:$4 sm:$0xff]   ;;  %v15312_v37 = vld [vmem:[#allocation11 + $0x14c] ss:$16 sps:$4 sm:$0xff]  }
 0x24c   : > { %v15307_v36 = vld [vmem:[#allocation11 + $0x368] ss:$16 sps:$4 sm:$0xff]  }
 0x24e   : > { %1752 = vmatpush1.bf16.msra.mxu0 %v15256_v23  ;;  %1793 = vmatpush1.bf16.msra.mxu1 %v15259_v18  ;;  %v15315_v23 = vld [vmem:[#allocation11 + $0x34c] ss:$16 sps:$4 sm:$0xff]   ;;  %v15310_v18 = vld [vmem:[#allocation11 + $0x148] ss:$16 sps:$4 sm:$0xff]  }
 0x24f   : > { %1753 = vmatprep.subr.bf16.mxu0 %v15264_v0  ;;  %1794 = vmatprep.subr.bf16.mxu1 %v15267_v38  ;;  %v15313_v0 = vld [vmem:[#allocation11 + $0x348] ss:$16 sps:$4 sm:$0xff]   ;;  %v15318_v38 = vld [vmem:[#allocation11 + $0x12c] ss:$16 sps:$4 sm:$0xff]  }
 0x252   : > { %1754 = vmatpush1.bf16.msra.mxu0 %v15262_v39  ;;  %1795 = vmatpush1.bf16.msra.mxu1 %v15265_v40  ;;  %v15321_v39 = vld [vmem:[#allocation11 + $0x32c] ss:$16 sps:$4 sm:$0xff]   ;;  %v15316_v40 = vld [vmem:[#allocation11 + $0x128] ss:$16 sps:$4 sm:$0xff]  }
 0x253   : > { %1755 = vmatprep.subr.bf16.mxu0 %v15270_v42  ;;  %1796 = vmatprep.subr.bf16.mxu1 %v15273_v43  ;;  %v15319_v42 = vld [vmem:[#allocation11 + $0x328] ss:$16 sps:$4 sm:$0xff]   ;;  %v778_v43 = vmul.f32 %v17796_v19, %v17627_v11 }
 0x256   : > { %1756 = vmatpush1.bf16.msra.mxu0 %v15268_v46  ;;  %1797 = vmatpush1.bf16.msra.mxu1 %v15271_v17  ;;  %v782_v46 = vmul.f32 %v17791_v34, %v17673_v26  ;;  %v780_v17 = vmul.f32 %v17796_v19, %v17654_v22  ;;  %v15330_v22 = vld [vmem:[#allocation13 + $0xe4] ss:$16 sps:$4 sm:$0xff]  }
 0x257   : > { %1757 = vmatprep.subr.bf16.mxu0 %v15276_v41  ;;  %1798 = vmatprep.subr.bf16.mxu1 %v15279_v21  ;;  %v784_v41 = vmul.f32 %v17791_v34, %v17679_v8  ;;  %v15324_v21 = vld [vmem:[#allocation11 + $0x10c] ss:$16 sps:$4 sm:$0xff]   ;;  %v15333_v8 = vld [vmem:[#allocation13 + $0x2e4] ss:$16 sps:$4 sm:$0xff]   ;;  %v15328_v34 = vld [vmem:[#allocation13 + $0xe0] ss:$16 sps:$4 sm:$0xff]  }
 0x258   : > { %v790_v11 = vmul.f32 %v782_v46, %v17764_v4  ;;  %v788_v26 = vmul.f32 %v780_v17, %v17767_v2  ;;  %v15369_v46 = vld [vmem:[#allocation13 + $0x224] ss:$16 sps:$4 sm:$0xff]   ;;  %v15367_v17 = vld [vmem:[#allocation13 + $0x220] ss:$16 sps:$4 sm:$0xff]  }
 0x25a   : > { %1758 = vmatpush1.bf16.msra.mxu0 %v15274_v32  ;;  %1799 = vmatpush1.bf16.msra.mxu1 %v15277_v44  ;;  %v15327_v32 = vld [vmem:[#allocation11 + $0x30c] ss:$16 sps:$4 sm:$0xff]   ;;  %v15322_v44 = vld [vmem:[#allocation11 + $0x108] ss:$16 sps:$4 sm:$0xff]  }
 0x25b   : > { %1759 = vmatprep.subr.bf16.mxu0 %v15282_v25  ;;  %1800 = vmatprep.subr.bf16.mxu1 %v15285_v55  ;;  %v15325_v25 = vld [vmem:[#allocation11 + $0x308] ss:$16 sps:$4 sm:$0xff]   ;;  %v786_v55 = vmul.f32 %v778_v43, %v17764_v4  ;;  %v15364_v43 = vld [vmem:[#allocation13 + $0x20] ss:$16 sps:$4 sm:$0xff]  }
 0x25d   : > { %v794_v19 = vadd.f32 %v786_v55, %v17776_v3  ;;  %v15376_v55 = vld [vmem:[#allocation13 + $0x1e0] ss:$16 sps:$4 sm:$0xff]  }
 0x25e   : > { %1760 = vmatpush2.bf16.msra.mxu0 %v15280_v56  ;;  %1801 = vmatpush2.bf16.msra.mxu1 %v15283_v58  ;;  %v792_v56 = vmul.f32 %v784_v41, %v17767_v2  ;;  %v798_v58 = vadd.f32 %v790_v11, %v17776_v3  ;;  %v15372_v41 = vld [vmem:[#allocation13 + $0x4] ss:$16 sps:$4 sm:$0xff]  }
 0x25f   : > { %1761 = vmatprep.subr.bf16.mxu0 %v15288_v59  ;;  %1802 = vmatprep.subr.bf16.mxu1 %v15291_v60  ;;  %v15331_v59 = vld [vmem:[#allocation13 + $0x2e0] ss:$16 sps:$4 sm:$0xff]   ;;  %v796_v60 = vadd.f32 %v788_v26, %v17779_v28  ;;  %v15381_v11 = vld [vmem:[#allocation13 + $0x3e4] ss:$16 sps:$4 sm:$0xff]  }
 0x260   : > { %v15379_v26 = vld [vmem:[#allocation13 + $0x3e0] ss:$16 sps:$4 sm:$0xff]  }
 0x262   : > { %1762 = vmatpush2.bf16.msra.mxu0 %v15286_v9  ;;  %1803 = vmatpush2.bf16.msra.mxu1 %v15289_v61  ;;  %v800_v9 = vadd.f32 %v792_v56, %v17779_v28  ;;  %v15336_v61 = vld [vmem:[#allocation13 + $0xc4] ss:$16 sps:$4 sm:$0xff]  }
 0x263   : > { %1763 = vmatprep.subr.bf16.mxu0 %v15294_v62  ;;  %1804 = vmatprep.subr.bf16.mxu1 %v15297_v63  ;;  %v15339_v62 = vld [vmem:[#allocation13 + $0x2c4] ss:$16 sps:$4 sm:$0xff]   ;;  %v17845_v63 = vpack.c.bf16 %v798_v58, %v794_v19  ;;  %v15388_v58 = vld [vmem:[#allocation13 + $0x1a0] ss:$16 sps:$4 sm:$0xff]  }
 0x264   : > { %v15384_v56 = vld [vmem:[#allocation13 + $0x1c4] ss:$16 sps:$4 sm:$0xff]  }
 0x265   : > { %v15390_v19 = vld [vmem:[#allocation13 + $0x1a4] ss:$16 sps:$4 sm:$0xff]  }
 0x266   : > { %1764 = vmatpush2.bf16.msra.mxu0 %v15292_v15  ;;  %1805 = vmatpush2.bf16.msra.mxu1 %v15295_v27  ;;  %v17849_v15 = vpack.c.bf16 %v800_v9, %v796_v60  ;;  %v15334_v27 = vld [vmem:[#allocation13 + $0xc0] ss:$16 sps:$4 sm:$0xff]   ;;  %v15396_v9 = vld [vmem:[#allocation13 + $0x184] ss:$16 sps:$4 sm:$0xff]  }
 0x267   : > { %1765 = vmatprep.subr.bf16.mxu0 %v15300_v20  ;;  %1806 = vmatprep.subr.bf16.mxu1 %v15303_v7  ;;  %v15337_v20 = vld [vmem:[#allocation13 + $0x2c0] ss:$16 sps:$4 sm:$0xff]   ;;  %v15342_v7 = vld [vmem:[#allocation13 + $0xa4] ss:$16 sps:$4 sm:$0xff]  }
 0x268   : > { %v15391_v60 = vld [vmem:[#allocation13 + $0x3a0] ss:$16 sps:$4 sm:$0xff]  }
 0x26a   : > { %1766 = vmatpush2.bf16.msra.mxu0 %v15298_v24  ;;  %1807 = vmatpush2.bf16.msra.mxu1 %v15301_v10  ;;  %v15345_v24 = vld [vmem:[#allocation13 + $0x2a4] ss:$16 sps:$4 sm:$0xff]   ;;  %v15340_v10 = vld [vmem:[#allocation13 + $0xa0] ss:$16 sps:$4 sm:$0xff]  }
 0x26b   : > { %1767 = vmatprep.subr.bf16.mxu0 %v15306_v12  ;;  %1808 = vmatprep.subr.bf16.mxu1 %v15309_v14  ;;  %v15351_v12 = vld [vmem:[#allocation13 + $0x284] ss:$16 sps:$4 sm:$0xff]   ;;  %v15346_v14 = vld [vmem:[#allocation13 + $0x80] ss:$16 sps:$4 sm:$0xff]  }
 0x26e   : > { %1768 = vmatpush2.bf16.msra.mxu0 %v15304_v35  ;;  %1809 = vmatpush2.bf16.msra.mxu1 %v15307_v36  ;;  %v15349_v35 = vld [vmem:[#allocation13 + $0x280] ss:$16 sps:$4 sm:$0xff]   ;;  %v15354_v36 = vld [vmem:[#allocation13 + $0x64] ss:$16 sps:$4 sm:$0xff]  }
 0x26f   : > { %1769 = vmatprep.subr.bf16.mxu0 %v15312_v37  ;;  %1810 = vmatprep.subr.bf16.mxu1 %v15315_v23  ;;  %v15352_v37 = vld [vmem:[#allocation13 + $0x60] ss:$16 sps:$4 sm:$0xff]   ;;  %v15357_v23 = vld [vmem:[#allocation13 + $0x264] ss:$16 sps:$4 sm:$0xff]  }
 0x272   : > { %1770 = vmatpush2.bf16.msra.mxu0 %v15310_v18  ;;  %1811 = vmatpush2.bf16.msra.mxu1 %v15313_v0  ;;  %v15355_v18 = vld [vmem:[#allocation13 + $0x260] ss:$16 sps:$4 sm:$0xff]   ;;  %v15360_v0 = vld [vmem:[#allocation13 + $0x44] ss:$16 sps:$4 sm:$0xff]  }
 0x273   : > { %1771 = vmatprep.subr.bf16.mxu0 %v15318_v38  ;;  %1812 = vmatprep.subr.bf16.mxu1 %v15321_v39  ;;  %v15358_v38 = vld [vmem:[#allocation13 + $0x40] ss:$16 sps:$4 sm:$0xff]   ;;  %v15363_v39 = vld [vmem:[#allocation13 + $0x244] ss:$16 sps:$4 sm:$0xff]  }
 0x276   : > { %1772 = vmatpush2.bf16.msra.mxu0 %v15316_v40  ;;  %1813 = vmatpush2.bf16.msra.mxu1 %v15319_v42  ;;  %v15361_v40 = vld [vmem:[#allocation13 + $0x240] ss:$16 sps:$4 sm:$0xff]   ;;  %v15366_v42 = vld [vmem:[#allocation13 + $0x24] ss:$16 sps:$4 sm:$0xff]  }
 0x277   : > { %1773 = vmatprep.subr.bf16.mxu0 %v15324_v21  ;;  %1814 = vmatprep.subr.bf16.mxu1 %v15327_v32  ;;  %v15370_v21 = vld [vmem:[#allocation13] ss:$16 sps:$4 sm:$0xff]   ;;  %v15375_v32 = vld [vmem:[#allocation13 + $0x204] ss:$16 sps:$4 sm:$0xff]  }
 0x27a   : > { %1774 = vmatpush2.bf16.msra.mxu0 %v15322_v44  ;;  %1815 = vmatpush2.bf16.msra.mxu1 %v15325_v25  ;;  %v15373_v44 = vld [vmem:[#allocation13 + $0x200] ss:$16 sps:$4 sm:$0xff]   ;;  %v15378_v25 = vld [vmem:[#allocation13 + $0x1e4] ss:$16 sps:$4 sm:$0xff]  }
 0x27b   : > { %2613 = vmatprep.subr.bf16.mxu0 %v15330_v22  ;;  %2656 = vmatprep.subr.bf16.mxu1 %v15333_v8  ;;  %v15382_v22 = vld [vmem:[#allocation13 + $0x1c0] ss:$16 sps:$4 sm:$0xff]   ;;  %v15387_v8 = vld [vmem:[#allocation13 + $0x3c4] ss:$16 sps:$4 sm:$0xff]  }
 0x27d   : > { %1776 = vmatmul.mubr.bf16.vlgmr.msra.gmra.mxu0 %v17805_v31  ;;  %1817 = vmatmul.mubr.bf16.vlgmr.msra.gmra.mxu1 %v17807_v1  ;;  %v15343_v31 = vld [vmem:[#allocation13 + $0x2a0] ss:$16 sps:$4 sm:$0xff]   ;;  %v15348_v1 = vld [vmem:[#allocation13 + $0x84] ss:$16 sps:$4 sm:$0xff]  }
 0x27e   : > { %2614 = vmatpush1.bf16.msra.mxu0 %v15328_v34  ;;  %2645 = vmatprep.mubr.bf16.mxu0 %v17845_v63  ;;  %v15385_v34 = vld [vmem:[#allocation13 + $0x3c0] ss:$16 sps:$4 sm:$0xff]  }
 0x27f   : > { %2657 = vmatpush1.bf16.msra.mxu1 %v15331_v59  ;;  %2688 = vmatprep.mubr.bf16.mxu1 %v17849_v15  ;;  %v15393_v59 = vld [vmem:[#allocation13 + $0x3a4] ss:$16 sps:$4 sm:$0xff]  }
 0x280   : > { %2615 = vmatprep.subr.bf16.mxu0 %v15336_v61  ;;  %2658 = vmatprep.subr.bf16.mxu1 %v15339_v62  ;;  %v15394_v61 = vld [vmem:[#allocation13 + $0x180] ss:$16 sps:$4 sm:$0xff]   ;;  %v15399_v62 = vld [vmem:[#allocation13 + $0x384] ss:$16 sps:$4 sm:$0xff]  }
 0x282   : > { %2616 = vmatpush1.bf16.msra.mxu0 %v15334_v27  ;;  %v15397_v27 = vld [vmem:[#allocation13 + $0x380] ss:$16 sps:$4 sm:$0xff]  }
 0x283   : > { %2659 = vmatpush1.bf16.msra.mxu1 %v15337_v20  ;;  %2617 = vmatprep.subr.bf16.mxu0 %v15342_v7  ;;  %v15402_v20 = vld [vmem:[#allocation13 + $0x164] ss:$16 sps:$4 sm:$0xff]   ;;  %v15400_v7 = vld [vmem:[#allocation13 + $0x160] ss:$16 sps:$4 sm:$0xff]  }
 0x284   : > { %2660 = vmatprep.subr.bf16.mxu1 %v15345_v24  ;;  %v15405_v24 = vld [vmem:[#allocation13 + $0x364] ss:$16 sps:$4 sm:$0xff]  }
 0x286   : > { %2618 = vmatpush1.bf16.msra.mxu0 %v15340_v10  ;;  %v15403_v10 = vld [vmem:[#allocation13 + $0x360] ss:$16 sps:$4 sm:$0xff]  }
 0x287   : > { %2661 = vmatpush1.bf16.msra.mxu1 %v15343_v31  ;;  %2619 = vmatprep.subr.bf16.mxu0 %v15348_v1  ;;  %v15408_v31 = vld [vmem:[#allocation13 + $0x144] ss:$16 sps:$4 sm:$0xff]   ;;  %v15406_v1 = vld [vmem:[#allocation13 + $0x140] ss:$16 sps:$4 sm:$0xff]  }
 0x288   : > { %2662 = vmatprep.subr.bf16.mxu1 %v15351_v12  ;;  %v15411_v12 = vld [vmem:[#allocation13 + $0x344] ss:$16 sps:$4 sm:$0xff]  }
 0x28a   : > { %2620 = vmatpush1.bf16.msra.mxu0 %v15346_v14  ;;  %v15409_v14 = vld [vmem:[#allocation13 + $0x340] ss:$16 sps:$4 sm:$0xff]  }
 0x28b   : > { %2663 = vmatpush1.bf16.msra.mxu1 %v15349_v35  ;;  %2621 = vmatprep.subr.bf16.mxu0 %v15354_v36  ;;  %v15414_v35 = vld [vmem:[#allocation13 + $0x124] ss:$16 sps:$4 sm:$0xff]   ;;  %v15412_v36 = vld [vmem:[#allocation13 + $0x120] ss:$16 sps:$4 sm:$0xff]  }
 0x28c   : > { %2664 = vmatprep.subr.bf16.mxu1 %v15357_v23  ;;  %v15415_v23 = vld [vmem:[#allocation13 + $0x320] ss:$16 sps:$4 sm:$0xff]  }
 0x28e   : > { %2622 = vmatpush1.bf16.msra.mxu0 %v15352_v37  ;;  %v15417_v37 = vld [vmem:[#allocation13 + $0x324] ss:$16 sps:$4 sm:$0xff]  }
 0x28f   : > { %2665 = vmatpush1.bf16.msra.mxu1 %v15355_v18  ;;  %2623 = vmatprep.subr.bf16.mxu0 %v15360_v0  ;;  %v15420_v18 = vld [vmem:[#allocation13 + $0x104] ss:$16 sps:$4 sm:$0xff]   ;;  %v15418_v0 = vld [vmem:[#allocation13 + $0x100] ss:$16 sps:$4 sm:$0xff]  }
 0x290   : > { %2666 = vmatprep.subr.bf16.mxu1 %v15363_v39  ;;  %v15421_v39 = vld [vmem:[#allocation13 + $0x300] ss:$16 sps:$4 sm:$0xff]  }
 0x292   : > { %2624 = vmatpush1.bf16.msra.mxu0 %v15358_v38  ;;  %v15423_v38 = vld [vmem:[#allocation13 + $0x304] ss:$16 sps:$4 sm:$0xff]  }
 0x293   : > { %2667 = vmatpush1.bf16.msra.mxu1 %v15361_v40  ;;  %2625 = vmatprep.subr.bf16.mxu0 %v15366_v42  ;;  %v15426_v40 = vld [vmem:[#allocation13 + $0xec] ss:$16 sps:$4 sm:$0xff]   ;;  %v15424_v42 = vld [vmem:[#allocation13 + $0xe8] ss:$16 sps:$4 sm:$0xff]  }
 0x294   : > { %2668 = vmatprep.subr.bf16.mxu1 %v15369_v46  ;;  %v15427_v46 = vld [vmem:[#allocation13 + $0x2e8] ss:$16 sps:$4 sm:$0xff]  }
 0x296   : > { %2626 = vmatpush1.bf16.msra.mxu0 %v15364_v43  ;;  %v15429_v43 = vld [vmem:[#allocation13 + $0x2ec] ss:$16 sps:$4 sm:$0xff]  }
 0x297   : > { %2669 = vmatpush1.bf16.msra.mxu1 %v15367_v17  ;;  %2627 = vmatprep.subr.bf16.mxu0 %v15372_v41  ;;  %v15432_v17 = vld [vmem:[#allocation13 + $0xcc] ss:$16 sps:$4 sm:$0xff]  }
 0x298   : > { %2670 = vmatprep.subr.bf16.mxu1 %v15375_v32  ;;  %v15435_v41 = vld [vmem:[#allocation13 + $0x2cc] ss:$16 sps:$4 sm:$0xff]  }
 0x29a   : > { %2628 = vmatpush1.bf16.msra.mxu0 %v15370_v21  ;;  %v15430_v21 = vld [vmem:[#allocation13 + $0xc8] ss:$16 sps:$4 sm:$0xff]  }
 0x29b   : > { %2671 = vmatpush1.bf16.msra.mxu1 %v15373_v44  ;;  %2629 = vmatprep.subr.bf16.mxu0 %v15378_v25 }
 0x29c   : > { %2672 = vmatprep.subr.bf16.mxu1 %v15381_v11  ;;  %v15438_v11 = vld [vmem:[#allocation13 + $0xac] ss:$16 sps:$4 sm:$0xff]  }
 0x29e   : > { %2630 = vmatpush2.bf16.msra.mxu0 %v15376_v55  ;;  %v15433_v55 = vld [vmem:[#allocation13 + $0x2c8] ss:$16 sps:$4 sm:$0xff]  }
 0x29f   : > { %2673 = vmatpush2.bf16.msra.mxu1 %v15379_v26  ;;  %2631 = vmatprep.subr.bf16.mxu0 %v15384_v56  ;;  %v15436_v56 = vld [vmem:[#allocation13 + $0xa8] ss:$16 sps:$4 sm:$0xff]  }
 0x2a0   : > { %2674 = vmatprep.subr.bf16.mxu1 %v15387_v8 }
 0x2a2   : > { %2632 = vmatpush2.bf16.msra.mxu0 %v15382_v22  ;;  %v15441_v22 = vld [vmem:[#allocation13 + $0x2ac] ss:$16 sps:$4 sm:$0xff]  }
 0x2a3   : > { %2675 = vmatpush2.bf16.msra.mxu1 %v15385_v34  ;;  %2633 = vmatprep.subr.bf16.mxu0 %v15390_v19  ;;  %v15439_v19 = vld [vmem:[#allocation13 + $0x2a8] ss:$16 sps:$4 sm:$0xff]  }
 0x2a4   : > { %2676 = vmatprep.subr.bf16.mxu1 %v15393_v59  ;;  %v15442_v59 = vld [vmem:[#allocation13 + $0x88] ss:$16 sps:$4 sm:$0xff]  }
 0x2a6   : > { %2634 = vmatpush2.bf16.msra.mxu0 %v15388_v58  ;;  %v15447_v58 = vld [vmem:[#allocation13 + $0x28c] ss:$16 sps:$4 sm:$0xff]  }
 0x2a7   : > { %2677 = vmatpush2.bf16.msra.mxu1 %v15391_v60  ;;  %2635 = vmatprep.subr.bf16.mxu0 %v15396_v9  ;;  %v15450_v60 = vld [vmem:[#allocation13 + $0x6c] ss:$16 sps:$4 sm:$0xff]  }
 0x2a8   : > { %2678 = vmatprep.subr.bf16.mxu1 %v15399_v62  ;;  %v15453_v9 = vld [vmem:[#allocation13 + $0x26c] ss:$16 sps:$4 sm:$0xff]   ;;  %v15451_v62 = vld [vmem:[#allocation13 + $0x268] ss:$16 sps:$4 sm:$0xff]  }
 0x2aa   : > { %2636 = vmatpush2.bf16.msra.mxu0 %v15394_v61  ;;  %v15448_v61 = vld [vmem:[#allocation13 + $0x68] ss:$16 sps:$4 sm:$0xff]  }
 0x2ab   : > { %2679 = vmatpush2.bf16.msra.mxu1 %v15397_v27  ;;  %2637 = vmatprep.subr.bf16.mxu0 %v15402_v20  ;;  %v15456_v27 = vld [vmem:[#allocation13 + $0x4c] ss:$16 sps:$4 sm:$0xff]  }
 0x2ac   : > { %2680 = vmatprep.subr.bf16.mxu1 %v15405_v24  ;;  %v15459_v20 = vld [vmem:[#allocation13 + $0x24c] ss:$16 sps:$4 sm:$0xff]   ;;  %v15457_v24 = vld [vmem:[#allocation13 + $0x248] ss:$16 sps:$4 sm:$0xff]  }
 0x2ae   : > { %2638 = vmatpush2.bf16.msra.mxu0 %v15400_v7  ;;  %v15454_v7 = vld [vmem:[#allocation13 + $0x48] ss:$16 sps:$4 sm:$0xff]  }
 0x2af   : > { %2681 = vmatpush2.bf16.msra.mxu1 %v15403_v10  ;;  %2639 = vmatprep.subr.bf16.mxu0 %v15408_v31  ;;  %v15462_v10 = vld [vmem:[#allocation13 + $0x2c] ss:$16 sps:$4 sm:$0xff]  }
 0x2b0   : > { %2682 = vmatprep.subr.bf16.mxu1 %v15411_v12 }
 0x2b2   : > { %2640 = vmatpush2.bf16.msra.mxu0 %v15406_v1  ;;  %v15465_v1 = vld [vmem:[#allocation13 + $0x22c] ss:$16 sps:$4 sm:$0xff]  }
 0x2b3   : > { %2683 = vmatpush2.bf16.msra.mxu1 %v15409_v14  ;;  %2641 = vmatprep.subr.bf16.mxu0 %v15414_v35 }
 0x2b4   : > { %2684 = vmatprep.subr.bf16.mxu1 %v15417_v37 }
 0x2b6   : > { %2642 = vmatpush2.bf16.msra.mxu0 %v15412_v36  ;;  %v15460_v36 = vld [vmem:[#allocation13 + $0x28] ss:$16 sps:$4 sm:$0xff]  }
 0x2b7   : > { %2685 = vmatpush2.bf16.msra.mxu1 %v15415_v23  ;;  %2643 = vmatprep.subr.bf16.mxu0 %v15420_v18  ;;  %v15463_v18 = vld [vmem:[#allocation13 + $0x228] ss:$16 sps:$4 sm:$0xff]  }
 0x2b8   : > { %2686 = vmatprep.subr.bf16.mxu1 %v15423_v38 }
 0x2ba   : > { %2644 = vmatpush2.bf16.msra.mxu0 %v15418_v0  ;;  %v15468_v0 = vld [vmem:[#allocation13 + $0xc] ss:$16 sps:$4 sm:$0xff]  }
 0x2bb   : > { %2687 = vmatpush2.bf16.msra.mxu1 %v15421_v39  ;;  %2699 = vmatprep.subr.bf16.mxu0 %v15426_v40  ;;  %v15471_v39 = vld [vmem:[#allocation13 + $0x20c] ss:$16 sps:$4 sm:$0xff]  }
 0x2bc   : > { %2742 = vmatprep.subr.bf16.mxu1 %v15429_v43 }
 0x2bd   : > { %2646 = vmatmul.mubr.bf16.vlgmr.msra.gmra.mxu0 %v17825_v30 }
 0x2be   : > { %2689 = vmatmul.mubr.bf16.vlgmr.msra.gmra.mxu1 %v17827_v13  ;;  %2700 = vmatpush1.bf16.msra.mxu0 %v15424_v42  ;;  %v842_v32 = vpop.xlane.xlu1 %841 }
 0x2bf   : > { %2731 = vmatprep.mubr.bf16.mxu0 %v17845_v63  ;;  %2743 = vmatpush1.bf16.msra.mxu1 %v15427_v46  ;;  %v844_v44 = vmul.f32 0.001953125, %v842_v32  ;;  %v837_v25 = vpop.xlane.xlu0 %836  ;;  %v15444_v63 = vld [vmem:[#allocation13 + $0x8c] ss:$16 sps:$4 sm:$0xff]   ;;  %v15469_v46 = vld [vmem:[#allocation13 + $0x208] ss:$16 sps:$4 sm:$0xff]  }
 0x2c0   : > { %2774 = vmatprep.mubr.bf16.mxu1 %v17849_v15  ;;  %v843_v26 = vmul.f32 0.001953125, %v837_v25  ;;  %2701 = vmatprep.subr.bf16.mxu0 %v15432_v17  ;;  %v15445_v15 = vld [vmem:[#allocation13 + $0x288] ss:$16 sps:$4 sm:$0xff]   ;;  %v15474_v17 = vld [vmem:[#allocation13 + $0x1ec] ss:$16 sps:$4 sm:$0xff]  }
 0x2c1   : > { %v846_v8 = vadd.f32 1e-05, %v844_v44  ;;  %2744 = vmatprep.subr.bf16.mxu1 %v15435_v41  ;;  %v15475_v44 = vld [vmem:[#allocation13 + $0x3e8] ss:$16 sps:$4 sm:$0xff]   ;;  %v15483_v25 = vld [vmem:[#allocation13 + $0x3cc] ss:$16 sps:$4 sm:$0xff]  }
 0x2c2   : > { %v845_v34 = vadd.f32 1e-05, %v843_v26  ;;  %2702 = vmatpush1.bf16.msra.mxu0 %v15430_v21  ;;  %v15489_v26 = vld [vmem:[#allocation13 + $0x3ac] ss:$16 sps:$4 sm:$0xff]  }
 0x2c3   : > { %16678 = vrsqrt.f32 %v846_v8  ;;  %2745 = vmatpush1.bf16.msra.mxu1 %v15433_v55  ;;  %2703 = vmatprep.subr.bf16.mxu0 %v15438_v11  ;;  %v15478_v55 = vld [vmem:[#allocation13 + $0x1c8] ss:$16 sps:$4 sm:$0xff]   ;;  %v15492_v8 = vld [vmem:[#allocation13 + $0x18c] ss:$16 sps:$4 sm:$0xff]  }
 0x2c4   : > { %16680 = vrsqrt.f32 %v845_v34  ;;  %2746 = vmatprep.subr.bf16.mxu1 %v15441_v22  ;;  %v15481_v11 = vld [vmem:[#allocation13 + $0x3c8] ss:$16 sps:$4 sm:$0xff]   ;;  %v15495_v34 = vld [vmem:[#allocation13 + $0x38c] ss:$16 sps:$4 sm:$0xff]  }
 0x2c5   : > { %v15487_v22 = vld [vmem:[#allocation13 + $0x3a8] ss:$16 sps:$4 sm:$0xff]  }
 0x2c6   : > { %2704 = vmatpush1.bf16.msra.mxu0 %v15436_v56  ;;  %v15484_v56 = vld [vmem:[#allocation13 + $0x1a8] ss:$16 sps:$4 sm:$0xff]  }
 0x2c7   : > { %2747 = vmatpush1.bf16.msra.mxu1 %v15439_v19  ;;  %2705 = vmatprep.subr.bf16.mxu0 %v15444_v63  ;;  %v15490_v19 = vld [vmem:[#allocation13 + $0x188] ss:$16 sps:$4 sm:$0xff]  }
 0x2c8   : > { %2748 = vmatprep.subr.bf16.mxu1 %v15447_v58  ;;  %v15493_v63 = vld [vmem:[#allocation13 + $0x388] ss:$16 sps:$4 sm:$0xff]   ;;  %v15498_v58 = vld [vmem:[#allocation13 + $0x16c] ss:$16 sps:$4 sm:$0xff]  }
 0x2ca   : > { %2706 = vmatpush1.bf16.msra.mxu0 %v15442_v59  ;;  %v15501_v59 = vld [vmem:[#allocation13 + $0x36c] ss:$16 sps:$4 sm:$0xff]  }
 0x2cb   : > { %2749 = vmatpush1.bf16.msra.mxu1 %v15445_v15  ;;  %2707 = vmatprep.subr.bf16.mxu0 %v15450_v60  ;;  %v15496_v15 = vld [vmem:[#allocation13 + $0x168] ss:$16 sps:$4 sm:$0xff]  }
 0x2cc   : > { %2750 = vmatprep.subr.bf16.mxu1 %v15453_v9  ;;  %v15499_v60 = vld [vmem:[#allocation13 + $0x368] ss:$16 sps:$4 sm:$0xff]   ;;  %v15504_v9 = vld [vmem:[#allocation13 + $0x14c] ss:$16 sps:$4 sm:$0xff]  }
 0x2ce   : > { %2708 = vmatpush1.bf16.msra.mxu0 %v15448_v61  ;;  %v15507_v61 = vld [vmem:[#allocation13 + $0x34c] ss:$16 sps:$4 sm:$0xff]  }
 0x2cf   : > { %2751 = vmatpush1.bf16.msra.mxu1 %v15451_v62  ;;  %2709 = vmatprep.subr.bf16.mxu0 %v15456_v27  ;;  %v15502_v62 = vld [vmem:[#allocation13 + $0x148] ss:$16 sps:$4 sm:$0xff]  }
 0x2d0   : > { %v17857_v31 = vpop.eup %16678  ;;  %2752 = vmatprep.subr.bf16.mxu1 %v15459_v20  ;;  %v15505_v27 = vld [vmem:[#allocation13 + $0x348] ss:$16 sps:$4 sm:$0xff]   ;;  %v15510_v20 = vld [vmem:[#allocation13 + $0x12c] ss:$16 sps:$4 sm:$0xff]  }
 0x2d1   : > { %v17859_v12 = vpop.eup %16680  ;;  %v853_v14 = vmul.f32 %v17857_v31, %v17718_v47  ;;  %v855_v35 = vmul.f32 %v17857_v31, %v17724_v49 }
 0x2d2   : > { %2710 = vmatpush1.bf16.msra.mxu0 %v15454_v7  ;;  %v849_v37 = vmul.f32 %v17859_v12, %v17730_v51  ;;  %v851_v23 = vmul.f32 %v17859_v12, %v17736_v53  ;;  %v15466_v51 = vld [vmem:[#allocation13 + $0x8] ss:$16 sps:$4 sm:$0xff]   ;;  %v15513_v7 = vld [vmem:[#allocation13 + $0x32c] ss:$16 sps:$4 sm:$0xff]  }
 0x2d3   : > { %2753 = vmatpush1.bf16.msra.mxu1 %v15457_v24  ;;  %2711 = vmatprep.subr.bf16.mxu0 %v15462_v10  ;;  %v861_v38 = vmul.f32 %v853_v14, %v17770_v5  ;;  %v863_v42 = vmul.f32 %v855_v35, %v17773_v6  ;;  %v850_v24 = vmul.f32 %v17859_v12, %v17733_v52 }
 0x2d4   : > { %2754 = vmatprep.subr.bf16.mxu1 %v15465_v1  ;;  %v857_v47 = vmul.f32 %v849_v37, %v17770_v5  ;;  %v859_v49 = vmul.f32 %v851_v23, %v17773_v6  ;;  %v15477_v5 = vld [vmem:[#allocation13 + $0x3ec] ss:$16 sps:$4 sm:$0xff]   ;;  %v15472_v6 = vld [vmem:[#allocation13 + $0x1e8] ss:$16 sps:$4 sm:$0xff]   ;;  %v854_v10 = vmul.f32 %v17857_v31, %v17721_v48  ;;  %v852_v14 = vmul.f32 %v17859_v12, %v17739_v16 }
 0x2d5   : > { %v869_v40 = vadd.f32 %v861_v38, %v17782_v29  ;;  %v871_v41 = vadd.f32 %v863_v42, %v17789_v33  ;;  %v15508_v1 = vld [vmem:[#allocation13 + $0x128] ss:$16 sps:$4 sm:$0xff]   ;;  %v856_v35 = vmul.f32 %v17857_v31, %v17727_v50  ;;  %v15516_v37 = vld [vmem:[#allocation13 + $0x10c] ss:$16 sps:$4 sm:$0xff]   ;;  %v15522_v31 = vld [vmem:[#allocation14 + $0xe4] ss:$16 sps:$4 sm:$0xff]  }
 0x2d6   : > { %2712 = vmatpush1.bf16.msra.mxu0 %v15460_v36  ;;  %v865_v53 = vadd.f32 %v857_v47, %v17782_v29  ;;  %v867_v43 = vadd.f32 %v859_v49, %v17789_v33  ;;  %v15480_v29 = vld [vmem:[#allocation13 + $0x1cc] ss:$16 sps:$4 sm:$0xff]   ;;  %v15511_v36 = vld [vmem:[#allocation13 + $0x328] ss:$16 sps:$4 sm:$0xff]   ;;  %v862_v52 = vmul.f32 %v854_v10, %v17764_v4  ;;  %v860_v16 = vmul.f32 %v852_v14, %v17767_v2  ;;  %v15525_v38 = vld [vmem:[#allocation14 + $0x2e4] ss:$16 sps:$4 sm:$0xff]  }
 0x2d7   : > { %2755 = vmatpush1.bf16.msra.mxu1 %v15463_v18  ;;  %2713 = vmatprep.subr.bf16.mxu0 %v15468_v0  ;;  %v15486_v33 = vld [vmem:[#allocation13 + $0x1ac] ss:$16 sps:$4 sm:$0xff]   ;;  %v858_v18 = vmul.f32 %v850_v24, %v17764_v4  ;;  %v15514_v48 = vld [vmem:[#allocation13 + $0x108] ss:$16 sps:$4 sm:$0xff]   ;;  %v17892_v0 = vsub.s32 4, %v17715_v45  ;;  %v864_v12 = vmul.f32 %v856_v35, %v17767_v2  ;;  %v17898_v49 = vld [vmem:[#allocation8] sm:$0xff] }
 0x2d8   : > { %2756 = vmatprep.subr.bf16.mxu1 %v15471_v39  ;;  %v17877_v21 = vpack.c.bf16 %v869_v40, %v865_v53  ;;  %v17879_v32 = vpack.c.bf16 %v871_v41, %v867_v43  ;;  %v15519_v23 = vld [vmem:[#allocation13 + $0x30c] ss:$16 sps:$4 sm:$0xff]   ;;  %v15517_v50 = vld [vmem:[#allocation13 + $0x308] ss:$16 sps:$4 sm:$0xff]   ;;  %v870_v47 = vadd.f32 %v862_v52, %v17776_v3  ;;  %v15520_v4 = vld [vmem:[#allocation14 + $0xe0] ss:$16 sps:$4 sm:$0xff]   ;;  %v868_v42 = vadd.f32 %v860_v16, %v17779_v28 }
 0x2d9   : > { %v866_v39 = vadd.f32 %v858_v18, %v17776_v3  ;;  %v1008_v40 = vrot.slane %v17898_v49, %v17892_v0  ;;  %v872_v2 = vadd.f32 %v864_v12, %v17779_v28  ;;  %v17904_v53 = vld [vmem:[#allocation8 + $0x8] sm:$0xff]  ;;  %v15528_v43 = vld [vmem:[#allocation14 + $0xc4] ss:$16 sps:$4 sm:$0xff]   ;;  %v15550_v24 = vld [vmem:[#allocation14 + $0x40] ss:$16 sps:$4 sm:$0xff]  }
 0x2da   : > { %2714 = vmatpush1.bf16.msra.mxu0 %v15466_v51  ;;  %v15523_v51 = vld [vmem:[#allocation14 + $0x2e0] ss:$16 sps:$4 sm:$0xff]   ;;  %v1012_v3 = vrot.slane %v17904_v53, %v17892_v0  ;;  %v15561_v14 = vld [vmem:[#allocation14 + $0x224] ss:$16 sps:$4 sm:$0xff]  }
 0x2db   : > { %2757 = vmatpush1.bf16.msra.mxu1 %v15469_v46  ;;  %2715 = vmatprep.subr.bf16.mxu0 %v15474_v17  ;;  %v17909_v41 = vpack.c.bf16 %v870_v47, %v866_v39  ;;  %v15553_v10 = vld [vmem:[#allocation14 + $0x240] ss:$16 sps:$4 sm:$0xff]   ;;  %v15573_v16 = vld [vmem:[#allocation14 + $0x3e4] ss:$16 sps:$4 sm:$0xff]  }
 0x2dc   : > { %2758 = vmatprep.subr.bf16.mxu1 %v15477_v5  ;;  %v15531_v5 = vld [vmem:[#allocation14 + $0x2c4] ss:$16 sps:$4 sm:$0xff]   ;;  %v15556_v35 = vld [vmem:[#allocation14 + $0x20] ss:$16 sps:$4 sm:$0xff]  }
 0x2dd   : > { %v15562_v18 = vld [vmem:[#allocation14] ss:$16 sps:$4 sm:$0xff]  }
 0x2de   : > { %2716 = vmatpush2.bf16.msra.mxu0 %v15472_v6  ;;  %v17912_v6 = vpack.c.bf16 %v872_v2, %v868_v42  ;;  %v15565_v52 = vld [vmem:[#allocation14 + $0x200] ss:$16 sps:$4 sm:$0xff]  }
 0x2df   : > { %2759 = vmatpush2.bf16.msra.mxu1 %v15475_v44  ;;  %2717 = vmatprep.subr.bf16.mxu0 %v15480_v29  ;;  %v15526_v44 = vld [vmem:[#allocation14 + $0xc0] ss:$16 sps:$4 sm:$0xff]  }
 0x2e0   : > { %2760 = vmatprep.subr.bf16.mxu1 %v15483_v25  ;;  %v15568_v12 = vld [vmem:[#allocation14 + $0x1e0] ss:$16 sps:$4 sm:$0xff]  }
 0x2e1   : > { %v15574_v39 = vld [vmem:[#allocation14 + $0x1c0] ss:$16 sps:$4 sm:$0xff]  }
 0x2e2   : > { %2718 = vmatpush2.bf16.msra.mxu0 %v15478_v55  ;;  %v15529_v55 = vld [vmem:[#allocation14 + $0x2c0] ss:$16 sps:$4 sm:$0xff]  }
 0x2e3   : > { %2761 = vmatpush2.bf16.msra.mxu1 %v15481_v11  ;;  %2719 = vmatprep.subr.bf16.mxu0 %v15486_v33  ;;  %v15534_v11 = vld [vmem:[#allocation14 + $0xa4] ss:$16 sps:$4 sm:$0xff]   ;;  %v15577_v47 = vld [vmem:[#allocation14 + $0x3c0] ss:$16 sps:$4 sm:$0xff]  }
 0x2e4   : > { %2762 = vmatprep.subr.bf16.mxu1 %v15489_v26  ;;  %v15537_v26 = vld [vmem:[#allocation14 + $0x2a4] ss:$16 sps:$4 sm:$0xff]   ;;  %v15580_v42 = vld [vmem:[#allocation14 + $0x1a0] ss:$16 sps:$4 sm:$0xff]  }
 0x2e5   : > { %v15583_v2 = vld [vmem:[#allocation14 + $0x3a0] ss:$16 sps:$4 sm:$0xff]  }
 0x2e6   : > { %2720 = vmatpush2.bf16.msra.mxu0 %v15484_v56 }
 0x2e7   : > { %2763 = vmatpush2.bf16.msra.mxu1 %v15487_v22  ;;  %2721 = vmatprep.subr.bf16.mxu0 %v15492_v8  ;;  %v15532_v8 = vld [vmem:[#allocation14 + $0xa0] ss:$16 sps:$4 sm:$0xff]  }
 0x2e8   : > { %2764 = vmatprep.subr.bf16.mxu1 %v15495_v34 }
 0x2ea   : > { %2722 = vmatpush2.bf16.msra.mxu0 %v15490_v19 }
 0x2eb   : > { %2765 = vmatpush2.bf16.msra.mxu1 %v15493_v63  ;;  %2723 = vmatprep.subr.bf16.mxu0 %v15498_v58  ;;  %v15535_v63 = vld [vmem:[#allocation14 + $0x2a0] ss:$16 sps:$4 sm:$0xff]   ;;  %v15540_v58 = vld [vmem:[#allocation14 + $0x84] ss:$16 sps:$4 sm:$0xff]  }
 0x2ec   : > { %2766 = vmatprep.subr.bf16.mxu1 %v15501_v59  ;;  %v15543_v59 = vld [vmem:[#allocation14 + $0x284] ss:$16 sps:$4 sm:$0xff]  }
 0x2ee   : > { %2724 = vmatpush2.bf16.msra.mxu0 %v15496_v15  ;;  %v15538_v15 = vld [vmem:[#allocation14 + $0x80] ss:$16 sps:$4 sm:$0xff]  }
 0x2ef   : > { %2767 = vmatpush2.bf16.msra.mxu1 %v15499_v60  ;;  %2725 = vmatprep.subr.bf16.mxu0 %v15504_v9  ;;  %v15541_v60 = vld [vmem:[#allocation14 + $0x280] ss:$16 sps:$4 sm:$0xff]   ;;  %v15546_v9 = vld [vmem:[#allocation14 + $0x64] ss:$16 sps:$4 sm:$0xff]  }
 0x2f0   : > { %2768 = vmatprep.subr.bf16.mxu1 %v15507_v61  ;;  %v15549_v61 = vld [vmem:[#allocation14 + $0x264] ss:$16 sps:$4 sm:$0xff]  }
 0x2f2   : > { %2726 = vmatpush2.bf16.msra.mxu0 %v15502_v62  ;;  %v15544_v62 = vld [vmem:[#allocation14 + $0x60] ss:$16 sps:$4 sm:$0xff]  }
 0x2f3   : > { %2769 = vmatpush2.bf16.msra.mxu1 %v15505_v27  ;;  %2727 = vmatprep.subr.bf16.mxu0 %v15510_v20  ;;  %v15547_v27 = vld [vmem:[#allocation14 + $0x260] ss:$16 sps:$4 sm:$0xff]   ;;  %v15552_v20 = vld [vmem:[#allocation14 + $0x44] ss:$16 sps:$4 sm:$0xff]  }
 0x2f4   : > { %2770 = vmatprep.subr.bf16.mxu1 %v15513_v7  ;;  %v15555_v7 = vld [vmem:[#allocation14 + $0x244] ss:$16 sps:$4 sm:$0xff]  }
 0x2f6   : > { %2728 = vmatpush2.bf16.msra.mxu0 %v15508_v1  ;;  %v15558_v1 = vld [vmem:[#allocation14 + $0x24] ss:$16 sps:$4 sm:$0xff]  }
 0x2f7   : > { %2771 = vmatpush2.bf16.msra.mxu1 %v15511_v36  ;;  %2729 = vmatprep.subr.bf16.mxu0 %v15516_v37  ;;  %v15559_v36 = vld [vmem:[#allocation14 + $0x220] ss:$16 sps:$4 sm:$0xff]   ;;  %v15564_v37 = vld [vmem:[#allocation14 + $0x4] ss:$16 sps:$4 sm:$0xff]  }
 0x2f8   : > { %2772 = vmatprep.subr.bf16.mxu1 %v15519_v23  ;;  %v15567_v23 = vld [vmem:[#allocation14 + $0x204] ss:$16 sps:$4 sm:$0xff]  }
 0x2fa   : > { %2730 = vmatpush2.bf16.msra.mxu0 %v15514_v48  ;;  %v15570_v48 = vld [vmem:[#allocation14 + $0x1e4] ss:$16 sps:$4 sm:$0xff]  }
 0x2fb   : > { %2773 = vmatpush2.bf16.msra.mxu1 %v15517_v50  ;;  %3569 = vmatprep.subr.bf16.mxu0 %v15522_v31  ;;  %v15571_v50 = vld [vmem:[#allocation14 + $0x3e0] ss:$16 sps:$4 sm:$0xff]   ;;  %v15576_v31 = vld [vmem:[#allocation14 + $0x1c4] ss:$16 sps:$4 sm:$0xff]  }
 0x2fc   : > { %3612 = vmatprep.subr.bf16.mxu1 %v15525_v38  ;;  %v15579_v38 = vld [vmem:[#allocation14 + $0x3c4] ss:$16 sps:$4 sm:$0xff]  }
 0x2fd   : > { %2732 = vmatmul.mubr.bf16.vlgmr.msra.gmra.mxu0 %v17825_v30  ;;  %v1695_v46 = vpop.f32.mrf.mxu0  ;;  %v1736_v17 = vpop.f32.mrf.mxu1 }
 0x2fe   : > { %2775 = vmatmul.mubr.bf16.vlgmr.msra.gmra.mxu1 %v17827_v13  ;;  %v1696_v28 = vadd.f32 %v1695_v46, %v1008_v40  ;;  %3570 = vmatpush1.bf16.msra.mxu0 %v15520_v4  ;;  %v15582_v4 = vld [vmem:[#allocation14 + $0x1a4] ss:$16 sps:$4 sm:$0xff]   ;;  %v15589_v46 = vld [vmem:[#allocation14 + $0x380] ss:$16 sps:$4 sm:$0xff]  }
 0x2ff   : > { %3601 = vmatprep.mubr.bf16.mxu0 %v17909_v41  ;;  %3613 = vmatpush1.bf16.msra.mxu1 %v15523_v51  ;;  %v1697_v29 = vpop.f32.mrf.mxu0  ;;  %v1738_v25 = vpop.f32.mrf.mxu1  ;;  %v15585_v40 = vld [vmem:[#allocation14 + $0x3a4] ss:$16 sps:$4 sm:$0xff]  }
 0x300   : > { %v17915_v30 = vadd.f32 %v1736_v17, %v1696_v28  ;;  %3644 = vmatprep.mubr.bf16.mxu1 %v17912_v6  ;;  %v1698_v33 = vadd.f32 %v1697_v29, %v1012_v3  ;;  %3571 = vmatprep.subr.bf16.mxu0 %v15528_v43  ;;  %v15588_v51 = vld [vmem:[#allocation14 + $0x184] ss:$16 sps:$4 sm:$0xff]   ;;  %v15586_v43 = vld [vmem:[#allocation14 + $0x180] ss:$16 sps:$4 sm:$0xff]  }
 0x301   : > { %3614 = vmatprep.subr.bf16.mxu1 %v15531_v5  ;;  %v1699_v13 = vpop.f32.mrf.mxu0  ;;  %v1740_v56 = vpop.f32.mrf.mxu1  ;;  %v15591_v3 = vld [vmem:[#allocation14 + $0x384] ss:$16 sps:$4 sm:$0xff]   ;;  %v15592_v28 = vld [vmem:[#allocation14 + $0x160] ss:$16 sps:$4 sm:$0xff]  }
 0x302   : > { %v17918_v22 = vadd.f32 %v1738_v25, %v1698_v33  ;;  %3572 = vmatpush1.bf16.msra.mxu0 %v15526_v44  ;;  %v15594_v17 = vld [vmem:[#allocation14 + $0x164] ss:$16 sps:$4 sm:$0xff]   ;;  %v15595_v44 = vld [vmem:[#allocation14 + $0x360] ss:$16 sps:$4 sm:$0xff]  }
 0x303   : > { %3615 = vmatpush1.bf16.msra.mxu1 %v15529_v55  ;;  %v1700_v34 = vpop.f32.mrf.mxu0  ;;  %v1741_v19 = vpop.f32.mrf.mxu1  ;;  %3573 = vmatprep.subr.bf16.mxu0 %v15534_v11  ;;  %v15597_v5 = vld [vmem:[#allocation14 + $0x364] ss:$16 sps:$4 sm:$0xff]   ;;  %v15598_v55 = vld [vmem:[#allocation14 + $0x140] ss:$16 sps:$4 sm:$0xff]  }
 0x304   : > { %3616 = vmatprep.subr.bf16.mxu1 %v15537_v26  ;;  %v15600_v29 = vld [vmem:[#allocation14 + $0x144] ss:$16 sps:$4 sm:$0xff]   ;;  %v15601_v11 = vld [vmem:[#allocation14 + $0x340] ss:$16 sps:$4 sm:$0xff]  }
 0x305   : > { %v15603_v25 = vld [vmem:[#allocation14 + $0x344] ss:$16 sps:$4 sm:$0xff]   ;;  %v15604_v13 = vld [vmem:[#allocation14 + $0x120] ss:$16 sps:$4 sm:$0xff]  }
 0x306   : > { %3574 = vmatpush1.bf16.msra.mxu0 %v15532_v8  ;;  %v15606_v33 = vld [vmem:[#allocation14 + $0x124] ss:$16 sps:$4 sm:$0xff]   ;;  %v15607_v56 = vld [vmem:[#allocation14 + $0x320] ss:$16 sps:$4 sm:$0xff]  }
 0x307   : > { %3617 = vmatpush1.bf16.msra.mxu1 %v15535_v63  ;;  %3575 = vmatprep.subr.bf16.mxu0 %v15540_v58  ;;  %v15609_v26 = vld [vmem:[#allocation14 + $0x324] ss:$16 sps:$4 sm:$0xff]   ;;  %v15610_v19 = vld [vmem:[#allocation14 + $0x100] ss:$16 sps:$4 sm:$0xff]   ;;  %v15618_v58 = vld [vmem:[#allocation14 + $0xec] ss:$16 sps:$4 sm:$0xff]  }
 0x308   : > { %3618 = vmatprep.subr.bf16.mxu1 %v15543_v59  ;;  %v15612_v8 = vld [vmem:[#allocation14 + $0x104] ss:$16 sps:$4 sm:$0xff]   ;;  %v15613_v63 = vld [vmem:[#allocation14 + $0x300] ss:$16 sps:$4 sm:$0xff]   ;;  %v15621_v59 = vld [vmem:[#allocation14 + $0x2ec] ss:$16 sps:$4 sm:$0xff]  }
 0x309   : > { %v15615_v34 = vld [vmem:[#allocation14 + $0x304] ss:$16 sps:$4 sm:$0xff]  }
 0x30a   : > { %3576 = vmatpush1.bf16.msra.mxu0 %v15538_v15  ;;  %v17920_v15 = vld [vmem:[#allocation8 + $0x10] sm:$0xff] }
 0x30b   : > { %3619 = vmatpush1.bf16.msra.mxu1 %v15541_v60  ;;  %3577 = vmatprep.subr.bf16.mxu0 %v15546_v9  ;;  %v1016_v60 = vrot.slane %v17920_v15, %v17892_v0  ;;  %v15616_v9 = vld [vmem:[#allocation14 + $0xe8] ss:$16 sps:$4 sm:$0xff]  }
 0x30c   : > { %3620 = vmatprep.subr.bf16.mxu1 %v15549_v61  ;;  %v15619_v61 = vld [vmem:[#allocation14 + $0x2e8] ss:$16 sps:$4 sm:$0xff]  }
 0x30e   : > { %3578 = vmatpush1.bf16.msra.mxu0 %v15544_v62  ;;  %v17924_v62 = vld [vmem:[#allocation8 + $0x18] sm:$0xff] }
 0x30f   : > { %3621 = vmatpush1.bf16.msra.mxu1 %v15547_v27  ;;  %3579 = vmatprep.subr.bf16.mxu0 %v15552_v20  ;;  %v1020_v27 = vrot.slane %v17924_v62, %v17892_v0  ;;  %v15624_v20 = vld [vmem:[#allocation14 + $0xcc] ss:$16 sps:$4 sm:$0xff]  }
 0x310   : > { %3622 = vmatprep.subr.bf16.mxu1 %v15555_v7 }
 0x312   : > { %3580 = vmatpush1.bf16.msra.mxu0 %v15550_v24 }
 0x313   : > { %3623 = vmatpush1.bf16.msra.mxu1 %v15553_v10  ;;  %3581 = vmatprep.subr.bf16.mxu0 %v15558_v1  ;;  %v15627_v10 = vld [vmem:[#allocation14 + $0x2cc] ss:$16 sps:$4 sm:$0xff]  }
 0x314   : > { %3624 = vmatprep.subr.bf16.mxu1 %v15561_v14  ;;  %v15622_v14 = vld [vmem:[#allocation14 + $0xc8] ss:$16 sps:$4 sm:$0xff]  }
 0x316   : > { %3582 = vmatpush1.bf16.msra.mxu0 %v15556_v35 }
 0x317   : > { %3625 = vmatpush1.bf16.msra.mxu1 %v15559_v36  ;;  %3583 = vmatprep.subr.bf16.mxu0 %v15564_v37  ;;  %v15625_v37 = vld [vmem:[#allocation14 + $0x2c8] ss:$16 sps:$4 sm:$0xff]  }
 0x318   : > { %3626 = vmatprep.subr.bf16.mxu1 %v15567_v23  ;;  %v15630_v23 = vld [vmem:[#allocation14 + $0xac] ss:$16 sps:$4 sm:$0xff]  }
 0x31a   : > { %3584 = vmatpush1.bf16.msra.mxu0 %v15562_v18 }
 0x31b   : > { %3627 = vmatpush1.bf16.msra.mxu1 %v15565_v52  ;;  %3585 = vmatprep.subr.bf16.mxu0 %v15570_v48  ;;  %v15633_v48 = vld [vmem:[#allocation14 + $0x2ac] ss:$16 sps:$4 sm:$0xff]  }
 0x31c   : > { %3628 = vmatprep.subr.bf16.mxu1 %v15573_v16 }
 0x31e   : > { %3586 = vmatpush2.bf16.msra.mxu0 %v15568_v12 }
 0x31f   : > { %3629 = vmatpush2.bf16.msra.mxu1 %v15571_v50  ;;  %3587 = vmatprep.subr.bf16.mxu0 %v15576_v31  ;;  %v15628_v31 = vld [vmem:[#allocation14 + $0xa8] ss:$16 sps:$4 sm:$0xff]  }
 0x320   : > { %3630 = vmatprep.subr.bf16.mxu1 %v15579_v38 }
 0x322   : > { %3588 = vmatpush2.bf16.msra.mxu0 %v15574_v39  ;;  %v15631_v39 = vld [vmem:[#allocation14 + $0x2a8] ss:$16 sps:$4 sm:$0xff]  }
 0x323   : > { %3631 = vmatpush2.bf16.msra.mxu1 %v15577_v47  ;;  %3589 = vmatprep.subr.bf16.mxu0 %v15582_v4  ;;  %v15636_v47 = vld [vmem:[#allocation14 + $0x8c] ss:$16 sps:$4 sm:$0xff]  }
 0x324   : > { %3632 = vmatprep.subr.bf16.mxu1 %v15585_v40  ;;  %v15639_v4 = vld [vmem:[#allocation14 + $0x28c] ss:$16 sps:$4 sm:$0xff]   ;;  %v15637_v40 = vld [vmem:[#allocation14 + $0x288] ss:$16 sps:$4 sm:$0xff]  }
 0x326   : > { %3590 = vmatpush2.bf16.msra.mxu0 %v15580_v42  ;;  %v15642_v42 = vld [vmem:[#allocation14 + $0x6c] ss:$16 sps:$4 sm:$0xff]  }
 0x327   : > { %3633 = vmatpush2.bf16.msra.mxu1 %v15583_v2  ;;  %3591 = vmatprep.subr.bf16.mxu0 %v15588_v51  ;;  %v15645_v2 = vld [vmem:[#allocation14 + $0x26c] ss:$16 sps:$4 sm:$0xff]   ;;  %v15640_v51 = vld [vmem:[#allocation14 + $0x68] ss:$16 sps:$4 sm:$0xff]  }
 0x328   : > { %3634 = vmatprep.subr.bf16.mxu1 %v15591_v3  ;;  %v15643_v3 = vld [vmem:[#allocation14 + $0x268] ss:$16 sps:$4 sm:$0xff]  }
 0x32a   : > { %3592 = vmatpush2.bf16.msra.mxu0 %v15586_v43  ;;  %v15648_v43 = vld [vmem:[#allocation14 + $0x4c] ss:$16 sps:$4 sm:$0xff]  }
 0x32b   : > { %3635 = vmatpush2.bf16.msra.mxu1 %v15589_v46  ;;  %3593 = vmatprep.subr.bf16.mxu0 %v15594_v17  ;;  %v15651_v46 = vld [vmem:[#allocation14 + $0x24c] ss:$16 sps:$4 sm:$0xff]   ;;  %v15646_v17 = vld [vmem:[#allocation14 + $0x48] ss:$16 sps:$4 sm:$0xff]  }
 0x32c   : > { %3636 = vmatprep.subr.bf16.mxu1 %v15597_v5  ;;  %v15649_v5 = vld [vmem:[#allocation14 + $0x248] ss:$16 sps:$4 sm:$0xff]  }
 0x32e   : > { %3594 = vmatpush2.bf16.msra.mxu0 %v15592_v28  ;;  %v15654_v28 = vld [vmem:[#allocation14 + $0x2c] ss:$16 sps:$4 sm:$0xff]  }
 0x32f   : > { %3637 = vmatpush2.bf16.msra.mxu1 %v15595_v44  ;;  %3595 = vmatprep.subr.bf16.mxu0 %v15600_v29  ;;  %v15657_v44 = vld [vmem:[#allocation14 + $0x22c] ss:$16 sps:$4 sm:$0xff]   ;;  %v15652_v29 = vld [vmem:[#allocation14 + $0x28] ss:$16 sps:$4 sm:$0xff]  }
 0x330   : > { %3638 = vmatprep.subr.bf16.mxu1 %v15603_v25  ;;  %v15655_v25 = vld [vmem:[#allocation14 + $0x228] ss:$16 sps:$4 sm:$0xff]  }
 0x332   : > { %3596 = vmatpush2.bf16.msra.mxu0 %v15598_v55  ;;  %v15660_v55 = vld [vmem:[#allocation14 + $0xc] ss:$16 sps:$4 sm:$0xff]  }
 0x333   : > { %3639 = vmatpush2.bf16.msra.mxu1 %v15601_v11  ;;  %3597 = vmatprep.subr.bf16.mxu0 %v15606_v33  ;;  %v15663_v11 = vld [vmem:[#allocation14 + $0x20c] ss:$16 sps:$4 sm:$0xff]   ;;  %v15658_v33 = vld [vmem:[#allocation14 + $0x8] ss:$16 sps:$4 sm:$0xff]  }
 0x334   : > { %3640 = vmatprep.subr.bf16.mxu1 %v15609_v26  ;;  %v15661_v26 = vld [vmem:[#allocation14 + $0x208] ss:$16 sps:$4 sm:$0xff]  }
 0x336   : > { %3598 = vmatpush2.bf16.msra.mxu0 %v15604_v13  ;;  %v15666_v13 = vld [vmem:[#allocation14 + $0x1ec] ss:$16 sps:$4 sm:$0xff]  }
 0x337   : > { %3641 = vmatpush2.bf16.msra.mxu1 %v15607_v56  ;;  %3599 = vmatprep.subr.bf16.mxu0 %v15612_v8  ;;  %v15669_v56 = vld [vmem:[#allocation14 + $0x3ec] ss:$16 sps:$4 sm:$0xff]   ;;  %v15664_v8 = vld [vmem:[#allocation14 + $0x1e8] ss:$16 sps:$4 sm:$0xff]  }
 0x338   : > { %3642 = vmatprep.subr.bf16.mxu1 %v15615_v34  ;;  %v15667_v34 = vld [vmem:[#allocation14 + $0x3e8] ss:$16 sps:$4 sm:$0xff]  }
 0x33a   : > { %3600 = vmatpush2.bf16.msra.mxu0 %v15610_v19  ;;  %v15672_v19 = vld [vmem:[#allocation14 + $0x1cc] ss:$16 sps:$4 sm:$0xff]  }
 0x33b   : > { %3643 = vmatpush2.bf16.msra.mxu1 %v15613_v63  ;;  %3655 = vmatprep.subr.bf16.mxu0 %v15618_v58  ;;  %v15675_v63 = vld [vmem:[#allocation14 + $0x3cc] ss:$16 sps:$4 sm:$0xff]   ;;  %v15670_v58 = vld [vmem:[#allocation14 + $0x1c8] ss:$16 sps:$4 sm:$0xff]  }
 0x33c   : > { %3698 = vmatprep.subr.bf16.mxu1 %v15621_v59  ;;  %v15673_v59 = vld [vmem:[#allocation14 + $0x3c8] ss:$16 sps:$4 sm:$0xff]  }
 0x33d   : > { %v1777_v7 = vpop.f32.mrf.mxu0  ;;  %v1818_v24 = vpop.f32.mrf.mxu1  ;;  %3602 = vmatmul.mubr.bf16.vlgmr.msra.gmra.mxu0 %v17877_v21 }
 0x33e   : > { %v1778_v1 = vadd.f32 %v1777_v7, %v1016_v60  ;;  %3645 = vmatmul.mubr.bf16.vlgmr.msra.gmra.mxu1 %v17879_v32  ;;  %3656 = vmatpush1.bf16.msra.mxu0 %v15616_v9  ;;  %v15678_v60 = vld [vmem:[#allocation14 + $0x1ac] ss:$16 sps:$4 sm:$0xff]  }
 0x33f   : > { %3687 = vmatprep.mubr.bf16.mxu0 %v17909_v41  ;;  %3699 = vmatpush1.bf16.msra.mxu1 %v15619_v61  ;;  %v1779_v35 = vpop.f32.mrf.mxu0  ;;  %v1820_v36 = vpop.f32.mrf.mxu1  ;;  %v15681_v9 = vld [vmem:[#allocation14 + $0x3ac] ss:$16 sps:$4 sm:$0xff]   ;;  %v15676_v61 = vld [vmem:[#allocation14 + $0x1a8] ss:$16 sps:$4 sm:$0xff]  }
 0x340   : > { %v17931_v18 = vadd.f32 %v1818_v24, %v1778_v1  ;;  %3730 = vmatprep.mubr.bf16.mxu1 %v17912_v6  ;;  %v1780_v52 = vadd.f32 %v1779_v35, %v1020_v27  ;;  %3657 = vmatprep.subr.bf16.mxu0 %v15624_v20  ;;  %v15634_v6 = vld [vmem:[#allocation14 + $0x88] ss:$16 sps:$4 sm:$0xff]   ;;  %v15684_v20 = vld [vmem:[#allocation14 + $0x18c] ss:$16 sps:$4 sm:$0xff]  }
 0x341   : > { %v1781_v16 = vpop.f32.mrf.mxu0  ;;  %v1822_v12 = vpop.f32.mrf.mxu1  ;;  %3700 = vmatprep.subr.bf16.mxu1 %v15627_v10  ;;  %v15679_v27 = vld [vmem:[#allocation14 + $0x3a8] ss:$16 sps:$4 sm:$0xff]   ;;  %v15687_v7 = vld [vmem:[#allocation14 + $0x38c] ss:$16 sps:$4 sm:$0xff]  }
 0x342   : > { %v17934_v50 = vadd.f32 %v1820_v36, %v1780_v52  ;;  %3658 = vmatpush1.bf16.msra.mxu0 %v15622_v14  ;;  %v15682_v24 = vld [vmem:[#allocation14 + $0x188] ss:$16 sps:$4 sm:$0xff]   ;;  %v15690_v1 = vld [vmem:[#allocation14 + $0x16c] ss:$16 sps:$4 sm:$0xff]  }
 0x343   : > { %3701 = vmatpush1.bf16.msra.mxu1 %v15625_v37  ;;  %v1782_v41 = vpop.f32.mrf.mxu0  ;;  %v1823_v38 = vpop.f32.mrf.mxu1  ;;  %3659 = vmatprep.subr.bf16.mxu0 %v15630_v23  ;;  %v15685_v10 = vld [vmem:[#allocation14 + $0x388] ss:$16 sps:$4 sm:$0xff]   ;;  %v15693_v14 = vld [vmem:[#allocation14 + $0x36c] ss:$16 sps:$4 sm:$0xff]  }
 0x344   : > { %3702 = vmatprep.subr.bf16.mxu1 %v15633_v48  ;;  %v15688_v35 = vld [vmem:[#allocation14 + $0x168] ss:$16 sps:$4 sm:$0xff]   ;;  %v15696_v37 = vld [vmem:[#allocation14 + $0x14c] ss:$16 sps:$4 sm:$0xff]  }
 0x345   : > { %v15691_v36 = vld [vmem:[#allocation14 + $0x368] ss:$16 sps:$4 sm:$0xff]   ;;  %v15699_v23 = vld [vmem:[#allocation14 + $0x34c] ss:$16 sps:$4 sm:$0xff]  }
 0x346   : > { %3660 = vmatpush1.bf16.msra.mxu0 %v15628_v31  ;;  %v15694_v52 = vld [vmem:[#allocation14 + $0x148] ss:$16 sps:$4 sm:$0xff]   ;;  %v15702_v16 = vld [vmem:[#allocation14 + $0x12c] ss:$16 sps:$4 sm:$0xff]  }
 0x347   : > { %3703 = vmatpush1.bf16.msra.mxu1 %v15631_v39  ;;  %3661 = vmatprep.subr.bf16.mxu0 %v15636_v47  ;;  %v15697_v48 = vld [vmem:[#allocation14 + $0x348] ss:$16 sps:$4 sm:$0xff]   ;;  %v15705_v12 = vld [vmem:[#allocation14 + $0x32c] ss:$16 sps:$4 sm:$0xff]  }
 0x348   : > { %3704 = vmatprep.subr.bf16.mxu1 %v15639_v4  ;;  %v15700_v31 = vld [vmem:[#allocation14 + $0x128] ss:$16 sps:$4 sm:$0xff]   ;;  %v15708_v38 = vld [vmem:[#allocation14 + $0x10c] ss:$16 sps:$4 sm:$0xff]  }
 0x349   : > { %v15703_v41 = vld [vmem:[#allocation14 + $0x328] ss:$16 sps:$4 sm:$0xff]   ;;  %v15711_v39 = vld [vmem:[#allocation14 + $0x30c] ss:$16 sps:$4 sm:$0xff]  }
 0x34a   : > { %3662 = vmatpush1.bf16.msra.mxu0 %v15634_v6  ;;  %v15706_v47 = vld [vmem:[#allocation14 + $0x108] ss:$16 sps:$4 sm:$0xff]   ;;  %v17203_v6 = vmov 0.0  }
 0x34b   : > { %3705 = vmatpush1.bf16.msra.mxu1 %v15637_v40  ;;  %3663 = vmatprep.subr.bf16.mxu0 %v15642_v42  ;;  %v15709_v4 = vld [vmem:[#allocation14 + $0x308] ss:$16 sps:$4 sm:$0xff]   ;;  %v17938_v40 = vsub.s32 5, %v17715_v45 }
 0x34c   : > { %3706 = vmatprep.subr.bf16.mxu1 %v15645_v2 }
 0x34e   : > { %3664 = vmatpush1.bf16.msra.mxu0 %v15640_v51 }
 0x34f   : > { %3707 = vmatpush1.bf16.msra.mxu1 %v15643_v3  ;;  %3665 = vmatprep.subr.bf16.mxu0 %v15648_v43  ;;  %v1960_v3 = vrot.slane %v17898_v49, %v17938_v40 }
 0x350   : > { %3708 = vmatprep.subr.bf16.mxu1 %v15651_v46 }
 0x352   : > { %3666 = vmatpush1.bf16.msra.mxu0 %v15646_v17  ;;  %v1964_v17 = vrot.slane %v17904_v53, %v17938_v40 }
 0x353   : > { %3709 = vmatpush1.bf16.msra.mxu1 %v15649_v5  ;;  %3667 = vmatprep.subr.bf16.mxu0 %v15654_v28 }
 0x354   : > { %3710 = vmatprep.subr.bf16.mxu1 %v15657_v44 }
 0x356   : > { %3668 = vmatpush1.bf16.msra.mxu0 %v15652_v29 }
 0x357   : > { %3711 = vmatpush1.bf16.msra.mxu1 %v15655_v25  ;;  %3669 = vmatprep.subr.bf16.mxu0 %v15660_v55 }
 0x358   : > { %3712 = vmatprep.subr.bf16.mxu1 %v15663_v11 }
 0x35a   : > { %3670 = vmatpush1.bf16.msra.mxu0 %v15658_v33 }
 0x35b   : > { %3713 = vmatpush1.bf16.msra.mxu1 %v15661_v26  ;;  %3671 = vmatprep.subr.bf16.mxu0 %v15666_v13  ;;  %v1825_v13 = vmul.f32 0.088388346, %v17915_v30  ;;  %v1968_v30 = vrot.slane %v17920_v15, %v17938_v40 }
 0x35c   : > { %3714 = vmatprep.subr.bf16.mxu1 %v15669_v56  ;;  %v1826_v56 = vmul.f32 0.088388346, %v17918_v22  ;;  %v1972_v22 = vrot.slane %v17924_v62, %v17938_v40 }
 0x35e   : > { %3672 = vmatpush2.bf16.msra.mxu0 %v15664_v8 }
 0x35f   : > { %3715 = vmatpush2.bf16.msra.mxu1 %v15667_v34  ;;  %3673 = vmatprep.subr.bf16.mxu0 %v15672_v19 }
 0x360   : > { %3716 = vmatprep.subr.bf16.mxu1 %v15675_v63 }
 0x362   : > { %3674 = vmatpush2.bf16.msra.mxu0 %v15670_v58 }
 0x363   : > { %3717 = vmatpush2.bf16.msra.mxu1 %v15673_v59  ;;  %3675 = vmatprep.subr.bf16.mxu0 %v15678_v60 }
 0x364   : > { %3718 = vmatprep.subr.bf16.mxu1 %v15681_v9 }
 0x366   : > { %3676 = vmatpush2.bf16.msra.mxu0 %v15676_v61 }
 0x367   : > { %3719 = vmatpush2.bf16.msra.mxu1 %v15679_v27  ;;  %3677 = vmatprep.subr.bf16.mxu0 %v15684_v20 }
 0x368   : > { %3720 = vmatprep.subr.bf16.mxu1 %v15687_v7 }
 0x36a   : > { %3678 = vmatpush2.bf16.msra.mxu0 %v15682_v24 }
 0x36b   : > { %3721 = vmatpush2.bf16.msra.mxu1 %v15685_v10  ;;  %3679 = vmatprep.subr.bf16.mxu0 %v15690_v1 }
 0x36c   : > { %3722 = vmatprep.subr.bf16.mxu1 %v15693_v14 }
 0x36e   : > { %3680 = vmatpush2.bf16.msra.mxu0 %v15688_v35  ;;  %v1827_v35 = vmul.f32 0.088388346, %v17931_v18 }
 0x36f   : > { %3723 = vmatpush2.bf16.msra.mxu1 %v15691_v36  ;;  %3681 = vmatprep.subr.bf16.mxu0 %v15696_v37  ;;  %v1828_v36 = vmul.f32 0.088388346, %v17934_v50  ;;  %v17976_v37 = vsub.s32 6, %v17715_v45 }
 0x370   : > { %3724 = vmatprep.subr.bf16.mxu1 %v15699_v23 }
 0x371   : > { %v2916_v18 = vrot.slane %v17898_v49, %v17976_v37  ;;  %v2920_v50 = vrot.slane %v17904_v53, %v17976_v37  ;;  %v2924_v53 = vrot.slane %v17920_v15, %v17976_v37 }
 0x372   : > { %3682 = vmatpush2.bf16.msra.mxu0 %v15694_v52 }
 0x373   : > { %3725 = vmatpush2.bf16.msra.mxu1 %v15697_v48  ;;  %3683 = vmatprep.subr.bf16.mxu0 %v15702_v16 }
 0x374   : > { %3726 = vmatprep.subr.bf16.mxu1 %v15705_v12 }
 0x376   : > { %3684 = vmatpush2.bf16.msra.mxu0 %v15700_v31 }
 0x377   : > { %3727 = vmatpush2.bf16.msra.mxu1 %v15703_v41  ;;  %3685 = vmatprep.subr.bf16.mxu0 %v15708_v38 }
 0x378   : > { %3728 = vmatprep.subr.bf16.mxu1 %v15711_v39 }
 0x37a   : > { %3686 = vmatpush2.bf16.msra.mxu0 %v15706_v47 }
 0x37b   : > { %3729 = vmatpush2.bf16.msra.mxu1 %v15709_v4  ;;  %14930 = vmatprep.subr.mxu0 %v17203_v6 }
 0x37c   : > { %14937 = vmatprep.subr.mxu1 %v17203_v6 }
 0x37d   : > { %v2647_v42 = vpop.f32.mrf.mxu0  ;;  %3688 = vmatmul.mubr.bf16.vlgmr.msra.gmra.mxu0 %v17877_v21 }
 0x37e   : > { %v2690_v2 = vpop.f32.mrf.mxu1  ;;  %3731 = vmatmul.mubr.bf16.vlgmr.msra.gmra.mxu1 %v17879_v32  ;;  %14934 = vmatprep.mubr.msk.f32.mxu0 %vm17204_vm0, %v17203_v6  ;;  %v2648_v32 = vadd.f32 %v2647_v42, %v1960_v3 }
 0x37f   : > { %v2649_v51 = vpop.f32.mrf.mxu0  ;;  %14941 = vmatprep.mubr.msk.f32.mxu1 %vm17204_vm0, %v17203_v6 }
 0x380   : > { %v2692_v43 = vpop.f32.mrf.mxu1  ;;  %v2650_v55 = vadd.f32 %v2649_v51, %v1964_v17  ;;  %v2691_v33 = vadd.f32 %v2690_v2, %v2648_v32 }
 0x381   : > { %v2651_v46 = vpop.f32.mrf.mxu0 }
 0x382   : > { %v2652_v21 = vadd.f32 %v2651_v46, %v1960_v3  ;;  %v2694_v5 = vpop.f32.mrf.mxu1  ;;  %v2693_v26 = vadd.f32 %v2692_v43, %v2650_v55  ;;  %v2928_v43 = vrot.slane %v17924_v62, %v17976_v37 }
 0x383   : > { %v2653_v28 = vpop.f32.mrf.mxu0 }
 0x384   : > { %v2695_v44 = vadd.f32 %v2694_v5, %v2652_v21  ;;  %v2654_v29 = vadd.f32 %v2653_v28, %v1964_v17  ;;  %v2696_v25 = vpop.f32.mrf.mxu1 }
 0x386   : > { %v2697_v11 = vadd.f32 %v2696_v25, %v2654_v29  ;;  %14931 = vmatpush3.xpose.msra.mxu0 %v2695_v44 }
 0x387   : > { %14932 = vmatprep.subr.mxu0 %v17203_v6 }
 0x388   : > { %14938 = vmatpush3.xpose.msra.mxu1 %v2697_v11 }
 0x389   : > { %14939 = vmatprep.subr.mxu1 %v17203_v6 }
 0x38a   : > { %14933 = vmatpush3.xpose.msra.mxu0 %v2691_v33 }
 0x38b   : > { %14944 = vmatprep.subr.mxu0 %v17203_v6 }
 0x38c   : > { %14940 = vmatpush3.xpose.msra.mxu1 %v2693_v26 }
 0x38d   : > { %14935 = vmatmul.mubr.f32.vlgmr.msra.gmra.mxu0 %v1825_v13  ;;  %14951 = vmatprep.subr.mxu1 %v17203_v6 }
 0x38e   : > { %14948 = vmatprep.mubr.msk.f32.mxu0 %vm17204_vm0, %v17203_v6 }
 0x38f   : > { %14942 = vmatmul.mubr.f32.vlgmr.msra.gmra.mxu1 %v1826_v56 }
 0x390   : > { %14955 = vmatprep.mubr.msk.f32.mxu1 %vm17204_vm0, %v17203_v6 }
 0x3bd   : > { %v2733_v8 = vpop.f32.mrf.mxu0 }
 0x3be   : > { %v2776_v34 = vpop.f32.mrf.mxu1  ;;  %v2734_v61 = vadd.f32 %v2733_v8, %v1968_v30 }
 0x3bf   : > { %v2735_v19 = vpop.f32.mrf.mxu0 }
 0x3c0   : > { %v2778_v63 = vpop.f32.mrf.mxu1  ;;  %v2736_v24 = vadd.f32 %v2735_v19, %v1972_v22  ;;  %v2777_v1 = vadd.f32 %v2776_v34, %v2734_v61 }
 0x3c1   : > { %v2737_v58 = vpop.f32.mrf.mxu0 }
 0x3c2   : > { %v2738_v59 = vadd.f32 %v2737_v58, %v1968_v30  ;;  %v2780_v60 = vpop.f32.mrf.mxu1  ;;  %v2779_v14 = vadd.f32 %v2778_v63, %v2736_v24 }
 0x3c3   : > { %v2739_v9 = vpop.f32.mrf.mxu0 }
 0x3c4   : > { %v2781_v27 = vadd.f32 %v2780_v60, %v2738_v59  ;;  %v2740_v20 = vadd.f32 %v2739_v9, %v1972_v22  ;;  %v2782_v7 = vpop.f32.mrf.mxu1 }
 0x3c6   : > { %v2783_v10 = vadd.f32 %v2782_v7, %v2740_v20  ;;  %14945 = vmatpush3.xpose.msra.mxu0 %v2781_v27 }
 0x3c7   : > { %14946 = vmatprep.subr.mxu0 %v17203_v6 }
 0x3c8   : > { %14952 = vmatpush3.xpose.msra.mxu1 %v2783_v10 }
 0x3c9   : > { %14953 = vmatprep.subr.mxu1 %v17203_v6 }
 0x3ca   : > { %14947 = vmatpush3.xpose.msra.mxu0 %v2777_v1 }
 0x3cb   : > { %14958 = vmatprep.subr.mxu0 %v17203_v6 }
 0x3cc   : > { %14954 = vmatpush3.xpose.msra.mxu1 %v2779_v14 }
 0x3cd   : > { %14949 = vmatmul.mubr.f32.vlgmr.msra.gmra.mxu0 %v1827_v35  ;;  %14965 = vmatprep.subr.mxu1 %v17203_v6 }
 0x3ce   : > { %14962 = vmatprep.mubr.msk.f32.mxu0 %vm17204_vm0, %v17203_v6 }
 0x3cf   : > { %14956 = vmatmul.mubr.f32.vlgmr.msra.gmra.mxu1 %v1828_v36 }
 0x3d0   : > { %14969 = vmatprep.mubr.msk.f32.mxu1 %vm17204_vm0, %v17203_v6 }
 0x3fd   : > { %v3603_v23 = vpop.f32.mrf.mxu0 }
 0x3fe   : > { %v3646_v52 = vpop.f32.mrf.mxu1  ;;  %v3604_v31 = vadd.f32 %v3603_v23, %v2916_v18 }
 0x3ff   : > { %v3605_v48 = vpop.f32.mrf.mxu0 }
 0x400   : > { %v3648_v16 = vpop.f32.mrf.mxu1  ;;  %v3606_v47 = vadd.f32 %v3605_v48, %v2920_v50  ;;  %v3647_v51 = vadd.f32 %v3646_v52, %v3604_v31 }
 0x401   : > { %v3607_v12 = vpop.f32.mrf.mxu0 }
 0x402   : > { %v3608_v41 = vadd.f32 %v3607_v12, %v2916_v18  ;;  %v3650_v38 = vpop.f32.mrf.mxu1  ;;  %v3649_v49 = vadd.f32 %v3648_v16, %v3606_v47 }
 0x403   : > { %v3609_v39 = vpop.f32.mrf.mxu0 }
 0x404   : > { %v3651_v4 = vadd.f32 %v3650_v38, %v3608_v41  ;;  %v3610_v42 = vadd.f32 %v3609_v39, %v2920_v50  ;;  %v3652_v2 = vpop.f32.mrf.mxu1 }
 0x406   : > { %v3653_v3 = vadd.f32 %v3652_v2, %v3610_v42  ;;  %14959 = vmatpush3.msra.mxu0 %v3651_v4 }
 0x407   : > { %14960 = vmatprep.subr.mxu0 %v17203_v6 }
 0x408   : > { %14961 = vmatpush3.msra.mxu0 %v3647_v51  ;;  %14966 = vmatpush3.msra.mxu1 %v3653_v3 }
 0x409   : > { %14967 = vmatprep.subr.mxu1 %v17203_v6  ;;  %14972 = vmatprep.subr.mxu0 %v17203_v6 }
 0x40a   : > { %14968 = vmatpush3.msra.mxu1 %v3649_v49  ;;  %v15714_v49 = vld [vmem:[#allocation16 + $0xe4] ss:$16 sps:$4 sm:$0xff]  }
 0x40b   : > { %14979 = vmatprep.subr.mxu1 %v17203_v6 }
 0x43d   : > { %v3689_v46 = vpop.f32.mrf.mxu0 }
 0x43e   : > { %v3690_v17 = vadd.f32 %v3689_v46, %v2924_v53  ;;  %v3732_v21 = vpop.f32.mrf.mxu1 }
 0x43f   : > { %v3691_v5 = vpop.f32.mrf.mxu0 }
 0x440   : > { %v17990_v28 = vadd.f32 %v3732_v21, %v3690_v17  ;;  %v3692_v32 = vadd.f32 %v3691_v5, %v2928_v43  ;;  %v3734_v44 = vpop.f32.mrf.mxu1  ;;  %v15712_v17 = vld [vmem:[#allocation16 + $0xe0] ss:$16 sps:$4 sm:$0xff]  }
 0x441   : > { %v3693_v29 = vpop.f32.mrf.mxu0 }
 0x442   : > { %v17992_v25 = vadd.f32 %v3734_v44, %v3692_v32  ;;  %v3694_v55 = vadd.f32 %v3693_v29, %v2924_v53  ;;  %v3736_v11 = vpop.f32.mrf.mxu1  ;;  %v15717_v32 = vld [vmem:[#allocation16 + $0xc4] ss:$16 sps:$4 sm:$0xff]  }
 0x443   : > { %v3695_v33 = vpop.f32.mrf.mxu0 }
 0x444   : > { %v3737_v26 = vadd.f32 %v3736_v11, %v3694_v55  ;;  %v3696_v13 = vadd.f32 %v3695_v33, %v2928_v43  ;;  %v3738_v15 = vpop.f32.mrf.mxu1  ;;  %v15720_v55 = vld [vmem:[#allocation16 + $0xa4] ss:$16 sps:$4 sm:$0xff]   ;;  %v15718_v33 = vld [vmem:[#allocation16 + $0xa0] ss:$16 sps:$4 sm:$0xff]  }
 0x446   : > { %v3739_v56 = vadd.f32 %v3738_v15, %v3696_v13  ;;  %v15762_v13 = vld [vmem:[#allocation16 + $0x2e4] ss:$16 sps:$4 sm:$0xff]  }
 0x447   : > { %v15723_v15 = vld [vmem:[#allocation16 + $0x84] ss:$16 sps:$4 sm:$0xff]  }
 0x44d   : > { %v3807_v62 = vpop.f32.mrf.mxu0 }
 0x44e   : > { %v4022_v8 = vsel %vm4021_vm1, %v3807_v62, -inf }
 0x44f   : > { %v3877_v34 = vpop.f32.mrf.mxu1  ;;  %4023 = vmax.xlane.f32.xlu1 %v4022_v8  ;;  %v14936_v19 = vpop.f32.mrf.mxu0  ;;  %v15721_v8 = vld [vmem:[#allocation16 + $0x80] ss:$16 sps:$4 sm:$0xff]  }
 0x450   : > { %v4025_v30 = vsel %vm4021_vm1, %v3877_v34, -inf  ;;  %v15774_v19 = vld [vmem:[#allocation16 + $0x2a4] ss:$16 sps:$4 sm:$0xff]  }
 0x451   : > { %4026 = vmax.xlane.f32.xlu0 %v4025_v30  ;;  %v14943_v63 = vpop.f32.mrf.mxu1  ;;  %v15772_v30 = vld [vmem:[#allocation16 + $0x2a0] ss:$16 sps:$4 sm:$0xff]  }
 0x452   : > { %v15724_v63 = vld [vmem:[#allocation16 + $0x60] ss:$16 sps:$4 sm:$0xff]  }
 0x48d   : > { %v3947_v58 = vpop.f32.mrf.mxu0 }
 0x48e   : > { %v4028_v22 = vsel %vm4021_vm1, %v3947_v58, -inf }
 0x48f   : > { %v4017_v59 = vpop.f32.mrf.mxu1  ;;  %4029 = vmax.xlane.f32.xlu1 %v4028_v22  ;;  %v14950_v60 = vpop.f32.mrf.mxu0  ;;  %v15780_v22 = vld [vmem:[#allocation16 + $0x284] ss:$16 sps:$4 sm:$0xff]  }
 0x490   : > { %v4031_v9 = vsel %vm4021_vm1, %v4017_v59, -inf  ;;  %v15727_v60 = vld [vmem:[#allocation16 + $0x40] ss:$16 sps:$4 sm:$0xff]  }
 0x491   : > { %4032 = vmax.xlane.f32.xlu0 %v4031_v9  ;;  %v14957_v61 = vpop.f32.mrf.mxu1  ;;  %v15732_v9 = vld [vmem:[#allocation16 + $0x24] ss:$16 sps:$4 sm:$0xff]  }
 0x492   : > { %v15786_v61 = vld [vmem:[#allocation16 + $0x264] ss:$16 sps:$4 sm:$0xff]  }
 0x4d8   : > { %v4024_v27 = vpop.xlane.xlu1 %4023 }
 0x4d9   : > { %v4034_v20 = vsub.f32 %v3807_v62, %v4024_v27  ;;  %v15766_v62 = vld [vmem:[#allocation16 + $0x2c0] ss:$16 sps:$4 sm:$0xff]  }
 0x4da   : > { %v4027_v7 = vpop.xlane.xlu0 %4026  ;;  %v15784_v27 = vld [vmem:[#allocation16 + $0x260] ss:$16 sps:$4 sm:$0xff]  }
 0x4db   : > { %v4038_v24 = vmul.f32 1.442695, %v4034_v20  ;;  %v4035_v10 = vsub.f32 %v3877_v34, %v4027_v7  ;;  %v15726_v34 = vld [vmem:[#allocation16 + $0x64] ss:$16 sps:$4 sm:$0xff]   ;;  %v15730_v20 = vld [vmem:[#allocation16 + $0x20] ss:$16 sps:$4 sm:$0xff]  }
 0x4dc   : > { %v15735_v7 = vld [vmem:[#allocation16 + $0x4] ss:$16 sps:$4 sm:$0xff]  }
 0x4dd   : > { %16682 = vpow2.f32 %v4038_v24  ;;  %v4040_v1 = vmul.f32 1.442695, %v4035_v10  ;;  %v15792_v24 = vld [vmem:[#allocation16 + $0x244] ss:$16 sps:$4 sm:$0xff]   ;;  %v15790_v10 = vld [vmem:[#allocation16 + $0x240] ss:$16 sps:$4 sm:$0xff]  }
 0x4df   : > { %16684 = vpow2.f32 %v4040_v1  ;;  %v15733_v1 = vld [vmem:[#allocation16] ss:$16 sps:$4 sm:$0xff]  }
 0x4ea   : > { %v16683_v14 = vpop.eup %16682 }
 0x4eb   : > { %v4046_v35 = vsel %vm4021_vm1, %v16683_v14, 0.0 }
 0x4ec   : > { %v16685_v36 = vpop.eup %16684  ;;  %4047 = vadd.xlane.f32.xlu1 %v4046_v35  ;;  %v15798_v35 = vld [vmem:[#allocation16 + $0x224] ss:$16 sps:$4 sm:$0xff]  }
 0x4ed   : > { %v4049_v23 = vsel %vm4021_vm1, %v16685_v36, 0.0 }
 0x4ee   : > { %4050 = vadd.xlane.f32.xlu0 %v4049_v23  ;;  %v15736_v23 = vld [vmem:[#allocation16 + $0x1e0] ss:$16 sps:$4 sm:$0xff]  }
 0x518   : > { %v4030_v18 = vpop.xlane.xlu1 %4029 }
 0x519   : > { %v4036_v52 = vsub.f32 %v3947_v58, %v4030_v18  ;;  %v15729_v58 = vld [vmem:[#allocation16 + $0x44] ss:$16 sps:$4 sm:$0xff]  }
 0x51a   : > { %v4033_v48 = vpop.xlane.xlu0 %4032  ;;  %v15741_v18 = vld [vmem:[#allocation16 + $0x1c4] ss:$16 sps:$4 sm:$0xff]  }
 0x51b   : > { %v4042_v50 = vmul.f32 1.442695, %v4036_v52  ;;  %v4037_v16 = vsub.f32 %v4017_v59, %v4033_v48  ;;  %v15778_v59 = vld [vmem:[#allocation16 + $0x280] ss:$16 sps:$4 sm:$0xff]   ;;  %v15804_v52 = vld [vmem:[#allocation16 + $0x204] ss:$16 sps:$4 sm:$0xff]  }
 0x51c   : > { %v15802_v48 = vld [vmem:[#allocation16 + $0x200] ss:$16 sps:$4 sm:$0xff]  }
 0x51d   : > { %16686 = vpow2.f32 %v4042_v50  ;;  %v4044_v12 = vmul.f32 1.442695, %v4037_v16  ;;  %v15739_v50 = vld [vmem:[#allocation16 + $0x1c0] ss:$16 sps:$4 sm:$0xff]   ;;  %v15744_v16 = vld [vmem:[#allocation16 + $0x1a4] ss:$16 sps:$4 sm:$0xff]  }
 0x51f   : > { %16688 = vpow2.f32 %v4044_v12  ;;  %v15810_v12 = vld [vmem:[#allocation16 + $0x3e4] ss:$16 sps:$4 sm:$0xff]  }
 0x52a   : > { %v16687_v31 = vpop.eup %16686 }
 0x52b   : > { %v4052_v41 = vsel %vm4021_vm1, %v16687_v31, 0.0 }
 0x52c   : > { %v16689_v38 = vpop.eup %16688  ;;  %4053 = vadd.xlane.f32.xlu1 %v4052_v41  ;;  %v15742_v41 = vld [vmem:[#allocation16 + $0x1a0] ss:$16 sps:$4 sm:$0xff]  }
 0x52d   : > { %v4055_v39 = vsel %vm4021_vm1, %v16689_v38, 0.0 }
 0x52e   : > { %4056 = vadd.xlane.f32.xlu0 %v4055_v39  ;;  %v15816_v39 = vld [vmem:[#allocation16 + $0x3c4] ss:$16 sps:$4 sm:$0xff]  }
 0x575   : > { %v4048_v47 = vpop.xlane.xlu1 %4047 }
 0x576   : > { %16690 = vrcp.f32 %v4048_v47  ;;  %v15814_v47 = vld [vmem:[#allocation16 + $0x3c0] ss:$16 sps:$4 sm:$0xff]  }
 0x577   : > { %v4051_v4 = vpop.xlane.xlu0 %4050 }
 0x578   : > { %16692 = vrcp.f32 %v4051_v4  ;;  %v15745_v4 = vld [vmem:[#allocation16 + $0x180] ss:$16 sps:$4 sm:$0xff]  }
 0x583   : > { %v16691_v42 = vpop.eup %16690 }
 0x584   : > { %v4062_v2 = vmul.f32 %v16691_v42, %v16683_v14  ;;  %v15738_v14 = vld [vmem:[#allocation16 + $0x1e4] ss:$16 sps:$4 sm:$0xff]  }
 0x585   : > { %v16693_v51 = vpop.eup %16692  ;;  %v15750_v42 = vld [vmem:[#allocation16 + $0x164] ss:$16 sps:$4 sm:$0xff]  }
 0x586   : > { %14963 = vmatmul.mubr.msk.f32.vlgmr.msra.gmra.mxu0 %vm4021_vm1, %v4062_v2  ;;  %v4063_v3 = vmul.f32 %v16693_v51, %v16685_v36  ;;  %v15796_v36 = vld [vmem:[#allocation16 + $0x220] ss:$16 sps:$4 sm:$0xff]  }
 0x587   : > { %14973 = vmatpush3.msra.mxu0 %v3737_v26  ;;  %14976 = vmatprep.mubr.msk.f32.mxu0 %vm17204_vm0, %v17203_v6  ;;  %v15760_v26 = vld [vmem:[#allocation16 + $0x2e0] ss:$16 sps:$4 sm:$0xff]  }
 0x588   : > { %14974 = vmatprep.subr.mxu0 %v17203_v6  ;;  %14970 = vmatmul.mubr.msk.f32.vlgmr.msra.gmra.mxu1 %vm4021_vm1, %v4063_v3  ;;  %v4358_v21 = vadd.f32 %v4063_v3, %v4062_v2  ;;  %v15822_v2 = vld [vmem:[#allocation16 + $0x3a4] ss:$16 sps:$4 sm:$0xff]   ;;  %v15820_v51 = vld [vmem:[#allocation16 + $0x3a0] ss:$16 sps:$4 sm:$0xff]  }
 0x589   : > { %14975 = vmatpush3.msra.mxu0 %v17990_v28  ;;  %14980 = vmatpush3.msra.mxu1 %v3739_v56  ;;  %v15768_v56 = vld [vmem:[#allocation16 + $0x2c4] ss:$16 sps:$4 sm:$0xff]   ;;  %v15748_v3 = vld [vmem:[#allocation16 + $0x160] ss:$16 sps:$4 sm:$0xff]  }
 0x58a   : > { %14981 = vmatprep.subr.mxu1 %v17203_v6  ;;  %14983 = vmatprep.mubr.msk.f32.mxu1 %vm17204_vm0, %v17203_v6  ;;  %v15715_v6 = vld [vmem:[#allocation16 + $0xc0] ss:$16 sps:$4 sm:$0xff]  }
 0x58b   : > { %14982 = vmatpush3.msra.mxu1 %v17992_v25  ;;  %5151 = vmatprep.subr.bf16.mxu0 %v15714_v49  ;;  %v15753_v49 = vld [vmem:[#allocation16 + $0x144] ss:$16 sps:$4 sm:$0xff]  }
 0x58c   : > { %5192 = vmatprep.subr.bf16.mxu1 %v15762_v13  ;;  %v15858_v13 = vld [vmem:[#allocation16 + $0x2ec] ss:$16 sps:$4 sm:$0xff]  }
 0x5b5   : > { %v4054_v53 = vpop.xlane.xlu1 %4053 }
 0x5b6   : > { %16694 = vrcp.f32 %v4054_v53  ;;  %v15828_v53 = vld [vmem:[#allocation16 + $0x384] ss:$16 sps:$4 sm:$0xff]  }
 0x5b7   : > { %v4057_v43 = vpop.xlane.xlu0 %4056 }
 0x5b8   : > { %16696 = vrcp.f32 %v4057_v43  ;;  %v15826_v43 = vld [vmem:[#allocation16 + $0x380] ss:$16 sps:$4 sm:$0xff]  }
 0x5c3   : > { %v16695_v46 = vpop.eup %16694 }
 0x5c4   : > { %v4064_v5 = vmul.f32 %v16695_v46, %v16687_v31  ;;  %v15808_v31 = vld [vmem:[#allocation16 + $0x3e0] ss:$16 sps:$4 sm:$0xff]  }
 0x5c5   : > { %v16697_v28 = vpop.eup %16696  ;;  %v15751_v46 = vld [vmem:[#allocation16 + $0x140] ss:$16 sps:$4 sm:$0xff]  }
 0x5c6   : > { %14977 = vmatmul.mubr.msk.f32.vlgmr.msra.gmra.mxu0 %vm4021_vm1, %v4064_v5  ;;  %v4359_v44 = vadd.f32 %v4358_v21, %v4064_v5  ;;  %v4065_v29 = vmul.f32 %v16697_v28, %v16689_v38  ;;  %v15747_v38 = vld [vmem:[#allocation16 + $0x184] ss:$16 sps:$4 sm:$0xff]   ;;  %v15832_v5 = vld [vmem:[#allocation16 + $0x360] ss:$16 sps:$4 sm:$0xff]  }
 0x5c7   : > { %5152 = vmatpush1.bf16.msra.mxu0 %v15712_v17  ;;  %v15756_v17 = vld [vmem:[#allocation16 + $0x124] ss:$16 sps:$4 sm:$0xff]  }
 0x5c8   : > { %14984 = vmatmul.mubr.msk.f32.vlgmr.msra.gmra.mxu1 %vm4021_vm1, %v4065_v29  ;;  %v4360_v25 = vadd.f32 %v4359_v44, %v4065_v29  ;;  %5153 = vmatprep.subr.bf16.mxu0 %v15717_v32  ;;  %v15834_v21 = vld [vmem:[#allocation16 + $0x364] ss:$16 sps:$4 sm:$0xff]   ;;  %v15754_v32 = vld [vmem:[#allocation16 + $0x120] ss:$16 sps:$4 sm:$0xff]  }
 0x5c9   : > { %5193 = vmatpush1.bf16.msra.mxu1 %v15760_v26  ;;  %v15759_v28 = vld [vmem:[#allocation16 + $0x104] ss:$16 sps:$4 sm:$0xff]   ;;  %v15838_v29 = vld [vmem:[#allocation16 + $0x340] ss:$16 sps:$4 sm:$0xff]  }
 0x5ca   : > { %v4361_v11 = vmul.f32 0.25, %v4360_v25  ;;  %5194 = vmatprep.subr.bf16.mxu1 %v15768_v56  ;;  %v15840_v44 = vld [vmem:[#allocation16 + $0x344] ss:$16 sps:$4 sm:$0xff]   ;;  %v15765_v25 = vld [vmem:[#allocation16 + $0xec] ss:$16 sps:$4 sm:$0xff]  }
 0x5cb   : > { %5154 = vmatpush1.bf16.msra.mxu0 %v15715_v6  ;;  %v15757_v6 = vld [vmem:[#allocation16 + $0x100] ss:$16 sps:$4 sm:$0xff]   ;;  %v15852_v26 = vld [vmem:[#allocation16 + $0x304] ss:$16 sps:$4 sm:$0xff]  }
 0x5cc   : > { %5155 = vmatprep.subr.bf16.mxu0 %v15720_v55  ;;  %4362 = vst.msk [vmem:[%s18015_s15] sm:$0xff] %vm4021_vm1, %v4361_v11  ;;  %v15846_v55 = vld [vmem:[#allocation16 + $0x324] ss:$16 sps:$4 sm:$0xff]   ;;  %v15844_v11 = vld [vmem:[#allocation16 + $0x320] ss:$16 sps:$4 sm:$0xff]  }
 0x5cd   : > { %5195 = vmatpush1.bf16.msra.mxu1 %v15766_v62 }
 0x5ce   : > { %5196 = vmatprep.subr.bf16.mxu1 %v15774_v19 }
 0x5cf   : > { %5156 = vmatpush1.bf16.msra.mxu0 %v15718_v33  ;;  %v15850_v33 = vld [vmem:[#allocation16 + $0x300] ss:$16 sps:$4 sm:$0xff]  }
 0x5d0   : > { %5157 = vmatprep.subr.bf16.mxu0 %v15723_v15 }
 0x5d1   : > { %5197 = vmatpush1.bf16.msra.mxu1 %v15772_v30 }
 0x5d2   : > { %5198 = vmatprep.subr.bf16.mxu1 %v15780_v22  ;;  %v15777_v22 = vld [vmem:[#allocation16 + $0xac] ss:$16 sps:$4 sm:$0xff]  }
 0x5d3   : > { %5158 = vmatpush1.bf16.msra.mxu0 %v15721_v8 }
 0x5d4   : > { %5159 = vmatprep.subr.bf16.mxu0 %v15726_v34  ;;  %v15763_v34 = vld [vmem:[#allocation16 + $0xe8] ss:$16 sps:$4 sm:$0xff]  }
 0x5d5   : > { %5199 = vmatpush1.bf16.msra.mxu1 %v15778_v59  ;;  %v15775_v59 = vld [vmem:[#allocation16 + $0xa8] ss:$16 sps:$4 sm:$0xff]  }
 0x5d6   : > { %5200 = vmatprep.subr.bf16.mxu1 %v15786_v61  ;;  %v15789_v61 = vld [vmem:[#allocation16 + $0x6c] ss:$16 sps:$4 sm:$0xff]  }
 0x5d7   : > { %5160 = vmatpush1.bf16.msra.mxu0 %v15724_v63  ;;  %v15771_v63 = vld [vmem:[#allocation16 + $0xcc] ss:$16 sps:$4 sm:$0xff]  }
 0x5d8   : > { %5161 = vmatprep.subr.bf16.mxu0 %v15729_v58  ;;  %v15769_v58 = vld [vmem:[#allocation16 + $0xc8] ss:$16 sps:$4 sm:$0xff]  }
 0x5d9   : > { %5201 = vmatpush1.bf16.msra.mxu1 %v15784_v27  ;;  %v15787_v27 = vld [vmem:[#allocation16 + $0x68] ss:$16 sps:$4 sm:$0xff]  }
 0x5da   : > { %5202 = vmatprep.subr.bf16.mxu1 %v15792_v24  ;;  %v15801_v24 = vld [vmem:[#allocation16 + $0x2c] ss:$16 sps:$4 sm:$0xff]  }
 0x5db   : > { %5162 = vmatpush1.bf16.msra.mxu0 %v15727_v60  ;;  %v15783_v60 = vld [vmem:[#allocation16 + $0x8c] ss:$16 sps:$4 sm:$0xff]  }
 0x5dc   : > { %5163 = vmatprep.subr.bf16.mxu0 %v15732_v9  ;;  %v15781_v9 = vld [vmem:[#allocation16 + $0x88] ss:$16 sps:$4 sm:$0xff]  }
 0x5dd   : > { %5203 = vmatpush1.bf16.msra.mxu1 %v15790_v10  ;;  %v15799_v10 = vld [vmem:[#allocation16 + $0x28] ss:$16 sps:$4 sm:$0xff]  }
 0x5de   : > { %5204 = vmatprep.subr.bf16.mxu1 %v15798_v35  ;;  %v15813_v35 = vld [vmem:[#allocation16 + $0x1ec] ss:$16 sps:$4 sm:$0xff]  }
 0x5df   : > { %5164 = vmatpush1.bf16.msra.mxu0 %v15730_v20  ;;  %v15795_v20 = vld [vmem:[#allocation16 + $0x4c] ss:$16 sps:$4 sm:$0xff]  }
 0x5e0   : > { %5165 = vmatprep.subr.bf16.mxu0 %v15735_v7  ;;  %v15793_v7 = vld [vmem:[#allocation16 + $0x48] ss:$16 sps:$4 sm:$0xff]  }
 0x5e1   : > { %5205 = vmatpush1.bf16.msra.mxu1 %v15796_v36  ;;  %v15811_v36 = vld [vmem:[#allocation16 + $0x1e8] ss:$16 sps:$4 sm:$0xff]  }
 0x5e2   : > { %5206 = vmatprep.subr.bf16.mxu1 %v15804_v52  ;;  %v15825_v52 = vld [vmem:[#allocation16 + $0x1ac] ss:$16 sps:$4 sm:$0xff]  }
 0x5e3   : > { %5166 = vmatpush1.bf16.msra.mxu0 %v15733_v1  ;;  %v15807_v1 = vld [vmem:[#allocation16 + $0xc] ss:$16 sps:$4 sm:$0xff]  }
 0x5e4   : > { %5167 = vmatprep.subr.bf16.mxu0 %v15738_v14  ;;  %v15805_v14 = vld [vmem:[#allocation16 + $0x8] ss:$16 sps:$4 sm:$0xff]  }
 0x5e5   : > { %5207 = vmatpush1.bf16.msra.mxu1 %v15802_v48  ;;  %v15823_v48 = vld [vmem:[#allocation16 + $0x1a8] ss:$16 sps:$4 sm:$0xff]  }
 0x5e6   : > { %5208 = vmatprep.subr.bf16.mxu1 %v15810_v12  ;;  %v15837_v12 = vld [vmem:[#allocation16 + $0x16c] ss:$16 sps:$4 sm:$0xff]  }
 0x5e7   : > { %5168 = vmatpush2.bf16.msra.mxu0 %v15736_v23  ;;  %v15819_v23 = vld [vmem:[#allocation16 + $0x1cc] ss:$16 sps:$4 sm:$0xff]  }
 0x5e8   : > { %5169 = vmatprep.subr.bf16.mxu0 %v15741_v18  ;;  %v15817_v18 = vld [vmem:[#allocation16 + $0x1c8] ss:$16 sps:$4 sm:$0xff]  }
 0x5e9   : > { %5209 = vmatpush2.bf16.msra.mxu1 %v15808_v31  ;;  %v15835_v31 = vld [vmem:[#allocation16 + $0x168] ss:$16 sps:$4 sm:$0xff]  }
 0x5ea   : > { %5210 = vmatprep.subr.bf16.mxu1 %v15816_v39  ;;  %v15849_v39 = vld [vmem:[#allocation16 + $0x12c] ss:$16 sps:$4 sm:$0xff]  }
 0x5eb   : > { %5170 = vmatpush2.bf16.msra.mxu0 %v15739_v50  ;;  %v15831_v50 = vld [vmem:[#allocation16 + $0x18c] ss:$16 sps:$4 sm:$0xff]  }
 0x5ec   : > { %5171 = vmatprep.subr.bf16.mxu0 %v15744_v16  ;;  %v15829_v16 = vld [vmem:[#allocation16 + $0x188] ss:$16 sps:$4 sm:$0xff]  }
 0x5ed   : > { %5211 = vmatpush2.bf16.msra.mxu1 %v15814_v47  ;;  %v15847_v47 = vld [vmem:[#allocation16 + $0x128] ss:$16 sps:$4 sm:$0xff]  }
 0x5ee   : > { %5212 = vmatprep.subr.bf16.mxu1 %v15822_v2 }
 0x5ef   : > { %5172 = vmatpush2.bf16.msra.mxu0 %v15742_v41  ;;  %v15843_v41 = vld [vmem:[#allocation16 + $0x14c] ss:$16 sps:$4 sm:$0xff]  }
 0x5f0   : > { %5173 = vmatprep.subr.bf16.mxu0 %v15747_v38  ;;  %v15841_v38 = vld [vmem:[#allocation16 + $0x148] ss:$16 sps:$4 sm:$0xff]  }
 0x5f1   : > { %5213 = vmatpush2.bf16.msra.mxu1 %v15820_v51 }
 0x5f2   : > { %5214 = vmatprep.subr.bf16.mxu1 %v15828_v53  ;;  %v15856_v53 = vld [vmem:[#allocation16 + $0x2e8] ss:$16 sps:$4 sm:$0xff]  }
 0x5f3   : > { %5174 = vmatpush2.bf16.msra.mxu0 %v15745_v4  ;;  %v15855_v4 = vld [vmem:[#allocation16 + $0x10c] ss:$16 sps:$4 sm:$0xff]  }
 0x5f4   : > { %5175 = vmatprep.subr.bf16.mxu0 %v15750_v42  ;;  %v15853_v42 = vld [vmem:[#allocation16 + $0x108] ss:$16 sps:$4 sm:$0xff]  }
 0x5f5   : > { %5215 = vmatpush2.bf16.msra.mxu1 %v15826_v43 }
 0x5f6   : > { %5216 = vmatprep.subr.bf16.mxu1 %v15834_v21  ;;  %v15859_v21 = vld [vmem:[#allocation16 + $0x2c8] ss:$16 sps:$4 sm:$0xff]  }
 0x5f7   : > { %5176 = vmatpush2.bf16.msra.mxu0 %v15748_v3 }
 0x5f8   : > { %5177 = vmatprep.subr.bf16.mxu0 %v15753_v49 }
 0x5f9   : > { %5217 = vmatpush2.bf16.msra.mxu1 %v15832_v5  ;;  %v15864_v5 = vld [vmem:[#allocation16 + $0x2ac] ss:$16 sps:$4 sm:$0xff]  }
 0x5fa   : > { %5218 = vmatprep.subr.bf16.mxu1 %v15840_v44  ;;  %v15865_v44 = vld [vmem:[#allocation16 + $0x288] ss:$16 sps:$4 sm:$0xff]  }
 0x5fb   : > { %5178 = vmatpush2.bf16.msra.mxu0 %v15751_v46 }
 0x5fc   : > { %5179 = vmatprep.subr.bf16.mxu0 %v15756_v17  ;;  %v15861_v17 = vld [vmem:[#allocation16 + $0x2cc] ss:$16 sps:$4 sm:$0xff]  }
 0x5fd   : > { %5219 = vmatpush2.bf16.msra.mxu1 %v15838_v29  ;;  %v15870_v29 = vld [vmem:[#allocation16 + $0x26c] ss:$16 sps:$4 sm:$0xff]  }
 0x5fe   : > { %5220 = vmatprep.subr.bf16.mxu1 %v15846_v55  ;;  %v15871_v55 = vld [vmem:[#allocation16 + $0x248] ss:$16 sps:$4 sm:$0xff]  }
 0x5ff   : > { %5180 = vmatpush2.bf16.msra.mxu0 %v15754_v32  ;;  %v15862_v32 = vld [vmem:[#allocation16 + $0x2a8] ss:$16 sps:$4 sm:$0xff]  }
 0x600   : > { %5181 = vmatprep.subr.bf16.mxu0 %v15759_v28  ;;  %v15867_v28 = vld [vmem:[#allocation16 + $0x28c] ss:$16 sps:$4 sm:$0xff]  }
 0x601   : > { %5221 = vmatpush2.bf16.msra.mxu1 %v15844_v11  ;;  %v15876_v11 = vld [vmem:[#allocation16 + $0x22c] ss:$16 sps:$4 sm:$0xff]  }
 0x602   : > { %5222 = vmatprep.subr.bf16.mxu1 %v15852_v26  ;;  %v15879_v26 = vld [vmem:[#allocation16 + $0x20c] ss:$16 sps:$4 sm:$0xff]  }
 0x603   : > { %5182 = vmatpush2.bf16.msra.mxu0 %v15757_v6  ;;  %v15868_v6 = vld [vmem:[#allocation16 + $0x268] ss:$16 sps:$4 sm:$0xff]  }
 0x604   : > { %5233 = vmatprep.subr.bf16.mxu0 %v15765_v25  ;;  %v15873_v25 = vld [vmem:[#allocation16 + $0x24c] ss:$16 sps:$4 sm:$0xff]  }
 0x605   : > { %5223 = vmatpush2.bf16.msra.mxu1 %v15850_v33  ;;  %v15874_v33 = vld [vmem:[#allocation16 + $0x228] ss:$16 sps:$4 sm:$0xff]  }
 0x606   : > { %5274 = vmatprep.subr.bf16.mxu1 %v15858_v13  ;;  %v15877_v13 = vld [vmem:[#allocation16 + $0x208] ss:$16 sps:$4 sm:$0xff]  }
 0x646   : > { %v4135_v15 = vpop.f32.mrf.mxu0 }
 0x647   : > { %v18019_v19 = vpack.c.bf16 %v4135_v15, %v4135_v15  ;;  %v15882_v15 = vld [vmem:[#allocation16 + $0x3ec] ss:$16 sps:$4 sm:$0xff]  }
 0x648   : > { %v14964_v56 = vpop.f32.mrf.mxu0  ;;  %v4208_v62 = vpop.f32.mrf.mxu1 }
 0x649   : > { %v4364_v8 = vpack.c.bf16 %v4208_v62, %v4208_v62  ;;  %v15880_v56 = vld [vmem:[#allocation16 + $0x3e8] ss:$16 sps:$4 sm:$0xff]   ;;  %v15885_v62 = vld [vmem:[#allocation16 + $0x3cc] ss:$16 sps:$4 sm:$0xff]  }
 0x64a   : > { %v14971_v30 = vpop.f32.mrf.mxu1 }
 0x64b   : > { %5183 = vmatprep.mubr.bf16.mxu0 %v4364_v8  ;;  %v15891_v30 = vld [vmem:[#allocation16 + $0x38c] ss:$16 sps:$4 sm:$0xff]  }
 0x64c   : > { %5184 = vmatmul.mubr.bf16.vlgmr.msra.gmra.mxu0 %v18019_v19 }
 0x64d   : > { %5234 = vmatpush1.bf16.msra.mxu0 %v15763_v34  ;;  %5265 = vmatprep.mubr.bf16.mxu0 %v4364_v8  ;;  %v15883_v8 = vld [vmem:[#allocation16 + $0x3c8] ss:$16 sps:$4 sm:$0xff]   ;;  %v15888_v34 = vld [vmem:[#allocation16 + $0x3ac] ss:$16 sps:$4 sm:$0xff]  }
 0x64e   : > { %5235 = vmatprep.subr.bf16.mxu0 %v15771_v63  ;;  %v15889_v63 = vld [vmem:[#allocation16 + $0x388] ss:$16 sps:$4 sm:$0xff]  }
 0x651   : > { %5236 = vmatpush1.bf16.msra.mxu0 %v15769_v58  ;;  %v15894_v58 = vld [vmem:[#allocation16 + $0x36c] ss:$16 sps:$4 sm:$0xff]  }
 0x652   : > { %5237 = vmatprep.subr.bf16.mxu0 %v15777_v22  ;;  %v15892_v22 = vld [vmem:[#allocation16 + $0x368] ss:$16 sps:$4 sm:$0xff]  }
 0x655   : > { %5238 = vmatpush1.bf16.msra.mxu0 %v15775_v59  ;;  %v15897_v59 = vld [vmem:[#allocation16 + $0x34c] ss:$16 sps:$4 sm:$0xff]  }
 0x656   : > { %5239 = vmatprep.subr.bf16.mxu0 %v15783_v60  ;;  %v15895_v60 = vld [vmem:[#allocation16 + $0x348] ss:$16 sps:$4 sm:$0xff]  }
 0x659   : > { %5240 = vmatpush1.bf16.msra.mxu0 %v15781_v9  ;;  %v15900_v9 = vld [vmem:[#allocation16 + $0x32c] ss:$16 sps:$4 sm:$0xff]  }
 0x65a   : > { %5241 = vmatprep.subr.bf16.mxu0 %v15789_v61  ;;  %v15898_v61 = vld [vmem:[#allocation16 + $0x328] ss:$16 sps:$4 sm:$0xff]  }
 0x65d   : > { %5242 = vmatpush1.bf16.msra.mxu0 %v15787_v27  ;;  %v15903_v27 = vld [vmem:[#allocation16 + $0x30c] ss:$16 sps:$4 sm:$0xff]  }
 0x65e   : > { %5243 = vmatprep.subr.bf16.mxu0 %v15795_v20  ;;  %v15901_v20 = vld [vmem:[#allocation16 + $0x308] ss:$16 sps:$4 sm:$0xff]  }
 0x661   : > { %5244 = vmatpush1.bf16.msra.mxu0 %v15793_v7 }
 0x662   : > { %5245 = vmatprep.subr.bf16.mxu0 %v15801_v24 }
 0x665   : > { %5246 = vmatpush1.bf16.msra.mxu0 %v15799_v10 }
 0x666   : > { %5247 = vmatprep.subr.bf16.mxu0 %v15807_v1 }
 0x669   : > { %5248 = vmatpush1.bf16.msra.mxu0 %v15805_v14 }
 0x66a   : > { %5249 = vmatprep.subr.bf16.mxu0 %v15813_v35 }
 0x66d   : > { %5250 = vmatpush2.bf16.msra.mxu0 %v15811_v36 }
 0x66e   : > { %5251 = vmatprep.subr.bf16.mxu0 %v15819_v23 }
 0x671   : > { %5252 = vmatpush2.bf16.msra.mxu0 %v15817_v18 }
 0x672   : > { %5253 = vmatprep.subr.bf16.mxu0 %v15825_v52 }
 0x675   : > { %5254 = vmatpush2.bf16.msra.mxu0 %v15823_v48 }
 0x676   : > { %5255 = vmatprep.subr.bf16.mxu0 %v15831_v50 }
 0x679   : > { %5256 = vmatpush2.bf16.msra.mxu0 %v15829_v16  ;;  %v18028_v16 = vsub.s32 7, %v17715_v45 }
 0x67a   : > { %5257 = vmatprep.subr.bf16.mxu0 %v15837_v12  ;;  %v18030_v12 = vld [vmem:[#allocation8 + $0x8] sm:$0xff] }
 0x67d   : > { %5258 = vmatpush2.bf16.msra.mxu0 %v15835_v31  ;;  %v4502_v31 = vrot.slane %v18030_v12, %v18028_v16 }
 0x67e   : > { %5259 = vmatprep.subr.bf16.mxu0 %v15843_v41  ;;  %v18034_v41 = vld [vmem:[#allocation8] sm:$0xff] }
 0x681   : > { %5260 = vmatpush2.bf16.msra.mxu0 %v15841_v38  ;;  %v4498_v38 = vrot.slane %v18034_v41, %v18028_v16 }
 0x682   : > { %5261 = vmatprep.subr.bf16.mxu0 %v15849_v39 }
 0x685   : > { %5262 = vmatpush2.bf16.msra.mxu0 %v15847_v47 }
 0x686   : > { %v4281_v2 = vpop.f32.mrf.mxu0  ;;  %5263 = vmatprep.subr.bf16.mxu0 %v15855_v4  ;;  %v18038_v4 = vld [vmem:[#allocation8 + $0x10] sm:$0xff] }
 0x687   : > { %v18022_v43 = vpack.c.bf16 %v4281_v2, %v4281_v2 }
 0x688   : > { %v14978_v51 = vpop.f32.mrf.mxu0  ;;  %v4354_v3 = vpop.f32.mrf.mxu1 }
 0x689   : > { %v4366_v49 = vpack.c.bf16 %v4354_v3, %v4354_v3  ;;  %5264 = vmatpush2.bf16.msra.mxu0 %v15853_v42  ;;  %v4506_v42 = vrot.slane %v18038_v4, %v18028_v16  ;;  %v18042_v3 = vld [vmem:[#allocation8 + $0x18] sm:$0xff] }
 0x68a   : > { %v14985_v46 = vpop.f32.mrf.mxu1 }
 0x68b   : > { %5224 = vmatprep.mubr.bf16.mxu1 %v4366_v49 }
 0x68c   : > { %5266 = vmatmul.mubr.bf16.vlgmr.msra.gmra.mxu0 %v18019_v19  ;;  %5225 = vmatmul.mubr.bf16.vlgmr.msra.gmra.mxu1 %v18022_v43  ;;  %v15886_v19 = vld [vmem:[#allocation16 + $0x3a8] ss:$16 sps:$4 sm:$0xff]  }
 0x68d   : > { %5275 = vmatpush1.bf16.msra.mxu1 %v15856_v53  ;;  %5306 = vmatprep.mubr.bf16.mxu1 %v4366_v49  ;;  %v4510_v49 = vrot.slane %v18042_v3, %v18028_v16 }
 0x68e   : > { %5276 = vmatprep.subr.bf16.mxu1 %v15861_v17 }
 0x691   : > { %5277 = vmatpush1.bf16.msra.mxu1 %v15859_v21  ;;  %v16773_v21 = vld [vmem:[%s17553_s25] sm:$0xff] }
 0x692   : > { %5278 = vmatprep.subr.bf16.mxu1 %v15864_v5 }
 0x695   : > { %5279 = vmatpush1.bf16.msra.mxu1 %v15862_v32 }
 0x696   : > { %5280 = vmatprep.subr.bf16.mxu1 %v15867_v28 }
 0x699   : > { %5281 = vmatpush1.bf16.msra.mxu1 %v15865_v44 }
 0x69a   : > { %5282 = vmatprep.subr.bf16.mxu1 %v15870_v29  ;;  %v16774_v29 = vld [vmem:[%s17553_s25 + $0x10] sm:$0xff] }
 0x69d   : > { %5283 = vmatpush1.bf16.msra.mxu1 %v15868_v6 }
 0x69e   : > { %5284 = vmatprep.subr.bf16.mxu1 %v15873_v25 }
 0x6a1   : > { %5285 = vmatpush1.bf16.msra.mxu1 %v15871_v55 }
 0x6a2   : > { %5286 = vmatprep.subr.bf16.mxu1 %v15876_v11 }
 0x6a5   : > { %5287 = vmatpush1.bf16.msra.mxu1 %v15874_v33  ;;  %v16775_v33 = vld [vmem:[%s17553_s25 + $0x18] sm:$0xff] }
 0x6a6   : > { %5288 = vmatprep.subr.bf16.mxu1 %v15879_v26 }
 0x6a9   : > { %5289 = vmatpush1.bf16.msra.mxu1 %v15877_v13 }
 0x6aa   : > { %5290 = vmatprep.subr.bf16.mxu1 %v15882_v15 }
 0x6ad   : > { %5291 = vmatpush2.bf16.msra.mxu1 %v15880_v56 }
 0x6ae   : > { %5292 = vmatprep.subr.bf16.mxu1 %v15885_v62  ;;  %v5501_v62 = vld [vmem:[#allocation17 + $0x380] sm:$0xff] }
 0x6b1   : > { %5293 = vmatpush2.bf16.msra.mxu1 %v15883_v8  ;;  %v5509_v8 = vld [vmem:[#allocation17 + $0x3c0] sm:$0xff] }
 0x6b2   : > { %5294 = vmatprep.subr.bf16.mxu1 %v15888_v34  ;;  %v5757_v34 = vld [vmem:[#allocation17 + $0xb80] sm:$0xff] }
 0x6b5   : > { %5295 = vmatpush2.bf16.msra.mxu1 %v15886_v19  ;;  %v13979_v19 = vcombine.low %v5501_v62, %v5509_v8 }
 0x6b6   : > { %5296 = vmatprep.subr.bf16.mxu1 %v15891_v30  ;;  %v13980_v30 = vcombine.high %v5501_v62, %v5509_v8  ;;  %v5669_v62 = vld [vmem:[#allocation17 + $0x8c0] sm:$0xff] }
 0x6b8   : > { %8543 = vmatprep.subr.bf16.mxu0 %v13980_v30 }
 0x6b9   : > { %5297 = vmatpush2.bf16.msra.mxu1 %v15889_v63  ;;  %v5765_v63 = vld [vmem:[#allocation17 + $0xbc0] sm:$0xff]  ;;  %8544 = vmatpush1.bf16.msra.mxu0 %v13979_v19 }
 0x6ba   : > { %5298 = vmatprep.subr.bf16.mxu1 %v15894_v58  ;;  %v5485_v58 = vld [vmem:[#allocation17 + $0x300] sm:$0xff] }
 0x6bd   : > { %5299 = vmatpush2.bf16.msra.mxu1 %v15892_v22  ;;  %v5493_v22 = vld [vmem:[#allocation17 + $0x340] sm:$0xff] }
 0x6be   : > { %5300 = vmatprep.subr.bf16.mxu1 %v15897_v59  ;;  %v14235_v59 = vcombine.low %v5757_v34, %v5765_v63 }
 0x6c1   : > { %5301 = vmatpush2.bf16.msra.mxu1 %v15895_v60  ;;  %v14236_v60 = vcombine.high %v5757_v34, %v5765_v63  ;;  %v5389_v63 = vld [vmem:[#allocation17] sm:$0xff] }
 0x6c2   : > { %5302 = vmatprep.subr.bf16.mxu1 %v15900_v9  ;;  %v13964_v9 = vcombine.high %v5485_v58, %v5493_v22 }
 0x6c4   : > { %8545 = vmatprep.subr.bf16.mxu0 %v13964_v9 }
 0x6c5   : > { %5303 = vmatpush2.bf16.msra.mxu1 %v15898_v61  ;;  %v5741_v61 = vld [vmem:[#allocation17 + $0xb00] sm:$0xff] }
 0x6c6   : > { %5304 = vmatprep.subr.bf16.mxu1 %v15903_v27  ;;  %v5749_v27 = vld [vmem:[#allocation17 + $0xb40] sm:$0xff] }
 0x6c9   : > { %5305 = vmatpush2.bf16.msra.mxu1 %v15901_v20  ;;  %v5469_v20 = vld [vmem:[#allocation17 + $0x280] sm:$0xff] }
 0x6ca   : > { %8584 = vmatprep.subr.bf16.mxu1 %v14236_v60 }
 0x6cc   : > { %5307 = vmatmul.mubr.bf16.vlgmr.msra.gmra.mxu1 %v18022_v43  ;;  %v16772_v43 = vld [vmem:[%s17553_s25 + $0x8] sm:$0xff] }
 0x6cd   : > { %8585 = vmatpush1.bf16.msra.mxu1 %v14235_v59  ;;  %v5653_v59 = vld [vmem:[#allocation17 + $0x840] sm:$0xff] }
 0x70c   : > { %v5185_v7 = vpop.f32.mrf.mxu0 }
 0x70d   : > { %v5186_v47 = vadd.f32 %v5185_v7, %v4498_v38  ;;  %v14220_v7 = vcombine.high %v5741_v61, %v5749_v27 }
 0x70e   : > { %v5187_v24 = vpop.f32.mrf.mxu0 }
 0x70f   : > { %v5188_v39 = vadd.f32 %v5187_v24, %v4502_v31  ;;  %v5477_v24 = vld [vmem:[#allocation17 + $0x2c0] sm:$0xff]  ;;  %8586 = vmatprep.subr.bf16.mxu1 %v14220_v7 }
 0x710   : > { %v5189_v10 = vpop.f32.mrf.mxu0  ;;  %v13947_v31 = vcombine.low %v5469_v20, %v5477_v24  ;;  %v5637_v7 = vld [vmem:[#allocation17 + $0x7c0] sm:$0xff] }
 0x711   : > { %v5725_v10 = vld [vmem:[#allocation17 + $0xa80] sm:$0xff] }
 0x712   : > { %v5190_v1 = vpop.f32.mrf.mxu0 }
 0x713   : > { %v5733_v1 = vld [vmem:[#allocation17 + $0xac0] sm:$0xff] }
 0x714   : > { %v14203_v38 = vcombine.low %v5725_v10, %v5733_v1 }
 0x74c   : > { %v5267_v14 = vpop.f32.mrf.mxu0  ;;  %v5226_v35 = vpop.f32.mrf.mxu1 }
 0x74d   : > { %v5227_v51 = vadd.f32 %v5226_v35, %v5186_v47  ;;  %v5268_v53 = vadd.f32 %v5267_v14, %v4506_v42  ;;  %v13963_v14 = vcombine.low %v5485_v58, %v5493_v22  ;;  %v14219_v35 = vcombine.low %v5741_v61, %v5749_v27  ;;  %v5437_v42 = vld [vmem:[#allocation17 + $0x180] sm:$0xff] }
 0x74e   : > { %v5269_v36 = vpop.f32.mrf.mxu0  ;;  %v5228_v23 = vpop.f32.mrf.mxu1  ;;  %v5397_v58 = vld [vmem:[#allocation17 + $0x40] sm:$0xff] }
 0x74f   : > { %v5229_v2 = vadd.f32 %v5228_v23, %v5188_v39  ;;  %v18050_v5 = vadd.f32 %v16773_v21, %v5227_v51  ;;  %v5270_v32 = vadd.f32 %v5269_v36, %v4510_v49  ;;  %v13948_v36 = vcombine.high %v5469_v20, %v5477_v24  ;;  %8546 = vmatpush1.bf16.msra.mxu0 %v13963_v14  ;;  %v5693_v51 = vld [vmem:[#allocation17 + $0x980] sm:$0xff] }
 0x750   : > { %v5271_v18 = vpop.f32.mrf.mxu0  ;;  %v5230_v52 = vpop.f32.mrf.mxu1  ;;  %v14204_v23 = vcombine.high %v5725_v10, %v5733_v1  ;;  %8587 = vmatpush1.bf16.msra.mxu1 %v14219_v35  ;;  %v5701_v49 = vld [vmem:[#allocation17 + $0x9c0] sm:$0xff]  ;;  %v13868_v61 = vcombine.high %v5389_v63, %v5397_v58  ;;  %v13867_v1 = vcombine.low %v5389_v63, %v5397_v58 }
 0x751   : > { %v18047_v46 = vadd.f32 %v16772_v43, %v5229_v2  ;;  %v5453_v18 = vld [vmem:[#allocation17 + $0x200] sm:$0xff]  ;;  %8547 = vmatprep.subr.bf16.mxu0 %v13948_v36  ;;  %v14172_v21 = vcombine.high %v5693_v51, %v5701_v49 }
 0x752   : > { %v5272_v48 = vpop.f32.mrf.mxu0  ;;  %v5231_v50 = vpop.f32.mrf.mxu1  ;;  %v5461_v52 = vld [vmem:[#allocation17 + $0x240] sm:$0xff]  ;;  %8588 = vmatprep.subr.bf16.mxu1 %v14204_v23 }
 0x753   : > { %v5319_v55 = vadd.f32 %v18047_v46, %v18050_v5  ;;  %v5709_v48 = vld [vmem:[#allocation17 + $0xa00] sm:$0xff]  ;;  %v13932_v39 = vcombine.high %v5453_v18, %v5461_v52  ;;  %8548 = vmatpush1.bf16.msra.mxu0 %v13947_v31 }
 0x754   : > { %v5717_v50 = vld [vmem:[#allocation17 + $0xa40] sm:$0xff]  ;;  %8589 = vmatpush1.bf16.msra.mxu1 %v14203_v38 }
 0x755   : > { %v14188_v47 = vcombine.high %v5709_v48, %v5717_v50  ;;  %v5445_v2 = vld [vmem:[#allocation17 + $0x1c0] sm:$0xff]  ;;  %8549 = vmatprep.subr.bf16.mxu0 %v13932_v39  ;;  %v14187_v43 = vcombine.low %v5709_v48, %v5717_v50 }
 0x756   : > { %v5645_v22 = vld [vmem:[#allocation17 + $0x800] sm:$0xff] }
 0x757   : > { %8590 = vmatprep.subr.bf16.mxu1 %v14188_v47  ;;  %v14124_v27 = vcombine.high %v5645_v22, %v5653_v59  ;;  %v5629_v20 = vld [vmem:[#allocation17 + $0x780] sm:$0xff]  ;;  %v14123_v14 = vcombine.low %v5645_v22, %v5653_v59 }
 0x758   : > { %8591 = vmatpush1.bf16.msra.mxu1 %v14187_v43  ;;  %v5885_v24 = vld [vmem:[#allocation17 + $0xf80] sm:$0xff]  ;;  %v14108_v35 = vcombine.high %v5629_v20, %v5637_v7  ;;  %v14107_v50 = vcombine.low %v5629_v20, %v5637_v7 }
 0x759   : > { %8592 = vmatprep.subr.bf16.mxu1 %v14172_v21  ;;  %v5893_v10 = vld [vmem:[#allocation17 + $0xfc0] sm:$0xff] }
 0x75a   : > { %v14364_v36 = vcombine.high %v5885_v24, %v5893_v10  ;;  %v5613_v23 = vld [vmem:[#allocation17 + $0x700] sm:$0xff]  ;;  %v14363_v31 = vcombine.low %v5885_v24, %v5893_v10 }
 0x75b   : > { %v5877_v48 = vld [vmem:[#allocation17 + $0xf40] sm:$0xff] }
 0x75c   : > { %v5837_v63 = vld [vmem:[#allocation17 + $0xe00] sm:$0xff] }
 0x75d   : > { %v5845_v22 = vld [vmem:[#allocation17 + $0xe40] sm:$0xff] }
 0x75e   : > { %v5565_v59 = vld [vmem:[#allocation17 + $0x580] sm:$0xff]  ;;  %v14315_v7 = vcombine.low %v5837_v63, %v5845_v22 }
 0x75f   : > { %v5829_v20 = vld [vmem:[#allocation17 + $0xdc0] sm:$0xff] }
 0x78c   : > { %v5308_v17 = vpop.f32.mrf.mxu1 }
 0x78d   : > { %v5309_v28 = vadd.f32 %v5308_v17, %v5268_v53  ;;  %v13931_v53 = vcombine.low %v5453_v18, %v5461_v52  ;;  %v13916_v17 = vcombine.high %v5437_v42, %v5445_v2  ;;  %v5621_v18 = vld [vmem:[#allocation17 + $0x740] sm:$0xff] }
 0x78e   : > { %v5310_v44 = vpop.f32.mrf.mxu1  ;;  %v5869_v52 = vld [vmem:[#allocation17 + $0xf00] sm:$0xff]  ;;  %v14092_v38 = vcombine.high %v5613_v23, %v5621_v18  ;;  %v14091_v47 = vcombine.low %v5613_v23, %v5621_v18 }
 0x78f   : > { %v18053_v6 = vadd.f32 %v16774_v29, %v5309_v28  ;;  %v5311_v25 = vadd.f32 %v5310_v44, %v5270_v32  ;;  %v5421_v32 = vld [vmem:[#allocation17 + $0x100] sm:$0xff]  ;;  %8550 = vmatpush1.bf16.msra.mxu0 %v13931_v53  ;;  %v14348_v39 = vcombine.high %v5869_v52, %v5877_v48 }
 0x790   : > { %v5312_v11 = vpop.f32.mrf.mxu1  ;;  %v5429_v28 = vld [vmem:[#allocation17 + $0x140] sm:$0xff]  ;;  %8551 = vmatprep.subr.bf16.mxu0 %v13916_v17 }
 0x791   : > { %v18058_v26 = vadd.f32 %v16775_v33, %v5311_v25  ;;  %v5320_v13 = vadd.f32 %v5319_v55, %v18053_v6  ;;  %v5677_v44 = vld [vmem:[#allocation17 + $0x900] sm:$0xff]  ;;  %v13915_v25 = vcombine.low %v5437_v42, %v5445_v2  ;;  %v14171_v55 = vcombine.low %v5693_v51, %v5701_v49 }
 0x792   : > { %v5313_v15 = vpop.f32.mrf.mxu1  ;;  %v5685_v29 = vld [vmem:[#allocation17 + $0x940] sm:$0xff]  ;;  %v13900_v11 = vcombine.high %v5421_v32, %v5429_v28  ;;  %v13899_v8 = vcombine.low %v5421_v32, %v5429_v28  ;;  %v14347_v42 = vcombine.low %v5869_v52, %v5877_v48 }
 0x793   : > { %v5321_v56 = vadd.f32 %v5320_v13, %v18058_v26  ;;  %v14156_v33 = vcombine.high %v5677_v44, %v5685_v29  ;;  %v5405_v13 = vld [vmem:[#allocation17 + $0x80] sm:$0xff]  ;;  %8552 = vmatpush1.bf16.msra.mxu0 %v13915_v25  ;;  %8593 = vmatpush1.bf16.msra.mxu1 %v14171_v55  ;;  %v14155_v34 = vcombine.low %v5677_v44, %v5685_v29 }
 0x794   : > { %v5413_v15 = vld [vmem:[#allocation17 + $0xc0] sm:$0xff]  ;;  %8553 = vmatprep.subr.bf16.mxu0 %v13900_v11 }
 0x795   : > { %5322 = vadd.xlane.f32.xlu0 %v5321_v56  ;;  %v5661_v56 = vld [vmem:[#allocation17 + $0x880] sm:$0xff]  ;;  %v13884_v19 = vcombine.high %v5405_v13, %v5413_v15  ;;  %8594 = vmatprep.subr.bf16.mxu1 %v14156_v33  ;;  %v13883_v60 = vcombine.low %v5405_v13, %v5413_v15 }
 0x796   : > { %v14140_v30 = vcombine.high %v5661_v56, %v5669_v62  ;;  %v14139_v9 = vcombine.low %v5661_v56, %v5669_v62  ;;  %v5597_v11 = vld [vmem:[#allocation17 + $0x680] sm:$0xff] }
 0x797   : > { %8554 = vmatpush1.bf16.msra.mxu0 %v13899_v8  ;;  %8595 = vmatpush1.bf16.msra.mxu1 %v14155_v34  ;;  %v5605_v33 = vld [vmem:[#allocation17 + $0x6c0] sm:$0xff] }
 0x798   : > { %8555 = vmatprep.subr.bf16.mxu0 %v13884_v19  ;;  %8596 = vmatprep.subr.bf16.mxu1 %v14140_v30  ;;  %v5853_v13 = vld [vmem:[#allocation17 + $0xe80] sm:$0xff]  ;;  %v14076_v15 = vcombine.high %v5597_v11, %v5605_v33  ;;  %v14075_v62 = vcombine.low %v5597_v11, %v5605_v33 }
 0x799   : > { %v5861_v56 = vld [vmem:[#allocation17 + $0xec0] sm:$0xff] }
 0x79a   : > { %v14331_v8 = vcombine.low %v5853_v13, %v5861_v56  ;;  %v14332_v34 = vcombine.high %v5853_v13, %v5861_v56  ;;  %v5581_v19 = vld [vmem:[#allocation17 + $0x600] sm:$0xff]  ;;  %v5510_v56 = vld [vmem:[#allocation17 + $0x3c8] sm:$0xff] }
 0x79b   : > { %8556 = vmatpush1.bf16.msra.mxu0 %v13883_v60  ;;  %8597 = vmatpush1.bf16.msra.mxu1 %v14139_v9  ;;  %v5589_v30 = vld [vmem:[#allocation17 + $0x640] sm:$0xff] }
 0x79c   : > { %8557 = vmatprep.subr.bf16.mxu0 %v13868_v61  ;;  %8598 = vmatprep.subr.bf16.mxu1 %v14124_v27  ;;  %v14060_v58 = vcombine.high %v5581_v19, %v5589_v30  ;;  %v5573_v60 = vld [vmem:[#allocation17 + $0x5c0] sm:$0xff]  ;;  %v14059_v9 = vcombine.low %v5581_v19, %v5589_v30  ;;  %v14316_v61 = vcombine.high %v5837_v63, %v5845_v22  ;;  %v5766_v19 = vld [vmem:[#allocation17 + $0xbc8] sm:$0xff] }
 0x79d   : > { %v5821_v27 = vld [vmem:[#allocation17 + $0xd80] sm:$0xff]  ;;  %v14044_v24 = vcombine.high %v5565_v59, %v5573_v60  ;;  %v14043_v23 = vcombine.low %v5565_v59, %v5573_v60  ;;  %v18083_v60 = vsub.s32 2, %v17715_v45 }
 0x79e   : > { %v14300_v10 = vcombine.high %v5821_v27, %v5829_v20  ;;  %v14299_v18 = vcombine.low %v5821_v27, %v5829_v20 }
 0x79f   : > { %8558 = vmatpush1.bf16.msra.mxu0 %v13867_v1  ;;  %8599 = vmatpush1.bf16.msra.mxu1 %v14123_v14  ;;  %v5549_v1 = vld [vmem:[#allocation17 + $0x500] sm:$0xff]  ;;  %v5360_v27 = vrot.slane %v18042_v3, %v18083_v60  ;;  %v5348_v20 = vrot.slane %v18034_v41, %v18083_v60 }
 0x7a0   : > { %8559 = vmatprep.subr.bf16.mxu0 %v14108_v35  ;;  %8600 = vmatprep.subr.bf16.mxu1 %v14364_v36  ;;  %v5557_v14 = vld [vmem:[#allocation17 + $0x540] sm:$0xff] }
 0x7a1   : > { %v5805_v35 = vld [vmem:[#allocation17 + $0xd00] sm:$0xff]  ;;  %v14028_v52 = vcombine.high %v5549_v1, %v5557_v14 }
 0x7a2   : > { %v5813_v36 = vld [vmem:[#allocation17 + $0xd40] sm:$0xff] }
 0x7a3   : > { %8560 = vmatpush2.bf16.msra.mxu0 %v14107_v50  ;;  %8601 = vmatpush2.bf16.msra.mxu1 %v14363_v31  ;;  %v14284_v48 = vcombine.high %v5805_v35, %v5813_v36  ;;  %v5533_v50 = vld [vmem:[#allocation17 + $0x480] sm:$0xff] }
 0x7a4   : > { %8561 = vmatprep.subr.bf16.mxu0 %v14092_v38  ;;  %8602 = vmatprep.subr.bf16.mxu1 %v14348_v39  ;;  %v5541_v31 = vld [vmem:[#allocation17 + $0x4c0] sm:$0xff] }
 0x7a5   : > { %v5789_v38 = vld [vmem:[#allocation17 + $0xc80] sm:$0xff] }
 0x7a6   : > { %v5797_v39 = vld [vmem:[#allocation17 + $0xcc0] sm:$0xff] }
 0x7a7   : > { %8562 = vmatpush2.bf16.msra.mxu0 %v14091_v47  ;;  %8603 = vmatpush2.bf16.msra.mxu1 %v14347_v42  ;;  %v14027_v47 = vcombine.low %v5549_v1, %v5557_v14  ;;  %v14283_v42 = vcombine.low %v5805_v35, %v5813_v36 }
 0x7a8   : > { %8563 = vmatprep.subr.bf16.mxu0 %v14076_v15  ;;  %8604 = vmatprep.subr.bf16.mxu1 %v14332_v34  ;;  %v5502_v15 = vld [vmem:[#allocation17 + $0x388] sm:$0xff] }
 0x7a9   : > { %v13982_v34 = vcombine.high %v5502_v15, %v5510_v56 }
 0x7ab   : > { %8564 = vmatpush2.bf16.msra.mxu0 %v14075_v62  ;;  %8605 = vmatpush2.bf16.msra.mxu1 %v14331_v8  ;;  %v5758_v62 = vld [vmem:[#allocation17 + $0xb88] sm:$0xff]  ;;  %v13981_v8 = vcombine.low %v5502_v15, %v5510_v56 }
 0x7ac   : > { %8565 = vmatprep.subr.bf16.mxu0 %v14060_v58  ;;  %8606 = vmatprep.subr.bf16.mxu1 %v14316_v61  ;;  %v14237_v30 = vcombine.low %v5758_v62, %v5766_v19  ;;  %v14238_v63 = vcombine.high %v5758_v62, %v5766_v19  ;;  %v5352_v61 = vrot.slane %v18030_v12, %v18083_v60  ;;  %v5710_v15 = vld [vmem:[#allocation17 + $0xa08] sm:$0xff] }
 0x7ad   : > { %v5718_v56 = vld [vmem:[#allocation17 + $0xa48] sm:$0xff] }
 0x7ae   : > { %v14190_v19 = vcombine.high %v5710_v15, %v5718_v56 }
 0x7af   : > { %8566 = vmatpush2.bf16.msra.mxu0 %v14059_v9  ;;  %8607 = vmatpush2.bf16.msra.mxu1 %v14315_v7  ;;  %v18086_v9 = vsub.s32 3, %v17715_v45  ;;  %v5356_v7 = vrot.slane %v18038_v4, %v18083_v60 }
 0x7b0   : > { %8567 = vmatprep.subr.bf16.mxu0 %v14044_v24  ;;  %8608 = vmatprep.subr.bf16.mxu1 %v14300_v10 }
 0x7b1   : > { %v5372_v10 = vrot.slane %v18030_v12, %v18086_v9  ;;  %v5380_v45 = vrot.slane %v18042_v3, %v18086_v9  ;;  %v5368_v1 = vrot.slane %v18034_v41, %v18086_v9  ;;  %v5376_v14 = vrot.slane %v18038_v4, %v18086_v9  ;;  %v5486_v41 = vld [vmem:[#allocation17 + $0x308] sm:$0xff] }
 0x7b2   : > { %v5750_v4 = vld [vmem:[#allocation17 + $0xb48] sm:$0xff] }
 0x7b3   : > { %8568 = vmatpush2.bf16.msra.mxu0 %v14043_v23  ;;  %8609 = vmatpush2.bf16.msra.mxu1 %v14299_v18 }
 0x7b4   : > { %8569 = vmatprep.subr.bf16.mxu0 %v14028_v52  ;;  %8610 = vmatprep.subr.bf16.mxu1 %v14284_v48 }
 0x7b7   : > { %8570 = vmatpush2.bf16.msra.mxu0 %v14027_v47  ;;  %8611 = vmatpush2.bf16.msra.mxu1 %v14283_v42  ;;  %v5494_v47 = vld [vmem:[#allocation17 + $0x348] sm:$0xff] }
 0x7b8   : > { %v5742_v42 = vld [vmem:[#allocation17 + $0xb08] sm:$0xff] }
 0x81e   : > { %v5323_v2 = vpop.xlane.xlu0 %5322 }
 0x81f   : > { %v5324_v51 = vmul.f32 0.001953125, %v5323_v2  ;;  %v14012_v2 = vcombine.high %v5533_v50, %v5541_v31 }
 0x821   : > { %v18063_v49 = vsub.f32 %v18050_v5, %v5324_v51  ;;  %v18066_v53 = vsub.f32 %v18047_v46, %v5324_v51  ;;  %v18069_v43 = vsub.f32 %v18053_v6, %v5324_v51  ;;  %v18072_v17 = vsub.f32 %v18058_v26, %v5324_v51  ;;  %8571 = vmatprep.subr.bf16.mxu0 %v14012_v2 }
 0x822   : > { %v14268_v51 = vcombine.high %v5789_v38, %v5797_v39 }
 0x823   : > { %v5329_v21 = vmul.f32 %v18063_v49, %v18063_v49  ;;  %v5330_v32 = vmul.f32 %v18066_v53, %v18066_v53  ;;  %v5331_v28 = vmul.f32 %v18069_v43, %v18069_v43  ;;  %v5332_v29 = vmul.f32 %v18072_v17, %v18072_v17 }
 0x824   : > { %8612 = vmatprep.subr.bf16.mxu1 %v14268_v51  ;;  %v13966_v51 = vcombine.high %v5486_v41, %v5494_v47 }
 0x825   : > { %v5333_v44 = vadd.f32 %v5330_v32, %v5329_v21  ;;  %v5517_v21 = vld [vmem:[#allocation17 + $0x400] sm:$0xff] }
 0x826   : > { %v5525_v32 = vld [vmem:[#allocation17 + $0x440] sm:$0xff] }
 0x827   : > { %v5334_v25 = vadd.f32 %v5333_v44, %v5331_v28  ;;  %v5773_v28 = vld [vmem:[#allocation17 + $0xc00] sm:$0xff]  ;;  %v13995_v33 = vcombine.low %v5517_v21, %v5525_v32 }
 0x828   : > { %v5781_v44 = vld [vmem:[#allocation17 + $0xc40] sm:$0xff] }
 0x829   : > { %v5335_v55 = vadd.f32 %v5334_v25, %v5332_v29  ;;  %v14011_v29 = vcombine.low %v5533_v50, %v5541_v31  ;;  %v14267_v25 = vcombine.low %v5789_v38, %v5797_v39  ;;  %v14252_v11 = vcombine.high %v5773_v28, %v5781_v44 }
 0x82a   : > { %v14251_v13 = vcombine.low %v5773_v28, %v5781_v44  ;;  %v5726_v28 = vld [vmem:[#allocation17 + $0xa88] sm:$0xff] }
 0x82b   : > { %5336 = vadd.xlane.f32.xlu1 %v5335_v55  ;;  %v13996_v55 = vcombine.high %v5517_v21, %v5525_v32  ;;  %8572 = vmatpush2.bf16.msra.mxu0 %v14011_v29  ;;  %v14222_v21 = vcombine.high %v5742_v42, %v5750_v4  ;;  %v5478_v32 = vld [vmem:[#allocation17 + $0x2c8] sm:$0xff]  ;;  %v13965_v29 = vcombine.low %v5486_v41, %v5494_v47 }
 0x82c   : > { %8613 = vmatpush2.bf16.msra.mxu1 %v14267_v25  ;;  %v5734_v44 = vld [vmem:[#allocation17 + $0xac8] sm:$0xff]  ;;  %v14221_v25 = vcombine.low %v5742_v42, %v5750_v4 }
 0x82d   : > { %8573 = vmatprep.subr.bf16.mxu0 %v13996_v55  ;;  %8614 = vmatprep.subr.bf16.mxu1 %v14252_v11  ;;  %v14206_v11 = vcombine.high %v5726_v28, %v5734_v44  ;;  %v5646_v41 = vld [vmem:[#allocation17 + $0x808] sm:$0xff] }
 0x82e   : > { %v5654_v47 = vld [vmem:[#allocation17 + $0x848] sm:$0xff] }
 0x82f   : > { %8574 = vmatpush2.bf16.msra.mxu0 %v13995_v33  ;;  %v5454_v33 = vld [vmem:[#allocation17 + $0x208] sm:$0xff] }
 0x830   : > { %8615 = vmatpush2.bf16.msra.mxu1 %v14251_v13  ;;  %8625 = vmatprep.subr.bf16.mxu0 %v13982_v34  ;;  %v5462_v13 = vld [vmem:[#allocation17 + $0x248] sm:$0xff]  ;;  %v14205_v34 = vcombine.low %v5726_v28, %v5734_v44 }
 0x831   : > { %8666 = vmatprep.subr.bf16.mxu1 %v14238_v63  ;;  %v5446_v63 = vld [vmem:[#allocation17 + $0x1c8] sm:$0xff] }
 0x832   : > { %v5886_v28 = vld [vmem:[#allocation17 + $0xf88] sm:$0xff] }
 0x833   : > { %v5894_v44 = vld [vmem:[#allocation17 + $0xfc8] sm:$0xff] }
 0x8b4   : > { %v5337_v58 = vpop.xlane.xlu1 %5336 }
 0x8b5   : > { %v5338_v22 = vmul.f32 0.001953125, %v5337_v58  ;;  %v5694_v58 = vld [vmem:[#allocation17 + $0x988] sm:$0xff] }
 0x8b7   : > { %v5339_v59 = vadd.f32 1e-05, %v5338_v22  ;;  %v5702_v22 = vld [vmem:[#allocation17 + $0x9c8] sm:$0xff] }
 0x8b9   : > { %16698 = vrsqrt.f32 %v5339_v59  ;;  %v13933_v59 = vcombine.low %v5454_v33, %v5462_v13 }
 0x8c6   : > { %v16699_v24 = vpop.eup %16698 }
 0x8c7   : > { %v5342_v35 = vmul.f32 %v16699_v24, %v18066_v53  ;;  %v5344_v36 = vmul.f32 %v16699_v24, %v18072_v17  ;;  %v5341_v23 = vmul.f32 %v16699_v24, %v18063_v49  ;;  %v5343_v18 = vmul.f32 %v16699_v24, %v18069_v43  ;;  %v5470_v43 = vld [vmem:[#allocation17 + $0x288] sm:$0xff] }
 0x8c8   : > { %v13950_v55 = vcombine.high %v5470_v43, %v5478_v32  ;;  %v13949_v62 = vcombine.low %v5470_v43, %v5478_v32  ;;  %v5430_v24 = vld [vmem:[#allocation17 + $0x148] sm:$0xff] }
 0x8c9   : > { %v5362_v52 = vmul.f32 %v5352_v61, %v5342_v35  ;;  %v5364_v48 = vmul.f32 %v5360_v27, %v5344_v36  ;;  %v5361_v12 = vmul.f32 %v5348_v20, %v5341_v23  ;;  %v5363_v50 = vmul.f32 %v5356_v7, %v5343_v18  ;;  %v5422_v7 = vld [vmem:[#allocation17 + $0x108] sm:$0xff] }
 0x8ca   : > { %v14189_v61 = vcombine.low %v5710_v15, %v5718_v56  ;;  %v14174_v20 = vcombine.high %v5694_v58, %v5702_v22  ;;  %v13902_v35 = vcombine.high %v5422_v7, %v5430_v24  ;;  %v5406_v23 = vld [vmem:[#allocation17 + $0x88] sm:$0xff] }
 0x8cb   : > { %v5382_v31 = vadd.f32 %v5372_v10, %v5362_v52  ;;  %v5384_v3 = vadd.f32 %v5380_v45, %v5364_v48  ;;  %v5381_v38 = vadd.f32 %v5368_v1, %v5361_v12  ;;  %v5383_v39 = vadd.f32 %v5376_v14, %v5363_v50  ;;  %v5678_v10 = vld [vmem:[#allocation17 + $0x908] sm:$0xff] }
 0x8cc   : > { %v5686_v45 = vld [vmem:[#allocation17 + $0x948] sm:$0xff]  ;;  %v14173_v14 = vcombine.low %v5694_v58, %v5702_v22  ;;  %v13901_v12 = vcombine.low %v5422_v7, %v5430_v24 }
 0x8cd   : > { %v18108_v2 = vpack.c.bf16 %v5382_v31, %v5382_v31  ;;  %v18110_v53 = vpack.c.bf16 %v5384_v3, %v5384_v3  ;;  %v18112_v17 = vpack.c.bf16 %v5381_v38, %v5381_v38  ;;  %v18114_v49 = vpack.c.bf16 %v5383_v39, %v5383_v39  ;;  %v5414_v18 = vld [vmem:[#allocation17 + $0xc8] sm:$0xff] }
 0x8ce   : > { %v14158_v36 = vcombine.high %v5678_v10, %v5686_v45  ;;  %v5662_v52 = vld [vmem:[#allocation17 + $0x888] sm:$0xff]  ;;  %v14157_v50 = vcombine.low %v5678_v10, %v5686_v45  ;;  %v13886_v31 = vcombine.high %v5406_v23, %v5414_v18  ;;  %v13885_v42 = vcombine.low %v5406_v23, %v5414_v18 }
 0x8cf   : > { %8575 = vmatprep.mubr.bf16.mxu0 %v18108_v2  ;;  %8616 = vmatprep.mubr.bf16.mxu1 %v18110_v53  ;;  %v5670_v48 = vld [vmem:[#allocation17 + $0x8c8] sm:$0xff] }
 0x8d0   : > { %8576 = vmatmul.mubr.bf16.vlgmr.msra.gmra.mxu0 %v18112_v17  ;;  %8617 = vmatmul.mubr.bf16.vlgmr.msra.gmra.mxu1 %v18114_v49  ;;  %v14142_v3 = vcombine.high %v5662_v52, %v5670_v48  ;;  %v5390_v38 = vld [vmem:[#allocation17 + $0x8] sm:$0xff]  ;;  %v14141_v4 = vcombine.low %v5662_v52, %v5670_v48 }
 0x8d1   : > { %8626 = vmatpush1.bf16.msra.mxu0 %v13981_v8  ;;  %8667 = vmatpush1.bf16.msra.mxu1 %v14237_v30  ;;  %v13934_v8 = vcombine.high %v5454_v33, %v5462_v13  ;;  %v5438_v30 = vld [vmem:[#allocation17 + $0x188] sm:$0xff] }
 0x8d2   : > { %8657 = vmatprep.mubr.bf16.mxu0 %v18108_v2  ;;  %8698 = vmatprep.mubr.bf16.mxu1 %v18110_v53  ;;  %v13918_v27 = vcombine.high %v5438_v30, %v5446_v63  ;;  %v13917_v1 = vcombine.low %v5438_v30, %v5446_v63  ;;  %v5398_v39 = vld [vmem:[#allocation17 + $0x48] sm:$0xff] }
 0x8d3   : > { %8627 = vmatprep.subr.bf16.mxu0 %v13966_v51  ;;  %8668 = vmatprep.subr.bf16.mxu1 %v14222_v21  ;;  %v13870_v43 = vcombine.high %v5390_v38, %v5398_v39  ;;  %v14126_v51 = vcombine.high %v5646_v41, %v5654_v47  ;;  %v5630_v21 = vld [vmem:[#allocation17 + $0x788] sm:$0xff] }
 0x8d4   : > { %v5638_v32 = vld [vmem:[#allocation17 + $0x7c8] sm:$0xff] }
 0x8d5   : > { %8628 = vmatpush1.bf16.msra.mxu0 %v13965_v29  ;;  %8669 = vmatpush1.bf16.msra.mxu1 %v14221_v25  ;;  %v13869_v29 = vcombine.low %v5390_v38, %v5398_v39  ;;  %v14125_v25 = vcombine.low %v5646_v41, %v5654_v47  ;;  %v5614_v33 = vld [vmem:[#allocation17 + $0x708] sm:$0xff] }
 0x8d6   : > { %8629 = vmatprep.subr.bf16.mxu0 %v13950_v55  ;;  %8670 = vmatprep.subr.bf16.mxu1 %v14206_v11  ;;  %v14110_v55 = vcombine.high %v5630_v21, %v5638_v32  ;;  %v14366_v11 = vcombine.high %v5886_v28, %v5894_v44  ;;  %v5622_v13 = vld [vmem:[#allocation17 + $0x748] sm:$0xff] }
 0x8d7   : > { %v5870_v15 = vld [vmem:[#allocation17 + $0xf08] sm:$0xff] }
 0x8d8   : > { %v5878_v56 = vld [vmem:[#allocation17 + $0xf48] sm:$0xff] }
 0x8d9   : > { %8630 = vmatpush1.bf16.msra.mxu0 %v13949_v62  ;;  %8671 = vmatpush1.bf16.msra.mxu1 %v14205_v34  ;;  %v14109_v62 = vcombine.low %v5630_v21, %v5638_v32  ;;  %v14365_v34 = vcombine.low %v5886_v28, %v5894_v44  ;;  %v5598_v30 = vld [vmem:[#allocation17 + $0x688] sm:$0xff] }
 0x8da   : > { %8631 = vmatprep.subr.bf16.mxu0 %v13934_v8  ;;  %8672 = vmatprep.subr.bf16.mxu1 %v14190_v19  ;;  %v14094_v8 = vcombine.high %v5614_v33, %v5622_v13  ;;  %v14350_v19 = vcombine.high %v5870_v15, %v5878_v56  ;;  %v5606_v63 = vld [vmem:[#allocation17 + $0x6c8] sm:$0xff] }
 0x8db   : > { %v5854_v58 = vld [vmem:[#allocation17 + $0xe88] sm:$0xff] }
 0x8dc   : > { %v5862_v22 = vld [vmem:[#allocation17 + $0xec8] sm:$0xff] }
 0x8dd   : > { %8632 = vmatpush1.bf16.msra.mxu0 %v13933_v59  ;;  %8673 = vmatpush1.bf16.msra.mxu1 %v14189_v61  ;;  %v14093_v59 = vcombine.low %v5614_v33, %v5622_v13  ;;  %v14349_v61 = vcombine.low %v5870_v15, %v5878_v56  ;;  %v5582_v7 = vld [vmem:[#allocation17 + $0x608] sm:$0xff] }
 0x8de   : > { %8633 = vmatprep.subr.bf16.mxu0 %v13918_v27  ;;  %8674 = vmatprep.subr.bf16.mxu1 %v14174_v20  ;;  %v14078_v27 = vcombine.high %v5598_v30, %v5606_v63  ;;  %v14334_v20 = vcombine.high %v5854_v58, %v5862_v22  ;;  %v5590_v24 = vld [vmem:[#allocation17 + $0x648] sm:$0xff] }
 0x8df   : > { %v5838_v10 = vld [vmem:[#allocation17 + $0xe08] sm:$0xff] }
 0x8e0   : > { %v5846_v45 = vld [vmem:[#allocation17 + $0xe48] sm:$0xff] }
 0x8e1   : > { %8634 = vmatpush1.bf16.msra.mxu0 %v13917_v1  ;;  %8675 = vmatpush1.bf16.msra.mxu1 %v14173_v14  ;;  %v14077_v1 = vcombine.low %v5598_v30, %v5606_v63  ;;  %v14333_v14 = vcombine.low %v5854_v58, %v5862_v22  ;;  %v5566_v23 = vld [vmem:[#allocation17 + $0x588] sm:$0xff]  ;;  %v5503_v30 = vld [vmem:[#allocation17 + $0x390] sm:$0xff] }
 0x8e2   : > { %8635 = vmatprep.subr.bf16.mxu0 %v13902_v35  ;;  %8676 = vmatprep.subr.bf16.mxu1 %v14158_v36  ;;  %v14062_v35 = vcombine.high %v5582_v7, %v5590_v24  ;;  %v14318_v36 = vcombine.high %v5838_v10, %v5846_v45  ;;  %v5574_v18 = vld [vmem:[#allocation17 + $0x5c8] sm:$0xff]  ;;  %v5511_v63 = vld [vmem:[#allocation17 + $0x3d0] sm:$0xff] }
 0x8e3   : > { %v5822_v52 = vld [vmem:[#allocation17 + $0xd88] sm:$0xff]  ;;  %v5759_v58 = vld [vmem:[#allocation17 + $0xb90] sm:$0xff] }
 0x8e4   : > { %v5830_v48 = vld [vmem:[#allocation17 + $0xdc8] sm:$0xff]  ;;  %v5767_v22 = vld [vmem:[#allocation17 + $0xbd0] sm:$0xff] }
 0x8e5   : > { %8636 = vmatpush1.bf16.msra.mxu0 %v13901_v12  ;;  %8677 = vmatpush1.bf16.msra.mxu1 %v14157_v50  ;;  %v14061_v12 = vcombine.low %v5582_v7, %v5590_v24  ;;  %v14317_v50 = vcombine.low %v5838_v10, %v5846_v45  ;;  %v5550_v38 = vld [vmem:[#allocation17 + $0x508] sm:$0xff]  ;;  %v5487_v7 = vld [vmem:[#allocation17 + $0x310] sm:$0xff] }
 0x8e6   : > { %8637 = vmatprep.subr.bf16.mxu0 %v13886_v31  ;;  %8678 = vmatprep.subr.bf16.mxu1 %v14142_v3  ;;  %v14046_v31 = vcombine.high %v5566_v23, %v5574_v18  ;;  %v14302_v3 = vcombine.high %v5822_v52, %v5830_v48  ;;  %v5558_v39 = vld [vmem:[#allocation17 + $0x548] sm:$0xff]  ;;  %v5495_v24 = vld [vmem:[#allocation17 + $0x350] sm:$0xff] }
 0x8e7   : > { %v5806_v41 = vld [vmem:[#allocation17 + $0xd08] sm:$0xff]  ;;  %v5743_v10 = vld [vmem:[#allocation17 + $0xb10] sm:$0xff] }
 0x8e8   : > { %v5814_v47 = vld [vmem:[#allocation17 + $0xd48] sm:$0xff]  ;;  %v5751_v45 = vld [vmem:[#allocation17 + $0xb50] sm:$0xff] }
 0x8e9   : > { %8638 = vmatpush1.bf16.msra.mxu0 %v13885_v42  ;;  %8679 = vmatpush1.bf16.msra.mxu1 %v14141_v4  ;;  %v14045_v42 = vcombine.low %v5566_v23, %v5574_v18  ;;  %v14301_v4 = vcombine.low %v5822_v52, %v5830_v48  ;;  %v5534_v21 = vld [vmem:[#allocation17 + $0x488] sm:$0xff]  ;;  %v5471_v23 = vld [vmem:[#allocation17 + $0x290] sm:$0xff] }
 0x8ea   : > { %8639 = vmatprep.subr.bf16.mxu0 %v13870_v43  ;;  %8680 = vmatprep.subr.bf16.mxu1 %v14126_v51  ;;  %v14030_v43 = vcombine.high %v5550_v38, %v5558_v39  ;;  %v14286_v51 = vcombine.high %v5806_v41, %v5814_v47  ;;  %v5542_v32 = vld [vmem:[#allocation17 + $0x4c8] sm:$0xff]  ;;  %v5479_v18 = vld [vmem:[#allocation17 + $0x2d0] sm:$0xff] }
 0x8eb   : > { %v5790_v28 = vld [vmem:[#allocation17 + $0xc88] sm:$0xff]  ;;  %v5727_v52 = vld [vmem:[#allocation17 + $0xa90] sm:$0xff] }
 0x8ec   : > { %v5798_v44 = vld [vmem:[#allocation17 + $0xcc8] sm:$0xff]  ;;  %v5735_v48 = vld [vmem:[#allocation17 + $0xad0] sm:$0xff] }
 0x8ed   : > { %8640 = vmatpush1.bf16.msra.mxu0 %v13869_v29  ;;  %8681 = vmatpush1.bf16.msra.mxu1 %v14125_v25  ;;  %v14029_v29 = vcombine.low %v5550_v38, %v5558_v39  ;;  %v14285_v25 = vcombine.low %v5806_v41, %v5814_v47  ;;  %v5518_v33 = vld [vmem:[#allocation17 + $0x408] sm:$0xff]  ;;  %v5455_v38 = vld [vmem:[#allocation17 + $0x210] sm:$0xff] }
 0x8ee   : > { %8641 = vmatprep.subr.bf16.mxu0 %v14110_v55  ;;  %8682 = vmatprep.subr.bf16.mxu1 %v14366_v11  ;;  %v14014_v55 = vcombine.high %v5534_v21, %v5542_v32  ;;  %v14270_v11 = vcombine.high %v5790_v28, %v5798_v44  ;;  %v5526_v13 = vld [vmem:[#allocation17 + $0x448] sm:$0xff]  ;;  %v5463_v39 = vld [vmem:[#allocation17 + $0x250] sm:$0xff] }
 0x8ef   : > { %v5774_v15 = vld [vmem:[#allocation17 + $0xc08] sm:$0xff]  ;;  %v5711_v41 = vld [vmem:[#allocation17 + $0xa10] sm:$0xff] }
 0x8f0   : > { %v5782_v56 = vld [vmem:[#allocation17 + $0xc48] sm:$0xff]  ;;  %v5719_v47 = vld [vmem:[#allocation17 + $0xa50] sm:$0xff] }
 0x8f1   : > { %8642 = vmatpush2.bf16.msra.mxu0 %v14109_v62  ;;  %8683 = vmatpush2.bf16.msra.mxu1 %v14365_v34  ;;  %v14013_v62 = vcombine.low %v5534_v21, %v5542_v32  ;;  %v14269_v34 = vcombine.low %v5790_v28, %v5798_v44  ;;  %v5439_v21 = vld [vmem:[#allocation17 + $0x190] sm:$0xff] }
 0x8f2   : > { %8643 = vmatprep.subr.bf16.mxu0 %v14094_v8  ;;  %8684 = vmatprep.subr.bf16.mxu1 %v14350_v19  ;;  %v13998_v8 = vcombine.high %v5518_v33, %v5526_v13  ;;  %v14254_v19 = vcombine.high %v5774_v15, %v5782_v56  ;;  %v5447_v32 = vld [vmem:[#allocation17 + $0x1d0] sm:$0xff] }
 0x8f3   : > { %v5695_v28 = vld [vmem:[#allocation17 + $0x990] sm:$0xff] }
 0x8f4   : > { %v5703_v44 = vld [vmem:[#allocation17 + $0x9d0] sm:$0xff] }
 0x8f5   : > { %8644 = vmatpush2.bf16.msra.mxu0 %v14093_v59  ;;  %8685 = vmatpush2.bf16.msra.mxu1 %v14349_v61  ;;  %v13997_v59 = vcombine.low %v5518_v33, %v5526_v13  ;;  %v14253_v61 = vcombine.low %v5774_v15, %v5782_v56  ;;  %v5423_v33 = vld [vmem:[#allocation17 + $0x110] sm:$0xff] }
 0x8f6   : > { %8645 = vmatprep.subr.bf16.mxu0 %v14078_v27  ;;  %8686 = vmatprep.subr.bf16.mxu1 %v14334_v20  ;;  %v13984_v27 = vcombine.high %v5503_v30, %v5511_v63  ;;  %v14240_v20 = vcombine.high %v5759_v58, %v5767_v22  ;;  %v5431_v13 = vld [vmem:[#allocation17 + $0x150] sm:$0xff] }
 0x8f7   : > { %v5679_v15 = vld [vmem:[#allocation17 + $0x910] sm:$0xff] }
 0x8f8   : > { %v5687_v56 = vld [vmem:[#allocation17 + $0x950] sm:$0xff] }
 0x8f9   : > { %8646 = vmatpush2.bf16.msra.mxu0 %v14077_v1  ;;  %8687 = vmatpush2.bf16.msra.mxu1 %v14333_v14  ;;  %v13983_v1 = vcombine.low %v5503_v30, %v5511_v63  ;;  %v14239_v14 = vcombine.low %v5759_v58, %v5767_v22  ;;  %v5407_v30 = vld [vmem:[#allocation17 + $0x90] sm:$0xff] }
 0x8fa   : > { %8647 = vmatprep.subr.bf16.mxu0 %v14062_v35  ;;  %8688 = vmatprep.subr.bf16.mxu1 %v14318_v36  ;;  %v13968_v35 = vcombine.high %v5487_v7, %v5495_v24  ;;  %v14224_v36 = vcombine.high %v5743_v10, %v5751_v45  ;;  %v5415_v63 = vld [vmem:[#allocation17 + $0xd0] sm:$0xff] }
 0x8fb   : > { %v5663_v58 = vld [vmem:[#allocation17 + $0x890] sm:$0xff] }
 0x8fc   : > { %v5671_v22 = vld [vmem:[#allocation17 + $0x8d0] sm:$0xff] }
 0x8fd   : > { %8648 = vmatpush2.bf16.msra.mxu0 %v14061_v12  ;;  %8689 = vmatpush2.bf16.msra.mxu1 %v14317_v50  ;;  %v13967_v12 = vcombine.low %v5487_v7, %v5495_v24  ;;  %v14223_v50 = vcombine.low %v5743_v10, %v5751_v45  ;;  %v5391_v7 = vld [vmem:[#allocation17 + $0x10] sm:$0xff] }
 0x8fe   : > { %8649 = vmatprep.subr.bf16.mxu0 %v14046_v31  ;;  %8690 = vmatprep.subr.bf16.mxu1 %v14302_v3  ;;  %v13952_v31 = vcombine.high %v5471_v23, %v5479_v18  ;;  %v14208_v3 = vcombine.high %v5727_v52, %v5735_v48  ;;  %v5399_v24 = vld [vmem:[#allocation17 + $0x50] sm:$0xff] }
 0x8ff   : > { %v5647_v10 = vld [vmem:[#allocation17 + $0x810] sm:$0xff] }
 0x900   : > { %v5655_v45 = vld [vmem:[#allocation17 + $0x850] sm:$0xff] }
 0x901   : > { %8650 = vmatpush2.bf16.msra.mxu0 %v14045_v42  ;;  %8691 = vmatpush2.bf16.msra.mxu1 %v14301_v4  ;;  %v13951_v42 = vcombine.low %v5471_v23, %v5479_v18  ;;  %v14207_v4 = vcombine.low %v5727_v52, %v5735_v48  ;;  %v5631_v23 = vld [vmem:[#allocation17 + $0x790] sm:$0xff] }
 0x902   : > { %8651 = vmatprep.subr.bf16.mxu0 %v14030_v43  ;;  %8692 = vmatprep.subr.bf16.mxu1 %v14286_v51  ;;  %v13936_v43 = vcombine.high %v5455_v38, %v5463_v39  ;;  %v14192_v51 = vcombine.high %v5711_v41, %v5719_v47  ;;  %v5639_v18 = vld [vmem:[#allocation17 + $0x7d0] sm:$0xff] }
 0x903   : > { %v5887_v52 = vld [vmem:[#allocation17 + $0xf90] sm:$0xff] }
 0x904   : > { %v5895_v48 = vld [vmem:[#allocation17 + $0xfd0] sm:$0xff] }
 0x905   : > { %8652 = vmatpush2.bf16.msra.mxu0 %v14029_v29  ;;  %8693 = vmatpush2.bf16.msra.mxu1 %v14285_v25  ;;  %v13935_v29 = vcombine.low %v5455_v38, %v5463_v39  ;;  %v14191_v25 = vcombine.low %v5711_v41, %v5719_v47  ;;  %v5615_v38 = vld [vmem:[#allocation17 + $0x710] sm:$0xff] }
 0x906   : > { %8653 = vmatprep.subr.bf16.mxu0 %v14014_v55  ;;  %8694 = vmatprep.subr.bf16.mxu1 %v14270_v11  ;;  %v13920_v55 = vcombine.high %v5439_v21, %v5447_v32  ;;  %v14176_v11 = vcombine.high %v5695_v28, %v5703_v44  ;;  %v5623_v39 = vld [vmem:[#allocation17 + $0x750] sm:$0xff] }
 0x907   : > { %v5871_v41 = vld [vmem:[#allocation17 + $0xf10] sm:$0xff] }
 0x908   : > { %v5879_v47 = vld [vmem:[#allocation17 + $0xf50] sm:$0xff] }
 0x909   : > { %8654 = vmatpush2.bf16.msra.mxu0 %v14013_v62  ;;  %8695 = vmatpush2.bf16.msra.mxu1 %v14269_v34  ;;  %v13919_v62 = vcombine.low %v5439_v21, %v5447_v32  ;;  %v14175_v34 = vcombine.low %v5695_v28, %v5703_v44  ;;  %v5599_v21 = vld [vmem:[#allocation17 + $0x690] sm:$0xff] }
 0x90a   : > { %8655 = vmatprep.subr.bf16.mxu0 %v13998_v8  ;;  %8696 = vmatprep.subr.bf16.mxu1 %v14254_v19  ;;  %v13904_v8 = vcombine.high %v5423_v33, %v5431_v13  ;;  %v14160_v19 = vcombine.high %v5679_v15, %v5687_v56  ;;  %v5607_v32 = vld [vmem:[#allocation17 + $0x6d0] sm:$0xff] }
 0x90b   : > { %v5855_v28 = vld [vmem:[#allocation17 + $0xe90] sm:$0xff] }
 0x90c   : > { %v5863_v44 = vld [vmem:[#allocation17 + $0xed0] sm:$0xff] }
 0x90d   : > { %8656 = vmatpush2.bf16.msra.mxu0 %v13997_v59  ;;  %8697 = vmatpush2.bf16.msra.mxu1 %v14253_v61  ;;  %v13903_v59 = vcombine.low %v5423_v33, %v5431_v13  ;;  %v14159_v61 = vcombine.low %v5679_v15, %v5687_v56  ;;  %v5583_v33 = vld [vmem:[#allocation17 + $0x610] sm:$0xff] }
 0x90e   : > { %8707 = vmatprep.subr.bf16.mxu0 %v13984_v27  ;;  %8748 = vmatprep.subr.bf16.mxu1 %v14240_v20  ;;  %v13888_v27 = vcombine.high %v5407_v30, %v5415_v63  ;;  %v14144_v20 = vcombine.high %v5663_v58, %v5671_v22  ;;  %v5591_v13 = vld [vmem:[#allocation17 + $0x650] sm:$0xff] }
 0x90f   : > { %v5839_v15 = vld [vmem:[#allocation17 + $0xe10] sm:$0xff] }
 0x910   : > { %8658 = vmatmul.mubr.bf16.vlgmr.msra.gmra.mxu0 %v18112_v17  ;;  %8699 = vmatmul.mubr.bf16.vlgmr.msra.gmra.mxu1 %v18114_v49  ;;  %v5847_v56 = vld [vmem:[#allocation17 + $0xe50] sm:$0xff] }
 0x911   : > { %8708 = vmatpush1.bf16.msra.mxu0 %v13983_v1  ;;  %8739 = vmatprep.mubr.bf16.mxu0 %v18108_v2  ;;  %v13887_v1 = vcombine.low %v5407_v30, %v5415_v63  ;;  %v5567_v30 = vld [vmem:[#allocation17 + $0x590] sm:$0xff] }
 0x912   : > { %8749 = vmatpush1.bf16.msra.mxu1 %v14239_v14  ;;  %8780 = vmatprep.mubr.bf16.mxu1 %v18110_v53  ;;  %v14143_v14 = vcombine.low %v5663_v58, %v5671_v22  ;;  %v5575_v63 = vld [vmem:[#allocation17 + $0x5d0] sm:$0xff] }
 0x913   : > { %8709 = vmatprep.subr.bf16.mxu0 %v13968_v35  ;;  %8750 = vmatprep.subr.bf16.mxu1 %v14224_v36  ;;  %v13872_v35 = vcombine.high %v5391_v7, %v5399_v24  ;;  %v14128_v36 = vcombine.high %v5647_v10, %v5655_v45  ;;  %v5823_v58 = vld [vmem:[#allocation17 + $0xd90] sm:$0xff] }
 0x914   : > { %v5831_v22 = vld [vmem:[#allocation17 + $0xdd0] sm:$0xff] }
 0x915   : > { %8710 = vmatpush1.bf16.msra.mxu0 %v13967_v12  ;;  %v13871_v12 = vcombine.low %v5391_v7, %v5399_v24  ;;  %v5551_v7 = vld [vmem:[#allocation17 + $0x510] sm:$0xff] }
 0x916   : > { %8751 = vmatpush1.bf16.msra.mxu1 %v14223_v50  ;;  %8711 = vmatprep.subr.bf16.mxu0 %v13952_v31  ;;  %v14127_v50 = vcombine.low %v5647_v10, %v5655_v45  ;;  %v14112_v31 = vcombine.high %v5631_v23, %v5639_v18  ;;  %v5559_v24 = vld [vmem:[#allocation17 + $0x550] sm:$0xff] }
 0x917   : > { %8752 = vmatprep.subr.bf16.mxu1 %v14208_v3  ;;  %v14368_v3 = vcombine.high %v5887_v52, %v5895_v48  ;;  %v5807_v10 = vld [vmem:[#allocation17 + $0xd10] sm:$0xff] }
 0x918   : > { %v5815_v45 = vld [vmem:[#allocation17 + $0xd50] sm:$0xff] }
 0x919   : > { %8712 = vmatpush1.bf16.msra.mxu0 %v13951_v42  ;;  %v14111_v42 = vcombine.low %v5631_v23, %v5639_v18  ;;  %v5535_v23 = vld [vmem:[#allocation17 + $0x490] sm:$0xff] }
 0x91a   : > { %8753 = vmatpush1.bf16.msra.mxu1 %v14207_v4  ;;  %8713 = vmatprep.subr.bf16.mxu0 %v13936_v43  ;;  %v14367_v4 = vcombine.low %v5887_v52, %v5895_v48  ;;  %v14096_v43 = vcombine.high %v5615_v38, %v5623_v39  ;;  %v5543_v18 = vld [vmem:[#allocation17 + $0x4d0] sm:$0xff] }
 0x91b   : > { %8754 = vmatprep.subr.bf16.mxu1 %v14192_v51  ;;  %v14352_v51 = vcombine.high %v5871_v41, %v5879_v47  ;;  %v5791_v52 = vld [vmem:[#allocation17 + $0xc90] sm:$0xff] }
 0x91c   : > { %v5799_v48 = vld [vmem:[#allocation17 + $0xcd0] sm:$0xff] }
 0x91d   : > { %8714 = vmatpush1.bf16.msra.mxu0 %v13935_v29  ;;  %v14095_v29 = vcombine.low %v5615_v38, %v5623_v39  ;;  %v5519_v38 = vld [vmem:[#allocation17 + $0x410] sm:$0xff] }
 0x91e   : > { %8755 = vmatpush1.bf16.msra.mxu1 %v14191_v25  ;;  %8715 = vmatprep.subr.bf16.mxu0 %v13920_v55  ;;  %v14351_v25 = vcombine.low %v5871_v41, %v5879_v47  ;;  %v14080_v55 = vcombine.high %v5599_v21, %v5607_v32  ;;  %v5527_v39 = vld [vmem:[#allocation17 + $0x450] sm:$0xff] }
 0x91f   : > { %8756 = vmatprep.subr.bf16.mxu1 %v14176_v11  ;;  %v14336_v11 = vcombine.high %v5855_v28, %v5863_v44  ;;  %v5775_v41 = vld [vmem:[#allocation17 + $0xc10] sm:$0xff] }
 0x920   : > { %v5783_v47 = vld [vmem:[#allocation17 + $0xc50] sm:$0xff] }
 0x921   : > { %8716 = vmatpush1.bf16.msra.mxu0 %v13919_v62  ;;  %v14079_v62 = vcombine.low %v5599_v21, %v5607_v32  ;;  %v5504_v21 = vld [vmem:[#allocation17 + $0x398] sm:$0xff] }
 0x922   : > { %8757 = vmatpush1.bf16.msra.mxu1 %v14175_v34  ;;  %8717 = vmatprep.subr.bf16.mxu0 %v13904_v8  ;;  %v14335_v34 = vcombine.low %v5855_v28, %v5863_v44  ;;  %v14064_v8 = vcombine.high %v5583_v33, %v5591_v13  ;;  %v5512_v32 = vld [vmem:[#allocation17 + $0x3d8] sm:$0xff] }
 0x923   : > { %8758 = vmatprep.subr.bf16.mxu1 %v14160_v19  ;;  %v14320_v19 = vcombine.high %v5839_v15, %v5847_v56  ;;  %v5760_v28 = vld [vmem:[#allocation17 + $0xb98] sm:$0xff] }
 0x924   : > { %v5768_v44 = vld [vmem:[#allocation17 + $0xbd8] sm:$0xff] }
 0x925   : > { %8718 = vmatpush1.bf16.msra.mxu0 %v13903_v59  ;;  %v14063_v59 = vcombine.low %v5583_v33, %v5591_v13  ;;  %v5488_v33 = vld [vmem:[#allocation17 + $0x318] sm:$0xff] }
 0x926   : > { %8759 = vmatpush1.bf16.msra.mxu1 %v14159_v61  ;;  %8719 = vmatprep.subr.bf16.mxu0 %v13888_v27  ;;  %v14319_v61 = vcombine.low %v5839_v15, %v5847_v56  ;;  %v14048_v27 = vcombine.high %v5567_v30, %v5575_v63  ;;  %v5496_v13 = vld [vmem:[#allocation17 + $0x358] sm:$0xff]  ;;  %v13985_v15 = vcombine.low %v5504_v21, %v5512_v32 }
 0x927   : > { %8760 = vmatprep.subr.bf16.mxu1 %v14144_v20  ;;  %v14304_v20 = vcombine.high %v5823_v58, %v5831_v22  ;;  %v5744_v56 = vld [vmem:[#allocation17 + $0xb18] sm:$0xff] }
 0x929   : > { %8720 = vmatpush1.bf16.msra.mxu0 %v13887_v1  ;;  %v14047_v1 = vcombine.low %v5567_v30, %v5575_v63  ;;  %v5480_v30 = vld [vmem:[#allocation17 + $0x2d8] sm:$0xff] }
 0x92a   : > { %8761 = vmatpush1.bf16.msra.mxu1 %v14143_v14  ;;  %8721 = vmatprep.subr.bf16.mxu0 %v13872_v35  ;;  %v14303_v14 = vcombine.low %v5823_v58, %v5831_v22  ;;  %v14032_v35 = vcombine.high %v5551_v7, %v5559_v24  ;;  %v5728_v58 = vld [vmem:[#allocation17 + $0xa98] sm:$0xff] }
 0x92b   : > { %8762 = vmatprep.subr.bf16.mxu1 %v14128_v36  ;;  %v14288_v36 = vcombine.high %v5807_v10, %v5815_v45  ;;  %v5736_v22 = vld [vmem:[#allocation17 + $0xad8] sm:$0xff] }
 0x92d   : > { %8722 = vmatpush1.bf16.msra.mxu0 %v13871_v12  ;;  %v14031_v12 = vcombine.low %v5551_v7, %v5559_v24  ;;  %v5456_v7 = vld [vmem:[#allocation17 + $0x218] sm:$0xff] }
 0x92e   : > { %8763 = vmatpush1.bf16.msra.mxu1 %v14127_v50  ;;  %8723 = vmatprep.subr.bf16.mxu0 %v14112_v31  ;;  %v14287_v50 = vcombine.low %v5807_v10, %v5815_v45  ;;  %v14016_v31 = vcombine.high %v5535_v23, %v5543_v18  ;;  %v5464_v24 = vld [vmem:[#allocation17 + $0x258] sm:$0xff] }
 0x92f   : > { %8764 = vmatprep.subr.bf16.mxu1 %v14368_v3  ;;  %v14272_v3 = vcombine.high %v5791_v52, %v5799_v48  ;;  %v5712_v10 = vld [vmem:[#allocation17 + $0xa18] sm:$0xff] }
 0x930   : > { %v5720_v45 = vld [vmem:[#allocation17 + $0xa58] sm:$0xff] }
 0x931   : > { %8724 = vmatpush2.bf16.msra.mxu0 %v14111_v42  ;;  %v14015_v42 = vcombine.low %v5535_v23, %v5543_v18  ;;  %v5440_v23 = vld [vmem:[#allocation17 + $0x198] sm:$0xff] }
 0x932   : > { %8765 = vmatpush2.bf16.msra.mxu1 %v14367_v4  ;;  %8725 = vmatprep.subr.bf16.mxu0 %v14096_v43  ;;  %v14271_v4 = vcombine.low %v5791_v52, %v5799_v48  ;;  %v14000_v43 = vcombine.high %v5519_v38, %v5527_v39  ;;  %v5448_v18 = vld [vmem:[#allocation17 + $0x1d8] sm:$0xff] }
 0x933   : > { %8766 = vmatprep.subr.bf16.mxu1 %v14352_v51  ;;  %v14256_v51 = vcombine.high %v5775_v41, %v5783_v47  ;;  %v5696_v52 = vld [vmem:[#allocation17 + $0x998] sm:$0xff] }
 0x934   : > { %v5704_v48 = vld [vmem:[#allocation17 + $0x9d8] sm:$0xff] }
 0x935   : > { %8726 = vmatpush2.bf16.msra.mxu0 %v14095_v29  ;;  %v13999_v29 = vcombine.low %v5519_v38, %v5527_v39  ;;  %v5424_v38 = vld [vmem:[#allocation17 + $0x118] sm:$0xff] }
 0x936   : > { %8767 = vmatpush2.bf16.msra.mxu1 %v14351_v25  ;;  %8727 = vmatprep.subr.bf16.mxu0 %v14080_v55  ;;  %v14255_v25 = vcombine.low %v5775_v41, %v5783_v47  ;;  %v13986_v55 = vcombine.high %v5504_v21, %v5512_v32  ;;  %v5432_v39 = vld [vmem:[#allocation17 + $0x158] sm:$0xff] }
 0x937   : > { %8768 = vmatprep.subr.bf16.mxu1 %v14336_v11  ;;  %v14242_v11 = vcombine.high %v5760_v28, %v5768_v44  ;;  %v5680_v41 = vld [vmem:[#allocation17 + $0x918] sm:$0xff] }
 0x938   : > { %v5688_v47 = vld [vmem:[#allocation17 + $0x958] sm:$0xff] }
 0x939   : > { %8728 = vmatpush2.bf16.msra.mxu0 %v14079_v62  ;;  %v5752_v62 = vld [vmem:[#allocation17 + $0xb58] sm:$0xff] }
 0x93a   : > { %8769 = vmatpush2.bf16.msra.mxu1 %v14335_v34  ;;  %8729 = vmatprep.subr.bf16.mxu0 %v14064_v8  ;;  %v14241_v34 = vcombine.low %v5760_v28, %v5768_v44  ;;  %v13970_v8 = vcombine.high %v5488_v33, %v5496_v13  ;;  %v14226_v63 = vcombine.high %v5744_v56, %v5752_v62  ;;  %v5408_v21 = vld [vmem:[#allocation17 + $0x98] sm:$0xff] }
 0x93b   : > { %8770 = vmatprep.subr.bf16.mxu1 %v14320_v19  ;;  %v5472_v19 = vld [vmem:[#allocation17 + $0x298] sm:$0xff] }
 0x93c   : > { %v5416_v32 = vld [vmem:[#allocation17 + $0xd8] sm:$0xff] }
 0x93d   : > { %8730 = vmatpush2.bf16.msra.mxu0 %v14063_v59  ;;  %v13969_v59 = vcombine.low %v5488_v33, %v5496_v13  ;;  %v5664_v28 = vld [vmem:[#allocation17 + $0x898] sm:$0xff] }
 0x93e   : > { %8771 = vmatpush2.bf16.msra.mxu1 %v14319_v61  ;;  %8731 = vmatprep.subr.bf16.mxu0 %v14048_v27  ;;  %v14225_v61 = vcombine.low %v5744_v56, %v5752_v62  ;;  %v13954_v27 = vcombine.high %v5472_v19, %v5480_v30  ;;  %v5672_v44 = vld [vmem:[#allocation17 + $0x8d8] sm:$0xff]  ;;  %v13889_v62 = vcombine.low %v5408_v21, %v5416_v32 }
 0x93f   : > { %8772 = vmatprep.subr.bf16.mxu1 %v14304_v20  ;;  %v14210_v20 = vcombine.high %v5728_v58, %v5736_v22  ;;  %v5392_v33 = vld [vmem:[#allocation17 + $0x18] sm:$0xff] }
 0x940   : > { %v5400_v13 = vld [vmem:[#allocation17 + $0x58] sm:$0xff] }
 0x941   : > { %8732 = vmatpush2.bf16.msra.mxu0 %v14047_v1  ;;  %v13953_v1 = vcombine.low %v5472_v19, %v5480_v30  ;;  %v5656_v56 = vld [vmem:[#allocation17 + $0x858] sm:$0xff] }
 0x942   : > { %8773 = vmatpush2.bf16.msra.mxu1 %v14303_v14  ;;  %8733 = vmatprep.subr.bf16.mxu0 %v14032_v35  ;;  %v14209_v14 = vcombine.low %v5728_v58, %v5736_v22  ;;  %v13938_v35 = vcombine.high %v5456_v7, %v5464_v24  ;;  %v5632_v30 = vld [vmem:[#allocation17 + $0x798] sm:$0xff] }
 0x943   : > { %8774 = vmatprep.subr.bf16.mxu1 %v14288_v36  ;;  %v14194_v36 = vcombine.high %v5712_v10, %v5720_v45  ;;  %v5888_v58 = vld [vmem:[#allocation17 + $0xf98] sm:$0xff] }
 0x944   : > { %v5896_v22 = vld [vmem:[#allocation17 + $0xfd8] sm:$0xff] }
 0x945   : > { %8734 = vmatpush2.bf16.msra.mxu0 %v14031_v12  ;;  %v13937_v12 = vcombine.low %v5456_v7, %v5464_v24  ;;  %v5616_v7 = vld [vmem:[#allocation17 + $0x718] sm:$0xff] }
 0x946   : > { %8775 = vmatpush2.bf16.msra.mxu1 %v14287_v50  ;;  %8735 = vmatprep.subr.bf16.mxu0 %v14016_v31  ;;  %v14193_v50 = vcombine.low %v5712_v10, %v5720_v45  ;;  %v13922_v31 = vcombine.high %v5440_v23, %v5448_v18  ;;  %v5624_v24 = vld [vmem:[#allocation17 + $0x758] sm:$0xff] }
 0x947   : > { %8776 = vmatprep.subr.bf16.mxu1 %v14272_v3  ;;  %v14178_v3 = vcombine.high %v5696_v52, %v5704_v48  ;;  %v5872_v10 = vld [vmem:[#allocation17 + $0xf18] sm:$0xff] }
 0x948   : > { %v5880_v45 = vld [vmem:[#allocation17 + $0xf58] sm:$0xff] }
 0x949   : > { %8736 = vmatpush2.bf16.msra.mxu0 %v14015_v42  ;;  %v13921_v42 = vcombine.low %v5440_v23, %v5448_v18  ;;  %v5600_v23 = vld [vmem:[#allocation17 + $0x698] sm:$0xff] }
 0x94a   : > { %8777 = vmatpush2.bf16.msra.mxu1 %v14271_v4  ;;  %8737 = vmatprep.subr.bf16.mxu0 %v14000_v43  ;;  %v14177_v4 = vcombine.low %v5696_v52, %v5704_v48  ;;  %v13906_v43 = vcombine.high %v5424_v38, %v5432_v39  ;;  %v5608_v18 = vld [vmem:[#allocation17 + $0x6d8] sm:$0xff] }
 0x94b   : > { %8778 = vmatprep.subr.bf16.mxu1 %v14256_v51  ;;  %v14162_v51 = vcombine.high %v5680_v41, %v5688_v47  ;;  %v5856_v52 = vld [vmem:[#allocation17 + $0xe98] sm:$0xff] }
 0x94c   : > { %v5864_v48 = vld [vmem:[#allocation17 + $0xed8] sm:$0xff] }
 0x94d   : > { %8738 = vmatpush2.bf16.msra.mxu0 %v13999_v29  ;;  %v13905_v29 = vcombine.low %v5424_v38, %v5432_v39  ;;  %v5584_v38 = vld [vmem:[#allocation17 + $0x618] sm:$0xff] }
 0x94e   : > { %8779 = vmatpush2.bf16.msra.mxu1 %v14255_v25  ;;  %8789 = vmatprep.subr.bf16.mxu0 %v13986_v55  ;;  %v14161_v25 = vcombine.low %v5680_v41, %v5688_v47  ;;  %v13890_v55 = vcombine.high %v5408_v21, %v5416_v32  ;;  %v5592_v39 = vld [vmem:[#allocation17 + $0x658] sm:$0xff] }
 0x94f   : > { %8830 = vmatprep.subr.bf16.mxu1 %v14242_v11  ;;  %v14146_v11 = vcombine.high %v5664_v28, %v5672_v44  ;;  %v5840_v41 = vld [vmem:[#allocation17 + $0xe18] sm:$0xff] }
 0x950   : > { %8740 = vmatmul.mubr.bf16.vlgmr.msra.gmra.mxu0 %v18112_v17  ;;  %v5848_v47 = vld [vmem:[#allocation17 + $0xe58] sm:$0xff] }
 0x951   : > { %8781 = vmatmul.mubr.bf16.vlgmr.msra.gmra.mxu1 %v18114_v49  ;;  %8790 = vmatpush1.bf16.msra.mxu0 %v13985_v15  ;;  %v5648_v15 = vld [vmem:[#allocation17 + $0x818] sm:$0xff] }
 0x952   : > { %8821 = vmatprep.mubr.bf16.mxu0 %v18108_v2  ;;  %8831 = vmatpush1.bf16.msra.mxu1 %v14241_v34  ;;  %v14145_v34 = vcombine.low %v5664_v28, %v5672_v44  ;;  %v14130_v19 = vcombine.high %v5648_v15, %v5656_v56  ;;  %v5568_v21 = vld [vmem:[#allocation17 + $0x598] sm:$0xff] }
 0x953   : > { %8862 = vmatprep.mubr.bf16.mxu1 %v18110_v53  ;;  %8791 = vmatprep.subr.bf16.mxu0 %v13970_v8  ;;  %v13874_v8 = vcombine.high %v5392_v33, %v5400_v13  ;;  %v5576_v32 = vld [vmem:[#allocation17 + $0x5d8] sm:$0xff] }
 0x954   : > { %8832 = vmatprep.subr.bf16.mxu1 %v14226_v63  ;;  %v5640_v63 = vld [vmem:[#allocation17 + $0x7d8] sm:$0xff] }
 0x955   : > { %8792 = vmatpush1.bf16.msra.mxu0 %v13969_v59  ;;  %v13873_v59 = vcombine.low %v5392_v33, %v5400_v13  ;;  %v5824_v28 = vld [vmem:[#allocation17 + $0xd98] sm:$0xff] }
 0x956   : > { %8833 = vmatpush1.bf16.msra.mxu1 %v14225_v61  ;;  %8793 = vmatprep.subr.bf16.mxu0 %v13954_v27  ;;  %v14129_v61 = vcombine.low %v5648_v15, %v5656_v56  ;;  %v14114_v27 = vcombine.high %v5632_v30, %v5640_v63  ;;  %v5832_v44 = vld [vmem:[#allocation17 + $0xdd8] sm:$0xff] }
 0x957   : > { %8834 = vmatprep.subr.bf16.mxu1 %v14210_v20  ;;  %v14370_v20 = vcombine.high %v5888_v58, %v5896_v22  ;;  %v5552_v33 = vld [vmem:[#allocation17 + $0x518] sm:$0xff] }
 0x958   : > { %v5560_v13 = vld [vmem:[#allocation17 + $0x558] sm:$0xff] }
 0x959   : > { %8794 = vmatpush1.bf16.msra.mxu0 %v13953_v1  ;;  %v14113_v1 = vcombine.low %v5632_v30, %v5640_v63  ;;  %v5808_v15 = vld [vmem:[#allocation17 + $0xd18] sm:$0xff] }
 0x95a   : > { %8835 = vmatpush1.bf16.msra.mxu1 %v14209_v14  ;;  %8795 = vmatprep.subr.bf16.mxu0 %v13938_v35  ;;  %v14369_v14 = vcombine.low %v5888_v58, %v5896_v22  ;;  %v14098_v35 = vcombine.high %v5616_v7, %v5624_v24  ;;  %v5816_v56 = vld [vmem:[#allocation17 + $0xd58] sm:$0xff] }
 0x95b   : > { %8836 = vmatprep.subr.bf16.mxu1 %v14194_v36  ;;  %v14354_v36 = vcombine.high %v5872_v10, %v5880_v45  ;;  %v5536_v30 = vld [vmem:[#allocation17 + $0x498] sm:$0xff] }
 0x95c   : > { %v5544_v63 = vld [vmem:[#allocation17 + $0x4d8] sm:$0xff] }
 0x95d   : > { %8796 = vmatpush1.bf16.msra.mxu0 %v13937_v12  ;;  %v14097_v12 = vcombine.low %v5616_v7, %v5624_v24  ;;  %v5792_v58 = vld [vmem:[#allocation17 + $0xc98] sm:$0xff] }
 0x95e   : > { %8837 = vmatpush1.bf16.msra.mxu1 %v14193_v50  ;;  %8797 = vmatprep.subr.bf16.mxu0 %v13922_v31  ;;  %v14353_v50 = vcombine.low %v5872_v10, %v5880_v45  ;;  %v14082_v31 = vcombine.high %v5600_v23, %v5608_v18  ;;  %v5800_v22 = vld [vmem:[#allocation17 + $0xcd8] sm:$0xff] }
 0x95f   : > { %8838 = vmatprep.subr.bf16.mxu1 %v14178_v3  ;;  %v14338_v3 = vcombine.high %v5856_v52, %v5864_v48  ;;  %v5520_v7 = vld [vmem:[#allocation17 + $0x418] sm:$0xff] }
 0x960   : > { %v5528_v24 = vld [vmem:[#allocation17 + $0x458] sm:$0xff] }
 0x961   : > { %8798 = vmatpush1.bf16.msra.mxu0 %v13921_v42  ;;  %v14081_v42 = vcombine.low %v5600_v23, %v5608_v18  ;;  %v5776_v10 = vld [vmem:[#allocation17 + $0xc18] sm:$0xff]  ;;  %v5505_v23 = vld [vmem:[#allocation17 + $0x3a0] sm:$0xff] }
 0x962   : > { %8839 = vmatpush1.bf16.msra.mxu1 %v14177_v4  ;;  %8799 = vmatprep.subr.bf16.mxu0 %v13906_v43  ;;  %v14337_v4 = vcombine.low %v5856_v52, %v5864_v48  ;;  %v14066_v43 = vcombine.high %v5584_v38, %v5592_v39  ;;  %v5784_v45 = vld [vmem:[#allocation17 + $0xc58] sm:$0xff]  ;;  %v5513_v18 = vld [vmem:[#allocation17 + $0x3e0] sm:$0xff] }
 0x963   : > { %8840 = vmatprep.subr.bf16.mxu1 %v14162_v51  ;;  %v14322_v51 = vcombine.high %v5840_v41, %v5848_v47  ;;  %v5761_v52 = vld [vmem:[#allocation17 + $0xba0] sm:$0xff] }
 0x964   : > { %v5769_v48 = vld [vmem:[#allocation17 + $0xbe0] sm:$0xff] }
 0x965   : > { %8800 = vmatpush1.bf16.msra.mxu0 %v13905_v29  ;;  %v14065_v29 = vcombine.low %v5584_v38, %v5592_v39  ;;  %v14244_v38 = vcombine.high %v5761_v52, %v5769_v48  ;;  %v5489_v39 = vld [vmem:[#allocation17 + $0x320] sm:$0xff] }
 0x966   : > { %8841 = vmatpush1.bf16.msra.mxu1 %v14161_v25  ;;  %8801 = vmatprep.subr.bf16.mxu0 %v13890_v55  ;;  %v14321_v25 = vcombine.low %v5840_v41, %v5848_v47  ;;  %v14050_v55 = vcombine.high %v5568_v21, %v5576_v32  ;;  %v5497_v41 = vld [vmem:[#allocation17 + $0x360] sm:$0xff]  ;;  %v13987_v47 = vcombine.low %v5505_v23, %v5513_v18 }
 0x967   : > { %8842 = vmatprep.subr.bf16.mxu1 %v14146_v11  ;;  %v14306_v11 = vcombine.high %v5824_v28, %v5832_v44 }
 0x969   : > { %8802 = vmatpush1.bf16.msra.mxu0 %v13889_v62  ;;  %v14049_v62 = vcombine.low %v5568_v21, %v5576_v32  ;;  %v13972_v32 = vcombine.high %v5489_v39, %v5497_v41 }
 0x96a   : > { %8843 = vmatpush1.bf16.msra.mxu1 %v14145_v34  ;;  %8803 = vmatprep.subr.bf16.mxu0 %v13874_v8  ;;  %v14305_v34 = vcombine.low %v5824_v28, %v5832_v44  ;;  %v14034_v8 = vcombine.high %v5552_v33, %v5560_v13  ;;  %v5473_v28 = vld [vmem:[#allocation17 + $0x2a0] sm:$0xff] }
 0x96b   : > { %8844 = vmatprep.subr.bf16.mxu1 %v14130_v19  ;;  %v14290_v19 = vcombine.high %v5808_v15, %v5816_v56  ;;  %v5481_v44 = vld [vmem:[#allocation17 + $0x2e0] sm:$0xff] }
 0x96d   : > { %8804 = vmatpush1.bf16.msra.mxu0 %v13873_v59  ;;  %v14033_v59 = vcombine.low %v5552_v33, %v5560_v13  ;;  %v5737_v33 = vld [vmem:[#allocation17 + $0xae0] sm:$0xff] }
 0x96e   : > { %8845 = vmatpush1.bf16.msra.mxu1 %v14129_v61  ;;  %8805 = vmatprep.subr.bf16.mxu0 %v14114_v27  ;;  %v14289_v61 = vcombine.low %v5808_v15, %v5816_v56  ;;  %v14018_v27 = vcombine.high %v5536_v30, %v5544_v63  ;;  %v13971_v15 = vcombine.low %v5489_v39, %v5497_v41  ;;  %v5433_v39 = vld [vmem:[#allocation17 + $0x160] sm:$0xff] }
 0x96f   : > { %8846 = vmatprep.subr.bf16.mxu1 %v14370_v20  ;;  %v14274_v20 = vcombine.high %v5792_v58, %v5800_v22  ;;  %v5681_v41 = vld [vmem:[#allocation17 + $0x920] sm:$0xff] }
 0x971   : > { %8806 = vmatpush2.bf16.msra.mxu0 %v14113_v1  ;;  %v14017_v1 = vcombine.low %v5536_v30, %v5544_v63 }
 0x972   : > { %8847 = vmatpush2.bf16.msra.mxu1 %v14369_v14  ;;  %8807 = vmatprep.subr.bf16.mxu0 %v14098_v35  ;;  %v14273_v14 = vcombine.low %v5792_v58, %v5800_v22  ;;  %v14002_v35 = vcombine.high %v5520_v7, %v5528_v24  ;;  %v5457_v58 = vld [vmem:[#allocation17 + $0x220] sm:$0xff] }
 0x973   : > { %8848 = vmatprep.subr.bf16.mxu1 %v14354_v36  ;;  %v14258_v36 = vcombine.high %v5776_v10, %v5784_v45  ;;  %v5465_v22 = vld [vmem:[#allocation17 + $0x260] sm:$0xff] }
 0x975   : > { %8808 = vmatpush2.bf16.msra.mxu0 %v14097_v12  ;;  %v14001_v12 = vcombine.low %v5520_v7, %v5528_v24  ;;  %v13955_v24 = vcombine.low %v5473_v28, %v5481_v44 }
 0x976   : > { %8849 = vmatpush2.bf16.msra.mxu1 %v14353_v50  ;;  %8809 = vmatprep.subr.bf16.mxu0 %v14082_v31  ;;  %v14257_v50 = vcombine.low %v5776_v10, %v5784_v45  ;;  %v13988_v31 = vcombine.high %v5505_v23, %v5513_v18  ;;  %v5449_v23 = vld [vmem:[#allocation17 + $0x1e0] sm:$0xff] }
 0x977   : > { %8850 = vmatprep.subr.bf16.mxu1 %v14338_v3  ;;  %v18130_v3 = vld [vmem:[#allocation10] sm:$0xff]  ;;  %v5697_v18 = vld [vmem:[#allocation17 + $0x9a0] sm:$0xff] }
 0x978   : > { %v5910_v21 = vrot.slane %v18130_v3, %v17759_v57 }
 0x979   : > { %8810 = vmatpush2.bf16.msra.mxu0 %v14081_v42  ;;  %v5906_v42 = vrot.slane %v18130_v3, %v17748_v54 }
 0x97a   : > { %8851 = vmatpush2.bf16.msra.mxu1 %v14337_v4  ;;  %8811 = vmatprep.subr.bf16.mxu0 %v14066_v43  ;;  %v5745_v4 = vld [vmem:[#allocation17 + $0xb20] sm:$0xff] }
 0x97b   : > { %8852 = vmatprep.subr.bf16.mxu1 %v14322_v51  ;;  %v5753_v43 = vld [vmem:[#allocation17 + $0xb60] sm:$0xff]  ;;  %v14243_v51 = vcombine.low %v5761_v52, %v5769_v48  ;;  %v13939_v48 = vcombine.low %v5457_v58, %v5465_v22 }
 0x97c   : > { %v5705_v52 = vld [vmem:[#allocation17 + $0x9e0] sm:$0xff] }
 0x97d   : > { %8812 = vmatpush2.bf16.msra.mxu0 %v14065_v29 }
 0x97e   : > { %8853 = vmatpush2.bf16.msra.mxu1 %v14321_v25  ;;  %8813 = vmatprep.subr.bf16.mxu0 %v14050_v55  ;;  %v14228_v55 = vcombine.high %v5745_v4, %v5753_v43 }
 0x97f   : > { %8854 = vmatprep.subr.bf16.mxu1 %v14306_v11  ;;  %v5729_v11 = vld [vmem:[#allocation17 + $0xaa0] sm:$0xff] }
 0x980   : > { %v14212_v63 = vcombine.high %v5729_v11, %v5737_v33 }
 0x981   : > { %8814 = vmatpush2.bf16.msra.mxu0 %v14049_v62 }
 0x982   : > { %8855 = vmatpush2.bf16.msra.mxu1 %v14305_v34  ;;  %8815 = vmatprep.subr.bf16.mxu0 %v14034_v8  ;;  %v14227_v34 = vcombine.low %v5745_v4, %v5753_v43  ;;  %v13956_v8 = vcombine.high %v5473_v28, %v5481_v44  ;;  %v14179_v4 = vcombine.low %v5697_v18, %v5705_v52  ;;  %v5665_v28 = vld [vmem:[#allocation17 + $0x8a0] sm:$0xff] }
 0x983   : > { %8856 = vmatprep.subr.bf16.mxu1 %v14290_v19  ;;  %v5673_v44 = vld [vmem:[#allocation17 + $0x8e0] sm:$0xff] }
 0x985   : > { %8816 = vmatpush2.bf16.msra.mxu0 %v14033_v59 }
 0x986   : > { %8857 = vmatpush2.bf16.msra.mxu1 %v14289_v61  ;;  %8817 = vmatprep.subr.bf16.mxu0 %v14018_v27  ;;  %v5713_v27 = vld [vmem:[#allocation17 + $0xa20] sm:$0xff] }
 0x987   : > { %8858 = vmatprep.subr.bf16.mxu1 %v14274_v20  ;;  %v5721_v20 = vld [vmem:[#allocation17 + $0xa60] sm:$0xff] }
 0x989   : > { %8818 = vmatpush2.bf16.msra.mxu0 %v14017_v1  ;;  %v14211_v1 = vcombine.low %v5729_v11, %v5737_v33  ;;  %v14148_v11 = vcombine.high %v5665_v28, %v5673_v44  ;;  %v5393_v33 = vld [vmem:[#allocation17 + $0x20] sm:$0xff] }
 0x98a   : > { %8859 = vmatpush2.bf16.msra.mxu1 %v14273_v14  ;;  %8819 = vmatprep.subr.bf16.mxu0 %v14002_v35  ;;  %v13940_v14 = vcombine.high %v5457_v58, %v5465_v22  ;;  %v14196_v35 = vcombine.high %v5713_v27, %v5721_v20  ;;  %v5641_v58 = vld [vmem:[#allocation17 + $0x7e0] sm:$0xff] }
 0x98b   : > { %8860 = vmatprep.subr.bf16.mxu1 %v14258_v36  ;;  %v5441_v36 = vld [vmem:[#allocation17 + $0x1a0] sm:$0xff] }
 0x98c   : > { %v5889_v22 = vld [vmem:[#allocation17 + $0xfa0] sm:$0xff] }
 0x98d   : > { %8820 = vmatpush2.bf16.msra.mxu0 %v14001_v12  ;;  %v14195_v12 = vcombine.low %v5713_v27, %v5721_v20 }
 0x98e   : > { %8861 = vmatpush2.bf16.msra.mxu1 %v14257_v50  ;;  %8871 = vmatprep.subr.bf16.mxu0 %v13988_v31  ;;  %v13924_v50 = vcombine.high %v5441_v36, %v5449_v23  ;;  %v14180_v31 = vcombine.high %v5697_v18, %v5705_v52  ;;  %v5601_v52 = vld [vmem:[#allocation17 + $0x6a0] sm:$0xff] }
 0x98f   : > { %8912 = vmatprep.subr.bf16.mxu1 %v14244_v38  ;;  %v5425_v38 = vld [vmem:[#allocation17 + $0x120] sm:$0xff] }
 0x990   : > { %8822 = vmatmul.mubr.bf16.vlgmr.msra.gmra.mxu0 %v18112_v17  ;;  %v8577_v29 = vpop.f32.mrf.mxu0  ;;  %v8618_v25 = vpop.f32.mrf.mxu1  ;;  %v13908_v43 = vcombine.high %v5425_v38, %v5433_v39 }
 0x991   : > { %8863 = vmatmul.mubr.bf16.vlgmr.msra.gmra.mxu1 %v18114_v49  ;;  %v8578_v13 = vadd.f32 %v8577_v29, %v5906_v42  ;;  %8872 = vmatpush1.bf16.msra.mxu0 %v13987_v47  ;;  %v5689_v47 = vld [vmem:[#allocation17 + $0x960] sm:$0xff]  ;;  %v13923_v42 = vcombine.low %v5441_v36, %v5449_v23  ;;  %v13907_v29 = vcombine.low %v5425_v38, %v5433_v39 }
 0x992   : > { %8903 = vmatprep.mubr.bf16.mxu0 %v18108_v2  ;;  %8913 = vmatpush1.bf16.msra.mxu1 %v14243_v51  ;;  %v8579_v56 = vpop.f32.mrf.mxu0  ;;  %v8620_v62 = vpop.f32.mrf.mxu1  ;;  %v14164_v51 = vcombine.high %v5681_v41, %v5689_v47 }
 0x993   : > { %v18139_v19 = vadd.f32 %v8618_v25, %v8578_v13  ;;  %8944 = vmatprep.mubr.bf16.mxu1 %v18110_v53  ;;  %v8580_v30 = vadd.f32 %v8579_v56, %v5910_v21  ;;  %8873 = vmatprep.subr.bf16.mxu0 %v13972_v32  ;;  %v5409_v21 = vld [vmem:[#allocation17 + $0xa0] sm:$0xff]  ;;  %v14163_v25 = vcombine.low %v5681_v41, %v5689_v47 }
 0x994   : > { %8914 = vmatprep.subr.bf16.mxu1 %v14228_v55  ;;  %v8581_v59 = vpop.f32.mrf.mxu0  ;;  %v8622_v61 = vpop.f32.mrf.mxu1  ;;  %v5417_v32 = vld [vmem:[#allocation17 + $0xe0] sm:$0xff] }
 0x995   : > { %v18142_v7 = vadd.f32 %v8620_v62, %v8580_v30  ;;  %8874 = vmatpush1.bf16.msra.mxu0 %v13971_v15  ;;  %v13892_v55 = vcombine.high %v5409_v21, %v5417_v32  ;;  %v5401_v13 = vld [vmem:[#allocation17 + $0x60] sm:$0xff]  ;;  %v13891_v62 = vcombine.low %v5409_v21, %v5417_v32 }
 0x996   : > { %8915 = vmatpush1.bf16.msra.mxu1 %v14227_v34  ;;  %v8582_v10 = vpop.f32.mrf.mxu0  ;;  %v8623_v45 = vpop.f32.mrf.mxu1  ;;  %8875 = vmatprep.subr.bf16.mxu0 %v13956_v8  ;;  %v5649_v15 = vld [vmem:[#allocation17 + $0x820] sm:$0xff]  ;;  %v14147_v34 = vcombine.low %v5665_v28, %v5673_v44  ;;  %v13876_v8 = vcombine.high %v5393_v33, %v5401_v13  ;;  %v13875_v61 = vcombine.low %v5393_v33, %v5401_v13 }
 0x997   : > { %8916 = vmatprep.subr.bf16.mxu1 %v14212_v63  ;;  %v5657_v56 = vld [vmem:[#allocation17 + $0x860] sm:$0xff] }
 0x998   : > { %v14132_v30 = vcombine.high %v5649_v15, %v5657_v56  ;;  %v5633_v63 = vld [vmem:[#allocation17 + $0x7a0] sm:$0xff]  ;;  %v14131_v27 = vcombine.low %v5649_v15, %v5657_v56 }
 0x999   : > { %8876 = vmatpush1.bf16.msra.mxu0 %v13955_v24  ;;  %v5897_v59 = vld [vmem:[#allocation17 + $0xfe0] sm:$0xff]  ;;  %v14116_v20 = vcombine.high %v5633_v63, %v5641_v58 }
 0x99a   : > { %8917 = vmatpush1.bf16.msra.mxu1 %v14211_v1  ;;  %8877 = vmatprep.subr.bf16.mxu0 %v13940_v14  ;;  %v14372_v24 = vcombine.high %v5889_v22, %v5897_v59  ;;  %v5617_v10 = vld [vmem:[#allocation17 + $0x720] sm:$0xff]  ;;  %v14371_v36 = vcombine.low %v5889_v22, %v5897_v59 }
 0x99b   : > { %8918 = vmatprep.subr.bf16.mxu1 %v14196_v35  ;;  %v5625_v45 = vld [vmem:[#allocation17 + $0x760] sm:$0xff]  ;;  %v14115_v35 = vcombine.low %v5633_v63, %v5641_v58 }
 0x99c   : > { %v5873_v1 = vld [vmem:[#allocation17 + $0xf20] sm:$0xff]  ;;  %v14100_v23 = vcombine.high %v5617_v10, %v5625_v45 }
 0x99d   : > { %8878 = vmatpush1.bf16.msra.mxu0 %v13939_v48  ;;  %v5881_v14 = vld [vmem:[#allocation17 + $0xf60] sm:$0xff] }
 0x99e   : > { %8919 = vmatpush1.bf16.msra.mxu1 %v14195_v12  ;;  %8879 = vmatprep.subr.bf16.mxu0 %v13924_v50  ;;  %v14356_v18 = vcombine.high %v5873_v1, %v5881_v14  ;;  %v5609_v48 = vld [vmem:[#allocation17 + $0x6e0] sm:$0xff]  ;;  %v14355_v38 = vcombine.low %v5873_v1, %v5881_v14 }
 0x99f   : > { %8920 = vmatprep.subr.bf16.mxu1 %v14180_v31  ;;  %v5857_v12 = vld [vmem:[#allocation17 + $0xea0] sm:$0xff]  ;;  %v14099_v31 = vcombine.low %v5617_v10, %v5625_v45  ;;  %v14084_v39 = vcombine.high %v5601_v52, %v5609_v48 }
 0x9a0   : > { %v5865_v50 = vld [vmem:[#allocation17 + $0xee0] sm:$0xff] }
 0x9a1   : > { %8880 = vmatpush1.bf16.msra.mxu0 %v13923_v42  ;;  %v14340_v41 = vcombine.high %v5857_v12, %v5865_v50  ;;  %v5585_v47 = vld [vmem:[#allocation17 + $0x620] sm:$0xff]  ;;  %v14339_v21 = vcombine.low %v5857_v12, %v5865_v50  ;;  %v5506_v50 = vld [vmem:[#allocation17 + $0x3a8] sm:$0xff] }
 0x9a2   : > { %8921 = vmatpush1.bf16.msra.mxu1 %v14179_v4  ;;  %8881 = vmatprep.subr.bf16.mxu0 %v13908_v43  ;;  %v5593_v42 = vld [vmem:[#allocation17 + $0x660] sm:$0xff] }
 0x9a3   : > { %8922 = vmatprep.subr.bf16.mxu1 %v14164_v51  ;;  %v5841_v4 = vld [vmem:[#allocation17 + $0xe20] sm:$0xff]  ;;  %v14083_v51 = vcombine.low %v5601_v52, %v5609_v48  ;;  %v14068_v32 = vcombine.high %v5585_v47, %v5593_v42 }
 0x9a4   : > { %v5849_v43 = vld [vmem:[#allocation17 + $0xe60] sm:$0xff] }
 0x9a5   : > { %8882 = vmatpush1.bf16.msra.mxu0 %v13907_v29  ;;  %v14324_v28 = vcombine.high %v5841_v4, %v5849_v43  ;;  %v5569_v44 = vld [vmem:[#allocation17 + $0x5a0] sm:$0xff]  ;;  %v14323_v33 = vcombine.low %v5841_v4, %v5849_v43  ;;  %v5490_v43 = vld [vmem:[#allocation17 + $0x328] sm:$0xff] }
 0x9a6   : > { %8923 = vmatpush1.bf16.msra.mxu1 %v14163_v25  ;;  %8883 = vmatprep.subr.bf16.mxu0 %v13892_v55  ;;  %v5577_v29 = vld [vmem:[#allocation17 + $0x5e0] sm:$0xff] }
 0x9a7   : > { %8924 = vmatprep.subr.bf16.mxu1 %v14148_v11  ;;  %v5825_v25 = vld [vmem:[#allocation17 + $0xda0] sm:$0xff]  ;;  %v14067_v11 = vcombine.low %v5585_v47, %v5593_v42  ;;  %v14052_v13 = vcombine.high %v5569_v44, %v5577_v29 }
 0x9a8   : > { %v5833_v55 = vld [vmem:[#allocation17 + $0xde0] sm:$0xff] }
 0x9a9   : > { %8884 = vmatpush1.bf16.msra.mxu0 %v13891_v62  ;;  %v14308_v15 = vcombine.high %v5825_v25, %v5833_v55  ;;  %v5553_v56 = vld [vmem:[#allocation17 + $0x520] sm:$0xff]  ;;  %v14307_v63 = vcombine.low %v5825_v25, %v5833_v55  ;;  %v5918_v25 = vrot.slane %v18130_v3, %v18086_v9 }
 0x9aa   : > { %8925 = vmatpush1.bf16.msra.mxu1 %v14147_v34  ;;  %8885 = vmatprep.subr.bf16.mxu0 %v13876_v8  ;;  %v5561_v62 = vld [vmem:[#allocation17 + $0x560] sm:$0xff] }
 0x9ab   : > { %8926 = vmatprep.subr.bf16.mxu1 %v14132_v30  ;;  %v5809_v34 = vld [vmem:[#allocation17 + $0xd20] sm:$0xff]  ;;  %v14051_v30 = vcombine.low %v5569_v44, %v5577_v29  ;;  %v14036_v58 = vcombine.high %v5553_v56, %v5561_v62  ;;  %v5754_v44 = vld [vmem:[#allocation17 + $0xb68] sm:$0xff] }
 0x9ac   : > { %v5817_v8 = vld [vmem:[#allocation17 + $0xd60] sm:$0xff] }
 0x9ad   : > { %8886 = vmatpush1.bf16.msra.mxu0 %v13875_v61  ;;  %v14292_v22 = vcombine.high %v5809_v34, %v5817_v8  ;;  %v5537_v59 = vld [vmem:[#allocation17 + $0x4a0] sm:$0xff]  ;;  %v14291_v10 = vcombine.low %v5809_v34, %v5817_v8  ;;  %v5738_v34 = vld [vmem:[#allocation17 + $0xae8] sm:$0xff] }
 0x9ae   : > { %8927 = vmatpush1.bf16.msra.mxu1 %v14131_v27  ;;  %8887 = vmatprep.subr.bf16.mxu0 %v14116_v20  ;;  %v5545_v61 = vld [vmem:[#allocation17 + $0x4e0] sm:$0xff] }
 0x9af   : > { %8928 = vmatprep.subr.bf16.mxu1 %v14372_v24  ;;  %v5793_v27 = vld [vmem:[#allocation17 + $0xca0] sm:$0xff]  ;;  %v14035_v24 = vcombine.low %v5553_v56, %v5561_v62  ;;  %v14020_v45 = vcombine.high %v5537_v59, %v5545_v61  ;;  %v5730_v62 = vld [vmem:[#allocation17 + $0xaa8] sm:$0xff] }
 0x9b0   : > { %v5801_v20 = vld [vmem:[#allocation17 + $0xce0] sm:$0xff] }
 0x9b1   : > { %8888 = vmatpush2.bf16.msra.mxu0 %v14115_v35  ;;  %v14276_v1 = vcombine.high %v5793_v27, %v5801_v20  ;;  %v5521_v14 = vld [vmem:[#allocation17 + $0x420] sm:$0xff]  ;;  %v14275_v52 = vcombine.low %v5793_v27, %v5801_v20  ;;  %v14214_v20 = vcombine.high %v5730_v62, %v5738_v34 }
 0x9b2   : > { %8929 = vmatpush2.bf16.msra.mxu1 %v14371_v36  ;;  %8889 = vmatprep.subr.bf16.mxu0 %v14100_v23  ;;  %v5529_v35 = vld [vmem:[#allocation17 + $0x460] sm:$0xff] }
 0x9b3   : > { %8930 = vmatprep.subr.bf16.mxu1 %v14356_v18  ;;  %v5777_v36 = vld [vmem:[#allocation17 + $0xc20] sm:$0xff]  ;;  %v14019_v18 = vcombine.low %v5537_v59, %v5545_v61  ;;  %v14004_v48 = vcombine.high %v5521_v14, %v5529_v35 }
 0x9b4   : > { %v5785_v23 = vld [vmem:[#allocation17 + $0xc60] sm:$0xff] }
 0x9b5   : > { %8890 = vmatpush2.bf16.msra.mxu0 %v14099_v31  ;;  %v14260_v12 = vcombine.high %v5777_v36, %v5785_v23  ;;  %v5514_v31 = vld [vmem:[#allocation17 + $0x3e8] sm:$0xff]  ;;  %v14259_v47 = vcombine.low %v5777_v36, %v5785_v23 }
 0x9b6   : > { %8931 = vmatpush2.bf16.msra.mxu1 %v14355_v38  ;;  %8891 = vmatprep.subr.bf16.mxu0 %v14084_v39  ;;  %v5762_v38 = vld [vmem:[#allocation17 + $0xba8] sm:$0xff]  ;;  %v13990_v42 = vcombine.high %v5506_v50, %v5514_v31 }
 0x9b7   : > { %8932 = vmatprep.subr.bf16.mxu1 %v14340_v41  ;;  %v5770_v39 = vld [vmem:[#allocation17 + $0xbe8] sm:$0xff]  ;;  %v14003_v41 = vcombine.low %v5521_v14, %v5529_v35 }
 0x9b8   : > { %v14246_v4 = vcombine.high %v5762_v38, %v5770_v39  ;;  %v14245_v29 = vcombine.low %v5762_v38, %v5770_v39  ;;  %v5714_v14 = vld [vmem:[#allocation17 + $0xa28] sm:$0xff] }
 0x9b9   : > { %8892 = vmatpush2.bf16.msra.mxu0 %v14083_v51  ;;  %v5498_v51 = vld [vmem:[#allocation17 + $0x368] sm:$0xff] }
 0x9ba   : > { %8933 = vmatpush2.bf16.msra.mxu1 %v14339_v21  ;;  %8893 = vmatprep.subr.bf16.mxu0 %v14068_v32  ;;  %v5914_v21 = vrot.slane %v18130_v3, %v18083_v60  ;;  %v13989_v32 = vcombine.low %v5506_v50, %v5514_v31  ;;  %v13974_v55 = vcombine.high %v5490_v43, %v5498_v51  ;;  %v5722_v35 = vld [vmem:[#allocation17 + $0xa68] sm:$0xff] }
 0x9bb   : > { %8934 = vmatprep.subr.bf16.mxu1 %v14324_v28  ;;  %v5746_v28 = vld [vmem:[#allocation17 + $0xb28] sm:$0xff]  ;;  %v14198_v50 = vcombine.high %v5714_v14, %v5722_v35 }
 0x9bc   : > { %v14230_v56 = vcombine.high %v5746_v28, %v5754_v44  ;;  %v5442_v31 = vld [vmem:[#allocation17 + $0x1a8] sm:$0xff] }
 0x9bd   : > { %8894 = vmatpush2.bf16.msra.mxu0 %v14067_v11  ;;  %v5474_v11 = vld [vmem:[#allocation17 + $0x2a8] sm:$0xff] }
 0x9be   : > { %8935 = vmatpush2.bf16.msra.mxu1 %v14323_v33  ;;  %8895 = vmatprep.subr.bf16.mxu0 %v14052_v13  ;;  %v5482_v33 = vld [vmem:[#allocation17 + $0x2e8] sm:$0xff] }
 0x9bf   : > { %8936 = vmatprep.subr.bf16.mxu1 %v14308_v15  ;;  %v13958_v59 = vcombine.high %v5474_v11, %v5482_v33  ;;  %v13957_v23 = vcombine.low %v5474_v11, %v5482_v33  ;;  %v5450_v38 = vld [vmem:[#allocation17 + $0x1e8] sm:$0xff] }
 0x9c0   : > { %v5698_v39 = vld [vmem:[#allocation17 + $0x9a8] sm:$0xff] }
 0x9c1   : > { %8896 = vmatpush2.bf16.msra.mxu0 %v14051_v30  ;;  %v13973_v30 = vcombine.low %v5490_v43, %v5498_v51  ;;  %v5426_v51 = vld [vmem:[#allocation17 + $0x128] sm:$0xff] }
 0x9c2   : > { %8937 = vmatpush2.bf16.msra.mxu1 %v14307_v63  ;;  %8897 = vmatprep.subr.bf16.mxu0 %v14036_v58  ;;  %v5410_v11 = vld [vmem:[#allocation17 + $0xa8] sm:$0xff] }
 0x9c3   : > { %8938 = vmatprep.subr.bf16.mxu1 %v14292_v22  ;;  %v14229_v22 = vcombine.low %v5746_v28, %v5754_v44  ;;  %v5690_v28 = vld [vmem:[#allocation17 + $0x968] sm:$0xff]  ;;  %v13925_v44 = vcombine.low %v5442_v31, %v5450_v38 }
 0x9c4   : > { %v5418_v33 = vld [vmem:[#allocation17 + $0xe8] sm:$0xff] }
 0x9c5   : > { %8898 = vmatpush2.bf16.msra.mxu0 %v14035_v24  ;;  %v5458_v24 = vld [vmem:[#allocation17 + $0x228] sm:$0xff] }
 0x9c6   : > { %8939 = vmatpush2.bf16.msra.mxu1 %v14291_v10  ;;  %8899 = vmatprep.subr.bf16.mxu0 %v14020_v45  ;;  %v5466_v10 = vld [vmem:[#allocation17 + $0x268] sm:$0xff] }
 0x9c7   : > { %8940 = vmatprep.subr.bf16.mxu1 %v14276_v1 }
 0x9c9   : > { %8900 = vmatpush2.bf16.msra.mxu0 %v14019_v18 }
 0x9ca   : > { %8941 = vmatpush2.bf16.msra.mxu1 %v14275_v52  ;;  %8901 = vmatprep.subr.bf16.mxu0 %v14004_v48  ;;  %v14213_v48 = vcombine.low %v5730_v62, %v5738_v34  ;;  %v13894_v34 = vcombine.high %v5410_v11, %v5418_v33 }
 0x9cb   : > { %8942 = vmatprep.subr.bf16.mxu1 %v14260_v12  ;;  %v13942_v12 = vcombine.high %v5458_v24, %v5466_v10 }
 0x9cd   : > { %8902 = vmatpush2.bf16.msra.mxu0 %v14003_v41  ;;  %v5706_v41 = vld [vmem:[#allocation17 + $0x9e8] sm:$0xff] }
 0x9ce   : > { %8943 = vmatpush2.bf16.msra.mxu1 %v14259_v47  ;;  %8953 = vmatprep.subr.bf16.mxu0 %v13990_v42  ;;  %v13941_v47 = vcombine.low %v5458_v24, %v5466_v10  ;;  %v14197_v42 = vcombine.low %v5714_v14, %v5722_v35  ;;  %v14182_v43 = vcombine.high %v5698_v39, %v5706_v41  ;;  %v5634_v10 = vld [vmem:[#allocation17 + $0x7a8] sm:$0xff] }
 0x9cf   : > { %8994 = vmatprep.subr.bf16.mxu1 %v14246_v4  ;;  %v13926_v4 = vcombine.high %v5442_v31, %v5450_v38  ;;  %v5898_v14 = vld [vmem:[#allocation17 + $0xfe8] sm:$0xff] }
 0x9d0   : > { %v8659_v13 = vpop.f32.mrf.mxu0  ;;  %v8700_v15 = vpop.f32.mrf.mxu1  ;;  %8904 = vmatmul.mubr.bf16.vlgmr.msra.gmra.mxu0 %v18112_v17  ;;  %v5882_v31 = vld [vmem:[#allocation17 + $0xf68] sm:$0xff] }
 0x9d1   : > { %v8660_v8 = vadd.f32 %v8659_v13, %v5914_v21  ;;  %8945 = vmatmul.mubr.bf16.vlgmr.msra.gmra.mxu1 %v18114_v49  ;;  %8954 = vmatpush1.bf16.msra.mxu0 %v13989_v32  ;;  %v5434_v21 = vld [vmem:[#allocation17 + $0x168] sm:$0xff] }
 0x9d2   : > { %8985 = vmatprep.mubr.bf16.mxu0 %v18108_v2  ;;  %8995 = vmatpush1.bf16.msra.mxu1 %v14245_v29  ;;  %v8661_v63 = vpop.f32.mrf.mxu0  ;;  %v8702_v58 = vpop.f32.mrf.mxu1  ;;  %v5682_v32 = vld [vmem:[#allocation17 + $0x928] sm:$0xff]  ;;  %v14181_v29 = vcombine.low %v5698_v39, %v5706_v41 }
 0x9d3   : > { %v18151_v61 = vadd.f32 %v8700_v15, %v8660_v8  ;;  %9026 = vmatprep.mubr.bf16.mxu1 %v18110_v53  ;;  %v8662_v27 = vadd.f32 %v8661_v63, %v5918_v25  ;;  %8955 = vmatprep.subr.bf16.mxu0 %v13974_v55  ;;  %v13910_v25 = vcombine.high %v5426_v51, %v5434_v21  ;;  %v5666_v13 = vld [vmem:[#allocation17 + $0x8a8] sm:$0xff] }
 0x9d4   : > { %v8663_v45 = vpop.f32.mrf.mxu0  ;;  %v8704_v1 = vpop.f32.mrf.mxu1  ;;  %8996 = vmatprep.subr.bf16.mxu1 %v14230_v56  ;;  %v14166_v55 = vcombine.high %v5682_v32, %v5690_v28  ;;  %v5674_v15 = vld [vmem:[#allocation17 + $0x8e8] sm:$0xff]  ;;  %v13909_v56 = vcombine.low %v5426_v51, %v5434_v21  ;;  %v14165_v62 = vcombine.low %v5682_v32, %v5690_v28 }
 0x9d5   : > { %v18154_v36 = vadd.f32 %v8702_v58, %v8662_v27  ;;  %8956 = vmatpush1.bf16.msra.mxu0 %v13973_v30  ;;  %v14150_v8 = vcombine.high %v5666_v13, %v5674_v15  ;;  %v5394_v30 = vld [vmem:[#allocation17 + $0x28] sm:$0xff]  ;;  %v14149_v27 = vcombine.low %v5666_v13, %v5674_v15 }
 0x9d6   : > { %8997 = vmatpush1.bf16.msra.mxu1 %v14229_v22  ;;  %v8664_v18 = vpop.f32.mrf.mxu0  ;;  %v8705_v52 = vpop.f32.mrf.mxu1  ;;  %8957 = vmatprep.subr.bf16.mxu0 %v13958_v59  ;;  %v5402_v63 = vld [vmem:[#allocation17 + $0x68] sm:$0xff]  ;;  %v13893_v59 = vcombine.low %v5410_v11, %v5418_v33 }
 0x9d7   : > { %8998 = vmatprep.subr.bf16.mxu1 %v14214_v20  ;;  %v5650_v58 = vld [vmem:[#allocation17 + $0x828] sm:$0xff]  ;;  %v13878_v20 = vcombine.high %v5394_v30, %v5402_v63  ;;  %v13877_v35 = vcombine.low %v5394_v30, %v5402_v63 }
 0x9d8   : > { %v5658_v22 = vld [vmem:[#allocation17 + $0x868] sm:$0xff] }
 0x9d9   : > { %8958 = vmatpush1.bf16.msra.mxu0 %v13957_v23  ;;  %v14134_v24 = vcombine.high %v5650_v58, %v5658_v22  ;;  %v5642_v45 = vld [vmem:[#allocation17 + $0x7e8] sm:$0xff]  ;;  %v14133_v23 = vcombine.low %v5650_v58, %v5658_v22 }
 0x9da   : > { %8999 = vmatpush1.bf16.msra.mxu1 %v14213_v48  ;;  %8959 = vmatprep.subr.bf16.mxu0 %v13942_v12  ;;  %v5890_v1 = vld [vmem:[#allocation17 + $0xfa8] sm:$0xff]  ;;  %v14118_v18 = vcombine.high %v5634_v10, %v5642_v45  ;;  %v14117_v38 = vcombine.low %v5634_v10, %v5642_v45 }
 0x9db   : > { %9000 = vmatprep.subr.bf16.mxu1 %v14198_v50  ;;  %v14374_v52 = vcombine.high %v5890_v1, %v5898_v14  ;;  %v5618_v48 = vld [vmem:[#allocation17 + $0x728] sm:$0xff]  ;;  %v14373_v39 = vcombine.low %v5890_v1, %v5898_v14 }
 0x9dc   : > { %v5626_v12 = vld [vmem:[#allocation17 + $0x768] sm:$0xff] }
 0x9dd   : > { %8960 = vmatpush1.bf16.msra.mxu0 %v13941_v47  ;;  %v5874_v50 = vld [vmem:[#allocation17 + $0xf28] sm:$0xff]  ;;  %v14102_v41 = vcombine.high %v5618_v48, %v5626_v12  ;;  %v14101_v21 = vcombine.low %v5618_v48, %v5626_v12 }
 0x9de   : > { %9001 = vmatpush1.bf16.msra.mxu1 %v14197_v42  ;;  %8961 = vmatprep.subr.bf16.mxu0 %v13926_v4  ;;  %v14358_v47 = vcombine.high %v5874_v50, %v5882_v31  ;;  %v5602_v42 = vld [vmem:[#allocation17 + $0x6a8] sm:$0xff]  ;;  %v14357_v32 = vcombine.low %v5874_v50, %v5882_v31 }
 0x9df   : > { %9002 = vmatprep.subr.bf16.mxu1 %v14182_v43  ;;  %v5610_v4 = vld [vmem:[#allocation17 + $0x6e8] sm:$0xff] }
 0x9e0   : > { %v5858_v43 = vld [vmem:[#allocation17 + $0xea8] sm:$0xff]  ;;  %v14086_v28 = vcombine.high %v5602_v42, %v5610_v4  ;;  %v14085_v33 = vcombine.low %v5602_v42, %v5610_v4 }
 0x9e1   : > { %8962 = vmatpush1.bf16.msra.mxu0 %v13925_v44  ;;  %v5866_v51 = vld [vmem:[#allocation17 + $0xee8] sm:$0xff] }
 0x9e2   : > { %9003 = vmatpush1.bf16.msra.mxu1 %v14181_v29  ;;  %8963 = vmatprep.subr.bf16.mxu0 %v13910_v25  ;;  %v14342_v44 = vcombine.high %v5858_v43, %v5866_v51  ;;  %v5586_v29 = vld [vmem:[#allocation17 + $0x628] sm:$0xff]  ;;  %v14341_v13 = vcombine.low %v5858_v43, %v5866_v51 }
 0x9e3   : > { %9004 = vmatprep.subr.bf16.mxu1 %v14166_v55  ;;  %v5594_v25 = vld [vmem:[#allocation17 + $0x668] sm:$0xff] }
 0x9e4   : > { %v5842_v55 = vld [vmem:[#allocation17 + $0xe28] sm:$0xff]  ;;  %v14070_v15 = vcombine.high %v5586_v29, %v5594_v25  ;;  %v14069_v63 = vcombine.low %v5586_v29, %v5594_v25  ;;  %v5771_v29 = vld [vmem:[#allocation17 + $0xbf0] sm:$0xff] }
 0x9e5   : > { %8964 = vmatpush1.bf16.msra.mxu0 %v13909_v56  ;;  %v5850_v11 = vld [vmem:[#allocation17 + $0xe68] sm:$0xff] }
 0x9e6   : > { %9005 = vmatpush1.bf16.msra.mxu1 %v14165_v62  ;;  %8965 = vmatprep.subr.bf16.mxu0 %v13894_v34  ;;  %v14326_v56 = vcombine.high %v5842_v55, %v5850_v11  ;;  %v5570_v62 = vld [vmem:[#allocation17 + $0x5a8] sm:$0xff]  ;;  %v14325_v58 = vcombine.low %v5842_v55, %v5850_v11 }
 0x9e7   : > { %9006 = vmatprep.subr.bf16.mxu1 %v14150_v8  ;;  %v5578_v34 = vld [vmem:[#allocation17 + $0x5e8] sm:$0xff] }
 0x9e8   : > { %v5826_v8 = vld [vmem:[#allocation17 + $0xda8] sm:$0xff]  ;;  %v14054_v22 = vcombine.high %v5570_v62, %v5578_v34  ;;  %v14053_v45 = vcombine.low %v5570_v62, %v5578_v34  ;;  %v5747_v34 = vld [vmem:[#allocation17 + $0xb30] sm:$0xff] }
 0x9e9   : > { %8966 = vmatpush1.bf16.msra.mxu0 %v13893_v59  ;;  %v5834_v30 = vld [vmem:[#allocation17 + $0xde8] sm:$0xff] }
 0x9ea   : > { %9007 = vmatpush1.bf16.msra.mxu1 %v14149_v27  ;;  %8967 = vmatprep.subr.bf16.mxu0 %v13878_v20  ;;  %v14310_v59 = vcombine.high %v5826_v8, %v5834_v30  ;;  %v5554_v27 = vld [vmem:[#allocation17 + $0x528] sm:$0xff]  ;;  %v14309_v1 = vcombine.low %v5826_v8, %v5834_v30  ;;  %v5755_v8 = vld [vmem:[#allocation17 + $0xb70] sm:$0xff] }
 0x9eb   : > { %9008 = vmatprep.subr.bf16.mxu1 %v14134_v24  ;;  %v5562_v20 = vld [vmem:[#allocation17 + $0x568] sm:$0xff] }
 0x9ec   : > { %v5810_v24 = vld [vmem:[#allocation17 + $0xd28] sm:$0xff]  ;;  %v14038_v14 = vcombine.high %v5554_v27, %v5562_v20  ;;  %v14037_v12 = vcombine.low %v5554_v27, %v5562_v20  ;;  %v14232_v20 = vcombine.high %v5747_v34, %v5755_v8 }
 0x9ed   : > { %8968 = vmatpush1.bf16.msra.mxu0 %v13877_v35  ;;  %v5818_v10 = vld [vmem:[#allocation17 + $0xd68] sm:$0xff] }
 0x9ee   : > { %9009 = vmatpush1.bf16.msra.mxu1 %v14133_v23  ;;  %8969 = vmatprep.subr.bf16.mxu0 %v14118_v18  ;;  %v14294_v35 = vcombine.high %v5810_v24, %v5818_v10  ;;  %v5538_v23 = vld [vmem:[#allocation17 + $0x4a8] sm:$0xff]  ;;  %v14293_v50 = vcombine.low %v5810_v24, %v5818_v10  ;;  %v5731_v24 = vld [vmem:[#allocation17 + $0xab0] sm:$0xff] }
 0x9ef   : > { %9010 = vmatprep.subr.bf16.mxu1 %v14374_v52  ;;  %v5546_v18 = vld [vmem:[#allocation17 + $0x4e8] sm:$0xff]  ;;  %v5739_v10 = vld [vmem:[#allocation17 + $0xaf0] sm:$0xff] }
 0x9f0   : > { %v5794_v52 = vld [vmem:[#allocation17 + $0xca8] sm:$0xff]  ;;  %v14022_v31 = vcombine.high %v5538_v23, %v5546_v18  ;;  %v14021_v4 = vcombine.low %v5538_v23, %v5546_v18 }
 0x9f1   : > { %8970 = vmatpush2.bf16.msra.mxu0 %v14117_v38  ;;  %v5802_v48 = vld [vmem:[#allocation17 + $0xce8] sm:$0xff] }
 0x9f2   : > { %9011 = vmatpush2.bf16.msra.mxu1 %v14373_v39  ;;  %8971 = vmatprep.subr.bf16.mxu0 %v14102_v41  ;;  %v14278_v38 = vcombine.high %v5794_v52, %v5802_v48  ;;  %v5522_v39 = vld [vmem:[#allocation17 + $0x428] sm:$0xff]  ;;  %v14277_v43 = vcombine.low %v5794_v52, %v5802_v48 }
 0x9f3   : > { %9012 = vmatprep.subr.bf16.mxu1 %v14358_v47  ;;  %v5530_v41 = vld [vmem:[#allocation17 + $0x468] sm:$0xff] }
 0x9f4   : > { %v5778_v47 = vld [vmem:[#allocation17 + $0xc28] sm:$0xff]  ;;  %v14006_v51 = vcombine.high %v5522_v39, %v5530_v41  ;;  %v14005_v25 = vcombine.low %v5522_v39, %v5530_v41  ;;  %v5715_v39 = vld [vmem:[#allocation17 + $0xa30] sm:$0xff] }
 0x9f5   : > { %8972 = vmatpush2.bf16.msra.mxu0 %v14101_v21  ;;  %v5786_v42 = vld [vmem:[#allocation17 + $0xc68] sm:$0xff]  ;;  %v5723_v41 = vld [vmem:[#allocation17 + $0xa70] sm:$0xff] }
 0x9f6   : > { %9013 = vmatpush2.bf16.msra.mxu1 %v14357_v32  ;;  %8973 = vmatprep.subr.bf16.mxu0 %v14086_v28  ;;  %v14262_v21 = vcombine.high %v5778_v47, %v5786_v42  ;;  %v5507_v32 = vld [vmem:[#allocation17 + $0x3b0] sm:$0xff]  ;;  %v14261_v55 = vcombine.low %v5778_v47, %v5786_v42 }
 0x9f7   : > { %9014 = vmatprep.subr.bf16.mxu1 %v14342_v44  ;;  %v5515_v28 = vld [vmem:[#allocation17 + $0x3f0] sm:$0xff] }
 0x9f8   : > { %v5763_v44 = vld [vmem:[#allocation17 + $0xbb0] sm:$0xff]  ;;  %v13992_v11 = vcombine.high %v5507_v32, %v5515_v28  ;;  %v13991_v62 = vcombine.low %v5507_v32, %v5515_v28  ;;  %v14200_v28 = vcombine.high %v5715_v39, %v5723_v41 }
 0x9f9   : > { %8974 = vmatpush2.bf16.msra.mxu0 %v14085_v33  ;;  %v14248_v33 = vcombine.high %v5763_v44, %v5771_v29  ;;  %v14247_v30 = vcombine.low %v5763_v44, %v5771_v29  ;;  %v5443_v44 = vld [vmem:[#allocation17 + $0x1b0] sm:$0xff] }
 0x9fa   : > { %9015 = vmatpush2.bf16.msra.mxu1 %v14341_v13  ;;  %8975 = vmatprep.subr.bf16.mxu0 %v14070_v15  ;;  %v5491_v13 = vld [vmem:[#allocation17 + $0x330] sm:$0xff] }
 0x9fb   : > { %9016 = vmatprep.subr.bf16.mxu1 %v14326_v56  ;;  %v5499_v15 = vld [vmem:[#allocation17 + $0x370] sm:$0xff]  ;;  %v5922_v56 = vrot.slane %v18130_v3, %v17892_v0 }
 0x9fc   : > { %v5451_v29 = vld [vmem:[#allocation17 + $0x1f0] sm:$0xff] }
 0x9fd   : > { %8976 = vmatpush2.bf16.msra.mxu0 %v14069_v63  ;;  %v5926_v63 = vrot.slane %v18130_v3, %v17938_v40  ;;  %v14231_v3 = vcombine.low %v5747_v34, %v5755_v8  ;;  %v5683_v34 = vld [vmem:[#allocation17 + $0x930] sm:$0xff] }
 0x9fe   : > { %9017 = vmatpush2.bf16.msra.mxu1 %v14325_v58  ;;  %8977 = vmatprep.subr.bf16.mxu0 %v14054_v22  ;;  %v13976_v58 = vcombine.high %v5491_v13, %v5499_v15  ;;  %v5475_v22 = vld [vmem:[#allocation17 + $0x2b0] sm:$0xff] }
 0x9ff   : > { %9018 = vmatprep.subr.bf16.mxu1 %v14310_v59  ;;  %v5483_v59 = vld [vmem:[#allocation17 + $0x2f0] sm:$0xff] }
 0xa00   : > { %v13960_v23 = vcombine.high %v5475_v22, %v5483_v59  ;;  %v5691_v8 = vld [vmem:[#allocation17 + $0x970] sm:$0xff] }
 0xa01   : > { %8978 = vmatpush2.bf16.msra.mxu0 %v14053_v45 }
 0xa02   : > { %9019 = vmatpush2.bf16.msra.mxu1 %v14309_v1  ;;  %8979 = vmatprep.subr.bf16.mxu0 %v14038_v14  ;;  %v13975_v14 = vcombine.low %v5491_v13, %v5499_v15  ;;  %v13928_v13 = vcombine.high %v5443_v44, %v5451_v29 }
 0xa03   : > { %9020 = vmatprep.subr.bf16.mxu1 %v14294_v35 }
 0xa05   : > { %8980 = vmatpush2.bf16.msra.mxu0 %v14037_v12  ;;  %v14216_v12 = vcombine.high %v5731_v24, %v5739_v10 }
 0xa06   : > { %9021 = vmatpush2.bf16.msra.mxu1 %v14293_v50  ;;  %8981 = vmatprep.subr.bf16.mxu0 %v14022_v31  ;;  %v5459_v50 = vld [vmem:[#allocation17 + $0x230] sm:$0xff] }
 0xa07   : > { %9022 = vmatprep.subr.bf16.mxu1 %v14278_v38  ;;  %v5467_v31 = vld [vmem:[#allocation17 + $0x270] sm:$0xff] }
 0xa09   : > { %8982 = vmatpush2.bf16.msra.mxu0 %v14021_v4  ;;  %v13959_v4 = vcombine.low %v5475_v22, %v5483_v59  ;;  %v14168_v22 = vcombine.high %v5683_v34, %v5691_v8  ;;  %v5411_v59 = vld [vmem:[#allocation17 + $0xb0] sm:$0xff] }
 0xa0a   : > { %9023 = vmatpush2.bf16.msra.mxu1 %v14277_v43  ;;  %8983 = vmatprep.subr.bf16.mxu0 %v14006_v51  ;;  %v14215_v51 = vcombine.low %v5731_v24, %v5739_v10  ;;  %v5675_v24 = vld [vmem:[#allocation17 + $0x8f0] sm:$0xff] }
 0xa0b   : > { %9024 = vmatprep.subr.bf16.mxu1 %v14262_v21  ;;  %v13944_v21 = vcombine.high %v5459_v50, %v5467_v31 }
 0xa0d   : > { %8984 = vmatpush2.bf16.msra.mxu0 %v14005_v25  ;;  %v5699_v25 = vld [vmem:[#allocation17 + $0x9b0] sm:$0xff] }
 0xa0e   : > { %9025 = vmatpush2.bf16.msra.mxu1 %v14261_v55  ;;  %9035 = vmatprep.subr.bf16.mxu0 %v13992_v11  ;;  %v5707_v55 = vld [vmem:[#allocation17 + $0x9f0] sm:$0xff]  ;;  %v13943_v11 = vcombine.low %v5459_v50, %v5467_v31 }
 0xa0f   : > { %9076 = vmatprep.subr.bf16.mxu1 %v14248_v33  ;;  %v14199_v33 = vcombine.low %v5715_v39, %v5723_v41  ;;  %v14184_v15 = vcombine.high %v5699_v25, %v5707_v55  ;;  %v5643_v39 = vld [vmem:[#allocation17 + $0x7f0] sm:$0xff] }
 0xa10   : > { %v8741_v27 = vpop.f32.mrf.mxu0  ;;  %8986 = vmatmul.mubr.bf16.vlgmr.msra.gmra.mxu0 %v18112_v17  ;;  %v5891_v41 = vld [vmem:[#allocation17 + $0xfb0] sm:$0xff] }
 0xa11   : > { %v8742_v45 = vadd.f32 %v8741_v27, %v5922_v56  ;;  %v8782_v1 = vpop.f32.mrf.mxu1  ;;  %9027 = vmatmul.mubr.bf16.vlgmr.msra.gmra.mxu1 %v18114_v49  ;;  %9036 = vmatpush1.bf16.msra.mxu0 %v13991_v62  ;;  %v5427_v56 = vld [vmem:[#allocation17 + $0x130] sm:$0xff] }
 0xa12   : > { %9067 = vmatprep.mubr.bf16.mxu0 %v18108_v2  ;;  %9077 = vmatpush1.bf16.msra.mxu1 %v14247_v30  ;;  %v8743_v35 = vpop.f32.mrf.mxu0  ;;  %v5435_v62 = vld [vmem:[#allocation17 + $0x170] sm:$0xff]  ;;  %v13927_v30 = vcombine.low %v5443_v44, %v5451_v29 }
 0xa13   : > { %v18163_v18 = vadd.f32 %v8782_v1, %v8742_v45  ;;  %9108 = vmatprep.mubr.bf16.mxu1 %v18110_v53  ;;  %v8744_v52 = vadd.f32 %v8743_v35, %v5926_v63  ;;  %v8784_v48 = vpop.f32.mrf.mxu1  ;;  %9037 = vmatprep.subr.bf16.mxu0 %v13976_v58  ;;  %v14183_v63 = vcombine.low %v5699_v25, %v5707_v55  ;;  %v5419_v27 = vld [vmem:[#allocation17 + $0xf0] sm:$0xff] }
 0xa14   : > { %v8745_v38 = vpop.f32.mrf.mxu0  ;;  %9078 = vmatprep.subr.bf16.mxu1 %v14232_v20  ;;  %v13912_v58 = vcombine.high %v5427_v56, %v5435_v62  ;;  %v5667_v20 = vld [vmem:[#allocation17 + $0x8b0] sm:$0xff]  ;;  %v13911_v10 = vcombine.low %v5427_v56, %v5435_v62  ;;  %v14167_v45 = vcombine.low %v5683_v34, %v5691_v8  ;;  %v13896_v1 = vcombine.high %v5411_v59, %v5419_v27 }
 0xa15   : > { %v18166_v47 = vadd.f32 %v8784_v48, %v8744_v52  ;;  %v8786_v42 = vpop.f32.mrf.mxu1  ;;  %9038 = vmatpush1.bf16.msra.mxu0 %v13975_v14  ;;  %v14152_v14 = vcombine.high %v5667_v20, %v5675_v24  ;;  %v5395_v35 = vld [vmem:[#allocation17 + $0x30] sm:$0xff]  ;;  %v13895_v48 = vcombine.low %v5411_v59, %v5419_v27 }
 0xa16   : > { %9079 = vmatpush1.bf16.msra.mxu1 %v14231_v3  ;;  %v8746_v43 = vpop.f32.mrf.mxu0  ;;  %9039 = vmatprep.subr.bf16.mxu0 %v13960_v23  ;;  %v5403_v3 = vld [vmem:[#allocation17 + $0x70] sm:$0xff] }
 0xa17   : > { %v8787_v32 = vpop.f32.mrf.mxu1  ;;  %9080 = vmatprep.subr.bf16.mxu1 %v14216_v12  ;;  %v5651_v23 = vld [vmem:[#allocation17 + $0x830] sm:$0xff]  ;;  %v14151_v12 = vcombine.low %v5667_v20, %v5675_v24  ;;  %v13880_v50 = vcombine.high %v5395_v35, %v5403_v3 }
 0xa18   : > { %v5659_v52 = vld [vmem:[#allocation17 + $0x870] sm:$0xff] }
 0xa19   : > { %9040 = vmatpush1.bf16.msra.mxu0 %v13959_v4  ;;  %v14136_v31 = vcombine.high %v5651_v23, %v5659_v52  ;;  %v5635_v38 = vld [vmem:[#allocation17 + $0x7b0] sm:$0xff]  ;;  %v13879_v4 = vcombine.low %v5395_v35, %v5403_v3  ;;  %v14135_v43 = vcombine.low %v5651_v23, %v5659_v52 }
 0xa1a   : > { %9081 = vmatpush1.bf16.msra.mxu1 %v14215_v51  ;;  %9041 = vmatprep.subr.bf16.mxu0 %v13944_v21  ;;  %v5899_v42 = vld [vmem:[#allocation17 + $0xff0] sm:$0xff]  ;;  %v14120_v51 = vcombine.high %v5635_v38, %v5643_v39  ;;  %v14119_v25 = vcombine.low %v5635_v38, %v5643_v39 }
 0xa1b   : > { %9082 = vmatprep.subr.bf16.mxu1 %v14200_v28  ;;  %v14376_v21 = vcombine.high %v5891_v41, %v5899_v42  ;;  %v5619_v32 = vld [vmem:[#allocation17 + $0x730] sm:$0xff]  ;;  %v14375_v55 = vcombine.low %v5891_v41, %v5899_v42 }
 0xa1c   : > { %v5627_v28 = vld [vmem:[#allocation17 + $0x770] sm:$0xff] }
 0xa1d   : > { %9042 = vmatpush1.bf16.msra.mxu0 %v13943_v11  ;;  %v5875_v44 = vld [vmem:[#allocation17 + $0xf30] sm:$0xff]  ;;  %v14104_v11 = vcombine.high %v5619_v32, %v5627_v28  ;;  %v14103_v34 = vcombine.low %v5619_v32, %v5627_v28 }
 0xa1e   : > { %9083 = vmatpush1.bf16.msra.mxu1 %v14199_v33  ;;  %9043 = vmatprep.subr.bf16.mxu0 %v13928_v13  ;;  %v5883_v29 = vld [vmem:[#allocation17 + $0xf70] sm:$0xff] }
 0xa1f   : > { %9084 = vmatprep.subr.bf16.mxu1 %v14184_v15  ;;  %v14360_v33 = vcombine.high %v5875_v44, %v5883_v29  ;;  %v5603_v13 = vld [vmem:[#allocation17 + $0x6b0] sm:$0xff]  ;;  %v14359_v8 = vcombine.low %v5875_v44, %v5883_v29 }
 0xa20   : > { %v5611_v15 = vld [vmem:[#allocation17 + $0x6f0] sm:$0xff] }
 0xa21   : > { %9044 = vmatpush1.bf16.msra.mxu0 %v13927_v30  ;;  %v5859_v56 = vld [vmem:[#allocation17 + $0xeb0] sm:$0xff]  ;;  %v14088_v30 = vcombine.high %v5603_v13, %v5611_v15  ;;  %v14087_v20 = vcombine.low %v5603_v13, %v5611_v15 }
 0xa22   : > { %9085 = vmatpush1.bf16.msra.mxu1 %v14183_v63  ;;  %9045 = vmatprep.subr.bf16.mxu0 %v13912_v58  ;;  %v5867_v62 = vld [vmem:[#allocation17 + $0xef0] sm:$0xff] }
 0xa23   : > { %9086 = vmatprep.subr.bf16.mxu1 %v14168_v22  ;;  %v14344_v63 = vcombine.high %v5859_v56, %v5867_v62  ;;  %v5587_v58 = vld [vmem:[#allocation17 + $0x630] sm:$0xff]  ;;  %v14343_v24 = vcombine.low %v5859_v56, %v5867_v62 }
 0xa24   : > { %v5595_v22 = vld [vmem:[#allocation17 + $0x670] sm:$0xff] }
 0xa25   : > { %9046 = vmatpush1.bf16.msra.mxu0 %v13911_v10  ;;  %v5843_v59 = vld [vmem:[#allocation17 + $0xe30] sm:$0xff]  ;;  %v14072_v10 = vcombine.high %v5587_v58, %v5595_v22  ;;  %v14071_v23 = vcombine.low %v5587_v58, %v5595_v22  ;;  %v5764_v58 = vld [vmem:[#allocation17 + $0xbb8] sm:$0xff] }
 0xa26   : > { %9087 = vmatpush1.bf16.msra.mxu1 %v14167_v45  ;;  %9047 = vmatprep.subr.bf16.mxu0 %v13896_v1  ;;  %v5851_v27 = vld [vmem:[#allocation17 + $0xe70] sm:$0xff]  ;;  %v5772_v22 = vld [vmem:[#allocation17 + $0xbf8] sm:$0xff] }
 0xa27   : > { %9088 = vmatprep.subr.bf16.mxu1 %v14152_v14  ;;  %v14328_v45 = vcombine.high %v5843_v59, %v5851_v27  ;;  %v5571_v1 = vld [vmem:[#allocation17 + $0x5b0] sm:$0xff]  ;;  %v14327_v52 = vcombine.low %v5843_v59, %v5851_v27 }
 0xa28   : > { %v5579_v14 = vld [vmem:[#allocation17 + $0x5f0] sm:$0xff] }
 0xa29   : > { %9048 = vmatpush1.bf16.msra.mxu0 %v13895_v48  ;;  %v5827_v35 = vld [vmem:[#allocation17 + $0xdb0] sm:$0xff]  ;;  %v14056_v48 = vcombine.high %v5571_v1, %v5579_v14  ;;  %v14055_v41 = vcombine.low %v5571_v1, %v5579_v14 }
 0xa2a   : > { %9089 = vmatpush1.bf16.msra.mxu1 %v14151_v12  ;;  %9049 = vmatprep.subr.bf16.mxu0 %v13880_v50  ;;  %v5835_v3 = vld [vmem:[#allocation17 + $0xdf0] sm:$0xff] }
 0xa2b   : > { %9090 = vmatprep.subr.bf16.mxu1 %v14136_v31  ;;  %v14312_v12 = vcombine.high %v5827_v35, %v5835_v3  ;;  %v5555_v50 = vld [vmem:[#allocation17 + $0x530] sm:$0xff]  ;;  %v14311_v42 = vcombine.low %v5827_v35, %v5835_v3  ;;  %v5748_v3 = vld [vmem:[#allocation17 + $0xb38] sm:$0xff] }
 0xa2c   : > { %v5563_v31 = vld [vmem:[#allocation17 + $0x570] sm:$0xff] }
 0xa2d   : > { %9050 = vmatpush1.bf16.msra.mxu0 %v13879_v4  ;;  %v5811_v38 = vld [vmem:[#allocation17 + $0xd30] sm:$0xff]  ;;  %v14040_v4 = vcombine.high %v5555_v50, %v5563_v31  ;;  %v14039_v44 = vcombine.low %v5555_v50, %v5563_v31  ;;  %v5476_v50 = vld [vmem:[#allocation17 + $0x2b8] sm:$0xff] }
 0xa2e   : > { %9091 = vmatpush1.bf16.msra.mxu1 %v14135_v43  ;;  %9051 = vmatprep.subr.bf16.mxu0 %v14120_v51  ;;  %v5819_v39 = vld [vmem:[#allocation17 + $0xd70] sm:$0xff]  ;;  %v5484_v31 = vld [vmem:[#allocation17 + $0x2f8] sm:$0xff] }
 0xa2f   : > { %9092 = vmatprep.subr.bf16.mxu1 %v14376_v21  ;;  %v14296_v43 = vcombine.high %v5811_v38, %v5819_v39  ;;  %v5539_v51 = vld [vmem:[#allocation17 + $0x4b0] sm:$0xff]  ;;  %v14295_v29 = vcombine.low %v5811_v38, %v5819_v39 }
 0xa30   : > { %v5547_v21 = vld [vmem:[#allocation17 + $0x4f0] sm:$0xff] }
 0xa31   : > { %9052 = vmatpush2.bf16.msra.mxu0 %v14119_v25  ;;  %v5795_v32 = vld [vmem:[#allocation17 + $0xcb0] sm:$0xff]  ;;  %v14024_v25 = vcombine.high %v5539_v51, %v5547_v21  ;;  %v14023_v56 = vcombine.low %v5539_v51, %v5547_v21 }
 0xa32   : > { %9093 = vmatpush2.bf16.msra.mxu1 %v14375_v55  ;;  %9053 = vmatprep.subr.bf16.mxu0 %v14104_v11  ;;  %v5803_v28 = vld [vmem:[#allocation17 + $0xcf0] sm:$0xff] }
 0xa33   : > { %9094 = vmatprep.subr.bf16.mxu1 %v14360_v33  ;;  %v14280_v55 = vcombine.high %v5795_v32, %v5803_v28  ;;  %v5523_v11 = vld [vmem:[#allocation17 + $0x430] sm:$0xff]  ;;  %v14279_v62 = vcombine.low %v5795_v32, %v5803_v28  ;;  %v13962_v28 = vcombine.high %v5476_v50, %v5484_v31 }
 0xa34   : > { %v5531_v33 = vld [vmem:[#allocation17 + $0x470] sm:$0xff] }
 0xa35   : > { %9054 = vmatpush2.bf16.msra.mxu0 %v14103_v34  ;;  %v5779_v13 = vld [vmem:[#allocation17 + $0xc30] sm:$0xff]  ;;  %v14008_v34 = vcombine.high %v5523_v11, %v5531_v33  ;;  %v14007_v59 = vcombine.low %v5523_v11, %v5531_v33  ;;  %v5460_v11 = vld [vmem:[#allocation17 + $0x238] sm:$0xff] }
 0xa36   : > { %9095 = vmatpush2.bf16.msra.mxu1 %v14359_v8  ;;  %9055 = vmatprep.subr.bf16.mxu0 %v14088_v30  ;;  %v5787_v15 = vld [vmem:[#allocation17 + $0xc70] sm:$0xff]  ;;  %v5508_v30 = vld [vmem:[#allocation17 + $0x3b8] sm:$0xff] }
 0xa37   : > { %9096 = vmatprep.subr.bf16.mxu1 %v14344_v63  ;;  %v14264_v8 = vcombine.high %v5779_v13, %v5787_v15  ;;  %v5516_v63 = vld [vmem:[#allocation17 + $0x3f8] sm:$0xff]  ;;  %v14263_v27 = vcombine.low %v5779_v13, %v5787_v15  ;;  %v16776_v1 = vld [vmem:[#allocation10] sm:$0xff] }
 0xa38   : > { %v5930_v14 = vrot.slane %v16776_v1, %v17976_v37  ;;  %v13993_v35 = vcombine.low %v5508_v30, %v5516_v63  ;;  %v5468_v33 = vld [vmem:[#allocation17 + $0x278] sm:$0xff] }
 0xa39   : > { %9056 = vmatpush2.bf16.msra.mxu0 %v14087_v20  ;;  %v13994_v20 = vcombine.high %v5508_v30, %v5516_v63  ;;  %v5716_v15 = vld [vmem:[#allocation17 + $0xa38] sm:$0xff] }
 0xa3a   : > { %9097 = vmatpush2.bf16.msra.mxu1 %v14343_v24  ;;  %9057 = vmatprep.subr.bf16.mxu0 %v14072_v10  ;;  %v14250_v24 = vcombine.high %v5764_v58, %v5772_v22  ;;  %v5492_v10 = vld [vmem:[#allocation17 + $0x338] sm:$0xff] }
 0xa3b   : > { %9098 = vmatprep.subr.bf16.mxu1 %v14328_v45  ;;  %v5500_v45 = vld [vmem:[#allocation17 + $0x378] sm:$0xff] }
 0xa3c   : > { %v13977_v51 = vcombine.low %v5492_v10, %v5500_v45 }
 0xa3d   : > { %9058 = vmatpush2.bf16.msra.mxu0 %v14071_v23  ;;  %v5756_v23 = vld [vmem:[#allocation17 + $0xb78] sm:$0xff] }
 0xa3e   : > { %9099 = vmatpush2.bf16.msra.mxu1 %v14327_v52  ;;  %9059 = vmatprep.subr.bf16.mxu0 %v14056_v48  ;;  %v14249_v52 = vcombine.low %v5764_v58, %v5772_v22  ;;  %v5934_v48 = vrot.slane %v16776_v1, %v18028_v16  ;;  %v14234_v39 = vcombine.high %v5748_v3, %v5756_v23  ;;  %v5444_v22 = vld [vmem:[#allocation17 + $0x1b8] sm:$0xff] }
 0xa3f   : > { %9100 = vmatprep.subr.bf16.mxu1 %v14312_v12  ;;  %v13978_v12 = vcombine.high %v5492_v10, %v5500_v45  ;;  %v14233_v32 = vcombine.low %v5748_v3, %v5756_v23  ;;  %v5684_v3 = vld [vmem:[#allocation17 + $0x938] sm:$0xff] }
 0xa40   : > { %v5692_v23 = vld [vmem:[#allocation17 + $0x978] sm:$0xff] }
 0xa41   : > { %9060 = vmatpush2.bf16.msra.mxu0 %v14055_v41  ;;  %v5732_v41 = vld [vmem:[#allocation17 + $0xab8] sm:$0xff] }
 0xa42   : > { %9101 = vmatpush2.bf16.msra.mxu1 %v14311_v42  ;;  %9061 = vmatprep.subr.bf16.mxu0 %v14040_v4  ;;  %v5740_v42 = vld [vmem:[#allocation17 + $0xaf8] sm:$0xff] }
 0xa43   : > { %9102 = vmatprep.subr.bf16.mxu1 %v14296_v43  ;;  %v14217_v30 = vcombine.low %v5732_v41, %v5740_v42 }
 0xa45   : > { %9062 = vmatpush2.bf16.msra.mxu0 %v14039_v44 }
 0xa46   : > { %9103 = vmatpush2.bf16.msra.mxu1 %v14295_v29  ;;  %9063 = vmatprep.subr.bf16.mxu0 %v14024_v25 }
 0xa47   : > { %9104 = vmatprep.subr.bf16.mxu1 %v14280_v55  ;;  %v14218_v55 = vcombine.high %v5732_v41, %v5740_v42  ;;  %v5668_v41 = vld [vmem:[#allocation17 + $0x8b8] sm:$0xff] }
 0xa48   : > { %v5676_v42 = vld [vmem:[#allocation17 + $0x8f8] sm:$0xff] }
 0xa49   : > { %9064 = vmatpush2.bf16.msra.mxu0 %v14023_v56  ;;  %v5724_v56 = vld [vmem:[#allocation17 + $0xa78] sm:$0xff] }
 0xa4a   : > { %9105 = vmatpush2.bf16.msra.mxu1 %v14279_v62  ;;  %9065 = vmatprep.subr.bf16.mxu0 %v14008_v34  ;;  %v13961_v34 = vcombine.low %v5476_v50, %v5484_v31  ;;  %v14202_v58 = vcombine.high %v5716_v15, %v5724_v56  ;;  %v14201_v10 = vcombine.low %v5716_v15, %v5724_v56  ;;  %v5412_v31 = vld [vmem:[#allocation17 + $0xb8] sm:$0xff] }
 0xa4b   : > { %9106 = vmatprep.subr.bf16.mxu1 %v14264_v8  ;;  %v14170_v50 = vcombine.high %v5684_v3, %v5692_v23  ;;  %v14153_v15 = vcombine.low %v5668_v41, %v5676_v42 }
 0xa4d   : > { %9066 = vmatpush2.bf16.msra.mxu0 %v14007_v59  ;;  %v5452_v59 = vld [vmem:[#allocation17 + $0x1f8] sm:$0xff] }
 0xa4e   : > { %9107 = vmatpush2.bf16.msra.mxu1 %v14263_v27  ;;  %9117 = vmatprep.subr.bf16.mxu0 %v13994_v20  ;;  %v5700_v27 = vld [vmem:[#allocation17 + $0x9b8] sm:$0xff]  ;;  %v13930_v45 = vcombine.high %v5444_v22, %v5452_v59 }
 0xa4f   : > { %9158 = vmatprep.subr.bf16.mxu1 %v14250_v24  ;;  %v5708_v20 = vld [vmem:[#allocation17 + $0x9f8] sm:$0xff]  ;;  %v13945_v24 = vcombine.low %v5460_v11, %v5468_v33 }
 0xa50   : > { %v8823_v38 = vpop.f32.mrf.mxu0  ;;  %9068 = vmatmul.mubr.bf16.vlgmr.msra.gmra.mxu0 %v18112_v17  ;;  %v14186_v1 = vcombine.high %v5700_v27, %v5708_v20 }
 0xa51   : > { %v8824_v4 = vadd.f32 %v8823_v38, %v5930_v14  ;;  %v8864_v43 = vpop.f32.mrf.mxu1  ;;  %9109 = vmatmul.mubr.bf16.vlgmr.msra.gmra.mxu1 %v18114_v49  ;;  %9118 = vmatpush1.bf16.msra.mxu0 %v13993_v35  ;;  %v5428_v14 = vld [vmem:[#allocation17 + $0x138] sm:$0xff] }
 0xa52   : > { %9149 = vmatprep.mubr.bf16.mxu0 %v18108_v2  ;;  %9159 = vmatpush1.bf16.msra.mxu1 %v14249_v52  ;;  %v8825_v21 = vpop.f32.mrf.mxu0  ;;  %v5436_v35 = vld [vmem:[#allocation17 + $0x178] sm:$0xff]  ;;  %v13929_v52 = vcombine.low %v5444_v22, %v5452_v59 }
 0xa53   : > { %v18173_v44 = vadd.f32 %v8864_v43, %v8824_v4  ;;  %9190 = vmatprep.mubr.bf16.mxu1 %v18110_v53  ;;  %v8826_v29 = vadd.f32 %v8825_v21, %v5934_v48  ;;  %v8866_v25 = vpop.f32.mrf.mxu1  ;;  %9119 = vmatprep.subr.bf16.mxu0 %v13978_v12  ;;  %v13946_v53 = vcombine.high %v5460_v11, %v5468_v33  ;;  %v5420_v38 = vld [vmem:[#allocation17 + $0xf8] sm:$0xff]  ;;  %v9202_v4 = vmul.f32 -1.702, %v18154_v36 }
 0xa54   : > { %v8827_v13 = vpop.f32.mrf.mxu0  ;;  %9160 = vmatprep.subr.bf16.mxu1 %v14234_v39  ;;  %v14185_v48 = vcombine.low %v5700_v27, %v5708_v20  ;;  %v13914_v12 = vcombine.high %v5428_v14, %v5436_v35  ;;  %v9200_v39 = vmul.f32 -1.702, %v18142_v7  ;;  %v13913_v43 = vcombine.low %v5428_v14, %v5436_v35  ;;  %v5660_v11 = vld [vmem:[#allocation17 + $0x878] sm:$0xff] }
 0xa55   : > { %v18176_v62 = vadd.f32 %v8866_v25, %v8826_v29  ;;  %v8868_v2 = vpop.f32.mrf.mxu1  ;;  %9120 = vmatpush1.bf16.msra.mxu0 %v13977_v51  ;;  %v14169_v51 = vcombine.low %v5684_v3, %v5692_v23  ;;  %v13898_v21 = vcombine.high %v5412_v31, %v5420_v38  ;;  %v5404_v29 = vld [vmem:[#allocation17 + $0x78] sm:$0xff]  ;;  %v9221_v33 = vmul.f32 1.442695, %v9202_v4 }
 0xa56   : > { %9161 = vmatpush1.bf16.msra.mxu1 %v14233_v32  ;;  %v8828_v8 = vpop.f32.mrf.mxu0  ;;  %9121 = vmatprep.subr.bf16.mxu0 %v13962_v28  ;;  %v14154_v32 = vcombine.high %v5668_v41, %v5676_v42  ;;  %v5396_v28 = vld [vmem:[#allocation17 + $0x38] sm:$0xff]  ;;  %v9217_v25 = vmul.f32 1.442695, %v9200_v39  ;;  %v13897_v13 = vcombine.low %v5412_v31, %v5420_v38 }
 0xa57   : > { %v8869_v63 = vpop.f32.mrf.mxu1  ;;  %9162 = vmatprep.subr.bf16.mxu1 %v14218_v55  ;;  %v5652_v55 = vld [vmem:[#allocation17 + $0x838] sm:$0xff]  ;;  %v13882_v56 = vcombine.high %v5396_v28, %v5404_v29 }
 0xa58   : > { %v14138_v2 = vcombine.high %v5652_v55, %v5660_v11  ;;  %v5644_v8 = vld [vmem:[#allocation17 + $0x7f8] sm:$0xff]  ;;  %16700 = vpow2.f32 %v9217_v25  ;;  %v13881_v63 = vcombine.low %v5396_v28, %v5404_v29 }
 0xa59   : > { %9122 = vmatpush1.bf16.msra.mxu0 %v13961_v34  ;;  %v5636_v34 = vld [vmem:[#allocation17 + $0x7b8] sm:$0xff]  ;;  %16702 = vpow2.f32 %v9221_v33 }
 0xa5a   : > { %9163 = vmatpush1.bf16.msra.mxu1 %v14217_v30  ;;  %9123 = vmatprep.subr.bf16.mxu0 %v13946_v53  ;;  %v5892_v30 = vld [vmem:[#allocation17 + $0xfb8] sm:$0xff]  ;;  %v14122_v22 = vcombine.high %v5636_v34, %v5644_v8 }
 0xa5b   : > { %9164 = vmatprep.subr.bf16.mxu1 %v14202_v58  ;;  %v5900_v53 = vld [vmem:[#allocation17 + $0xff8] sm:$0xff]  ;;  %v14137_v58 = vcombine.low %v5652_v55, %v5660_v11 }
 0xa5c   : > { %v14378_v59 = vcombine.high %v5892_v30, %v5900_v53  ;;  %v5620_v27 = vld [vmem:[#allocation17 + $0x738] sm:$0xff] }
 0xa5d   : > { %9124 = vmatpush1.bf16.msra.mxu0 %v13945_v24  ;;  %v5628_v20 = vld [vmem:[#allocation17 + $0x778] sm:$0xff] }
 0xa5e   : > { %9165 = vmatpush1.bf16.msra.mxu1 %v14201_v10  ;;  %9125 = vmatprep.subr.bf16.mxu0 %v13930_v45  ;;  %v5876_v24 = vld [vmem:[#allocation17 + $0xf38] sm:$0xff]  ;;  %v14121_v45 = vcombine.low %v5636_v34, %v5644_v8  ;;  %v14106_v14 = vcombine.high %v5620_v27, %v5628_v20 }
 0xa5f   : > { %9166 = vmatprep.subr.bf16.mxu1 %v14186_v1  ;;  %v5884_v10 = vld [vmem:[#allocation17 + $0xf78] sm:$0xff]  ;;  %v14377_v1 = vcombine.low %v5892_v30, %v5900_v53 }
 0xa60   : > { %v14362_v35 = vcombine.high %v5876_v24, %v5884_v10  ;;  %v5604_v3 = vld [vmem:[#allocation17 + $0x6b8] sm:$0xff] }
 0xa61   : > { %9126 = vmatpush1.bf16.msra.mxu0 %v13929_v52  ;;  %v5612_v23 = vld [vmem:[#allocation17 + $0x6f8] sm:$0xff] }
 0xa62   : > { %9167 = vmatpush1.bf16.msra.mxu1 %v14185_v48  ;;  %9127 = vmatprep.subr.bf16.mxu0 %v13914_v12  ;;  %v5860_v52 = vld [vmem:[#allocation17 + $0xeb8] sm:$0xff]  ;;  %v14105_v12 = vcombine.low %v5620_v27, %v5628_v20  ;;  %v14090_v31 = vcombine.high %v5604_v3, %v5612_v23 }
 0xa63   : > { %9168 = vmatprep.subr.bf16.mxu1 %v14170_v50  ;;  %v5868_v48 = vld [vmem:[#allocation17 + $0xef8] sm:$0xff]  ;;  %v14361_v50 = vcombine.low %v5876_v24, %v5884_v10 }
 0xa64   : > { %v14346_v38 = vcombine.high %v5860_v52, %v5868_v48  ;;  %v5588_v39 = vld [vmem:[#allocation17 + $0x638] sm:$0xff] }
 0xa65   : > { %9128 = vmatpush1.bf16.msra.mxu0 %v13913_v43  ;;  %v5596_v41 = vld [vmem:[#allocation17 + $0x678] sm:$0xff]  ;;  %v16701_v43 = vpop.eup %16700 }
 0xa66   : > { %9169 = vmatpush1.bf16.msra.mxu1 %v14169_v51  ;;  %9129 = vmatprep.subr.bf16.mxu0 %v13898_v21  ;;  %v5844_v42 = vld [vmem:[#allocation17 + $0xe38] sm:$0xff]  ;;  %v14089_v51 = vcombine.low %v5604_v3, %v5612_v23  ;;  %v16703_v21 = vpop.eup %16702  ;;  %v14074_v28 = vcombine.high %v5588_v39, %v5596_v41  ;;  %v9248_v11 = vadd.f32 1.0, %v16701_v43 }
 0xa67   : > { %9170 = vmatprep.subr.bf16.mxu1 %v14154_v32  ;;  %v5852_v4 = vld [vmem:[#allocation17 + $0xe78] sm:$0xff]  ;;  %v14345_v32 = vcombine.low %v5860_v52, %v5868_v48 }
 0xa68   : > { %v14330_v29 = vcombine.high %v5844_v42, %v5852_v4  ;;  %v5572_v25 = vld [vmem:[#allocation17 + $0x5b8] sm:$0xff]  ;;  %16704 = vrcp.f32 %v9248_v11  ;;  %v15904_v11 = vld [vmem:[#allocation19 + $0xe0] ss:$16 sps:$4 sm:$0xff]  }
 0xa69   : > { %9130 = vmatpush1.bf16.msra.mxu0 %v13897_v13  ;;  %v5580_v55 = vld [vmem:[#allocation17 + $0x5f8] sm:$0xff] }
 0xa6a   : > { %9171 = vmatpush1.bf16.msra.mxu1 %v14153_v15  ;;  %9131 = vmatprep.subr.bf16.mxu0 %v13882_v56  ;;  %v5828_v33 = vld [vmem:[#allocation17 + $0xdb8] sm:$0xff]  ;;  %v9250_v15 = vadd.f32 1.0, %v16703_v21  ;;  %v14073_v56 = vcombine.low %v5588_v39, %v5596_v41  ;;  %v14058_v34 = vcombine.high %v5572_v25, %v5580_v55 }
 0xa6b   : > { %9172 = vmatprep.subr.bf16.mxu1 %v14138_v2  ;;  %v5836_v13 = vld [vmem:[#allocation17 + $0xdf8] sm:$0xff]  ;;  %v14329_v2 = vcombine.low %v5844_v42, %v5852_v4 }
 0xa6c   : > { %v14314_v8 = vcombine.high %v5828_v33, %v5836_v13  ;;  %v5556_v30 = vld [vmem:[#allocation17 + $0x538] sm:$0xff]  ;;  %16706 = vrcp.f32 %v9250_v15  ;;  %v15912_v15 = vld [vmem:[#allocation19 + $0xc4] ss:$16 sps:$4 sm:$0xff]  }
 0xa6d   : > { %9132 = vmatpush1.bf16.msra.mxu0 %v13881_v63  ;;  %v5564_v53 = vld [vmem:[#allocation17 + $0x578] sm:$0xff] }
 0xa6e   : > { %9173 = vmatpush1.bf16.msra.mxu1 %v14137_v58  ;;  %9133 = vmatprep.subr.bf16.mxu0 %v14122_v22  ;;  %v5812_v63 = vld [vmem:[#allocation17 + $0xd38] sm:$0xff]  ;;  %v14057_v22 = vcombine.low %v5572_v25, %v5580_v55  ;;  %v14042_v27 = vcombine.high %v5556_v30, %v5564_v53 }
 0xa6f   : > { %9174 = vmatprep.subr.bf16.mxu1 %v14378_v59  ;;  %v5820_v58 = vld [vmem:[#allocation17 + $0xd78] sm:$0xff]  ;;  %v14313_v59 = vcombine.low %v5828_v33, %v5836_v13  ;;  %v15907_v33 = vld [vmem:[#allocation19 + $0x2e0] ss:$16 sps:$4 sm:$0xff]  }
 0xa70   : > { %v14298_v20 = vcombine.high %v5812_v63, %v5820_v58  ;;  %v5540_v24 = vld [vmem:[#allocation17 + $0x4b8] sm:$0xff] }
 0xa71   : > { %9134 = vmatpush2.bf16.msra.mxu0 %v14121_v45  ;;  %v5548_v10 = vld [vmem:[#allocation17 + $0x4f8] sm:$0xff] }
 0xa72   : > { %9175 = vmatpush2.bf16.msra.mxu1 %v14377_v1  ;;  %9135 = vmatprep.subr.bf16.mxu0 %v14106_v14  ;;  %v5796_v45 = vld [vmem:[#allocation17 + $0xcb8] sm:$0xff]  ;;  %v14041_v14 = vcombine.low %v5556_v30, %v5564_v53  ;;  %v14026_v3 = vcombine.high %v5540_v24, %v5548_v10  ;;  %v15918_v53 = vld [vmem:[#allocation19 + $0xa4] ss:$16 sps:$4 sm:$0xff]  }
 0xa73   : > { %9176 = vmatprep.subr.bf16.mxu1 %v14362_v35  ;;  %v5804_v1 = vld [vmem:[#allocation17 + $0xcf8] sm:$0xff]  ;;  %v14297_v35 = vcombine.low %v5812_v63, %v5820_v58 }
 0xa74   : > { %v14282_v23 = vcombine.high %v5796_v45, %v5804_v1  ;;  %v5524_v52 = vld [vmem:[#allocation17 + $0x438] sm:$0xff] }
 0xa75   : > { %9136 = vmatpush2.bf16.msra.mxu0 %v14105_v12  ;;  %v5532_v48 = vld [vmem:[#allocation17 + $0x478] sm:$0xff]  ;;  %v16705_v42 = vpop.eup %16704 }
 0xa76   : > { %9177 = vmatpush2.bf16.msra.mxu1 %v14361_v50  ;;  %9137 = vmatprep.subr.bf16.mxu0 %v14090_v31  ;;  %v5780_v12 = vld [vmem:[#allocation17 + $0xc38] sm:$0xff]  ;;  %v14025_v31 = vcombine.low %v5540_v24, %v5548_v10  ;;  %v14010_v39 = vcombine.high %v5524_v52, %v5532_v48  ;;  %v14009_v4 = vcombine.low %v5524_v52, %v5532_v48  ;;  %v15919_v10 = vld [vmem:[#allocation19 + $0x2a0] ss:$16 sps:$4 sm:$0xff]   ;;  %v15933_v52 = vld [vmem:[#allocation19 + $0x264] ss:$16 sps:$4 sm:$0xff]  }
 0xa77   : > { %9178 = vmatprep.subr.bf16.mxu1 %v14346_v38  ;;  %v5788_v50 = vld [vmem:[#allocation17 + $0xc78] sm:$0xff]  ;;  %v14281_v38 = vcombine.low %v5796_v45, %v5804_v1  ;;  %v15924_v45 = vld [vmem:[#allocation19 + $0x84] ss:$16 sps:$4 sm:$0xff]   ;;  %v15928_v48 = vld [vmem:[#allocation19 + $0x60] ss:$16 sps:$4 sm:$0xff]  }
 0xa78   : > { %v14266_v41 = vcombine.high %v5780_v12, %v5788_v50  ;;  %v18180_v21 = vld [vmem:[#allocation10 + $0x8] sm:$0xff] }
 0xa79   : > { %9138 = vmatpush2.bf16.msra.mxu0 %v14089_v51  ;;  %v16707_v43 = vpop.eup %16706  ;;  %v14265_v51 = vcombine.low %v5780_v12, %v5788_v50  ;;  %v5938_v55 = vrot.slane %v18180_v21, %v17748_v54  ;;  %v5942_v13 = vrot.slane %v18180_v21, %v17759_v57  ;;  %v15910_v54 = vld [vmem:[#allocation19 + $0xc0] ss:$16 sps:$4 sm:$0xff]   ;;  %v9199_v12 = vmul.f32 -1.702, %v18139_v19 }
 0xa7a   : > { %9179 = vmatpush2.bf16.msra.mxu1 %v14345_v32  ;;  %9139 = vmatprep.subr.bf16.mxu0 %v14074_v28  ;;  %v15906_v32 = vld [vmem:[#allocation19 + $0xe4] ss:$16 sps:$4 sm:$0xff]   ;;  %v9282_v25 = vmul.f32 %v16707_v43, %v18154_v36  ;;  %v15913_v57 = vld [vmem:[#allocation19 + $0x2c0] ss:$16 sps:$4 sm:$0xff]  }
 0xa7b   : > { %9180 = vmatprep.subr.bf16.mxu1 %v14330_v29  ;;  %v15909_v28 = vld [vmem:[#allocation19 + $0x2e4] ss:$16 sps:$4 sm:$0xff]   ;;  %v9280_v29 = vmul.f32 %v16705_v42, %v18142_v7  ;;  %v15931_v50 = vld [vmem:[#allocation19 + $0x260] ss:$16 sps:$4 sm:$0xff]   ;;  %v9206_v42 = vmul.f32 -1.702, %v18176_v62 }
 0xa7c   : > { %v15915_v7 = vld [vmem:[#allocation19 + $0x2c4] ss:$16 sps:$4 sm:$0xff]   ;;  %v18191_v36 = vpack.c.bf16 %v9282_v25, %v9282_v25  ;;  %v9215_v43 = vmul.f32 1.442695, %v9199_v12  ;;  %v15970_v12 = vld [vmem:[#allocation19 + $0x180] ss:$16 sps:$4 sm:$0xff]  }
 0xa7d   : > { %9140 = vmatpush2.bf16.msra.mxu0 %v14073_v56  ;;  %v18188_v56 = vpack.c.bf16 %v9280_v29, %v9280_v29  ;;  %v15945_v29 = vld [vmem:[#allocation19 + $0x224] ss:$16 sps:$4 sm:$0xff]  }
 0xa7e   : > { %9181 = vmatpush2.bf16.msra.mxu1 %v14329_v2  ;;  %9141 = vmatprep.subr.bf16.mxu0 %v14058_v34  ;;  %16708 = vpow2.f32 %v9215_v43  ;;  %v15982_v43 = vld [vmem:[#allocation19 + $0x140] ss:$16 sps:$4 sm:$0xff]  }
 0xa7f   : > { %9182 = vmatprep.subr.bf16.mxu1 %v14314_v8 }
 0xa81   : > { %9142 = vmatpush2.bf16.msra.mxu0 %v14057_v22  ;;  %v15921_v22 = vld [vmem:[#allocation19 + $0x2a4] ss:$16 sps:$4 sm:$0xff]  }
 0xa82   : > { %9183 = vmatpush2.bf16.msra.mxu1 %v14313_v59  ;;  %9143 = vmatprep.subr.bf16.mxu0 %v14042_v27 }
 0xa83   : > { %9184 = vmatprep.subr.bf16.mxu1 %v14298_v20  ;;  %v15916_v20 = vld [vmem:[#allocation19 + $0xa0] ss:$16 sps:$4 sm:$0xff]  }
 0xa85   : > { %9144 = vmatpush2.bf16.msra.mxu0 %v14041_v14  ;;  %v15927_v14 = vld [vmem:[#allocation19 + $0x284] ss:$16 sps:$4 sm:$0xff]  }
 0xa86   : > { %9185 = vmatpush2.bf16.msra.mxu1 %v14297_v35  ;;  %9145 = vmatprep.subr.bf16.mxu0 %v14026_v3  ;;  %v15922_v35 = vld [vmem:[#allocation19 + $0x80] ss:$16 sps:$4 sm:$0xff]  }
 0xa87   : > { %9186 = vmatprep.subr.bf16.mxu1 %v14282_v23  ;;  %v15925_v3 = vld [vmem:[#allocation19 + $0x280] ss:$16 sps:$4 sm:$0xff]   ;;  %v15930_v23 = vld [vmem:[#allocation19 + $0x64] ss:$16 sps:$4 sm:$0xff]  }
 0xa89   : > { %9146 = vmatpush2.bf16.msra.mxu0 %v14025_v31  ;;  %v15936_v31 = vld [vmem:[#allocation19 + $0x44] ss:$16 sps:$4 sm:$0xff]  }
 0xa8a   : > { %9187 = vmatpush2.bf16.msra.mxu1 %v14281_v38  ;;  %9147 = vmatprep.subr.bf16.mxu0 %v14010_v39  ;;  %v9201_v38 = vmul.f32 -1.702, %v18151_v61  ;;  %v15939_v39 = vld [vmem:[#allocation19 + $0x244] ss:$16 sps:$4 sm:$0xff]  }
 0xa8b   : > { %9188 = vmatprep.subr.bf16.mxu1 %v14266_v41  ;;  %v9204_v41 = vmul.f32 -1.702, %v18166_v47 }
 0xa8d   : > { %9148 = vmatpush2.bf16.msra.mxu0 %v14009_v4  ;;  %v15934_v4 = vld [vmem:[#allocation19 + $0x40] ss:$16 sps:$4 sm:$0xff]   ;;  %v9225_v25 = vmul.f32 1.442695, %v9204_v41 }
 0xa8e   : > { %9189 = vmatpush2.bf16.msra.mxu1 %v14265_v51  ;;  %12399 = vmatprep.subr.bf16.mxu0 %v15906_v32  ;;  %v15937_v51 = vld [vmem:[#allocation19 + $0x240] ss:$16 sps:$4 sm:$0xff]   ;;  %v15942_v32 = vld [vmem:[#allocation19 + $0x24] ss:$16 sps:$4 sm:$0xff]  }
 0xa8f   : > { %12440 = vmatprep.subr.bf16.mxu1 %v15909_v28  ;;  %v9219_v28 = vmul.f32 1.442695, %v9201_v38  ;;  %v15981_v38 = vld [vmem:[#allocation19 + $0x364] ss:$16 sps:$4 sm:$0xff]   ;;  %v15979_v41 = vld [vmem:[#allocation19 + $0x360] ss:$16 sps:$4 sm:$0xff]  }
 0xa90   : > { %v8905_v2 = vpop.f32.mrf.mxu0  ;;  %9150 = vmatmul.mubr.bf16.vlgmr.msra.gmra.mxu0 %v18112_v17 }
 0xa91   : > { %v8906_v34 = vadd.f32 %v8905_v2, %v5938_v55  ;;  %v8946_v8 = vpop.f32.mrf.mxu1  ;;  %9191 = vmatmul.mubr.bf16.vlgmr.msra.gmra.mxu1 %v18114_v49  ;;  %12400 = vmatpush1.bf16.msra.mxu0 %v15904_v11  ;;  %v9229_v55 = vmul.f32 1.442695, %v9206_v42  ;;  %v15940_v11 = vld [vmem:[#allocation19 + $0x20] ss:$16 sps:$4 sm:$0xff]   ;;  %16710 = vpow2.f32 %v9219_v28  ;;  %v15984_v42 = vld [vmem:[#allocation19 + $0x144] ss:$16 sps:$4 sm:$0xff]  }
 0xa92   : > { %12431 = vmatprep.mubr.bf16.mxu0 %v18188_v56  ;;  %12441 = vmatpush1.bf16.msra.mxu1 %v15907_v33  ;;  %v8907_v30 = vpop.f32.mrf.mxu0  ;;  %v15943_v33 = vld [vmem:[#allocation19 + $0x220] ss:$16 sps:$4 sm:$0xff]   ;;  %16712 = vpow2.f32 %v9225_v25  ;;  %v15993_v28 = vld [vmem:[#allocation19 + $0x324] ss:$16 sps:$4 sm:$0xff]  }
 0xa93   : > { %v18195_v63 = vadd.f32 %v8946_v8, %v8906_v34  ;;  %12472 = vmatprep.mubr.bf16.mxu1 %v18191_v36  ;;  %v8908_v17 = vadd.f32 %v8907_v30, %v5942_v13  ;;  %v8948_v58 = vpop.f32.mrf.mxu1  ;;  %12401 = vmatprep.subr.bf16.mxu0 %v15912_v15  ;;  %v15948_v13 = vld [vmem:[#allocation19 + $0x4] ss:$16 sps:$4 sm:$0xff]   ;;  %16714 = vpow2.f32 %v9229_v55  ;;  %v15946_v2 = vld [vmem:[#allocation19] ss:$16 sps:$4 sm:$0xff]  }
 0xa94   : > { %v8909_v59 = vpop.f32.mrf.mxu0  ;;  %12442 = vmatprep.subr.bf16.mxu1 %v15915_v7  ;;  %v15951_v15 = vld [vmem:[#allocation19 + $0x204] ss:$16 sps:$4 sm:$0xff]   ;;  %v15949_v7 = vld [vmem:[#allocation19 + $0x200] ss:$16 sps:$4 sm:$0xff]  }
 0xa95   : > { %v18198_v27 = vadd.f32 %v8948_v58, %v8908_v17  ;;  %v8950_v49 = vpop.f32.mrf.mxu1  ;;  %12402 = vmatpush1.bf16.msra.mxu0 %v15910_v54  ;;  %v15954_v34 = vld [vmem:[#allocation19 + $0x1e4] ss:$16 sps:$4 sm:$0xff]   ;;  %v15952_v54 = vld [vmem:[#allocation19 + $0x1e0] ss:$16 sps:$4 sm:$0xff]   ;;  %v16709_v59 = vpop.eup %16708 }
 0xa96   : > { %12443 = vmatpush1.bf16.msra.mxu1 %v15913_v57  ;;  %v8910_v24 = vpop.f32.mrf.mxu0  ;;  %12403 = vmatprep.subr.bf16.mxu0 %v15918_v53  ;;  %v15957_v8 = vld [vmem:[#allocation19 + $0x3e4] ss:$16 sps:$4 sm:$0xff]   ;;  %v15955_v30 = vld [vmem:[#allocation19 + $0x3e0] ss:$16 sps:$4 sm:$0xff]  }
 0xa97   : > { %v8951_v1 = vpop.f32.mrf.mxu1  ;;  %12444 = vmatprep.subr.bf16.mxu1 %v15921_v22  ;;  %v15960_v57 = vld [vmem:[#allocation19 + $0x1c4] ss:$16 sps:$4 sm:$0xff]   ;;  %v15958_v17 = vld [vmem:[#allocation19 + $0x1c0] ss:$16 sps:$4 sm:$0xff]  }
 0xa98   : > { %v15963_v53 = vld [vmem:[#allocation19 + $0x3c4] ss:$16 sps:$4 sm:$0xff]   ;;  %v15961_v58 = vld [vmem:[#allocation19 + $0x3c0] ss:$16 sps:$4 sm:$0xff]   ;;  %v9247_v1 = vadd.f32 1.0, %v16709_v59 }
 0xa99   : > { %12404 = vmatpush1.bf16.msra.mxu0 %v15916_v20  ;;  %v15966_v22 = vld [vmem:[#allocation19 + $0x1a4] ss:$16 sps:$4 sm:$0xff]   ;;  %v15991_v25 = vld [vmem:[#allocation19 + $0x320] ss:$16 sps:$4 sm:$0xff]  }
 0xa9a   : > { %12445 = vmatpush1.bf16.msra.mxu1 %v15919_v10  ;;  %12405 = vmatprep.subr.bf16.mxu0 %v15924_v45  ;;  %v15969_v49 = vld [vmem:[#allocation19 + $0x3a4] ss:$16 sps:$4 sm:$0xff]   ;;  %v15964_v10 = vld [vmem:[#allocation19 + $0x1a0] ss:$16 sps:$4 sm:$0xff]   ;;  %16716 = vrcp.f32 %v9247_v1 }
 0xa9b   : > { %12446 = vmatprep.subr.bf16.mxu1 %v15927_v14  ;;  %v15967_v14 = vld [vmem:[#allocation19 + $0x3a0] ss:$16 sps:$4 sm:$0xff]   ;;  %v15996_v55 = vld [vmem:[#allocation19 + $0x104] ss:$16 sps:$4 sm:$0xff]  }
 0xa9d   : > { %12406 = vmatpush1.bf16.msra.mxu0 %v15922_v35  ;;  %v15972_v35 = vld [vmem:[#allocation19 + $0x184] ss:$16 sps:$4 sm:$0xff]  }
 0xa9e   : > { %12447 = vmatpush1.bf16.msra.mxu1 %v15925_v3  ;;  %12407 = vmatprep.subr.bf16.mxu0 %v15930_v23  ;;  %v16711_v20 = vpop.eup %16710  ;;  %v15975_v23 = vld [vmem:[#allocation19 + $0x384] ss:$16 sps:$4 sm:$0xff]  }
 0xa9f   : > { %12448 = vmatprep.subr.bf16.mxu1 %v15933_v52  ;;  %v16713_v24 = vpop.eup %16712  ;;  %v9249_v3 = vadd.f32 1.0, %v16711_v20 }
 0xaa0   : > { %v16715_v45 = vpop.eup %16714  ;;  %v9252_v52 = vadd.f32 1.0, %v16713_v24 }
 0xaa1   : > { %12408 = vmatpush1.bf16.msra.mxu0 %v15928_v48  ;;  %v9254_v48 = vadd.f32 1.0, %v16715_v45  ;;  %16718 = vrcp.f32 %v9249_v3  ;;  %v16006_v45 = vld [vmem:[#allocation19 + $0x4c0] ss:$16 sps:$4 sm:$0xff]  }
 0xaa2   : > { %12449 = vmatpush1.bf16.msra.mxu1 %v15931_v50  ;;  %12409 = vmatprep.subr.bf16.mxu0 %v15936_v31  ;;  %v15973_v50 = vld [vmem:[#allocation19 + $0x380] ss:$16 sps:$4 sm:$0xff]   ;;  %v15978_v31 = vld [vmem:[#allocation19 + $0x164] ss:$16 sps:$4 sm:$0xff]   ;;  %16720 = vrcp.f32 %v9252_v52 }
 0xaa3   : > { %12450 = vmatprep.subr.bf16.mxu1 %v15939_v39  ;;  %16722 = vrcp.f32 %v9254_v48  ;;  %v15976_v39 = vld [vmem:[#allocation19 + $0x160] ss:$16 sps:$4 sm:$0xff]   ;;  %v16017_v52 = vld [vmem:[#allocation19 + $0x6a4] ss:$16 sps:$4 sm:$0xff]  }
 0xaa5   : > { %12410 = vmatpush1.bf16.msra.mxu0 %v15934_v4  ;;  %v15987_v4 = vld [vmem:[#allocation19 + $0x344] ss:$16 sps:$4 sm:$0xff]  }
 0xaa6   : > { %12451 = vmatpush1.bf16.msra.mxu1 %v15937_v51  ;;  %12411 = vmatprep.subr.bf16.mxu0 %v15942_v32  ;;  %v15985_v51 = vld [vmem:[#allocation19 + $0x340] ss:$16 sps:$4 sm:$0xff]   ;;  %v15990_v32 = vld [vmem:[#allocation19 + $0x124] ss:$16 sps:$4 sm:$0xff]  }
 0xaa7   : > { %12452 = vmatprep.subr.bf16.mxu1 %v15945_v29  ;;  %v15988_v29 = vld [vmem:[#allocation19 + $0x120] ss:$16 sps:$4 sm:$0xff]  }
 0xaa9   : > { %12412 = vmatpush1.bf16.msra.mxu0 %v15940_v11  ;;  %v16717_v11 = vpop.eup %16716 }
 0xaaa   : > { %12453 = vmatpush1.bf16.msra.mxu1 %v15943_v33  ;;  %12413 = vmatprep.subr.bf16.mxu0 %v15948_v13  ;;  %v15999_v33 = vld [vmem:[#allocation19 + $0x304] ss:$16 sps:$4 sm:$0xff]  }
 0xaab   : > { %12454 = vmatprep.subr.bf16.mxu1 %v15951_v15 }
 0xaad   : > { %12414 = vmatpush1.bf16.msra.mxu0 %v15946_v2  ;;  %v15994_v2 = vld [vmem:[#allocation19 + $0x100] ss:$16 sps:$4 sm:$0xff]  }
 0xaae   : > { %12455 = vmatpush1.bf16.msra.mxu1 %v15949_v7  ;;  %12415 = vmatprep.subr.bf16.mxu0 %v15954_v34  ;;  %v16719_v13 = vpop.eup %16718  ;;  %v9279_v34 = vmul.f32 %v16717_v11, %v18139_v19  ;;  %v16003_v19 = vld [vmem:[#allocation19 + $0x6e0] ss:$16 sps:$4 sm:$0xff]  }
 0xaaf   : > { %12456 = vmatprep.subr.bf16.mxu1 %v15957_v8  ;;  %v16721_v15 = vpop.eup %16720  ;;  %v15997_v8 = vld [vmem:[#allocation19 + $0x300] ss:$16 sps:$4 sm:$0xff]  }
 0xab0   : > { %v16723_v7 = vpop.eup %16722  ;;  %v18210_v59 = vpack.c.bf16 %v9279_v34, %v9279_v34  ;;  %v16027_v11 = vld [vmem:[#allocation19 + $0x660] ss:$16 sps:$4 sm:$0xff]  }
 0xab1   : > { %12416 = vmatpush2.bf16.msra.mxu0 %v15952_v54  ;;  %v16002_v54 = vld [vmem:[#allocation19 + $0x4e4] ss:$16 sps:$4 sm:$0xff]   ;;  %v16030_v34 = vld [vmem:[#allocation19 + $0x440] ss:$16 sps:$4 sm:$0xff]  }
 0xab2   : > { %12457 = vmatpush2.bf16.msra.mxu1 %v15955_v30  ;;  %12417 = vmatprep.subr.bf16.mxu0 %v15960_v57  ;;  %v9281_v30 = vmul.f32 %v16719_v13, %v18151_v61  ;;  %v16005_v57 = vld [vmem:[#allocation19 + $0x6e4] ss:$16 sps:$4 sm:$0xff]   ;;  %v9205_v13 = vmul.f32 -1.702, %v18173_v44 }
 0xab3   : > { %12458 = vmatprep.subr.bf16.mxu1 %v15963_v53  ;;  %v9284_v53 = vmul.f32 %v16721_v15, %v18166_v47  ;;  %v16008_v61 = vld [vmem:[#allocation19 + $0x4c4] ss:$16 sps:$4 sm:$0xff]  }
 0xab4   : > { %v16011_v47 = vld [vmem:[#allocation19 + $0x6c4] ss:$16 sps:$4 sm:$0xff]  }
 0xab5   : > { %12418 = vmatpush2.bf16.msra.mxu0 %v15958_v17  ;;  %v9286_v17 = vmul.f32 %v16723_v7, %v18176_v62  ;;  %v18214_v20 = vpack.c.bf16 %v9284_v53, %v9284_v53  ;;  %v16035_v15 = vld [vmem:[#allocation19 + $0x644] ss:$16 sps:$4 sm:$0xff]  }
 0xab6   : > { %12459 = vmatpush2.bf16.msra.mxu1 %v15961_v58  ;;  %12419 = vmatprep.subr.bf16.mxu0 %v15966_v22  ;;  %v5946_v58 = vrot.slane %v18180_v21, %v18083_v60  ;;  %v16000_v22 = vld [vmem:[#allocation19 + $0x4e0] ss:$16 sps:$4 sm:$0xff]   ;;  %v16041_v53 = vld [vmem:[#allocation19 + $0x624] ss:$16 sps:$4 sm:$0xff]  }
 0xab7   : > { %12460 = vmatprep.subr.bf16.mxu1 %v15969_v49  ;;  %v18212_v49 = vpack.c.bf16 %v9281_v30, %v9281_v30  ;;  %v18217_v62 = vpack.c.bf16 %v9286_v17, %v9286_v17  ;;  %v16038_v30 = vld [vmem:[#allocation19 + $0x424] ss:$16 sps:$4 sm:$0xff]  }
 0xab9   : > { %12420 = vmatpush2.bf16.msra.mxu0 %v15964_v10 }
 0xaba   : > { %12461 = vmatpush2.bf16.msra.mxu1 %v15967_v14  ;;  %12421 = vmatprep.subr.bf16.mxu0 %v15972_v35  ;;  %v16009_v14 = vld [vmem:[#allocation19 + $0x6c0] ss:$16 sps:$4 sm:$0xff]   ;;  %v16014_v35 = vld [vmem:[#allocation19 + $0x4a4] ss:$16 sps:$4 sm:$0xff]  }
 0xabb   : > { %12462 = vmatprep.subr.bf16.mxu1 %v15975_v23 }
 0xabd   : > { %12422 = vmatpush2.bf16.msra.mxu0 %v15970_v12  ;;  %v5950_v12 = vrot.slane %v18180_v21, %v18086_v9  ;;  %v16029_v9 = vld [vmem:[#allocation19 + $0x664] ss:$16 sps:$4 sm:$0xff]  }
 0xabe   : > { %12463 = vmatpush2.bf16.msra.mxu1 %v15973_v50  ;;  %12423 = vmatprep.subr.bf16.mxu0 %v15978_v31  ;;  %v16012_v31 = vld [vmem:[#allocation19 + $0x4a0] ss:$16 sps:$4 sm:$0xff]  }
 0xabf   : > { %12464 = vmatprep.subr.bf16.mxu1 %v15981_v38 }
 0xac1   : > { %12424 = vmatpush2.bf16.msra.mxu0 %v15976_v39  ;;  %v16015_v39 = vld [vmem:[#allocation19 + $0x6a0] ss:$16 sps:$4 sm:$0xff]  }
 0xac2   : > { %12465 = vmatpush2.bf16.msra.mxu1 %v15979_v41  ;;  %12425 = vmatprep.subr.bf16.mxu0 %v15984_v42  ;;  %v16020_v41 = vld [vmem:[#allocation19 + $0x484] ss:$16 sps:$4 sm:$0xff]  }
 0xac3   : > { %12466 = vmatprep.subr.bf16.mxu1 %v15987_v4  ;;  %v16023_v4 = vld [vmem:[#allocation19 + $0x684] ss:$16 sps:$4 sm:$0xff]  }
 0xac5   : > { %12426 = vmatpush2.bf16.msra.mxu0 %v15982_v43 }
 0xac6   : > { %12467 = vmatpush2.bf16.msra.mxu1 %v15985_v51  ;;  %12427 = vmatprep.subr.bf16.mxu0 %v15990_v32  ;;  %v16018_v51 = vld [vmem:[#allocation19 + $0x480] ss:$16 sps:$4 sm:$0xff]  }
 0xac7   : > { %12468 = vmatprep.subr.bf16.mxu1 %v15993_v28  ;;  %v16021_v32 = vld [vmem:[#allocation19 + $0x680] ss:$16 sps:$4 sm:$0xff]   ;;  %v16026_v28 = vld [vmem:[#allocation19 + $0x464] ss:$16 sps:$4 sm:$0xff]  }
 0xac9   : > { %12428 = vmatpush2.bf16.msra.mxu0 %v15988_v29 }
 0xaca   : > { %12469 = vmatpush2.bf16.msra.mxu1 %v15991_v25  ;;  %12429 = vmatprep.subr.bf16.mxu0 %v15996_v55  ;;  %v16024_v25 = vld [vmem:[#allocation19 + $0x460] ss:$16 sps:$4 sm:$0xff]   ;;  %v9203_v55 = vmul.f32 -1.702, %v18163_v18 }
 0xacb   : > { %12470 = vmatprep.subr.bf16.mxu1 %v15999_v33  ;;  %v16032_v33 = vld [vmem:[#allocation19 + $0x444] ss:$16 sps:$4 sm:$0xff]  }
 0xacd   : > { %12430 = vmatpush2.bf16.msra.mxu0 %v15994_v2  ;;  %v9208_v2 = vmul.f32 -1.702, %v18198_v27 }
 0xace   : > { %12471 = vmatpush2.bf16.msra.mxu1 %v15997_v8  ;;  %12481 = vmatprep.subr.bf16.mxu0 %v16002_v54  ;;  %v9223_v8 = vmul.f32 1.442695, %v9203_v55  ;;  %v16033_v54 = vld [vmem:[#allocation19 + $0x640] ss:$16 sps:$4 sm:$0xff]  }
 0xacf   : > { %12522 = vmatprep.subr.bf16.mxu1 %v16005_v57  ;;  %v9227_v57 = vmul.f32 1.442695, %v9205_v13  ;;  %v9233_v17 = vmul.f32 1.442695, %v9208_v2  ;;  %v16066_v55 = vld [vmem:[#allocation19 + $0x580] ss:$16 sps:$4 sm:$0xff]  }
 0xad0   : > { %v8987_v24 = vpop.f32.mrf.mxu0  ;;  %12432 = vmatmul.mubr.bf16.vlgmr.msra.gmra.mxu0 %v18210_v59  ;;  %16724 = vpow2.f32 %v9223_v8  ;;  %v16077_v13 = vld [vmem:[#allocation19 + $0x764] ss:$16 sps:$4 sm:$0xff]   ;;  %v16075_v2 = vld [vmem:[#allocation19 + $0x760] ss:$16 sps:$4 sm:$0xff]  }
 0xad1   : > { %v8988_v10 = vadd.f32 %v8987_v24, %v5946_v58  ;;  %v9028_v60 = vpop.f32.mrf.mxu1  ;;  %12473 = vmatmul.mubr.bf16.vlgmr.msra.gmra.mxu1 %v18212_v49  ;;  %12482 = vmatpush1.bf16.msra.mxu0 %v16000_v22  ;;  %v16036_v22 = vld [vmem:[#allocation19 + $0x420] ss:$16 sps:$4 sm:$0xff]   ;;  %16726 = vpow2.f32 %v9227_v57  ;;  %v16047_v24 = vld [vmem:[#allocation19 + $0x604] ss:$16 sps:$4 sm:$0xff]  }
 0xad2   : > { %12513 = vmatprep.mubr.bf16.mxu0 %v18214_v20  ;;  %12523 = vmatpush1.bf16.msra.mxu1 %v16003_v19  ;;  %v8989_v1 = vpop.f32.mrf.mxu0  ;;  %v16039_v19 = vld [vmem:[#allocation19 + $0x620] ss:$16 sps:$4 sm:$0xff]   ;;  %16728 = vpow2.f32 %v9233_v17  ;;  %v16089_v57 = vld [vmem:[#allocation19 + $0x724] ss:$16 sps:$4 sm:$0xff]  }
 0xad3   : > { %v18221_v3 = vadd.f32 %v9028_v60, %v8988_v10  ;;  %12554 = vmatprep.mubr.bf16.mxu1 %v18217_v62  ;;  %v9030_v23 = vpop.f32.mrf.mxu1  ;;  %12483 = vmatprep.subr.bf16.mxu0 %v16008_v61  ;;  %v8990_v43 = vadd.f32 %v8989_v1, %v5950_v12  ;;  %v16044_v61 = vld [vmem:[#allocation19 + $0x404] ss:$16 sps:$4 sm:$0xff]   ;;  %v16045_v10 = vld [vmem:[#allocation19 + $0x600] ss:$16 sps:$4 sm:$0xff]  }
 0xad4   : > { %v8991_v48 = vpop.f32.mrf.mxu0  ;;  %12524 = vmatprep.subr.bf16.mxu1 %v16011_v47  ;;  %v16042_v47 = vld [vmem:[#allocation19 + $0x400] ss:$16 sps:$4 sm:$0xff]   ;;  %v16050_v60 = vld [vmem:[#allocation19 + $0x5e4] ss:$16 sps:$4 sm:$0xff]  }
 0xad5   : > { %v9032_v50 = vpop.f32.mrf.mxu1  ;;  %12484 = vmatpush1.bf16.msra.mxu0 %v16006_v45  ;;  %v18226_v29 = vadd.f32 %v9030_v23, %v8990_v43  ;;  %v16053_v45 = vld [vmem:[#allocation19 + $0x7e4] ss:$16 sps:$4 sm:$0xff]   ;;  %v16048_v1 = vld [vmem:[#allocation19 + $0x5e0] ss:$16 sps:$4 sm:$0xff]  }
 0xad6   : > { %12525 = vmatpush1.bf16.msra.mxu1 %v16009_v14  ;;  %v8992_v38 = vpop.f32.mrf.mxu0  ;;  %12485 = vmatprep.subr.bf16.mxu0 %v16014_v35  ;;  %v16051_v14 = vld [vmem:[#allocation19 + $0x7e0] ss:$16 sps:$4 sm:$0xff]   ;;  %v16056_v35 = vld [vmem:[#allocation19 + $0x5c4] ss:$16 sps:$4 sm:$0xff]  }
 0xad7   : > { %v9033_v42 = vpop.f32.mrf.mxu1  ;;  %12526 = vmatprep.subr.bf16.mxu1 %v16017_v52  ;;  %v9210_v7 = vmul.f32 -1.702, %v18226_v29  ;;  %v16059_v23 = vld [vmem:[#allocation19 + $0x7c4] ss:$16 sps:$4 sm:$0xff]   ;;  %v16054_v52 = vld [vmem:[#allocation19 + $0x5c0] ss:$16 sps:$4 sm:$0xff]  }
 0xad8   : > { %v16057_v48 = vld [vmem:[#allocation19 + $0x7c0] ss:$16 sps:$4 sm:$0xff]   ;;  %v16062_v12 = vld [vmem:[#allocation19 + $0x5a4] ss:$16 sps:$4 sm:$0xff]  }
 0xad9   : > { %12486 = vmatpush1.bf16.msra.mxu0 %v16012_v31  ;;  %v9237_v58 = vmul.f32 1.442695, %v9210_v7  ;;  %v16065_v31 = vld [vmem:[#allocation19 + $0x7a4] ss:$16 sps:$4 sm:$0xff]   ;;  %v16063_v43 = vld [vmem:[#allocation19 + $0x7a0] ss:$16 sps:$4 sm:$0xff]  }
 0xada   : > { %12527 = vmatpush1.bf16.msra.mxu1 %v16015_v39  ;;  %12487 = vmatprep.subr.bf16.mxu0 %v16020_v41  ;;  %v16060_v41 = vld [vmem:[#allocation19 + $0x5a0] ss:$16 sps:$4 sm:$0xff]   ;;  %v16080_v7 = vld [vmem:[#allocation19 + $0x544] ss:$16 sps:$4 sm:$0xff]  }
 0xadb   : > { %12528 = vmatprep.subr.bf16.mxu1 %v16023_v4  ;;  %16730 = vpow2.f32 %v9237_v58  ;;  %v16078_v8 = vld [vmem:[#allocation19 + $0x540] ss:$16 sps:$4 sm:$0xff]   ;;  %v16092_v58 = vld [vmem:[#allocation19 + $0x504] ss:$16 sps:$4 sm:$0xff]  }
 0xadc   : > { %v16087_v17 = vld [vmem:[#allocation19 + $0x720] ss:$16 sps:$4 sm:$0xff]  }
 0xadd   : > { %12488 = vmatpush1.bf16.msra.mxu0 %v16018_v51  ;;  %v16725_v50 = vpop.eup %16724  ;;  %v16068_v51 = vld [vmem:[#allocation19 + $0x584] ss:$16 sps:$4 sm:$0xff]  }
 0xade   : > { %12529 = vmatpush1.bf16.msra.mxu1 %v16021_v32  ;;  %12489 = vmatprep.subr.bf16.mxu0 %v16026_v28  ;;  %v16727_v38 = vpop.eup %16726  ;;  %v9251_v4 = vadd.f32 1.0, %v16725_v50  ;;  %v16071_v28 = vld [vmem:[#allocation19 + $0x784] ss:$16 sps:$4 sm:$0xff]  }
 0xadf   : > { %12530 = vmatprep.subr.bf16.mxu1 %v16029_v9  ;;  %v16729_v39 = vpop.eup %16728  ;;  %v9253_v32 = vadd.f32 1.0, %v16727_v38 }
 0xae0   : > { %v9256_v9 = vadd.f32 1.0, %v16729_v39  ;;  %16732 = vrcp.f32 %v9251_v4 }
 0xae1   : > { %12490 = vmatpush1.bf16.msra.mxu0 %v16024_v25  ;;  %16734 = vrcp.f32 %v9253_v32 }
 0xae2   : > { %12531 = vmatpush1.bf16.msra.mxu1 %v16027_v11  ;;  %12491 = vmatprep.subr.bf16.mxu0 %v16032_v33  ;;  %v16069_v11 = vld [vmem:[#allocation19 + $0x780] ss:$16 sps:$4 sm:$0xff]   ;;  %v16074_v33 = vld [vmem:[#allocation19 + $0x564] ss:$16 sps:$4 sm:$0xff]   ;;  %16736 = vrcp.f32 %v9256_v9 }
 0xae3   : > { %12532 = vmatprep.subr.bf16.mxu1 %v16035_v15  ;;  %v16072_v15 = vld [vmem:[#allocation19 + $0x560] ss:$16 sps:$4 sm:$0xff]   ;;  %v16113_v9 = vld [vmem:[#allocation19 + $0xaa4] ss:$16 sps:$4 sm:$0xff]  }
 0xae5   : > { %12492 = vmatpush1.bf16.msra.mxu0 %v16030_v34  ;;  %v16083_v34 = vld [vmem:[#allocation19 + $0x744] ss:$16 sps:$4 sm:$0xff]  }
 0xae6   : > { %12533 = vmatpush1.bf16.msra.mxu1 %v16033_v54  ;;  %12493 = vmatprep.subr.bf16.mxu0 %v16038_v30  ;;  %v16081_v54 = vld [vmem:[#allocation19 + $0x740] ss:$16 sps:$4 sm:$0xff]   ;;  %v16086_v30 = vld [vmem:[#allocation19 + $0x524] ss:$16 sps:$4 sm:$0xff]  }
 0xae7   : > { %12534 = vmatprep.subr.bf16.mxu1 %v16041_v53  ;;  %v16084_v53 = vld [vmem:[#allocation19 + $0x520] ss:$16 sps:$4 sm:$0xff]  }
 0xae8   : > { %v16731_v42 = vpop.eup %16730 }
 0xae9   : > { %12494 = vmatpush1.bf16.msra.mxu0 %v16036_v22  ;;  %v9258_v25 = vadd.f32 1.0, %v16731_v42  ;;  %v16102_v42 = vld [vmem:[#allocation19 + $0x8c0] ss:$16 sps:$4 sm:$0xff]  }
 0xaea   : > { %12535 = vmatpush1.bf16.msra.mxu1 %v16039_v19  ;;  %12495 = vmatprep.subr.bf16.mxu0 %v16044_v61  ;;  %v16095_v19 = vld [vmem:[#allocation19 + $0x704] ss:$16 sps:$4 sm:$0xff]  }
 0xaeb   : > { %12536 = vmatprep.subr.bf16.mxu1 %v16047_v24  ;;  %16738 = vrcp.f32 %v9258_v25  ;;  %v5958_v25 = vrot.slane %v18180_v21, %v17938_v40  ;;  %v16122_v40 = vld [vmem:[#allocation19 + $0x864] ss:$16 sps:$4 sm:$0xff]  }
 0xaed   : > { %12496 = vmatpush1.bf16.msra.mxu0 %v16042_v47  ;;  %v16733_v22 = vpop.eup %16732  ;;  %v16090_v47 = vld [vmem:[#allocation19 + $0x500] ss:$16 sps:$4 sm:$0xff]  }
 0xaee   : > { %12537 = vmatpush1.bf16.msra.mxu1 %v16045_v10  ;;  %12497 = vmatprep.subr.bf16.mxu0 %v16050_v60  ;;  %v16735_v61 = vpop.eup %16734  ;;  %v9283_v60 = vmul.f32 %v16733_v22, %v18163_v18  ;;  %v16099_v18 = vld [vmem:[#allocation19 + $0xae0] ss:$16 sps:$4 sm:$0xff]   ;;  %v16128_v22 = vld [vmem:[#allocation19 + $0x844] ss:$16 sps:$4 sm:$0xff]  }
 0xaef   : > { %12538 = vmatprep.subr.bf16.mxu1 %v16053_v45  ;;  %v16737_v24 = vpop.eup %16736  ;;  %v16093_v45 = vld [vmem:[#allocation19 + $0x700] ss:$16 sps:$4 sm:$0xff]  }
 0xaf0   : > { %v18238_v50 = vpack.c.bf16 %v9283_v60, %v9283_v60  ;;  %v16129_v60 = vld [vmem:[#allocation19 + $0xa40] ss:$16 sps:$4 sm:$0xff]  }
 0xaf1   : > { %12498 = vmatpush2.bf16.msra.mxu0 %v16048_v1  ;;  %v16098_v1 = vld [vmem:[#allocation19 + $0x8e4] ss:$16 sps:$4 sm:$0xff]  }
 0xaf2   : > { %12539 = vmatpush2.bf16.msra.mxu1 %v16051_v14  ;;  %12499 = vmatprep.subr.bf16.mxu0 %v16056_v35  ;;  %v9285_v14 = vmul.f32 %v16735_v61, %v18173_v44  ;;  %v16101_v35 = vld [vmem:[#allocation19 + $0xae4] ss:$16 sps:$4 sm:$0xff]  }
 0xaf3   : > { %12540 = vmatprep.subr.bf16.mxu1 %v16059_v23  ;;  %v9288_v23 = vmul.f32 %v16737_v24, %v18198_v27  ;;  %v16104_v44 = vld [vmem:[#allocation19 + $0x8c4] ss:$16 sps:$4 sm:$0xff]  }
 0xaf4   : > { %v16107_v27 = vld [vmem:[#allocation19 + $0xac4] ss:$16 sps:$4 sm:$0xff]  }
 0xaf5   : > { %12500 = vmatpush2.bf16.msra.mxu0 %v16054_v52  ;;  %v18242_v38 = vpack.c.bf16 %v9288_v23, %v9288_v23  ;;  %v16131_v61 = vld [vmem:[#allocation19 + $0xa44] ss:$16 sps:$4 sm:$0xff]   ;;  %v16132_v23 = vld [vmem:[#allocation19 + $0x820] ss:$16 sps:$4 sm:$0xff]  }
 0xaf6   : > { %12541 = vmatpush2.bf16.msra.mxu1 %v16057_v48  ;;  %12501 = vmatprep.subr.bf16.mxu0 %v16062_v12  ;;  %v5954_v48 = vrot.slane %v18180_v21, %v17892_v0  ;;  %v16096_v12 = vld [vmem:[#allocation19 + $0x8e0] ss:$16 sps:$4 sm:$0xff]   ;;  %v16125_v21 = vld [vmem:[#allocation19 + $0xa64] ss:$16 sps:$4 sm:$0xff]  }
 0xaf7   : > { %12542 = vmatprep.subr.bf16.mxu1 %v16065_v31  ;;  %v18240_v31 = vpack.c.bf16 %v9285_v14, %v9285_v14  ;;  %v16137_v14 = vld [vmem:[#allocation19 + $0xa24] ss:$16 sps:$4 sm:$0xff]  }
 0xaf8   : > { %v16739_v10 = vpop.eup %16738 }
 0xaf9   : > { %12502 = vmatpush2.bf16.msra.mxu0 %v16060_v41  ;;  %v9290_v52 = vmul.f32 %v16739_v10, %v18226_v29 }
 0xafa   : > { %12543 = vmatpush2.bf16.msra.mxu1 %v16063_v43  ;;  %12503 = vmatprep.subr.bf16.mxu0 %v16068_v51  ;;  %v16105_v43 = vld [vmem:[#allocation19 + $0xac0] ss:$16 sps:$4 sm:$0xff]   ;;  %v16110_v51 = vld [vmem:[#allocation19 + $0x8a4] ss:$16 sps:$4 sm:$0xff]  }
 0xafb   : > { %12544 = vmatprep.subr.bf16.mxu1 %v16071_v28  ;;  %v18245_v29 = vpack.c.bf16 %v9290_v52, %v9290_v52  ;;  %v16135_v52 = vld [vmem:[#allocation19 + $0xa20] ss:$16 sps:$4 sm:$0xff]  }
 0xafd   : > { %12504 = vmatpush2.bf16.msra.mxu0 %v16066_v55 }
 0xafe   : > { %12545 = vmatpush2.bf16.msra.mxu1 %v16069_v11  ;;  %12505 = vmatprep.subr.bf16.mxu0 %v16074_v33  ;;  %v16108_v33 = vld [vmem:[#allocation19 + $0x8a0] ss:$16 sps:$4 sm:$0xff]  }
 0xaff   : > { %12546 = vmatprep.subr.bf16.mxu1 %v16077_v13 }
 0xb01   : > { %12506 = vmatpush2.bf16.msra.mxu0 %v16072_v15  ;;  %v16111_v15 = vld [vmem:[#allocation19 + $0xaa0] ss:$16 sps:$4 sm:$0xff]  }
 0xb02   : > { %12547 = vmatpush2.bf16.msra.mxu1 %v16075_v2  ;;  %12507 = vmatprep.subr.bf16.mxu0 %v16080_v7  ;;  %v16116_v2 = vld [vmem:[#allocation19 + $0x884] ss:$16 sps:$4 sm:$0xff]  }
 0xb03   : > { %12548 = vmatprep.subr.bf16.mxu1 %v16083_v34  ;;  %v16119_v34 = vld [vmem:[#allocation19 + $0xa84] ss:$16 sps:$4 sm:$0xff]  }
 0xb05   : > { %12508 = vmatpush2.bf16.msra.mxu0 %v16078_v8 }
 0xb06   : > { %12549 = vmatpush2.bf16.msra.mxu1 %v16081_v54  ;;  %12509 = vmatprep.subr.bf16.mxu0 %v16086_v30  ;;  %v16114_v54 = vld [vmem:[#allocation19 + $0x880] ss:$16 sps:$4 sm:$0xff]  }
 0xb07   : > { %12550 = vmatprep.subr.bf16.mxu1 %v16089_v57  ;;  %v16117_v30 = vld [vmem:[#allocation19 + $0xa80] ss:$16 sps:$4 sm:$0xff]  }
 0xb09   : > { %12510 = vmatpush2.bf16.msra.mxu0 %v16084_v53  ;;  %v16120_v53 = vld [vmem:[#allocation19 + $0x860] ss:$16 sps:$4 sm:$0xff]  }
 0xb0a   : > { %12551 = vmatpush2.bf16.msra.mxu1 %v16087_v17  ;;  %12511 = vmatprep.subr.bf16.mxu0 %v16092_v58  ;;  %v9207_v17 = vmul.f32 -1.702, %v18195_v63  ;;  %v16123_v58 = vld [vmem:[#allocation19 + $0xa60] ss:$16 sps:$4 sm:$0xff]  }
 0xb0b   : > { %12552 = vmatprep.subr.bf16.mxu1 %v16095_v19  ;;  %v9209_v19 = vmul.f32 -1.702, %v18221_v3 }
 0xb0c   : > { %v9231_v10 = vmul.f32 1.442695, %v9207_v17  ;;  %v16171_v17 = vld [vmem:[#allocation19 + $0xb60] ss:$16 sps:$4 sm:$0xff]  }
 0xb0d   : > { %12512 = vmatpush2.bf16.msra.mxu0 %v16090_v47  ;;  %v16126_v47 = vld [vmem:[#allocation19 + $0x840] ss:$16 sps:$4 sm:$0xff]  }
 0xb0e   : > { %12553 = vmatpush2.bf16.msra.mxu1 %v16093_v45  ;;  %12563 = vmatprep.subr.bf16.mxu0 %v16098_v1  ;;  %v16134_v45 = vld [vmem:[#allocation19 + $0x824] ss:$16 sps:$4 sm:$0xff]   ;;  %v9235_v1 = vmul.f32 1.442695, %v9209_v19  ;;  %16740 = vpow2.f32 %v9231_v10  ;;  %v16174_v19 = vld [vmem:[#allocation19 + $0x940] ss:$16 sps:$4 sm:$0xff]  }
 0xb0f   : > { %12604 = vmatprep.subr.bf16.mxu1 %v16101_v35  ;;  %v16180_v10 = vld [vmem:[#allocation19 + $0x920] ss:$16 sps:$4 sm:$0xff]  }
 0xb10   : > { %v9069_v39 = vpop.f32.mrf.mxu0  ;;  %12514 = vmatmul.mubr.bf16.vlgmr.msra.gmra.mxu0 %v18238_v50  ;;  %16742 = vpow2.f32 %v9235_v1 }
 0xb11   : > { %v9070_v41 = vadd.f32 %v9069_v39, %v5954_v48  ;;  %v9110_v0 = vpop.f32.mrf.mxu1  ;;  %12555 = vmatmul.mubr.bf16.vlgmr.msra.gmra.mxu1 %v18240_v31  ;;  %12564 = vmatpush1.bf16.msra.mxu0 %v16096_v12  ;;  %v16140_v48 = vld [vmem:[#allocation19 + $0x804] ss:$16 sps:$4 sm:$0xff]  }
 0xb12   : > { %12595 = vmatprep.mubr.bf16.mxu0 %v18242_v38  ;;  %12605 = vmatpush1.bf16.msra.mxu1 %v16099_v18  ;;  %v9071_v4 = vpop.f32.mrf.mxu0  ;;  %v16143_v12 = vld [vmem:[#allocation19 + $0xa04] ss:$16 sps:$4 sm:$0xff]   ;;  %v16138_v18 = vld [vmem:[#allocation19 + $0x800] ss:$16 sps:$4 sm:$0xff]  }
 0xb13   : > { %v18249_v32 = vadd.f32 %v9110_v0, %v9070_v41  ;;  %12636 = vmatprep.mubr.bf16.mxu1 %v18245_v29  ;;  %v9112_v28 = vpop.f32.mrf.mxu1  ;;  %12565 = vmatprep.subr.bf16.mxu0 %v16104_v44  ;;  %v9072_v8 = vadd.f32 %v9071_v4, %v5958_v25  ;;  %v16141_v44 = vld [vmem:[#allocation19 + $0xa00] ss:$16 sps:$4 sm:$0xff]   ;;  %v16146_v39 = vld [vmem:[#allocation19 + $0x9e4] ss:$16 sps:$4 sm:$0xff]  }
 0xb14   : > { %v9073_v55 = vpop.f32.mrf.mxu0  ;;  %12606 = vmatprep.subr.bf16.mxu1 %v16107_v27  ;;  %v16149_v27 = vld [vmem:[#allocation19 + $0xbe4] ss:$16 sps:$4 sm:$0xff]   ;;  %v16144_v41 = vld [vmem:[#allocation19 + $0x9e0] ss:$16 sps:$4 sm:$0xff]  }
 0xb15   : > { %v9114_v11 = vpop.f32.mrf.mxu1  ;;  %12566 = vmatpush1.bf16.msra.mxu0 %v16102_v42  ;;  %v18254_v57 = vadd.f32 %v9112_v28, %v9072_v8  ;;  %v16147_v0 = vld [vmem:[#allocation19 + $0xbe0] ss:$16 sps:$4 sm:$0xff]   ;;  %v16152_v42 = vld [vmem:[#allocation19 + $0x9c4] ss:$16 sps:$4 sm:$0xff]  }
 0xb16   : > { %12607 = vmatpush1.bf16.msra.mxu1 %v16105_v43  ;;  %v9074_v13 = vpop.f32.mrf.mxu0  ;;  %12567 = vmatprep.subr.bf16.mxu0 %v16110_v51  ;;  %v16155_v4 = vld [vmem:[#allocation19 + $0xbc4] ss:$16 sps:$4 sm:$0xff]   ;;  %v16150_v43 = vld [vmem:[#allocation19 + $0x9c0] ss:$16 sps:$4 sm:$0xff]  }
 0xb17   : > { %v9115_v7 = vpop.f32.mrf.mxu1  ;;  %12608 = vmatprep.subr.bf16.mxu1 %v16113_v9  ;;  %v9212_v24 = vmul.f32 -1.702, %v18254_v57  ;;  %v16153_v51 = vld [vmem:[#allocation19 + $0xbc0] ss:$16 sps:$4 sm:$0xff]   ;;  %v16158_v28 = vld [vmem:[#allocation19 + $0x9a4] ss:$16 sps:$4 sm:$0xff]  }
 0xb18   : > { %v16161_v25 = vld [vmem:[#allocation19 + $0xba4] ss:$16 sps:$4 sm:$0xff]  }
 0xb19   : > { %12568 = vmatpush1.bf16.msra.mxu0 %v16108_v33  ;;  %v9241_v35 = vmul.f32 1.442695, %v9212_v24  ;;  %v16156_v33 = vld [vmem:[#allocation19 + $0x9a0] ss:$16 sps:$4 sm:$0xff]   ;;  %v16182_v24 = vld [vmem:[#allocation19 + $0x924] ss:$16 sps:$4 sm:$0xff]  }
 0xb1a   : > { %12609 = vmatpush1.bf16.msra.mxu1 %v16111_v15  ;;  %12569 = vmatprep.subr.bf16.mxu0 %v16116_v2  ;;  %v16159_v15 = vld [vmem:[#allocation19 + $0xba0] ss:$16 sps:$4 sm:$0xff]   ;;  %v16164_v2 = vld [vmem:[#allocation19 + $0x984] ss:$16 sps:$4 sm:$0xff]  }
 0xb1b   : > { %12610 = vmatprep.subr.bf16.mxu1 %v16119_v34  ;;  %16744 = vpow2.f32 %v9241_v35  ;;  %v16741_v9 = vpop.eup %16740  ;;  %v16167_v34 = vld [vmem:[#allocation19 + $0xb84] ss:$16 sps:$4 sm:$0xff]  }
 0xb1c   : > { %v9255_v13 = vadd.f32 1.0, %v16741_v9 }
 0xb1d   : > { %12570 = vmatpush1.bf16.msra.mxu0 %v16114_v54  ;;  %v16743_v55 = vpop.eup %16742  ;;  %v16162_v54 = vld [vmem:[#allocation19 + $0x980] ss:$16 sps:$4 sm:$0xff]  }
 0xb1e   : > { %12611 = vmatpush1.bf16.msra.mxu1 %v16117_v30  ;;  %12571 = vmatprep.subr.bf16.mxu0 %v16122_v40  ;;  %v9257_v7 = vadd.f32 1.0, %v16743_v55  ;;  %16746 = vrcp.f32 %v9255_v13  ;;  %v16165_v30 = vld [vmem:[#allocation19 + $0xb80] ss:$16 sps:$4 sm:$0xff]   ;;  %v16170_v40 = vld [vmem:[#allocation19 + $0x964] ss:$16 sps:$4 sm:$0xff]  }
 0xb1f   : > { %12612 = vmatprep.subr.bf16.mxu1 %v16125_v21  ;;  %v16173_v21 = vld [vmem:[#allocation19 + $0xb64] ss:$16 sps:$4 sm:$0xff]  }
 0xb20   : > { %16748 = vrcp.f32 %v9257_v7 }
 0xb21   : > { %12572 = vmatpush1.bf16.msra.mxu0 %v16120_v53  ;;  %v16168_v53 = vld [vmem:[#allocation19 + $0x960] ss:$16 sps:$4 sm:$0xff]  }
 0xb22   : > { %12613 = vmatpush1.bf16.msra.mxu1 %v16123_v58  ;;  %12573 = vmatprep.subr.bf16.mxu0 %v16128_v22  ;;  %v16176_v58 = vld [vmem:[#allocation19 + $0x944] ss:$16 sps:$4 sm:$0xff]  }
 0xb23   : > { %12614 = vmatprep.subr.bf16.mxu1 %v16131_v61  ;;  %v16179_v22 = vld [vmem:[#allocation19 + $0xb44] ss:$16 sps:$4 sm:$0xff]   ;;  %v16177_v61 = vld [vmem:[#allocation19 + $0xb40] ss:$16 sps:$4 sm:$0xff]  }
 0xb25   : > { %12574 = vmatpush1.bf16.msra.mxu0 %v16126_v47  ;;  %v16185_v47 = vld [vmem:[#allocation19 + $0xb24] ss:$16 sps:$4 sm:$0xff]  }
 0xb26   : > { %12615 = vmatpush1.bf16.msra.mxu1 %v16129_v60  ;;  %12575 = vmatprep.subr.bf16.mxu0 %v16134_v45  ;;  %v16183_v60 = vld [vmem:[#allocation19 + $0xb20] ss:$16 sps:$4 sm:$0xff]   ;;  %v16188_v45 = vld [vmem:[#allocation19 + $0x904] ss:$16 sps:$4 sm:$0xff]  }
 0xb27   : > { %12616 = vmatprep.subr.bf16.mxu1 %v16137_v14  ;;  %v16191_v14 = vld [vmem:[#allocation19 + $0xb04] ss:$16 sps:$4 sm:$0xff]  }
 0xb28   : > { %v16745_v11 = vpop.eup %16744 }
 0xb29   : > { %12576 = vmatpush1.bf16.msra.mxu0 %v16132_v23  ;;  %v9260_v8 = vadd.f32 1.0, %v16745_v11  ;;  %v16201_v11 = vld [vmem:[#allocation19 + $0xec0] ss:$16 sps:$4 sm:$0xff]  }
 0xb2a   : > { %12617 = vmatpush1.bf16.msra.mxu1 %v16135_v52  ;;  %12577 = vmatprep.subr.bf16.mxu0 %v16140_v48  ;;  %v16186_v52 = vld [vmem:[#allocation19 + $0x900] ss:$16 sps:$4 sm:$0xff]  }
 0xb2b   : > { %12618 = vmatprep.subr.bf16.mxu1 %v16143_v12  ;;  %16750 = vrcp.f32 %v9260_v8  ;;  %v16747_v1 = vpop.eup %16746  ;;  %v16189_v12 = vld [vmem:[#allocation19 + $0xb00] ss:$16 sps:$4 sm:$0xff]  }
 0xb2c   : > { %v9287_v48 = vmul.f32 %v16747_v1, %v18195_v63  ;;  %v16777_v63 = vld [vmem:[#allocation10 + $0x8] sm:$0xff]  ;;  %v16219_v1 = vld [vmem:[#allocation19 + $0xe60] ss:$16 sps:$4 sm:$0xff]  }
 0xb2d   : > { %12578 = vmatpush1.bf16.msra.mxu0 %v16138_v18  ;;  %v16749_v35 = vpop.eup %16748  ;;  %v16194_v18 = vld [vmem:[#allocation19 + $0xce4] ss:$16 sps:$4 sm:$0xff]  }
 0xb2e   : > { %12619 = vmatpush1.bf16.msra.mxu1 %v16141_v44  ;;  %12579 = vmatprep.subr.bf16.mxu0 %v16146_v39  ;;  %v9289_v44 = vmul.f32 %v16749_v35, %v18221_v3  ;;  %v16197_v39 = vld [vmem:[#allocation19 + $0xee4] ss:$16 sps:$4 sm:$0xff]  }
 0xb2f   : > { %12620 = vmatprep.subr.bf16.mxu1 %v16149_v27 }
 0xb31   : > { %12580 = vmatpush2.bf16.msra.mxu0 %v16144_v41  ;;  %v16192_v41 = vld [vmem:[#allocation19 + $0xce0] ss:$16 sps:$4 sm:$0xff]  }
 0xb32   : > { %12621 = vmatpush2.bf16.msra.mxu1 %v16147_v0  ;;  %12581 = vmatprep.subr.bf16.mxu0 %v16152_v42  ;;  %v18262_v0 = vpack.c.bf16 %v9287_v48, %v9287_v48  ;;  %v16195_v42 = vld [vmem:[#allocation19 + $0xee0] ss:$16 sps:$4 sm:$0xff]  }
 0xb33   : > { %12622 = vmatprep.subr.bf16.mxu1 %v16155_v4  ;;  %v18264_v4 = vpack.c.bf16 %v9289_v44, %v9289_v44 }
 0xb35   : > { %12582 = vmatpush2.bf16.msra.mxu0 %v16150_v43  ;;  %v5966_v43 = vrot.slane %v16777_v63, %v18028_v16  ;;  %v5962_v16 = vrot.slane %v16777_v63, %v17976_v37  ;;  %v16239_v63 = vld [vmem:[#allocation19 + $0xe04] ss:$16 sps:$4 sm:$0xff]  }
 0xb36   : > { %12623 = vmatpush2.bf16.msra.mxu1 %v16153_v51  ;;  %12583 = vmatprep.subr.bf16.mxu0 %v16158_v28  ;;  %v16200_v51 = vld [vmem:[#allocation19 + $0xcc4] ss:$16 sps:$4 sm:$0xff]  }
 0xb37   : > { %12624 = vmatprep.subr.bf16.mxu1 %v16161_v25  ;;  %v16203_v28 = vld [vmem:[#allocation19 + $0xec4] ss:$16 sps:$4 sm:$0xff]   ;;  %v16198_v25 = vld [vmem:[#allocation19 + $0xcc0] ss:$16 sps:$4 sm:$0xff]  }
 0xb38   : > { %v16751_v23 = vpop.eup %16750 }
 0xb39   : > { %12584 = vmatpush2.bf16.msra.mxu0 %v16156_v33  ;;  %v9292_v27 = vmul.f32 %v16751_v23, %v18254_v57  ;;  %v16206_v33 = vld [vmem:[#allocation19 + $0xca4] ss:$16 sps:$4 sm:$0xff]  }
 0xb3a   : > { %12625 = vmatpush2.bf16.msra.mxu1 %v16159_v15  ;;  %12585 = vmatprep.subr.bf16.mxu0 %v16164_v2  ;;  %v16209_v2 = vld [vmem:[#allocation19 + $0xea4] ss:$16 sps:$4 sm:$0xff]  }
 0xb3b   : > { %12626 = vmatprep.subr.bf16.mxu1 %v16167_v34  ;;  %v18267_v3 = vpack.c.bf16 %v9292_v27, %v9292_v27  ;;  %v16227_v23 = vld [vmem:[#allocation19 + $0xe44] ss:$16 sps:$4 sm:$0xff]   ;;  %v16228_v27 = vld [vmem:[#allocation19 + $0xc20] ss:$16 sps:$4 sm:$0xff]  }
 0xb3d   : > { %12586 = vmatpush2.bf16.msra.mxu0 %v16162_v54  ;;  %v16204_v54 = vld [vmem:[#allocation19 + $0xca0] ss:$16 sps:$4 sm:$0xff]  }
 0xb3e   : > { %12627 = vmatpush2.bf16.msra.mxu1 %v16165_v30  ;;  %12587 = vmatprep.subr.bf16.mxu0 %v16170_v40  ;;  %v16207_v40 = vld [vmem:[#allocation19 + $0xea0] ss:$16 sps:$4 sm:$0xff]  }
 0xb3f   : > { %12628 = vmatprep.subr.bf16.mxu1 %v16173_v21  ;;  %v16212_v21 = vld [vmem:[#allocation19 + $0xc84] ss:$16 sps:$4 sm:$0xff]  }
 0xb41   : > { %12588 = vmatpush2.bf16.msra.mxu0 %v16168_v53 }
 0xb42   : > { %12629 = vmatpush2.bf16.msra.mxu1 %v16171_v17  ;;  %12589 = vmatprep.subr.bf16.mxu0 %v16176_v58  ;;  %v16215_v58 = vld [vmem:[#allocation19 + $0xe84] ss:$16 sps:$4 sm:$0xff]  }
 0xb43   : > { %12630 = vmatprep.subr.bf16.mxu1 %v16179_v22 }
 0xb45   : > { %12590 = vmatpush2.bf16.msra.mxu0 %v16174_v19  ;;  %v16210_v19 = vld [vmem:[#allocation19 + $0xc80] ss:$16 sps:$4 sm:$0xff]  }
 0xb46   : > { %12631 = vmatpush2.bf16.msra.mxu1 %v16177_v61  ;;  %12591 = vmatprep.subr.bf16.mxu0 %v16182_v24  ;;  %v16213_v61 = vld [vmem:[#allocation19 + $0xe80] ss:$16 sps:$4 sm:$0xff]   ;;  %v16218_v24 = vld [vmem:[#allocation19 + $0xc64] ss:$16 sps:$4 sm:$0xff]  }
 0xb47   : > { %12632 = vmatprep.subr.bf16.mxu1 %v16185_v47 }
 0xb49   : > { %12592 = vmatpush2.bf16.msra.mxu0 %v16180_v10  ;;  %v16221_v10 = vld [vmem:[#allocation19 + $0xe64] ss:$16 sps:$4 sm:$0xff]  }
 0xb4a   : > { %12633 = vmatpush2.bf16.msra.mxu1 %v16183_v60  ;;  %12593 = vmatprep.subr.bf16.mxu0 %v16188_v45  ;;  %v16216_v60 = vld [vmem:[#allocation19 + $0xc60] ss:$16 sps:$4 sm:$0xff]   ;;  %v9211_v45 = vmul.f32 -1.702, %v18249_v32 }
 0xb4b   : > { %12634 = vmatprep.subr.bf16.mxu1 %v16191_v14  ;;  %v16224_v14 = vld [vmem:[#allocation19 + $0xc44] ss:$16 sps:$4 sm:$0xff]  }
 0xb4c   : > { %v9239_v48 = vmul.f32 1.442695, %v9211_v45  ;;  %v16264_v45 = vld [vmem:[#allocation19 + $0xd60] ss:$16 sps:$4 sm:$0xff]  }
 0xb4d   : > { %12594 = vmatpush2.bf16.msra.mxu0 %v16186_v52  ;;  %v16222_v52 = vld [vmem:[#allocation19 + $0xc40] ss:$16 sps:$4 sm:$0xff]  }
 0xb4e   : > { %12635 = vmatpush2.bf16.msra.mxu1 %v16189_v12  ;;  %12645 = vmatprep.subr.bf16.mxu0 %v16194_v18  ;;  %v16225_v12 = vld [vmem:[#allocation19 + $0xe40] ss:$16 sps:$4 sm:$0xff]   ;;  %v16230_v18 = vld [vmem:[#allocation19 + $0xc24] ss:$16 sps:$4 sm:$0xff]  }
 0xb4f   : > { %12686 = vmatprep.subr.bf16.mxu1 %v16197_v39  ;;  %v16233_v39 = vld [vmem:[#allocation19 + $0xe24] ss:$16 sps:$4 sm:$0xff]  }
 0xb50   : > { %v9151_v9 = vpop.f32.mrf.mxu0  ;;  %12596 = vmatmul.mubr.bf16.vlgmr.msra.gmra.mxu0 %v18262_v0 }
 0xb51   : > { %v9192_v57 = vpop.f32.mrf.mxu1  ;;  %12637 = vmatmul.mubr.bf16.vlgmr.msra.gmra.mxu1 %v18264_v4  ;;  %12646 = vmatpush1.bf16.msra.mxu0 %v16192_v41  ;;  %v9152_v53 = vadd.f32 %v9151_v9, %v5962_v16  ;;  %v16231_v41 = vld [vmem:[#allocation19 + $0xe20] ss:$16 sps:$4 sm:$0xff]   ;;  %v16251_v16 = vld [vmem:[#allocation19 + $0xfc4] ss:$16 sps:$4 sm:$0xff]  }
 0xb52   : > { %12677 = vmatprep.mubr.bf16.mxu0 %v18267_v3  ;;  %12687 = vmatpush1.bf16.msra.mxu1 %v16195_v42  ;;  %v9153_v55 = vpop.f32.mrf.mxu0  ;;  %v16236_v42 = vld [vmem:[#allocation19 + $0xc04] ss:$16 sps:$4 sm:$0xff]   ;;  %v16237_v9 = vld [vmem:[#allocation19 + $0xe00] ss:$16 sps:$4 sm:$0xff]  }
 0xb53   : > { %v9154_v13 = vadd.f32 %v9153_v55, %v5966_v43  ;;  %v9194_v15 = vpop.f32.mrf.mxu1  ;;  %12647 = vmatprep.subr.bf16.mxu0 %v16200_v51  ;;  %12688 = vmatprep.subr.bf16.mxu1 %v16203_v28  ;;  %v18276_v47 = vadd.f32 %v9192_v57, %v9152_v53  ;;  %v16234_v28 = vld [vmem:[#allocation19 + $0xc00] ss:$16 sps:$4 sm:$0xff]   ;;  %v16242_v57 = vld [vmem:[#allocation19 + $0xde4] ss:$16 sps:$4 sm:$0xff]  }
 0xb54   : > { %v9155_v7 = vpop.f32.mrf.mxu0  ;;  %v16240_v55 = vld [vmem:[#allocation19 + $0xde0] ss:$16 sps:$4 sm:$0xff]   ;;  %v16260_v53 = vld [vmem:[#allocation19 + $0xd84] ss:$16 sps:$4 sm:$0xff]  }
 0xb55   : > { %v18273_v34 = vadd.f32 %v9194_v15, %v9154_v13  ;;  %v9196_v8 = vpop.f32.mrf.mxu1  ;;  %12648 = vmatpush1.bf16.msra.mxu0 %v16198_v25  ;;  %v9213_v35 = vmul.f32 -1.702, %v18276_v47  ;;  %v16245_v25 = vld [vmem:[#allocation19 + $0xfe4] ss:$16 sps:$4 sm:$0xff]   ;;  %v16246_v13 = vld [vmem:[#allocation19 + $0xdc0] ss:$16 sps:$4 sm:$0xff]  }
 0xb56   : > { %12689 = vmatpush1.bf16.msra.mxu1 %v16201_v11  ;;  %v9156_v30 = vpop.f32.mrf.mxu0  ;;  %12649 = vmatprep.subr.bf16.mxu0 %v16206_v33  ;;  %v16243_v11 = vld [vmem:[#allocation19 + $0xfe0] ss:$16 sps:$4 sm:$0xff]   ;;  %v16248_v33 = vld [vmem:[#allocation19 + $0xdc4] ss:$16 sps:$4 sm:$0xff]  }
 0xb57   : > { %v9214_v17 = vmul.f32 -1.702, %v18273_v34  ;;  %v9197_v37 = vpop.f32.mrf.mxu1  ;;  %12690 = vmatprep.subr.bf16.mxu1 %v16209_v2  ;;  %v9243_v44 = vmul.f32 1.442695, %v9213_v35  ;;  %v16249_v15 = vld [vmem:[#allocation19 + $0xfc0] ss:$16 sps:$4 sm:$0xff]  }
 0xb58   : > { %v16254_v2 = vld [vmem:[#allocation19 + $0xda4] ss:$16 sps:$4 sm:$0xff]   ;;  %v16252_v30 = vld [vmem:[#allocation19 + $0xda0] ss:$16 sps:$4 sm:$0xff]  }
 0xb59   : > { %v9245_v22 = vmul.f32 1.442695, %v9214_v17  ;;  %12650 = vmatpush1.bf16.msra.mxu0 %v16204_v54  ;;  %v16257_v8 = vld [vmem:[#allocation19 + $0xfa4] ss:$16 sps:$4 sm:$0xff]   ;;  %v16270_v35 = vld [vmem:[#allocation19 + $0xd40] ss:$16 sps:$4 sm:$0xff]  }
 0xb5a   : > { %12691 = vmatpush1.bf16.msra.mxu1 %v16207_v40  ;;  %12651 = vmatprep.subr.bf16.mxu0 %v16212_v21  ;;  %v16255_v21 = vld [vmem:[#allocation19 + $0xfa0] ss:$16 sps:$4 sm:$0xff]   ;;  %v16263_v37 = vld [vmem:[#allocation19 + $0xf84] ss:$16 sps:$4 sm:$0xff]  }
 0xb5b   : > { %16752 = vpow2.f32 %v9245_v22  ;;  %12692 = vmatprep.subr.bf16.mxu1 %v16215_v58 }
 0xb5c   : > { %16754 = vpow2.f32 %v9239_v48  ;;  %v16281_v48 = vld [vmem:[#allocation19 + $0xf24] ss:$16 sps:$4 sm:$0xff]  }
 0xb5d   : > { %12652 = vmatpush1.bf16.msra.mxu0 %v16210_v19  ;;  %16756 = vpow2.f32 %v9243_v44  ;;  %v16258_v19 = vld [vmem:[#allocation19 + $0xd80] ss:$16 sps:$4 sm:$0xff]   ;;  %v16284_v44 = vld [vmem:[#allocation19 + $0xd04] ss:$16 sps:$4 sm:$0xff]  }
 0xb5e   : > { %12693 = vmatpush1.bf16.msra.mxu1 %v16213_v61  ;;  %12653 = vmatprep.subr.bf16.mxu0 %v16218_v24  ;;  %v16261_v61 = vld [vmem:[#allocation19 + $0xf80] ss:$16 sps:$4 sm:$0xff]   ;;  %v16266_v24 = vld [vmem:[#allocation19 + $0xd64] ss:$16 sps:$4 sm:$0xff]  }
 0xb5f   : > { %12694 = vmatprep.subr.bf16.mxu1 %v16221_v10 }
 0xb61   : > { %12654 = vmatpush1.bf16.msra.mxu0 %v16216_v60  ;;  %v16269_v60 = vld [vmem:[#allocation19 + $0xf64] ss:$16 sps:$4 sm:$0xff]  }
 0xb62   : > { %12695 = vmatpush1.bf16.msra.mxu1 %v16219_v1  ;;  %12655 = vmatprep.subr.bf16.mxu0 %v16224_v14  ;;  %v16267_v1 = vld [vmem:[#allocation19 + $0xf60] ss:$16 sps:$4 sm:$0xff]   ;;  %v16275_v14 = vld [vmem:[#allocation19 + $0xf44] ss:$16 sps:$4 sm:$0xff]  }
 0xb63   : > { %12696 = vmatprep.subr.bf16.mxu1 %v16227_v23  ;;  %v16273_v23 = vld [vmem:[#allocation19 + $0xf40] ss:$16 sps:$4 sm:$0xff]  }
 0xb65   : > { %12656 = vmatpush1.bf16.msra.mxu0 %v16222_v52  ;;  %v16278_v52 = vld [vmem:[#allocation19 + $0xd24] ss:$16 sps:$4 sm:$0xff]  }
 0xb66   : > { %12697 = vmatpush1.bf16.msra.mxu1 %v16225_v12  ;;  %12657 = vmatprep.subr.bf16.mxu0 %v16230_v18  ;;  %v16276_v12 = vld [vmem:[#allocation19 + $0xd20] ss:$16 sps:$4 sm:$0xff]  }
 0xb67   : > { %12698 = vmatprep.subr.bf16.mxu1 %v16233_v39  ;;  %v16279_v18 = vld [vmem:[#allocation19 + $0xf20] ss:$16 sps:$4 sm:$0xff]  }
 0xb68   : > { %v16753_v43 = vpop.eup %16752 }
 0xb69   : > { %v9262_v51 = vadd.f32 1.0, %v16753_v43  ;;  %12658 = vmatpush1.bf16.msra.mxu0 %v16228_v27  ;;  %v16755_v7 = vpop.eup %16754  ;;  %v16287_v27 = vld [vmem:[#allocation19 + $0xf04] ss:$16 sps:$4 sm:$0xff]   ;;  %v16285_v43 = vld [vmem:[#allocation19 + $0xf00] ss:$16 sps:$4 sm:$0xff]  }
 0xb6a   : > { %12699 = vmatpush1.bf16.msra.mxu1 %v16231_v41  ;;  %12659 = vmatprep.subr.bf16.mxu0 %v16236_v42  ;;  %v16757_v54 = vpop.eup %16756  ;;  %v9259_v40 = vadd.f32 1.0, %v16755_v7  ;;  %v16282_v42 = vld [vmem:[#allocation19 + $0xd00] ss:$16 sps:$4 sm:$0xff]   ;;  %v16294_v7 = vld [vmem:[#allocation19 + $0xc8] ss:$16 sps:$4 sm:$0xff]  }
 0xb6b   : > { %16758 = vrcp.f32 %v9262_v51  ;;  %12700 = vmatprep.subr.bf16.mxu1 %v16239_v63  ;;  %v9261_v17 = vadd.f32 1.0, %v16757_v54  ;;  %v16290_v51 = vld [vmem:[#allocation19 + $0xec] ss:$16 sps:$4 sm:$0xff]   ;;  %v16297_v54 = vld [vmem:[#allocation19 + $0x2c8] ss:$16 sps:$4 sm:$0xff]  }
 0xb6c   : > { %16760 = vrcp.f32 %v9259_v40 }
 0xb6d   : > { %12660 = vmatpush1.bf16.msra.mxu0 %v16234_v28  ;;  %16762 = vrcp.f32 %v9261_v17  ;;  %v16305_v17 = vld [vmem:[#allocation19 + $0x2ac] ss:$16 sps:$4 sm:$0xff]  }
 0xb6e   : > { %12701 = vmatpush1.bf16.msra.mxu1 %v16237_v9  ;;  %12661 = vmatprep.subr.bf16.mxu0 %v16242_v57  ;;  %v16293_v9 = vld [vmem:[#allocation19 + $0x2ec] ss:$16 sps:$4 sm:$0xff]   ;;  %v16288_v57 = vld [vmem:[#allocation19 + $0xe8] ss:$16 sps:$4 sm:$0xff]  }
 0xb6f   : > { %12702 = vmatprep.subr.bf16.mxu1 %v16245_v25 }
 0xb71   : > { %12662 = vmatpush2.bf16.msra.mxu0 %v16240_v55  ;;  %v14379_v55 = vld [vmem:[#allocation8 + $0x20] ss:$0 sm:$0xff] }
 0xb72   : > { %12703 = vmatpush2.bf16.msra.mxu1 %v16243_v11  ;;  %12663 = vmatprep.subr.bf16.mxu0 %v16248_v33  ;;  %v16291_v11 = vld [vmem:[#allocation19 + $0x2e8] ss:$16 sps:$4 sm:$0xff]  }
 0xb73   : > { %12704 = vmatprep.subr.bf16.mxu1 %v16251_v16 }
 0xb75   : > { %12664 = vmatpush2.bf16.msra.mxu0 %v16246_v13  ;;  %v14380_v13 = vld [vmem:[#allocation8 + $0x28] ss:$0 sm:$0xff] }
 0xb76   : > { %12705 = vmatpush2.bf16.msra.mxu1 %v16249_v15  ;;  %12665 = vmatprep.subr.bf16.mxu0 %v16254_v2  ;;  %v16299_v15 = vld [vmem:[#allocation19 + $0x2cc] ss:$16 sps:$4 sm:$0xff]  }
 0xb77   : > { %12706 = vmatprep.subr.bf16.mxu1 %v16257_v8 }
 0xb78   : > { %v16759_v58 = vpop.eup %16758 }
 0xb79   : > { %v9294_v22 = vmul.f32 %v16759_v58, %v18273_v34  ;;  %12666 = vmatpush2.bf16.msra.mxu0 %v16252_v30  ;;  %v16272_v34 = vld [vmem:[#allocation19 + $0xd44] ss:$16 sps:$4 sm:$0xff]   ;;  %v16761_v39 = vpop.eup %16760  ;;  %v16302_v30 = vld [vmem:[#allocation19 + $0xac] ss:$16 sps:$4 sm:$0xff]  }
 0xb7a   : > { %12707 = vmatpush2.bf16.msra.mxu1 %v16255_v21  ;;  %12667 = vmatprep.subr.bf16.mxu0 %v16260_v53  ;;  %v16763_v41 = vpop.eup %16762  ;;  %v9291_v63 = vmul.f32 %v16761_v39, %v18249_v32  ;;  %v16296_v32 = vld [vmem:[#allocation19 + $0xcc] ss:$16 sps:$4 sm:$0xff]  }
 0xb7b   : > { %v18281_v10 = vpack.c.bf16 %v9294_v22, %v9294_v22  ;;  %12708 = vmatprep.subr.bf16.mxu1 %v16263_v37  ;;  %v9293_v28 = vmul.f32 %v16763_v41, %v18276_v47  ;;  %v16329_v39 = vld [vmem:[#allocation19 + $0x22c] ss:$16 sps:$4 sm:$0xff]   ;;  %v16327_v41 = vld [vmem:[#allocation19 + $0x228] ss:$16 sps:$4 sm:$0xff]  }
 0xb7c   : > { %v18286_v25 = vpack.c.bf16 %v9291_v63, %v9291_v63  ;;  %v16335_v63 = vld [vmem:[#allocation19 + $0x20c] ss:$16 sps:$4 sm:$0xff]  }
 0xb7d   : > { %12668 = vmatpush2.bf16.msra.mxu0 %v16258_v19  ;;  %12718 = vmatprep.mubr.bf16.mxu1 %v18281_v10  ;;  %v18288_v33 = vpack.c.bf16 %v9293_v28, %v9293_v28  ;;  %v16300_v19 = vld [vmem:[#allocation19 + $0xa8] ss:$16 sps:$4 sm:$0xff]   ;;  %v16338_v28 = vld [vmem:[#allocation19 + $0x1ec] ss:$16 sps:$4 sm:$0xff]  }
 0xb7e   : > { %12709 = vmatpush2.bf16.msra.mxu1 %v16261_v61  ;;  %12669 = vmatprep.subr.bf16.mxu0 %v16266_v24  ;;  %v16303_v61 = vld [vmem:[#allocation19 + $0x2a8] ss:$16 sps:$4 sm:$0xff]   ;;  %v16308_v24 = vld [vmem:[#allocation19 + $0x8c] ss:$16 sps:$4 sm:$0xff]  }
 0xb7f   : > { %12710 = vmatprep.subr.bf16.mxu1 %v16269_v60 }
 0xb81   : > { %12670 = vmatpush2.bf16.msra.mxu0 %v16264_v45  ;;  %v16311_v45 = vld [vmem:[#allocation19 + $0x28c] ss:$16 sps:$4 sm:$0xff]  }
 0xb82   : > { %12711 = vmatpush2.bf16.msra.mxu1 %v16267_v1  ;;  %12671 = vmatprep.subr.bf16.mxu0 %v16272_v34  ;;  %v16309_v1 = vld [vmem:[#allocation19 + $0x288] ss:$16 sps:$4 sm:$0xff]   ;;  %v16314_v34 = vld [vmem:[#allocation19 + $0x6c] ss:$16 sps:$4 sm:$0xff]  }
 0xb83   : > { %12712 = vmatprep.subr.bf16.mxu1 %v16275_v14  ;;  %v16317_v14 = vld [vmem:[#allocation19 + $0x26c] ss:$16 sps:$4 sm:$0xff]  }
 0xb85   : > { %12672 = vmatpush2.bf16.msra.mxu0 %v16270_v35  ;;  %v16312_v35 = vld [vmem:[#allocation19 + $0x68] ss:$16 sps:$4 sm:$0xff]  }
 0xb86   : > { %12713 = vmatpush2.bf16.msra.mxu1 %v16273_v23  ;;  %12673 = vmatprep.subr.bf16.mxu0 %v16278_v52  ;;  %v16315_v23 = vld [vmem:[#allocation19 + $0x268] ss:$16 sps:$4 sm:$0xff]   ;;  %v16320_v52 = vld [vmem:[#allocation19 + $0x4c] ss:$16 sps:$4 sm:$0xff]  }
 0xb87   : > { %12714 = vmatprep.subr.bf16.mxu1 %v16281_v48  ;;  %v16323_v48 = vld [vmem:[#allocation19 + $0x24c] ss:$16 sps:$4 sm:$0xff]  }
 0xb89   : > { %12674 = vmatpush2.bf16.msra.mxu0 %v16276_v12  ;;  %v16318_v12 = vld [vmem:[#allocation19 + $0x48] ss:$16 sps:$4 sm:$0xff]  }
 0xb8a   : > { %12715 = vmatpush2.bf16.msra.mxu1 %v16279_v18  ;;  %12675 = vmatprep.subr.bf16.mxu0 %v16284_v44  ;;  %v16321_v18 = vld [vmem:[#allocation19 + $0x248] ss:$16 sps:$4 sm:$0xff]   ;;  %v16326_v44 = vld [vmem:[#allocation19 + $0x2c] ss:$16 sps:$4 sm:$0xff]  }
 0xb8b   : > { %12716 = vmatprep.subr.bf16.mxu1 %v16287_v27  ;;  %v16324_v27 = vld [vmem:[#allocation19 + $0x28] ss:$16 sps:$4 sm:$0xff]  }
 0xb8d   : > { %12676 = vmatpush2.bf16.msra.mxu0 %v16282_v42  ;;  %v16332_v42 = vld [vmem:[#allocation19 + $0xc] ss:$16 sps:$4 sm:$0xff]  }
 0xb8e   : > { %12717 = vmatpush2.bf16.msra.mxu1 %v16285_v43  ;;  %12727 = vmatprep.subr.bf16.mxu0 %v16290_v51  ;;  %v16330_v43 = vld [vmem:[#allocation19 + $0x8] ss:$16 sps:$4 sm:$0xff]  }
 0xb8f   : > { %12768 = vmatprep.subr.bf16.mxu1 %v16293_v9  ;;  %v16333_v51 = vld [vmem:[#allocation19 + $0x208] ss:$16 sps:$4 sm:$0xff]   ;;  %v16341_v9 = vld [vmem:[#allocation19 + $0x3ec] ss:$16 sps:$4 sm:$0xff]  }
 0xb90   : > { %v12433_v16 = vpop.f32.mrf.mxu0  ;;  %12678 = vmatmul.mubr.bf16.vlgmr.msra.gmra.mxu0 %v18286_v25 }
 0xb91   : > { %v12434_v47 = vadd.f32 %v14379_v55, %v12433_v16  ;;  %v12474_v2 = vpop.f32.mrf.mxu1  ;;  %12719 = vmatmul.mubr.bf16.vlgmr.msra.gmra.mxu1 %v18288_v33  ;;  %12728 = vmatpush1.bf16.msra.mxu0 %v16288_v57  ;;  %v16336_v57 = vld [vmem:[#allocation19 + $0x1e8] ss:$16 sps:$4 sm:$0xff]  }
 0xb92   : > { %12759 = vmatprep.mubr.bf16.mxu0 %v18188_v56  ;;  %12769 = vmatpush1.bf16.msra.mxu1 %v16291_v11  ;;  %v12435_v8 = vpop.f32.mrf.mxu0  ;;  %v16339_v55 = vld [vmem:[#allocation19 + $0x3e8] ss:$16 sps:$4 sm:$0xff]   ;;  %v16344_v11 = vld [vmem:[#allocation19 + $0x1cc] ss:$16 sps:$4 sm:$0xff]  }
 0xb93   : > { %v18293_v40 = vadd.f32 %v12474_v2, %v12434_v47  ;;  %12800 = vmatprep.mubr.bf16.mxu1 %v18191_v36  ;;  %v12436_v21 = vadd.f32 %v14380_v13, %v12435_v8  ;;  %v12476_v53 = vpop.f32.mrf.mxu1  ;;  %12729 = vmatprep.subr.bf16.mxu0 %v16296_v32  ;;  %v16306_v36 = vld [vmem:[#allocation19 + $0x88] ss:$16 sps:$4 sm:$0xff]   ;;  %v16347_v32 = vld [vmem:[#allocation19 + $0x3cc] ss:$16 sps:$4 sm:$0xff]  }
 0xb94   : > { %v12437_v37 = vpop.f32.mrf.mxu0  ;;  %12770 = vmatprep.subr.bf16.mxu1 %v16299_v15  ;;  %v16342_v16 = vld [vmem:[#allocation19 + $0x1c8] ss:$16 sps:$4 sm:$0xff]   ;;  %v16350_v15 = vld [vmem:[#allocation19 + $0x1ac] ss:$16 sps:$4 sm:$0xff]  }
 0xb95   : > { %v18296_v58 = vadd.f32 %v12476_v53, %v12436_v21  ;;  %v12478_v22 = vpop.f32.mrf.mxu1  ;;  %12730 = vmatpush1.bf16.msra.mxu0 %v16294_v7  ;;  %v16345_v13 = vld [vmem:[#allocation19 + $0x3c8] ss:$16 sps:$4 sm:$0xff]   ;;  %v16353_v47 = vld [vmem:[#allocation19 + $0x3ac] ss:$16 sps:$4 sm:$0xff]  }
 0xb96   : > { %12771 = vmatpush1.bf16.msra.mxu1 %v16297_v54  ;;  %v12438_v56 = vpop.f32.mrf.mxu0  ;;  %12731 = vmatprep.subr.bf16.mxu0 %v16302_v30  ;;  %v16348_v2 = vld [vmem:[#allocation19 + $0x1a8] ss:$16 sps:$4 sm:$0xff]   ;;  %v16356_v8 = vld [vmem:[#allocation19 + $0x18c] ss:$16 sps:$4 sm:$0xff]  }
 0xb97   : > { %v12479_v60 = vpop.f32.mrf.mxu1  ;;  %12772 = vmatprep.subr.bf16.mxu1 %v16305_v17  ;;  %v16351_v7 = vld [vmem:[#allocation19 + $0x3a8] ss:$16 sps:$4 sm:$0xff]   ;;  %v16359_v54 = vld [vmem:[#allocation19 + $0x38c] ss:$16 sps:$4 sm:$0xff]  }
 0xb98   : > { %v16354_v30 = vld [vmem:[#allocation19 + $0x188] ss:$16 sps:$4 sm:$0xff]   ;;  %v16362_v53 = vld [vmem:[#allocation19 + $0x16c] ss:$16 sps:$4 sm:$0xff]  }
 0xb99   : > { %12732 = vmatpush1.bf16.msra.mxu0 %v16300_v19  ;;  %v16357_v21 = vld [vmem:[#allocation19 + $0x388] ss:$16 sps:$4 sm:$0xff]   ;;  %v16365_v17 = vld [vmem:[#allocation19 + $0x36c] ss:$16 sps:$4 sm:$0xff]  }
 0xb9a   : > { %12773 = vmatpush1.bf16.msra.mxu1 %v16303_v61  ;;  %12733 = vmatprep.subr.bf16.mxu0 %v16308_v24  ;;  %v16360_v37 = vld [vmem:[#allocation19 + $0x168] ss:$16 sps:$4 sm:$0xff]   ;;  %v16368_v19 = vld [vmem:[#allocation19 + $0x14c] ss:$16 sps:$4 sm:$0xff]  }
 0xb9b   : > { %12774 = vmatprep.subr.bf16.mxu1 %v16311_v45  ;;  %v16363_v22 = vld [vmem:[#allocation19 + $0x368] ss:$16 sps:$4 sm:$0xff]   ;;  %v16371_v56 = vld [vmem:[#allocation19 + $0x34c] ss:$16 sps:$4 sm:$0xff]  }
 0xb9c   : > { %v16366_v61 = vld [vmem:[#allocation19 + $0x148] ss:$16 sps:$4 sm:$0xff]   ;;  %v16374_v60 = vld [vmem:[#allocation19 + $0x12c] ss:$16 sps:$4 sm:$0xff]  }
 0xb9d   : > { %12734 = vmatpush1.bf16.msra.mxu0 %v16306_v36  ;;  %v16369_v24 = vld [vmem:[#allocation19 + $0x348] ss:$16 sps:$4 sm:$0xff]   ;;  %v16377_v45 = vld [vmem:[#allocation19 + $0x32c] ss:$16 sps:$4 sm:$0xff]  }
 0xb9e   : > { %12775 = vmatpush1.bf16.msra.mxu1 %v16309_v1  ;;  %12735 = vmatprep.subr.bf16.mxu0 %v16314_v34  ;;  %v16372_v36 = vld [vmem:[#allocation19 + $0x128] ss:$16 sps:$4 sm:$0xff]   ;;  %v16380_v34 = vld [vmem:[#allocation19 + $0x10c] ss:$16 sps:$4 sm:$0xff]  }
 0xb9f   : > { %12776 = vmatprep.subr.bf16.mxu1 %v16317_v14  ;;  %v16375_v1 = vld [vmem:[#allocation19 + $0x328] ss:$16 sps:$4 sm:$0xff]   ;;  %v16383_v14 = vld [vmem:[#allocation19 + $0x30c] ss:$16 sps:$4 sm:$0xff]  }
 0xba1   : > { %12736 = vmatpush1.bf16.msra.mxu0 %v16312_v35  ;;  %v16378_v35 = vld [vmem:[#allocation19 + $0x108] ss:$16 sps:$4 sm:$0xff]  }
 0xba2   : > { %12777 = vmatpush1.bf16.msra.mxu1 %v16315_v23  ;;  %12737 = vmatprep.subr.bf16.mxu0 %v16320_v52  ;;  %v16381_v23 = vld [vmem:[#allocation19 + $0x308] ss:$16 sps:$4 sm:$0xff]   ;;  %v16386_v52 = vld [vmem:[#allocation19 + $0x4ec] ss:$16 sps:$4 sm:$0xff]  }
 0xba3   : > { %12778 = vmatprep.subr.bf16.mxu1 %v16323_v48  ;;  %v16389_v48 = vld [vmem:[#allocation19 + $0x6ec] ss:$16 sps:$4 sm:$0xff]  }
 0xba5   : > { %12738 = vmatpush1.bf16.msra.mxu0 %v16318_v12  ;;  %v16384_v12 = vld [vmem:[#allocation19 + $0x4e8] ss:$16 sps:$4 sm:$0xff]  }
 0xba6   : > { %12779 = vmatpush1.bf16.msra.mxu1 %v16321_v18  ;;  %12739 = vmatprep.subr.bf16.mxu0 %v16326_v44  ;;  %v16387_v18 = vld [vmem:[#allocation19 + $0x6e8] ss:$16 sps:$4 sm:$0xff]   ;;  %v16392_v44 = vld [vmem:[#allocation19 + $0x4cc] ss:$16 sps:$4 sm:$0xff]  }
 0xba7   : > { %12780 = vmatprep.subr.bf16.mxu1 %v16329_v39 }
 0xba9   : > { %12740 = vmatpush1.bf16.msra.mxu0 %v16324_v27  ;;  %v16395_v27 = vld [vmem:[#allocation19 + $0x6cc] ss:$16 sps:$4 sm:$0xff]  }
 0xbaa   : > { %12781 = vmatpush1.bf16.msra.mxu1 %v16327_v41  ;;  %12741 = vmatprep.subr.bf16.mxu0 %v16332_v42 }
 0xbab   : > { %12782 = vmatprep.subr.bf16.mxu1 %v16335_v63  ;;  %v16390_v63 = vld [vmem:[#allocation19 + $0x4c8] ss:$16 sps:$4 sm:$0xff]  }
 0xbad   : > { %12742 = vmatpush1.bf16.msra.mxu0 %v16330_v43 }
 0xbae   : > { %12783 = vmatpush1.bf16.msra.mxu1 %v16333_v51  ;;  %12743 = vmatprep.subr.bf16.mxu0 %v16338_v28  ;;  %v16393_v51 = vld [vmem:[#allocation19 + $0x6c8] ss:$16 sps:$4 sm:$0xff]   ;;  %v16398_v28 = vld [vmem:[#allocation19 + $0x4ac] ss:$16 sps:$4 sm:$0xff]  }
 0xbaf   : > { %12784 = vmatprep.subr.bf16.mxu1 %v16341_v9 }
 0xbb1   : > { %12744 = vmatpush2.bf16.msra.mxu0 %v16336_v57 }
 0xbb2   : > { %12785 = vmatpush2.bf16.msra.mxu1 %v16339_v55  ;;  %12745 = vmatprep.subr.bf16.mxu0 %v16344_v11 }
 0xbb3   : > { %12786 = vmatprep.subr.bf16.mxu1 %v16347_v32 }
 0xbb5   : > { %12746 = vmatpush2.bf16.msra.mxu0 %v16342_v16  ;;  %v16399_v16 = vld [vmem:[#allocation19 + $0x6a8] ss:$16 sps:$4 sm:$0xff]  }
 0xbb6   : > { %12787 = vmatpush2.bf16.msra.mxu1 %v16345_v13  ;;  %12747 = vmatprep.subr.bf16.mxu0 %v16350_v15  ;;  %v16404_v13 = vld [vmem:[#allocation19 + $0x48c] ss:$16 sps:$4 sm:$0xff]  }
 0xbb7   : > { %12788 = vmatprep.subr.bf16.mxu1 %v16353_v47  ;;  %v16405_v47 = vld [vmem:[#allocation19 + $0x688] ss:$16 sps:$4 sm:$0xff]  }
 0xbb9   : > { %12748 = vmatpush2.bf16.msra.mxu0 %v16348_v2  ;;  %v16410_v2 = vld [vmem:[#allocation19 + $0x46c] ss:$16 sps:$4 sm:$0xff]  }
 0xbba   : > { %12789 = vmatpush2.bf16.msra.mxu1 %v16351_v7  ;;  %12749 = vmatprep.subr.bf16.mxu0 %v16356_v8  ;;  %v16413_v7 = vld [vmem:[#allocation19 + $0x66c] ss:$16 sps:$4 sm:$0xff]   ;;  %v16408_v8 = vld [vmem:[#allocation19 + $0x468] ss:$16 sps:$4 sm:$0xff]  }
 0xbbb   : > { %12790 = vmatprep.subr.bf16.mxu1 %v16359_v54  ;;  %v16411_v54 = vld [vmem:[#allocation19 + $0x668] ss:$16 sps:$4 sm:$0xff]  }
 0xbbd   : > { %12750 = vmatpush2.bf16.msra.mxu0 %v16354_v30  ;;  %v16416_v30 = vld [vmem:[#allocation19 + $0x44c] ss:$16 sps:$4 sm:$0xff]  }
 0xbbe   : > { %12791 = vmatpush2.bf16.msra.mxu1 %v16357_v21  ;;  %12751 = vmatprep.subr.bf16.mxu0 %v16362_v53  ;;  %v16419_v21 = vld [vmem:[#allocation19 + $0x64c] ss:$16 sps:$4 sm:$0xff]   ;;  %v16414_v53 = vld [vmem:[#allocation19 + $0x448] ss:$16 sps:$4 sm:$0xff]  }
 0xbbf   : > { %12792 = vmatprep.subr.bf16.mxu1 %v16365_v17  ;;  %v16417_v17 = vld [vmem:[#allocation19 + $0x648] ss:$16 sps:$4 sm:$0xff]  }
 0xbc1   : > { %12752 = vmatpush2.bf16.msra.mxu0 %v16360_v37  ;;  %v16422_v37 = vld [vmem:[#allocation19 + $0x42c] ss:$16 sps:$4 sm:$0xff]  }
 0xbc2   : > { %12793 = vmatpush2.bf16.msra.mxu1 %v16363_v22  ;;  %12753 = vmatprep.subr.bf16.mxu0 %v16368_v19  ;;  %v16425_v22 = vld [vmem:[#allocation19 + $0x62c] ss:$16 sps:$4 sm:$0xff]   ;;  %v16420_v19 = vld [vmem:[#allocation19 + $0x428] ss:$16 sps:$4 sm:$0xff]  }
 0xbc3   : > { %12794 = vmatprep.subr.bf16.mxu1 %v16371_v56  ;;  %v16423_v56 = vld [vmem:[#allocation19 + $0x628] ss:$16 sps:$4 sm:$0xff]  }
 0xbc5   : > { %12754 = vmatpush2.bf16.msra.mxu0 %v16366_v61  ;;  %v16428_v61 = vld [vmem:[#allocation19 + $0x40c] ss:$16 sps:$4 sm:$0xff]  }
 0xbc6   : > { %12795 = vmatpush2.bf16.msra.mxu1 %v16369_v24  ;;  %12755 = vmatprep.subr.bf16.mxu0 %v16374_v60  ;;  %v16431_v24 = vld [vmem:[#allocation19 + $0x60c] ss:$16 sps:$4 sm:$0xff]   ;;  %v16426_v60 = vld [vmem:[#allocation19 + $0x408] ss:$16 sps:$4 sm:$0xff]  }
 0xbc7   : > { %12796 = vmatprep.subr.bf16.mxu1 %v16377_v45  ;;  %v16429_v45 = vld [vmem:[#allocation19 + $0x608] ss:$16 sps:$4 sm:$0xff]  }
 0xbc9   : > { %12756 = vmatpush2.bf16.msra.mxu0 %v16372_v36  ;;  %v16434_v36 = vld [vmem:[#allocation19 + $0x5ec] ss:$16 sps:$4 sm:$0xff]  }
 0xbca   : > { %12797 = vmatpush2.bf16.msra.mxu1 %v16375_v1  ;;  %12757 = vmatprep.subr.bf16.mxu0 %v16380_v34  ;;  %v16437_v1 = vld [vmem:[#allocation19 + $0x7ec] ss:$16 sps:$4 sm:$0xff]   ;;  %v16432_v34 = vld [vmem:[#allocation19 + $0x5e8] ss:$16 sps:$4 sm:$0xff]  }
 0xbcb   : > { %12798 = vmatprep.subr.bf16.mxu1 %v16383_v14  ;;  %v16435_v14 = vld [vmem:[#allocation19 + $0x7e8] ss:$16 sps:$4 sm:$0xff]  }
 0xbcd   : > { %12758 = vmatpush2.bf16.msra.mxu0 %v16378_v35  ;;  %v16440_v35 = vld [vmem:[#allocation19 + $0x5cc] ss:$16 sps:$4 sm:$0xff]  }
 0xbce   : > { %12799 = vmatpush2.bf16.msra.mxu1 %v16381_v23  ;;  %12809 = vmatprep.subr.bf16.mxu0 %v16386_v52  ;;  %v16443_v23 = vld [vmem:[#allocation19 + $0x7cc] ss:$16 sps:$4 sm:$0xff]   ;;  %v16438_v52 = vld [vmem:[#allocation19 + $0x5c8] ss:$16 sps:$4 sm:$0xff]  }
 0xbcf   : > { %12850 = vmatprep.subr.bf16.mxu1 %v16389_v48  ;;  %v16441_v48 = vld [vmem:[#allocation19 + $0x7c8] ss:$16 sps:$4 sm:$0xff]  }
 0xbd0   : > { %v12515_v39 = vpop.f32.mrf.mxu0  ;;  %12760 = vmatmul.mubr.bf16.vlgmr.msra.gmra.mxu0 %v18210_v59 }
 0xbd1   : > { %v12516_v41 = vadd.f32 %v12515_v39, %v18293_v40  ;;  %v12556_v42 = vpop.f32.mrf.mxu1  ;;  %12801 = vmatmul.mubr.bf16.vlgmr.msra.gmra.mxu1 %v18212_v49  ;;  %12810 = vmatpush1.bf16.msra.mxu0 %v16384_v12  ;;  %v16401_v40 = vld [vmem:[#allocation19 + $0x6ac] ss:$16 sps:$4 sm:$0xff]   ;;  %v16447_v39 = vld [vmem:[#allocation19 + $0x7a8] ss:$16 sps:$4 sm:$0xff]  }
 0xbd2   : > { %12841 = vmatprep.mubr.bf16.mxu0 %v18214_v20  ;;  %12851 = vmatpush1.bf16.msra.mxu1 %v16387_v18  ;;  %v12517_v43 = vpop.f32.mrf.mxu0  ;;  %v16396_v20 = vld [vmem:[#allocation19 + $0x4a8] ss:$16 sps:$4 sm:$0xff]   ;;  %v16446_v12 = vld [vmem:[#allocation19 + $0x5ac] ss:$16 sps:$4 sm:$0xff]  }
 0xbd3   : > { %v18302_v9 = vadd.f32 %v12556_v42, %v12516_v41  ;;  %12882 = vmatprep.mubr.bf16.mxu1 %v18217_v62  ;;  %v12518_v59 = vadd.f32 %v12517_v43, %v18296_v58  ;;  %v12558_v57 = vpop.f32.mrf.mxu1  ;;  %12811 = vmatprep.subr.bf16.mxu0 %v16392_v44  ;;  %v16407_v62 = vld [vmem:[#allocation19 + $0x68c] ss:$16 sps:$4 sm:$0xff]   ;;  %v16402_v58 = vld [vmem:[#allocation19 + $0x488] ss:$16 sps:$4 sm:$0xff]  }
 0xbd4   : > { %v12519_v55 = vpop.f32.mrf.mxu0  ;;  %12852 = vmatprep.subr.bf16.mxu1 %v16395_v27  ;;  %v16449_v18 = vld [vmem:[#allocation19 + $0x7ac] ss:$16 sps:$4 sm:$0xff]   ;;  %v16444_v44 = vld [vmem:[#allocation19 + $0x5a8] ss:$16 sps:$4 sm:$0xff]  }
 0xbd5   : > { %v18306_v49 = vadd.f32 %v12558_v57, %v12518_v59  ;;  %v12560_v11 = vpop.f32.mrf.mxu1  ;;  %12812 = vmatpush1.bf16.msra.mxu0 %v16390_v63  ;;  %v16452_v27 = vld [vmem:[#allocation19 + $0x58c] ss:$16 sps:$4 sm:$0xff]   ;;  %v16450_v42 = vld [vmem:[#allocation19 + $0x588] ss:$16 sps:$4 sm:$0xff]  }
 0xbd6   : > { %12853 = vmatpush1.bf16.msra.mxu1 %v16393_v51  ;;  %v12520_v32 = vpop.f32.mrf.mxu0  ;;  %12813 = vmatprep.subr.bf16.mxu0 %v16398_v28  ;;  %v16455_v41 = vld [vmem:[#allocation19 + $0x78c] ss:$16 sps:$4 sm:$0xff]   ;;  %v16453_v63 = vld [vmem:[#allocation19 + $0x788] ss:$16 sps:$4 sm:$0xff]  }
 0xbd7   : > { %v12561_v15 = vpop.f32.mrf.mxu1  ;;  %12854 = vmatprep.subr.bf16.mxu1 %v16401_v40  ;;  %v16458_v43 = vld [vmem:[#allocation19 + $0x56c] ss:$16 sps:$4 sm:$0xff]   ;;  %v16456_v28 = vld [vmem:[#allocation19 + $0x568] ss:$16 sps:$4 sm:$0xff]  }
 0xbd8   : > { %v16461_v51 = vld [vmem:[#allocation19 + $0x76c] ss:$16 sps:$4 sm:$0xff]   ;;  %v16459_v59 = vld [vmem:[#allocation19 + $0x768] ss:$16 sps:$4 sm:$0xff]  }
 0xbd9   : > { %12814 = vmatpush1.bf16.msra.mxu0 %v16396_v20  ;;  %v16464_v57 = vld [vmem:[#allocation19 + $0x54c] ss:$16 sps:$4 sm:$0xff]   ;;  %v16462_v55 = vld [vmem:[#allocation19 + $0x548] ss:$16 sps:$4 sm:$0xff]  }
 0xbda   : > { %12855 = vmatpush1.bf16.msra.mxu1 %v16399_v16  ;;  %12815 = vmatprep.subr.bf16.mxu0 %v16404_v13  ;;  %v16467_v40 = vld [vmem:[#allocation19 + $0x74c] ss:$16 sps:$4 sm:$0xff]   ;;  %v16465_v11 = vld [vmem:[#allocation19 + $0x748] ss:$16 sps:$4 sm:$0xff]  }
 0xbdb   : > { %12856 = vmatprep.subr.bf16.mxu1 %v16407_v62  ;;  %v16470_v20 = vld [vmem:[#allocation19 + $0x52c] ss:$16 sps:$4 sm:$0xff]   ;;  %v16468_v16 = vld [vmem:[#allocation19 + $0x528] ss:$16 sps:$4 sm:$0xff]  }
 0xbdc   : > { %v16473_v32 = vld [vmem:[#allocation19 + $0x72c] ss:$16 sps:$4 sm:$0xff]   ;;  %v16471_v13 = vld [vmem:[#allocation19 + $0x728] ss:$16 sps:$4 sm:$0xff]  }
 0xbdd   : > { %12816 = vmatpush1.bf16.msra.mxu0 %v16402_v58  ;;  %v16476_v15 = vld [vmem:[#allocation19 + $0x50c] ss:$16 sps:$4 sm:$0xff]   ;;  %v16474_v58 = vld [vmem:[#allocation19 + $0x508] ss:$16 sps:$4 sm:$0xff]  }
 0xbde   : > { %12857 = vmatpush1.bf16.msra.mxu1 %v16405_v47  ;;  %12817 = vmatprep.subr.bf16.mxu0 %v16410_v2  ;;  %v16479_v62 = vld [vmem:[#allocation19 + $0x70c] ss:$16 sps:$4 sm:$0xff]   ;;  %v16477_v47 = vld [vmem:[#allocation19 + $0x708] ss:$16 sps:$4 sm:$0xff]  }
 0xbdf   : > { %12858 = vmatprep.subr.bf16.mxu1 %v16413_v7  ;;  %v16482_v2 = vld [vmem:[#allocation19 + $0x8ec] ss:$16 sps:$4 sm:$0xff]  }
 0xbe0   : > { %v16485_v7 = vld [vmem:[#allocation19 + $0xaec] ss:$16 sps:$4 sm:$0xff]  }
 0xbe1   : > { %12818 = vmatpush1.bf16.msra.mxu0 %v16408_v8  ;;  %v16480_v8 = vld [vmem:[#allocation19 + $0x8e8] ss:$16 sps:$4 sm:$0xff]  }
 0xbe2   : > { %12859 = vmatpush1.bf16.msra.mxu1 %v16411_v54  ;;  %12819 = vmatprep.subr.bf16.mxu0 %v16416_v30  ;;  %v16483_v54 = vld [vmem:[#allocation19 + $0xae8] ss:$16 sps:$4 sm:$0xff]   ;;  %v16488_v30 = vld [vmem:[#allocation19 + $0x8cc] ss:$16 sps:$4 sm:$0xff]  }
 0xbe3   : > { %12860 = vmatprep.subr.bf16.mxu1 %v16419_v21 }
 0xbe5   : > { %12820 = vmatpush1.bf16.msra.mxu0 %v16414_v53  ;;  %v16491_v53 = vld [vmem:[#allocation19 + $0xacc] ss:$16 sps:$4 sm:$0xff]  }
 0xbe6   : > { %12861 = vmatpush1.bf16.msra.mxu1 %v16417_v17  ;;  %12821 = vmatprep.subr.bf16.mxu0 %v16422_v37  ;;  %v16486_v37 = vld [vmem:[#allocation19 + $0x8c8] ss:$16 sps:$4 sm:$0xff]  }
 0xbe7   : > { %12862 = vmatprep.subr.bf16.mxu1 %v16425_v22 }
 0xbe9   : > { %12822 = vmatpush1.bf16.msra.mxu0 %v16420_v19  ;;  %v16489_v19 = vld [vmem:[#allocation19 + $0xac8] ss:$16 sps:$4 sm:$0xff]  }
 0xbea   : > { %12863 = vmatpush1.bf16.msra.mxu1 %v16423_v56  ;;  %12823 = vmatprep.subr.bf16.mxu0 %v16428_v61  ;;  %v16494_v56 = vld [vmem:[#allocation19 + $0x8ac] ss:$16 sps:$4 sm:$0xff]  }
 0xbeb   : > { %12864 = vmatprep.subr.bf16.mxu1 %v16431_v24 }
 0xbed   : > { %12824 = vmatpush1.bf16.msra.mxu0 %v16426_v60 }
 0xbee   : > { %12865 = vmatpush1.bf16.msra.mxu1 %v16429_v45  ;;  %12825 = vmatprep.subr.bf16.mxu0 %v16434_v36  ;;  %v16500_v36 = vld [vmem:[#allocation19 + $0x88c] ss:$16 sps:$4 sm:$0xff]  }
 0xbef   : > { %12866 = vmatprep.subr.bf16.mxu1 %v16437_v1 }
 0xbf1   : > { %12826 = vmatpush2.bf16.msra.mxu0 %v16432_v34  ;;  %v16503_v34 = vld [vmem:[#allocation19 + $0xa8c] ss:$16 sps:$4 sm:$0xff]  }
 0xbf2   : > { %12867 = vmatpush2.bf16.msra.mxu1 %v16435_v14  ;;  %12827 = vmatprep.subr.bf16.mxu0 %v16440_v35  ;;  %v16498_v14 = vld [vmem:[#allocation19 + $0x888] ss:$16 sps:$4 sm:$0xff]   ;;  %v16506_v35 = vld [vmem:[#allocation19 + $0x86c] ss:$16 sps:$4 sm:$0xff]  }
 0xbf3   : > { %12868 = vmatprep.subr.bf16.mxu1 %v16443_v23  ;;  %v16509_v23 = vld [vmem:[#allocation19 + $0xa6c] ss:$16 sps:$4 sm:$0xff]  }
 0xbf5   : > { %12828 = vmatpush2.bf16.msra.mxu0 %v16438_v52  ;;  %v16504_v52 = vld [vmem:[#allocation19 + $0x868] ss:$16 sps:$4 sm:$0xff]  }
 0xbf6   : > { %12869 = vmatpush2.bf16.msra.mxu1 %v16441_v48  ;;  %12829 = vmatprep.subr.bf16.mxu0 %v16446_v12  ;;  %v16507_v48 = vld [vmem:[#allocation19 + $0xa68] ss:$16 sps:$4 sm:$0xff]   ;;  %v16512_v12 = vld [vmem:[#allocation19 + $0x84c] ss:$16 sps:$4 sm:$0xff]  }
 0xbf7   : > { %12870 = vmatprep.subr.bf16.mxu1 %v16449_v18  ;;  %v16515_v18 = vld [vmem:[#allocation19 + $0xa4c] ss:$16 sps:$4 sm:$0xff]  }
 0xbf9   : > { %12830 = vmatpush2.bf16.msra.mxu0 %v16444_v44  ;;  %v16510_v44 = vld [vmem:[#allocation19 + $0x848] ss:$16 sps:$4 sm:$0xff]  }
 0xbfa   : > { %12871 = vmatpush2.bf16.msra.mxu1 %v16447_v39  ;;  %12831 = vmatprep.subr.bf16.mxu0 %v16452_v27  ;;  %v16513_v39 = vld [vmem:[#allocation19 + $0xa48] ss:$16 sps:$4 sm:$0xff]   ;;  %v16518_v27 = vld [vmem:[#allocation19 + $0x82c] ss:$16 sps:$4 sm:$0xff]  }
 0xbfb   : > { %12872 = vmatprep.subr.bf16.mxu1 %v16455_v41  ;;  %v16521_v41 = vld [vmem:[#allocation19 + $0xa2c] ss:$16 sps:$4 sm:$0xff]  }
 0xbfd   : > { %12832 = vmatpush2.bf16.msra.mxu0 %v16450_v42  ;;  %v16516_v42 = vld [vmem:[#allocation19 + $0x828] ss:$16 sps:$4 sm:$0xff]  }
 0xbfe   : > { %12873 = vmatpush2.bf16.msra.mxu1 %v16453_v63  ;;  %12833 = vmatprep.subr.bf16.mxu0 %v16458_v43  ;;  %v16519_v63 = vld [vmem:[#allocation19 + $0xa28] ss:$16 sps:$4 sm:$0xff]   ;;  %v16524_v43 = vld [vmem:[#allocation19 + $0x80c] ss:$16 sps:$4 sm:$0xff]  }
 0xbff   : > { %12874 = vmatprep.subr.bf16.mxu1 %v16461_v51  ;;  %v16527_v51 = vld [vmem:[#allocation19 + $0xa0c] ss:$16 sps:$4 sm:$0xff]  }
 0xc01   : > { %12834 = vmatpush2.bf16.msra.mxu0 %v16456_v28  ;;  %v16522_v28 = vld [vmem:[#allocation19 + $0x808] ss:$16 sps:$4 sm:$0xff]  }
 0xc02   : > { %12875 = vmatpush2.bf16.msra.mxu1 %v16459_v59  ;;  %12835 = vmatprep.subr.bf16.mxu0 %v16464_v57  ;;  %v16525_v59 = vld [vmem:[#allocation19 + $0xa08] ss:$16 sps:$4 sm:$0xff]   ;;  %v16530_v57 = vld [vmem:[#allocation19 + $0x9ec] ss:$16 sps:$4 sm:$0xff]  }
 0xc03   : > { %12876 = vmatprep.subr.bf16.mxu1 %v16467_v40  ;;  %v16533_v40 = vld [vmem:[#allocation19 + $0xbec] ss:$16 sps:$4 sm:$0xff]  }
 0xc05   : > { %12836 = vmatpush2.bf16.msra.mxu0 %v16462_v55  ;;  %v16528_v55 = vld [vmem:[#allocation19 + $0x9e8] ss:$16 sps:$4 sm:$0xff]  }
 0xc06   : > { %12877 = vmatpush2.bf16.msra.mxu1 %v16465_v11  ;;  %12837 = vmatprep.subr.bf16.mxu0 %v16470_v20  ;;  %v16531_v11 = vld [vmem:[#allocation19 + $0xbe8] ss:$16 sps:$4 sm:$0xff]   ;;  %v16536_v20 = vld [vmem:[#allocation19 + $0x9cc] ss:$16 sps:$4 sm:$0xff]  }
 0xc07   : > { %12878 = vmatprep.subr.bf16.mxu1 %v16473_v32  ;;  %v16539_v32 = vld [vmem:[#allocation19 + $0xbcc] ss:$16 sps:$4 sm:$0xff]  }
 0xc09   : > { %12838 = vmatpush2.bf16.msra.mxu0 %v16468_v16  ;;  %v16534_v16 = vld [vmem:[#allocation19 + $0x9c8] ss:$16 sps:$4 sm:$0xff]  }
 0xc0a   : > { %12879 = vmatpush2.bf16.msra.mxu1 %v16471_v13  ;;  %12839 = vmatprep.subr.bf16.mxu0 %v16476_v15  ;;  %v16537_v13 = vld [vmem:[#allocation19 + $0xbc8] ss:$16 sps:$4 sm:$0xff]   ;;  %v16542_v15 = vld [vmem:[#allocation19 + $0x9ac] ss:$16 sps:$4 sm:$0xff]  }
 0xc0b   : > { %12880 = vmatprep.subr.bf16.mxu1 %v16479_v62  ;;  %v16545_v62 = vld [vmem:[#allocation19 + $0xbac] ss:$16 sps:$4 sm:$0xff]  }
 0xc0d   : > { %12840 = vmatpush2.bf16.msra.mxu0 %v16474_v58  ;;  %v16540_v58 = vld [vmem:[#allocation19 + $0x9a8] ss:$16 sps:$4 sm:$0xff]  }
 0xc0e   : > { %12881 = vmatpush2.bf16.msra.mxu1 %v16477_v47  ;;  %12891 = vmatprep.subr.bf16.mxu0 %v16482_v2  ;;  %v16543_v47 = vld [vmem:[#allocation19 + $0xba8] ss:$16 sps:$4 sm:$0xff]   ;;  %v16548_v2 = vld [vmem:[#allocation19 + $0x98c] ss:$16 sps:$4 sm:$0xff]  }
 0xc0f   : > { %12932 = vmatprep.subr.bf16.mxu1 %v16485_v7  ;;  %v16551_v7 = vld [vmem:[#allocation19 + $0xb8c] ss:$16 sps:$4 sm:$0xff]  }
 0xc10   : > { %v18308_v21 = vpop.f32.mrf.mxu0  ;;  %12842 = vmatmul.mubr.bf16.vlgmr.msra.gmra.mxu0 %v18238_v50  ;;  %v16497_v50 = vld [vmem:[#allocation19 + $0xaac] ss:$16 sps:$4 sm:$0xff]  }
 0xc11   : > { %v18311_v17 = vpop.f32.mrf.mxu1  ;;  %12883 = vmatmul.mubr.bf16.vlgmr.msra.gmra.mxu1 %v18240_v31  ;;  %12892 = vmatpush1.bf16.msra.mxu0 %v16480_v8  ;;  %v16492_v31 = vld [vmem:[#allocation19 + $0x8a8] ss:$16 sps:$4 sm:$0xff]  }
 0xc12   : > { %12923 = vmatprep.mubr.bf16.mxu0 %v18242_v38  ;;  %12933 = vmatpush1.bf16.msra.mxu1 %v16483_v54  ;;  %v18315_v22 = vpop.f32.mrf.mxu0  ;;  %v16495_v38 = vld [vmem:[#allocation19 + $0xaa8] ss:$16 sps:$4 sm:$0xff]  }
 0xc13   : > { %12964 = vmatprep.mubr.bf16.mxu1 %v18245_v29  ;;  %v18318_v61 = vpop.f32.mrf.mxu1  ;;  %12893 = vmatprep.subr.bf16.mxu0 %v16488_v30  ;;  %v16501_v29 = vld [vmem:[#allocation19 + $0xa88] ss:$16 sps:$4 sm:$0xff]   ;;  %v16554_v30 = vld [vmem:[#allocation19 + $0x96c] ss:$16 sps:$4 sm:$0xff]  }
 0xc14   : > { %v12601_v24 = vpop.f32.mrf.mxu0  ;;  %12934 = vmatprep.subr.bf16.mxu1 %v16491_v53  ;;  %v16546_v8 = vld [vmem:[#allocation19 + $0x988] ss:$16 sps:$4 sm:$0xff]   ;;  %v16557_v53 = vld [vmem:[#allocation19 + $0xb6c] ss:$16 sps:$4 sm:$0xff]  }
 0xc15   : > { %v12642_v60 = vpop.f32.mrf.mxu1  ;;  %12894 = vmatpush1.bf16.msra.mxu0 %v16486_v37  ;;  %v16549_v54 = vld [vmem:[#allocation19 + $0xb88] ss:$16 sps:$4 sm:$0xff]  }
 0xc16   : > { %12935 = vmatpush1.bf16.msra.mxu1 %v16489_v19  ;;  %v12602_v45 = vpop.f32.mrf.mxu0  ;;  %12895 = vmatprep.subr.bf16.mxu0 %v16494_v56  ;;  %v16552_v37 = vld [vmem:[#allocation19 + $0x968] ss:$16 sps:$4 sm:$0xff]   ;;  %v16560_v56 = vld [vmem:[#allocation19 + $0x94c] ss:$16 sps:$4 sm:$0xff]  }
 0xc17   : > { %v12643_v1 = vpop.f32.mrf.mxu1  ;;  %12936 = vmatprep.subr.bf16.mxu1 %v16497_v50  ;;  %v16555_v19 = vld [vmem:[#allocation19 + $0xb68] ss:$16 sps:$4 sm:$0xff]   ;;  %v16563_v50 = vld [vmem:[#allocation19 + $0xb4c] ss:$16 sps:$4 sm:$0xff]  }
 0xc18   : > { %v16558_v24 = vld [vmem:[#allocation19 + $0x948] ss:$16 sps:$4 sm:$0xff]   ;;  %v16569_v45 = vld [vmem:[#allocation19 + $0xb2c] ss:$16 sps:$4 sm:$0xff]  }
 0xc19   : > { %12896 = vmatpush1.bf16.msra.mxu0 %v16492_v31  ;;  %v16561_v60 = vld [vmem:[#allocation19 + $0xb48] ss:$16 sps:$4 sm:$0xff]   ;;  %v16566_v31 = vld [vmem:[#allocation19 + $0x92c] ss:$16 sps:$4 sm:$0xff]  }
 0xc1a   : > { %12937 = vmatpush1.bf16.msra.mxu1 %v16495_v38  ;;  %12897 = vmatprep.subr.bf16.mxu0 %v16500_v36  ;;  %v16564_v38 = vld [vmem:[#allocation19 + $0x928] ss:$16 sps:$4 sm:$0xff]   ;;  %v16572_v1 = vld [vmem:[#allocation19 + $0x90c] ss:$16 sps:$4 sm:$0xff]  }
 0xc1b   : > { %12938 = vmatprep.subr.bf16.mxu1 %v16503_v34  ;;  %v16567_v36 = vld [vmem:[#allocation19 + $0xb28] ss:$16 sps:$4 sm:$0xff]   ;;  %v16575_v34 = vld [vmem:[#allocation19 + $0xb0c] ss:$16 sps:$4 sm:$0xff]  }
 0xc1d   : > { %12898 = vmatpush1.bf16.msra.mxu0 %v16498_v14  ;;  %v16570_v14 = vld [vmem:[#allocation19 + $0x908] ss:$16 sps:$4 sm:$0xff]  }
 0xc1e   : > { %12939 = vmatpush1.bf16.msra.mxu1 %v16501_v29  ;;  %12899 = vmatprep.subr.bf16.mxu0 %v16506_v35  ;;  %v16573_v29 = vld [vmem:[#allocation19 + $0xb08] ss:$16 sps:$4 sm:$0xff]   ;;  %v16578_v35 = vld [vmem:[#allocation19 + $0xcec] ss:$16 sps:$4 sm:$0xff]  }
 0xc1f   : > { %12940 = vmatprep.subr.bf16.mxu1 %v16509_v23  ;;  %v12598_v23 = vadd.f32 %v18308_v21, %v18302_v9 }
 0xc21   : > { %12900 = vmatpush1.bf16.msra.mxu0 %v16504_v52  ;;  %v16581_v52 = vld [vmem:[#allocation19 + $0xeec] ss:$16 sps:$4 sm:$0xff]  }
 0xc22   : > { %12941 = vmatpush1.bf16.msra.mxu1 %v16507_v48  ;;  %12901 = vmatprep.subr.bf16.mxu0 %v16512_v12  ;;  %v12600_v48 = vadd.f32 %v18315_v22, %v18306_v49  ;;  %v16576_v12 = vld [vmem:[#allocation19 + $0xce8] ss:$16 sps:$4 sm:$0xff]  }
 0xc23   : > { %12942 = vmatprep.subr.bf16.mxu1 %v16515_v18  ;;  %v16579_v18 = vld [vmem:[#allocation19 + $0xee8] ss:$16 sps:$4 sm:$0xff]  }
 0xc24   : > { %v12641_v9 = vadd.f32 %v18318_v61, %v12600_v48  ;;  %v16582_v49 = vld [vmem:[#allocation19 + $0xcc8] ss:$16 sps:$4 sm:$0xff]   ;;  %v16593_v61 = vld [vmem:[#allocation19 + $0xeac] ss:$16 sps:$4 sm:$0xff]  }
 0xc25   : > { %12902 = vmatpush1.bf16.msra.mxu0 %v16510_v44  ;;  %v12639_v44 = vadd.f32 %v18311_v17, %v12598_v23  ;;  %v16590_v17 = vld [vmem:[#allocation19 + $0xcac] ss:$16 sps:$4 sm:$0xff]   ;;  %v16639_v23 = vld [vmem:[#allocation19 + $0xfa8] ss:$16 sps:$4 sm:$0xff]  }
 0xc26   : > { %12943 = vmatpush1.bf16.msra.mxu1 %v16513_v39  ;;  %12903 = vmatprep.subr.bf16.mxu0 %v16518_v27  ;;  %v16584_v39 = vld [vmem:[#allocation19 + $0xccc] ss:$16 sps:$4 sm:$0xff]  }
 0xc27   : > { %12944 = vmatprep.subr.bf16.mxu1 %v16521_v41  ;;  %v16587_v41 = vld [vmem:[#allocation19 + $0xecc] ss:$16 sps:$4 sm:$0xff]  }
 0xc28   : > { %v16647_v48 = vld [vmem:[#allocation19 + $0xf8c] ss:$16 sps:$4 sm:$0xff]  }
 0xc29   : > { %12904 = vmatpush1.bf16.msra.mxu0 %v16516_v42 }
 0xc2a   : > { %12945 = vmatpush1.bf16.msra.mxu1 %v16519_v63  ;;  %12905 = vmatprep.subr.bf16.mxu0 %v16524_v43  ;;  %v16585_v63 = vld [vmem:[#allocation19 + $0xec8] ss:$16 sps:$4 sm:$0xff]  }
 0xc2b   : > { %12946 = vmatprep.subr.bf16.mxu1 %v16527_v51 }
 0xc2d   : > { %12906 = vmatpush1.bf16.msra.mxu0 %v16522_v28 }
 0xc2e   : > { %12947 = vmatpush1.bf16.msra.mxu1 %v16525_v59  ;;  %12907 = vmatprep.subr.bf16.mxu0 %v16530_v57 }
 0xc2f   : > { %12948 = vmatprep.subr.bf16.mxu1 %v16533_v40 }
 0xc31   : > { %12908 = vmatpush2.bf16.msra.mxu0 %v16528_v55  ;;  %v16591_v55 = vld [vmem:[#allocation19 + $0xea8] ss:$16 sps:$4 sm:$0xff]  }
 0xc32   : > { %12949 = vmatpush2.bf16.msra.mxu1 %v16531_v11  ;;  %12909 = vmatprep.subr.bf16.mxu0 %v16536_v20  ;;  %v16596_v11 = vld [vmem:[#allocation19 + $0xc8c] ss:$16 sps:$4 sm:$0xff]  }
 0xc33   : > { %12950 = vmatprep.subr.bf16.mxu1 %v16539_v32  ;;  %v16594_v32 = vld [vmem:[#allocation19 + $0xc88] ss:$16 sps:$4 sm:$0xff]  }
 0xc35   : > { %12910 = vmatpush2.bf16.msra.mxu0 %v16534_v16  ;;  %v16597_v16 = vld [vmem:[#allocation19 + $0xe88] ss:$16 sps:$4 sm:$0xff]  }
 0xc36   : > { %12951 = vmatpush2.bf16.msra.mxu1 %v16537_v13  ;;  %12911 = vmatprep.subr.bf16.mxu0 %v16542_v15  ;;  %v16602_v13 = vld [vmem:[#allocation19 + $0xc6c] ss:$16 sps:$4 sm:$0xff]  }
 0xc37   : > { %12952 = vmatprep.subr.bf16.mxu1 %v16545_v62  ;;  %v16605_v15 = vld [vmem:[#allocation19 + $0xe6c] ss:$16 sps:$4 sm:$0xff]   ;;  %v16600_v62 = vld [vmem:[#allocation19 + $0xc68] ss:$16 sps:$4 sm:$0xff]  }
 0xc39   : > { %12912 = vmatpush2.bf16.msra.mxu0 %v16540_v58  ;;  %v16603_v58 = vld [vmem:[#allocation19 + $0xe68] ss:$16 sps:$4 sm:$0xff]  }
 0xc3a   : > { %12953 = vmatpush2.bf16.msra.mxu1 %v16543_v47  ;;  %12913 = vmatprep.subr.bf16.mxu0 %v16548_v2  ;;  %v16608_v47 = vld [vmem:[#allocation19 + $0xc4c] ss:$16 sps:$4 sm:$0xff]   ;;  %v16606_v2 = vld [vmem:[#allocation19 + $0xc48] ss:$16 sps:$4 sm:$0xff]  }
 0xc3b   : > { %12954 = vmatprep.subr.bf16.mxu1 %v16551_v7  ;;  %v16609_v7 = vld [vmem:[#allocation19 + $0xe48] ss:$16 sps:$4 sm:$0xff]  }
 0xc3d   : > { %12914 = vmatpush2.bf16.msra.mxu0 %v16546_v8  ;;  %v16614_v8 = vld [vmem:[#allocation19 + $0xc2c] ss:$16 sps:$4 sm:$0xff]  }
 0xc3e   : > { %12955 = vmatpush2.bf16.msra.mxu1 %v16549_v54  ;;  %12915 = vmatprep.subr.bf16.mxu0 %v16554_v30  ;;  %v16617_v54 = vld [vmem:[#allocation19 + $0xe2c] ss:$16 sps:$4 sm:$0xff]   ;;  %v16612_v30 = vld [vmem:[#allocation19 + $0xc28] ss:$16 sps:$4 sm:$0xff]  }
 0xc3f   : > { %12956 = vmatprep.subr.bf16.mxu1 %v16557_v53  ;;  %v16615_v53 = vld [vmem:[#allocation19 + $0xe28] ss:$16 sps:$4 sm:$0xff]  }
 0xc41   : > { %12916 = vmatpush2.bf16.msra.mxu0 %v16552_v37  ;;  %v16620_v37 = vld [vmem:[#allocation19 + $0xc0c] ss:$16 sps:$4 sm:$0xff]  }
 0xc42   : > { %12957 = vmatpush2.bf16.msra.mxu1 %v16555_v19  ;;  %12917 = vmatprep.subr.bf16.mxu0 %v16560_v56  ;;  %v16623_v19 = vld [vmem:[#allocation19 + $0xe0c] ss:$16 sps:$4 sm:$0xff]   ;;  %v16618_v56 = vld [vmem:[#allocation19 + $0xc08] ss:$16 sps:$4 sm:$0xff]  }
 0xc43   : > { %12958 = vmatprep.subr.bf16.mxu1 %v16563_v50  ;;  %v16621_v50 = vld [vmem:[#allocation19 + $0xe08] ss:$16 sps:$4 sm:$0xff]  }
 0xc45   : > { %12918 = vmatpush2.bf16.msra.mxu0 %v16558_v24  ;;  %v16626_v24 = vld [vmem:[#allocation19 + $0xdec] ss:$16 sps:$4 sm:$0xff]  }
 0xc46   : > { %12959 = vmatpush2.bf16.msra.mxu1 %v16561_v60  ;;  %12919 = vmatprep.subr.bf16.mxu0 %v16566_v31  ;;  %v16629_v60 = vld [vmem:[#allocation19 + $0xfec] ss:$16 sps:$4 sm:$0xff]   ;;  %v16624_v31 = vld [vmem:[#allocation19 + $0xde8] ss:$16 sps:$4 sm:$0xff]  }
 0xc47   : > { %12960 = vmatprep.subr.bf16.mxu1 %v16569_v45  ;;  %v16627_v45 = vld [vmem:[#allocation19 + $0xfe8] ss:$16 sps:$4 sm:$0xff]  }
 0xc49   : > { %12920 = vmatpush2.bf16.msra.mxu0 %v16564_v38  ;;  %v16632_v38 = vld [vmem:[#allocation19 + $0xdcc] ss:$16 sps:$4 sm:$0xff]  }
 0xc4a   : > { %12961 = vmatpush2.bf16.msra.mxu1 %v16567_v36  ;;  %12921 = vmatprep.subr.bf16.mxu0 %v16572_v1  ;;  %v16635_v36 = vld [vmem:[#allocation19 + $0xfcc] ss:$16 sps:$4 sm:$0xff]   ;;  %v16630_v1 = vld [vmem:[#allocation19 + $0xdc8] ss:$16 sps:$4 sm:$0xff]  }
 0xc4b   : > { %12962 = vmatprep.subr.bf16.mxu1 %v16575_v34  ;;  %v16633_v34 = vld [vmem:[#allocation19 + $0xfc8] ss:$16 sps:$4 sm:$0xff]  }
 0xc4d   : > { %12922 = vmatpush2.bf16.msra.mxu0 %v16570_v14  ;;  %v16638_v14 = vld [vmem:[#allocation19 + $0xdac] ss:$16 sps:$4 sm:$0xff]  }
 0xc4e   : > { %12963 = vmatpush2.bf16.msra.mxu1 %v16573_v29  ;;  %12973 = vmatprep.subr.bf16.mxu0 %v16578_v35  ;;  %v16641_v29 = vld [vmem:[#allocation19 + $0xfac] ss:$16 sps:$4 sm:$0xff]   ;;  %v16636_v35 = vld [vmem:[#allocation19 + $0xda8] ss:$16 sps:$4 sm:$0xff]  }
 0xc4f   : > { %13014 = vmatprep.subr.bf16.mxu1 %v16581_v52  ;;  %v16644_v52 = vld [vmem:[#allocation19 + $0xd8c] ss:$16 sps:$4 sm:$0xff]  }
 0xc50   : > { %v12679_v27 = vpop.f32.mrf.mxu0  ;;  %12924 = vmatmul.mubr.bf16.vlgmr.msra.gmra.mxu0 %v18262_v0 }
 0xc51   : > { %v12680_v21 = vadd.f32 %v12679_v27, %v12639_v44  ;;  %v12720_v42 = vpop.f32.mrf.mxu1  ;;  %12965 = vmatmul.mubr.bf16.vlgmr.msra.gmra.mxu1 %v18264_v4  ;;  %12974 = vmatpush1.bf16.msra.mxu0 %v16576_v12  ;;  %v16642_v12 = vld [vmem:[#allocation19 + $0xd88] ss:$16 sps:$4 sm:$0xff]   ;;  %v16650_v44 = vld [vmem:[#allocation19 + $0xd6c] ss:$16 sps:$4 sm:$0xff]  }
 0xc52   : > { %13005 = vmatprep.mubr.bf16.mxu0 %v18267_v3  ;;  %13015 = vmatpush1.bf16.msra.mxu1 %v16579_v18  ;;  %v12681_v22 = vpop.f32.mrf.mxu0  ;;  %v16588_v3 = vld [vmem:[#allocation19 + $0xca8] ss:$16 sps:$4 sm:$0xff]  }
 0xc53   : > { %v12721_v43 = vadd.f32 %v12720_v42, %v12680_v21  ;;  %13046 = vmatprep.mubr.bf16.mxu1 %v18281_v10  ;;  %v12682_v51 = vadd.f32 %v12681_v22, %v12641_v9  ;;  %v12722_v0 = vpop.f32.mrf.mxu1  ;;  %12975 = vmatprep.subr.bf16.mxu0 %v16584_v39  ;;  %v16645_v18 = vld [vmem:[#allocation19 + $0xf88] ss:$16 sps:$4 sm:$0xff]   ;;  %v16653_v39 = vld [vmem:[#allocation19 + $0xf6c] ss:$16 sps:$4 sm:$0xff]  }
 0xc54   : > { %v12683_v28 = vpop.f32.mrf.mxu0  ;;  %13016 = vmatprep.subr.bf16.mxu1 %v16587_v41  ;;  %v16648_v27 = vld [vmem:[#allocation19 + $0xd68] ss:$16 sps:$4 sm:$0xff]   ;;  %v16656_v9 = vld [vmem:[#allocation19 + $0xd4c] ss:$16 sps:$4 sm:$0xff]  }
 0xc55   : > { %v13055_v4 = vadd.f32 %v12721_v43, %v18050_v5  ;;  %v12723_v59 = vadd.f32 %v12722_v0, %v12682_v51  ;;  %v12724_v57 = vpop.f32.mrf.mxu1  ;;  %12976 = vmatpush1.bf16.msra.mxu0 %v16582_v49  ;;  %v16599_v5 = vld [vmem:[#allocation19 + $0xe8c] ss:$16 sps:$4 sm:$0xff]   ;;  %v16651_v41 = vld [vmem:[#allocation19 + $0xf68] ss:$16 sps:$4 sm:$0xff]  }
 0xc56   : > { %13017 = vmatpush1.bf16.msra.mxu1 %v16585_v63  ;;  %v12684_v40 = vpop.f32.mrf.mxu0  ;;  %12977 = vmatprep.subr.bf16.mxu0 %v16590_v17  ;;  %v16659_v21 = vld [vmem:[#allocation19 + $0xf4c] ss:$16 sps:$4 sm:$0xff]   ;;  %v16654_v42 = vld [vmem:[#allocation19 + $0xd48] ss:$16 sps:$4 sm:$0xff]  }
 0xc57   : > { %13059 = vst [vmem:[%s18333_s26] sm:$0xff] %v13055_v4  ;;  %v13056_v10 = vadd.f32 %v12723_v59, %v18047_v46  ;;  %v12725_v20 = vpop.f32.mrf.mxu1  ;;  %13018 = vmatprep.subr.bf16.mxu1 %v16593_v61  ;;  %v16611_v46 = vld [vmem:[#allocation19 + $0xe4c] ss:$16 sps:$4 sm:$0xff]   ;;  %v16657_v49 = vld [vmem:[#allocation19 + $0xf48] ss:$16 sps:$4 sm:$0xff]   ;;  %v14381_v4 = vld [vmem:[#allocation8 + $0x30] ss:$0 sm:$0xff] }
 0xc58   : > { %v16662_v22 = vld [vmem:[#allocation19 + $0xd2c] ss:$16 sps:$4 sm:$0xff]   ;;  %v16660_v17 = vld [vmem:[#allocation19 + $0xd28] ss:$16 sps:$4 sm:$0xff]  }
 0xc59   : > { %13060 = vst [vmem:[%s18333_s26 + $0x8] sm:$0xff] %v13056_v10  ;;  %12978 = vmatpush1.bf16.msra.mxu0 %v16588_v3  ;;  %v16665_v63 = vld [vmem:[#allocation19 + $0xf2c] ss:$16 sps:$4 sm:$0xff]   ;;  %v16663_v43 = vld [vmem:[#allocation19 + $0xf28] ss:$16 sps:$4 sm:$0xff]  }
 0xc5a   : > { %13019 = vmatpush1.bf16.msra.mxu1 %v16591_v55  ;;  %12979 = vmatprep.subr.bf16.mxu0 %v16596_v11  ;;  %v16668_v51 = vld [vmem:[#allocation19 + $0xd0c] ss:$16 sps:$4 sm:$0xff]   ;;  %v16666_v61 = vld [vmem:[#allocation19 + $0xd08] ss:$16 sps:$4 sm:$0xff]  }
 0xc5b   : > { %13020 = vmatprep.subr.bf16.mxu1 %v16599_v5  ;;  %v16671_v0 = vld [vmem:[#allocation19 + $0xf0c] ss:$16 sps:$4 sm:$0xff]   ;;  %v16669_v28 = vld [vmem:[#allocation19 + $0xf08] ss:$16 sps:$4 sm:$0xff]  }
 0xc5c   : > { %v14382_v57 = vld [vmem:[#allocation8 + $0x38] ss:$0 sm:$0xff] }
 0xc5d   : > { %12980 = vmatpush1.bf16.msra.mxu0 %v16594_v32 }
 0xc5e   : > { %13021 = vmatpush1.bf16.msra.mxu1 %v16597_v16  ;;  %12981 = vmatprep.subr.bf16.mxu0 %v16602_v13 }
 0xc5f   : > { %13022 = vmatprep.subr.bf16.mxu1 %v16605_v15 }
 0xc61   : > { %12982 = vmatpush1.bf16.msra.mxu0 %v16600_v62 }
 0xc62   : > { %13023 = vmatpush1.bf16.msra.mxu1 %v16603_v58  ;;  %12983 = vmatprep.subr.bf16.mxu0 %v16608_v47 }
 0xc63   : > { %13024 = vmatprep.subr.bf16.mxu1 %v16611_v46 }
 0xc65   : > { %12984 = vmatpush1.bf16.msra.mxu0 %v16606_v2 }
 0xc66   : > { %13025 = vmatpush1.bf16.msra.mxu1 %v16609_v7  ;;  %12985 = vmatprep.subr.bf16.mxu0 %v16614_v8 }
 0xc67   : > { %13026 = vmatprep.subr.bf16.mxu1 %v16617_v54 }
 0xc69   : > { %12986 = vmatpush1.bf16.msra.mxu0 %v16612_v30 }
 0xc6a   : > { %13027 = vmatpush1.bf16.msra.mxu1 %v16615_v53  ;;  %12987 = vmatprep.subr.bf16.mxu0 %v16620_v37 }
 0xc6b   : > { %13028 = vmatprep.subr.bf16.mxu1 %v16623_v19 }
 0xc6d   : > { %12988 = vmatpush1.bf16.msra.mxu0 %v16618_v56 }
 0xc6e   : > { %13029 = vmatpush1.bf16.msra.mxu1 %v16621_v50  ;;  %12989 = vmatprep.subr.bf16.mxu0 %v16626_v24 }
 0xc6f   : > { %13030 = vmatprep.subr.bf16.mxu1 %v16629_v60 }
 0xc71   : > { %12990 = vmatpush2.bf16.msra.mxu0 %v16624_v31 }
 0xc72   : > { %13031 = vmatpush2.bf16.msra.mxu1 %v16627_v45  ;;  %12991 = vmatprep.subr.bf16.mxu0 %v16632_v38 }
 0xc73   : > { %13032 = vmatprep.subr.bf16.mxu1 %v16635_v36 }
 0xc75   : > { %12992 = vmatpush2.bf16.msra.mxu0 %v16630_v1 }
 0xc76   : > { %13033 = vmatpush2.bf16.msra.mxu1 %v16633_v34  ;;  %12993 = vmatprep.subr.bf16.mxu0 %v16638_v14 }
 0xc77   : > { %13034 = vmatprep.subr.bf16.mxu1 %v16641_v29 }
 0xc79   : > { %12994 = vmatpush2.bf16.msra.mxu0 %v16636_v35 }
 0xc7a   : > { %13035 = vmatpush2.bf16.msra.mxu1 %v16639_v23  ;;  %12995 = vmatprep.subr.bf16.mxu0 %v16644_v52 }
 0xc7b   : > { %13036 = vmatprep.subr.bf16.mxu1 %v16647_v48 }
 0xc7d   : > { %12996 = vmatpush2.bf16.msra.mxu0 %v16642_v12 }
 0xc7e   : > { %13037 = vmatpush2.bf16.msra.mxu1 %v16645_v18  ;;  %12997 = vmatprep.subr.bf16.mxu0 %v16650_v44 }
 0xc7f   : > { %13038 = vmatprep.subr.bf16.mxu1 %v16653_v39 }
 0xc81   : > { %12998 = vmatpush2.bf16.msra.mxu0 %v16648_v27 }
 0xc82   : > { %13039 = vmatpush2.bf16.msra.mxu1 %v16651_v41  ;;  %12999 = vmatprep.subr.bf16.mxu0 %v16656_v9 }
 0xc83   : > { %13040 = vmatprep.subr.bf16.mxu1 %v16659_v21 }
 0xc85   : > { %13000 = vmatpush2.bf16.msra.mxu0 %v16654_v42 }
 0xc86   : > { %13041 = vmatpush2.bf16.msra.mxu1 %v16657_v49  ;;  %13001 = vmatprep.subr.bf16.mxu0 %v16662_v22 }
 0xc87   : > { %13042 = vmatprep.subr.bf16.mxu1 %v16665_v63 }
 0xc89   : > { %13002 = vmatpush2.bf16.msra.mxu0 %v16660_v17 }
 0xc8a   : > { %13043 = vmatpush2.bf16.msra.mxu1 %v16663_v43  ;;  %13003 = vmatprep.subr.bf16.mxu0 %v16668_v51 }
 0xc8b   : > { %13044 = vmatprep.subr.bf16.mxu1 %v16671_v0 }
 0xc8d   : > { %13004 = vmatpush2.bf16.msra.mxu0 %v16666_v61 }
 0xc8e   : > { %13045 = vmatpush2.bf16.msra.mxu1 %v16669_v28 }
 0xc90   : > { %v12761_v59 = vpop.f32.mrf.mxu0  ;;  %13006 = vmatmul.mubr.bf16.vlgmr.msra.gmra.mxu0 %v18286_v25 }
 0xc91   : > { %v12762_v3 = vadd.f32 %v14381_v4, %v12761_v59  ;;  %v12802_v40 = vpop.f32.mrf.mxu1  ;;  %13047 = vmatmul.mubr.bf16.vlgmr.msra.gmra.mxu1 %v18288_v33 }
 0xc92   : > { %v12763_v55 = vpop.f32.mrf.mxu0 }
 0xc93   : > { %v12803_v11 = vadd.f32 %v12802_v40, %v12762_v3  ;;  %v12764_v10 = vadd.f32 %v14382_v57, %v12763_v55  ;;  %v12804_v20 = vpop.f32.mrf.mxu1 }
 0xc94   : > { %v12765_v5 = vpop.f32.mrf.mxu0 }
 0xc95   : > { %v12805_v32 = vadd.f32 %v12804_v20, %v12764_v10  ;;  %v12806_v16 = vpop.f32.mrf.mxu1 }
 0xc96   : > { %v12766_v13 = vpop.f32.mrf.mxu0 }
 0xc97   : > { %v12807_v15 = vpop.f32.mrf.mxu1 }
 0xcd0   : > { %v12843_v62 = vpop.f32.mrf.mxu0 }
 0xcd1   : > { %v12844_v58 = vadd.f32 %v12843_v62, %v12803_v11  ;;  %v12884_v25 = vpop.f32.mrf.mxu1 }
 0xcd2   : > { %v12845_v47 = vpop.f32.mrf.mxu0 }
 0xcd3   : > { %v12885_v46 = vadd.f32 %v12884_v25, %v12844_v58  ;;  %v12846_v2 = vadd.f32 %v12845_v47, %v12805_v32  ;;  %v12886_v33 = vpop.f32.mrf.mxu1 }
 0xcd4   : > { %v12847_v7 = vpop.f32.mrf.mxu0 }
 0xcd5   : > { %v12887_v8 = vadd.f32 %v12886_v33, %v12846_v2  ;;  %v12888_v54 = vpop.f32.mrf.mxu1 }
 0xcd6   : > { %v12848_v30 = vpop.f32.mrf.mxu0 }
 0xcd7   : > { %v12889_v53 = vpop.f32.mrf.mxu1 }
 0xcd8   : > { %17083 = shalt.err (!%p17080_p4)
}
 0xcd9   : > { %s17084_s19 = scalar_lea.hbm %s13094_s14, 128  ;;  %s17088_s1 = scalar_lea.hbm %s18487_s9, 256 }
 0xcda   : > { %p17085_p6 = scmp.ne.s32.totalorder %s13094_s14, %s17084_s19  ;;  %p17089_p13 = scmp.lt.s32.totalorder %s13094_s14, %s18487_s9 }
 0xcdb   : > { %p17090_p2 = scmp.lt.s32.totalorder %s17088_s1, %s17084_s19 }
 0xcdc   : > { %p17086_p7 = pnand %p17085_p6, %p18488_p10 }
 0xcdd   : > { %p17091_p8 = por %p17090_p2, %p17089_p13 }
 0xcde   : > { %p17087_p0 = pneg %p17086_p7 }
 0xce0   : > { %p17092_p3 = pnand %p17091_p8, %p17087_p0 }
 0xce2   : > { %17095 = shalt.err (!%p17092_p3)
}
 0xce3   : > { %15025 = dma.vmem_to_hbm [thread:$0]  (%p18488_p10), %s13097_s6, 128, %s13094_s14, %s13069_s7  }
 0xce4   : > { %s14905_s20 = sshll.u32 %s17293_s27, 9  ;;  %s13083_s29 = sshll.u32 %s18333_s26, 4  ;;  %s13084_s29 = int_to_ptr.vmem [resolvable:$true] %s13083_s29 }
 0xce5   : > { %s18489_s21 = sld [smem:[#allocation44_spill]]  ;;  %s13064_s13 = scalar_lea.sflag [#allocation4], %s17547_s17 }
 0xce6   : > { %s17096_s14 = scalar_lea.vmem %s13084_s29, 512  ;;  %s17206_s27 = smov [#allocation20]  }
 0xce7   : > { %p17097_p12 = scmp.ne.s32.totalorder %s13084_s29, %s17096_s14  ;;  %s17100_s7 = sshll.u32 %s17206_s27, 4  ;;  %s17101_s7 = int_to_ptr.vmem [resolvable:$false] %s17100_s7 }
 0xce8   : > { %s17102_s4 = scalar_lea.vmem %s17101_s7, 1024  ;;  %p17103_p1 = scmp.lt.s32.totalorder %s13084_s29, %s17101_s7 }
 0xce9   : > { %p17098_p5 = pnand %p17097_p12, %p18488_p10  ;;  %p17104_p9 = scmp.lt.s32.totalorder %s17102_s4, %s17096_s14 }
 0xceb   : > { %s18490_s6 = smov %s18489_s21  ;;  %s13081_s30 = scalar_lea.hbm %s18489_s21, %s14905_s20 }
 0xcec   : > { %p17099_p11 = pneg %p17098_p5  ;;  %p17105_p4 = por %p17104_p9, %p17103_p1 }
 0xcee   : > { %p17106_p6 = pnand %p17105_p4, %p17099_p11 }
 0xd10   : > { %v12925_v37 = vpop.f32.mrf.mxu0 }
 0xd11   : > { %v12966_v19 = vpop.f32.mrf.mxu1  ;;  %v12926_v38 = vadd.f32 %v12925_v37, %v12885_v46 }
 0xd12   : > { %v12927_v56 = vpop.f32.mrf.mxu0 }
 0xd13   : > { %v12968_v50 = vpop.f32.mrf.mxu1  ;;  %v12928_v36 = vadd.f32 %v12927_v56, %v12887_v8  ;;  %v12967_v1 = vadd.f32 %v12966_v19, %v12926_v38 }
 0xd14   : > { %v12929_v24 = vpop.f32.mrf.mxu0 }
 0xd15   : > { %v12970_v60 = vpop.f32.mrf.mxu1  ;;  %v12969_v14 = vadd.f32 %v12968_v50, %v12928_v36 }
 0xd16   : > { %v12930_v31 = vpop.f32.mrf.mxu0 }
 0xd17   : > { %v12971_v45 = vpop.f32.mrf.mxu1 }
 0xd50   : > { %v13007_v34 = vpop.f32.mrf.mxu0 }
 0xd51   : > { %v13008_v29 = vadd.f32 %v13007_v34, %v12967_v1  ;;  %v13048_v35 = vpop.f32.mrf.mxu1 }
 0xd52   : > { %v13009_v23 = vpop.f32.mrf.mxu0 }
 0xd53   : > { %v13049_v52 = vadd.f32 %v13048_v35, %v13008_v29  ;;  %v13010_v48 = vadd.f32 %v13009_v23, %v12969_v14  ;;  %v13050_v12 = vpop.f32.mrf.mxu1 }
 0xd54   : > { %v13011_v18 = vpop.f32.mrf.mxu0 }
 0xd55   : > { %v13057_v44 = vadd.f32 %v13049_v52, %v18053_v6  ;;  %v13051_v39 = vadd.f32 %v13050_v12, %v13010_v48  ;;  %v13052_v27 = vpop.f32.mrf.mxu1 }
 0xd56   : > { %v13012_v41 = vpop.f32.mrf.mxu0 }
 0xd57   : > { %13061 = vst [vmem:[%s18333_s26 + $0x10] sm:$0xff] %v13057_v44  ;;  %v13058_v9 = vadd.f32 %v13051_v39, %v18058_v26  ;;  %v13053_v21 = vpop.f32.mrf.mxu1 }
 0xd59   : > { %13062 = vst [vmem:[%s18333_s26 + $0x18] sm:$0xff] %v13058_v9 }
 0xd5a   : > { %17109 = shalt.err (!%p17106_p6)
}
 0xd5b   : > { %s17110_s11 = scalar_lea.hbm %s13081_s30, 512  ;;  %s17114_s5 = scalar_lea.hbm %s18490_s6, 1024 }
 0xd5c   : > { %p17111_p7 = scmp.ne.s32.totalorder %s13081_s30, %s17110_s11  ;;  %p17115_p2 = scmp.lt.s32.totalorder %s13081_s30, %s18490_s6 }
 0xd5d   : > { %p17116_p8 = scmp.lt.s32.totalorder %s17114_s5, %s17110_s11 }
 0xd5e   : > { %p17112_p0 = pnand %p17111_p7, %p18488_p10 }
 0xd5f   : > { %p17117_p3 = por %p17116_p8, %p17115_p2 }
 0xd60   : > { %p17113_p13 = pneg %p17112_p0 }
 0xd62   : > { %p17118_p12 = pnand %p17117_p3, %p17113_p13 }
 0xd64   : > { %17121 = shalt.err (!%p17118_p12)
}
 0xd65   : > { %15024 = dma.vmem_to_hbm [thread:$0]  (%p18488_p10), %s13084_s29, 512, %s13081_s30, %s13064_s13  }
 0xd66 PF: > { %s18491_s12 = sld [smem:[#allocation31_spill]]  ;;  %p18494_p11 = scmp.ge.s32.totalorder %s17184_s24, 2 }
 0xd67   : > { %s18492_s25 = sld [smem:[#allocation36_spill]] }
 0xd6c   : > { %s13108_s1 = sand.u32 1, %s18491_s12  }
 0xd6d   : > { %p18493_p5 = scmp.ne.s32.totalorder %s18492_s25, 0  ;;  %s13109_s23 = scalar_lea.sflag [#allocation4], %s13108_s1 }
 0xd6f   : > { %p15064_p1 = pnand %p18494_p11, %p18493_p5 }
 0xd71   : > { %p15065_p9 = pneg %p15064_p1 }
 0xd73   : > { %17163 = dma.done.wait (%p15065_p9), %s13109_s23, 512  }
 0xd74   : > { %17165 = vsyncadd (%p15065_p9), %s13109_s23, 4294966784  ;;  %s13118_s28 = scalar_lea.sflag [#allocation22], %s13108_s1 }
 0xd75   : > { %17167 = dma.done.wait (%p15065_p9), %s13118_s28, 128  }
 0xd76   : > { %17169 = vsyncadd (%p15065_p9), %s13118_s28, 4294967168  ;;  %s18495_s24 = sld [smem:[#allocation33_spill]]  ;;  %s18498_s21 = smov %s17176_s22 }
 0xd77   : > { %s18496_s20 = sld [smem:[#allocation32_spill]] }
 0xd78   : > { %s18497_s23 = sld [smem:[#allocation34_spill]] }
 0xd7c   : > { %p36_p10 = scmp.ge.s32.totalorder %s18495_s24, 4  }
 0xd7d   : > { %s18499_s22 = smov %s18496_s20 }
 0xd7e   :  { %38 = sbr.rel (!%p36_p10) target bundleno = 23 (0x17), region = 182 }
 0xd83   :  { %13123 = vsyncpa [#allocation3], 1 }
 0xd84   :  { %13125 = vsyncpa [#allocation3 + $0x1], 1 }
 0xd85   :  { %13126 = vsyncpa [#allocation6], 1 }
 0xd86   :  { %13128 = vsyncpa [#allocation6 + $0x1], 1 }
 0xd87   :  { %13129 = vsyncpa [#allocation9], 1 }
 0xd88   :  { %13130 = vsyncpa [#allocation12], 1 }
 0xd89   :  { %13131 = vsyncpa [#allocation15], 1 }
 0xd8a   :  { %13132 = vsyncpa [#allocation18], 1 }
 0xd8b   :  { %13133 = vsyncpa [#allocation4], 1 }
 0xd8c   :  { %13135 = vsyncpa [#allocation4 + $0x1], 1 }
 0xd8d   :  { %13136 = vsyncpa [#allocation22], 1 }
 0xd8e   :  { %13138 = vsyncpa [#allocation22 + $0x1], 1 }

</bundles_post_ra>
